<compile_context>
chip_gen: v7x
topology: tpu7x:2x2x1
jax: 0.10.0
libtpu: 0.0.40
codegen_flags: <defaults>
</compile_context>

<pallas_src>
import jax
import jax.numpy as jnp
import numpy as np
from jax.experimental import pallas as pl
from jax.experimental.pallas import tpu as pltpu


def env_context_kernel(idx_ref, emb_ref, w_ref, out_ref):
    # idx_ref : (TM, 2) int32   -- [:, 0] = current_node, [:, 1] = state node
    # emb_ref : (TM, N*D)       -- per-batch embeddings, node-major along lanes
    # w_ref   : (2D, D)         -- projection weight (transposed), VMEM-resident
    # out_ref : (TM, D)
    d = out_ref.shape[-1]
    n = emb_ref.shape[-1] // d

    cur_idx = idx_ref[:, 0:1]        # (TM, 1)
    state_idx = idx_ref[:, 1:2]      # (TM, 1)

    # In-kernel gather: static unroll over the (small) node axis; each slot is
    # an aligned lane slice, selected with a lane-broadcast compare. An index
    # outside [0, N) degrades gracefully to a zero row.
    cur = jnp.zeros((emb_ref.shape[0], d), emb_ref.dtype)
    state = jnp.zeros((emb_ref.shape[0], d), emb_ref.dtype)
    for node in range(n):
        row = emb_ref[:, node * d:(node + 1) * d]          # (TM, D)
        cur = jnp.where(cur_idx == node, row, cur)
        state = jnp.where(state_idx == node, row, state)

    # concat(cur, state) @ W_T as one K=2D matmul (fills the MXU contraction).
    ctx = jnp.concatenate([cur, state], axis=-1)           # (TM, 2D)
    out_ref[...] = jnp.dot(ctx, w_ref[...],
                           preferred_element_type=jnp.float32
                           ).astype(out_ref.dtype)


def _round_up(x, m):
    return ((x + m - 1) // m) * m


def env_context_forward(embeddings, current_node, state_node, w_t, *,
                        tm=256, compute_dtype=None):
    """embeddings: [B, N, D], current_node/state_node: [B] int,
    w_t: [2D, D] (transpose of the torch Linear weight). Returns [B, D].

    tm: batch tile (raise to 512-1024 for large B; VMEM stays well under the
    scoped limits at D=128 / small N). compute_dtype=jnp.bfloat16 halves input
    DMA bytes; accumulation stays f32."""
    B, N, D = embeddings.shape
    assert w_t.shape == (2 * D, D)
    out_dtype = embeddings.dtype

    if compute_dtype is not None:
        embeddings = embeddings.astype(compute_dtype)
        w_t = w_t.astype(compute_dtype)

    # Free, contiguous reshape: kernel selects node rows via static lane slices.
    emb2 = embeddings.reshape(B, N * D)
    # Fused index stream: one tiny [B, 2] input instead of two gathered [B, D]s.
    idx = jnp.stack([current_node.astype(jnp.int32),
                     state_node.astype(jnp.int32)], axis=-1)

    tm_eff = min(tm, _round_up(B, 8))
    grid = (pl.cdiv(B, tm_eff),)      # no jnp.pad; Pallas handles ragged tail

    return pl.pallas_call(
        env_context_kernel,
        out_shape=jax.ShapeDtypeStruct((B, D), out_dtype),
        grid_spec=pltpu.PrefetchScalarGridSpec(
            num_scalar_prefetch=0,
            grid=grid,
            in_specs=[
                pl.BlockSpec((tm_eff, 2), lambda i: (i, 0)),        # indices
                pl.BlockSpec((tm_eff, N * D), lambda i: (i, 0)),    # embeddings
                pl.BlockSpec((2 * D, D), lambda i: (0, 0)),         # weight
            ],
            out_specs=pl.BlockSpec((tm_eff, D), lambda i: (i, 0)),
        ),
        compiler_params=pltpu.CompilerParams(
            dimension_semantics=("parallel",)),
    )(idx, emb2, w_t)


if __name__ == "__main__":
    # Small, deterministic example shapes (D=128 keeps stores lane-dense).
    B, N, D = 512, 10, 128
    step_context_dim = 2 * D

    key = jax.random.PRNGKey(0)
    k_emb, k_w, k_cur, k_st = jax.random.split(key, 4)

    embeddings = jax.random.normal(k_emb, (B, N, D), dtype=jnp.float32)

    # nn.Linear(step_context_dim, D, bias=False) init: U(-1/sqrt(in), 1/sqrt(in));
    # torch weight shape [out, in] = [D, 2D]; kernel consumes its transpose [2D, D].
    bound = 1.0 / np.sqrt(step_context_dim)
    w_torch = jax.random.uniform(k_w, (D, step_context_dim),
                                 minval=-bound, maxval=bound,
                                 dtype=jnp.float32)
    w_t = w_torch.T                                   # [2D, D]

    current_node = jax.random.randint(k_cur, (B,), 0, N, dtype=jnp.int32)
    # TODO(synk): base-class _state_embedding raises NotImplementedError;
    #             instantiated TSP-style here as a per-batch node-index gather.
    state_node = jax.random.randint(k_st, (B,), 0, N, dtype=jnp.int32)

    out = jax.block_until_ready(
        env_context_forward(embeddings, current_node, state_node, w_t))

    # Pure-JAX reference (gather -> concat -> linear, no bias).
    cur_emb = embeddings[jnp.arange(B), current_node]     # [B, D]
    state_emb = embeddings[jnp.arange(B), state_node]     # [B, D]
    ref = jnp.concatenate([cur_emb, state_emb], axis=-1) @ w_t

    np.testing.assert_allclose(np.asarray(out), np.asarray(ref),
                               rtol=1e-4, atol=1e-4)

    # bf16 input/weight path (f32 accumulation) — loose tolerance vs f32 ref.
    out_bf16 = jax.block_until_ready(
        env_context_forward(embeddings, current_node, state_node, w_t,
                            compute_dtype=jnp.bfloat16))
    np.testing.assert_allclose(np.asarray(out_bf16), np.asarray(ref),
                               rtol=1e-1, atol=1e-1)

    print("KERNEL_OK")
</pallas_src>

<mosaic_0001>
module attributes {stable_mosaic.version = 11 : i64} {
  func.func @env_context_kernel(%arg0: i32, %arg1: memref<256x2xi32, #tpu.memory_space<vmem>>, %arg2: memref<256x1280xf32, #tpu.memory_space<vmem>>, %arg3: memref<256x128xf32, #tpu.memory_space<vmem>>, %arg4: memref<256x128xf32, #tpu.memory_space<vmem>>) attributes {dimension_semantics = [#tpu.dimension_semantics<parallel>], iteration_bounds = array<i64: 2>, scalar_prefetch = 0 : i64, scratch_operands = 0 : i64, tpu.core_type = #tpu.core_type<tc>, window_params = [{transform_indices = @transform_0, window_bounds = array<i64: 256, 2>}, {transform_indices = @transform_1, window_bounds = array<i64: 256, 1280>}, {pipeline_mode = #tpu.pipeline_mode<synchronous>, transform_indices = @transform_2, window_bounds = array<i64: 256, 128>}, {transform_indices = @transform_3, window_bounds = array<i64: 256, 128>}]} {
    %c0 = arith.constant 0 : index
    %c0_0 = arith.constant 0 : index
    %0 = vector.load %arg1[%c0, %c0_0] : memref<256x2xi32, #tpu.memory_space<vmem>>, vector<256x1xi32>
    %c0_1 = arith.constant 0 : index
    %c1 = arith.constant 1 : index
    %1 = vector.load %arg1[%c0_1, %c1] : memref<256x2xi32, #tpu.memory_space<vmem>>, vector<256x1xi32>
    %cst = arith.constant 0.000000e+00 : f32
    %2 = vector.broadcast %cst : f32 to vector<256x128xf32>
    %cst_2 = arith.constant 0.000000e+00 : f32
    %3 = vector.broadcast %cst_2 : f32 to vector<256x128xf32>
    %c0_3 = arith.constant 0 : index
    %c0_4 = arith.constant 0 : index
    %4 = vector.load %arg2[%c0_3, %c0_4] : memref<256x1280xf32, #tpu.memory_space<vmem>>, vector<256x128xf32>
    %c0_i32 = arith.constant 0 : i32
    %5 = vector.broadcast %c0_i32 : i32 to vector<256x1xi32>
    %6 = arith.cmpi eq, %0, %5 : vector<256x1xi32>
    %7 = vector.shape_cast %6 : vector<256x1xi1> to vector<256x1xi1>
    %8 = vector.broadcast %7 : vector<256x1xi1> to vector<256x128xi1>
    %9 = arith.select %8, %4, %2 : vector<256x128xi1>, vector<256x128xf32>
    %c0_i32_5 = arith.constant 0 : i32
    %10 = vector.broadcast %c0_i32_5 : i32 to vector<256x1xi32>
    %11 = arith.cmpi eq, %1, %10 : vector<256x1xi32>
    %12 = vector.shape_cast %11 : vector<256x1xi1> to vector<256x1xi1>
    %13 = vector.broadcast %12 : vector<256x1xi1> to vector<256x128xi1>
    %14 = arith.select %13, %4, %3 : vector<256x128xi1>, vector<256x128xf32>
    %c0_6 = arith.constant 0 : index
    %c128 = arith.constant 128 : index
    %15 = vector.load %arg2[%c0_6, %c128] : memref<256x1280xf32, #tpu.memory_space<vmem>>, vector<256x128xf32>
    %c1_i32 = arith.constant 1 : i32
    %16 = vector.broadcast %c1_i32 : i32 to vector<256x1xi32>
    %17 = arith.cmpi eq, %0, %16 : vector<256x1xi32>
    %18 = vector.shape_cast %17 : vector<256x1xi1> to vector<256x1xi1>
    %19 = vector.broadcast %18 : vector<256x1xi1> to vector<256x128xi1>
    %20 = arith.select %19, %15, %9 : vector<256x128xi1>, vector<256x128xf32>
    %c1_i32_7 = arith.constant 1 : i32
    %21 = vector.broadcast %c1_i32_7 : i32 to vector<256x1xi32>
    %22 = arith.cmpi eq, %1, %21 : vector<256x1xi32>
    %23 = vector.shape_cast %22 : vector<256x1xi1> to vector<256x1xi1>
    %24 = vector.broadcast %23 : vector<256x1xi1> to vector<256x128xi1>
    %25 = arith.select %24, %15, %14 : vector<256x128xi1>, vector<256x128xf32>
    %c0_8 = arith.constant 0 : index
    %c256 = arith.constant 256 : index
    %26 = vector.load %arg2[%c0_8, %c256] : memref<256x1280xf32, #tpu.memory_space<vmem>>, vector<256x128xf32>
    %c2_i32 = arith.constant 2 : i32
    %27 = vector.broadcast %c2_i32 : i32 to vector<256x1xi32>
    %28 = arith.cmpi eq, %0, %27 : vector<256x1xi32>
    %29 = vector.shape_cast %28 : vector<256x1xi1> to vector<256x1xi1>
    %30 = vector.broadcast %29 : vector<256x1xi1> to vector<256x128xi1>
    %31 = arith.select %30, %26, %20 : vector<256x128xi1>, vector<256x128xf32>
    %c2_i32_9 = arith.constant 2 : i32
    %32 = vector.broadcast %c2_i32_9 : i32 to vector<256x1xi32>
    %33 = arith.cmpi eq, %1, %32 : vector<256x1xi32>
    %34 = vector.shape_cast %33 : vector<256x1xi1> to vector<256x1xi1>
    %35 = vector.broadcast %34 : vector<256x1xi1> to vector<256x128xi1>
    %36 = arith.select %35, %26, %25 : vector<256x128xi1>, vector<256x128xf32>
    %c0_10 = arith.constant 0 : index
    %c384 = arith.constant 384 : index
    %37 = vector.load %arg2[%c0_10, %c384] : memref<256x1280xf32, #tpu.memory_space<vmem>>, vector<256x128xf32>
    %c3_i32 = arith.constant 3 : i32
    %38 = vector.broadcast %c3_i32 : i32 to vector<256x1xi32>
    %39 = arith.cmpi eq, %0, %38 : vector<256x1xi32>
    %40 = vector.shape_cast %39 : vector<256x1xi1> to vector<256x1xi1>
    %41 = vector.broadcast %40 : vector<256x1xi1> to vector<256x128xi1>
    %42 = arith.select %41, %37, %31 : vector<256x128xi1>, vector<256x128xf32>
    %c3_i32_11 = arith.constant 3 : i32
    %43 = vector.broadcast %c3_i32_11 : i32 to vector<256x1xi32>
    %44 = arith.cmpi eq, %1, %43 : vector<256x1xi32>
    %45 = vector.shape_cast %44 : vector<256x1xi1> to vector<256x1xi1>
    %46 = vector.broadcast %45 : vector<256x1xi1> to vector<256x128xi1>
    %47 = arith.select %46, %37, %36 : vector<256x128xi1>, vector<256x128xf32>
    %c0_12 = arith.constant 0 : index
    %c512 = arith.constant 512 : index
    %48 = vector.load %arg2[%c0_12, %c512] : memref<256x1280xf32, #tpu.memory_space<vmem>>, vector<256x128xf32>
    %c4_i32 = arith.constant 4 : i32
    %49 = vector.broadcast %c4_i32 : i32 to vector<256x1xi32>
    %50 = arith.cmpi eq, %0, %49 : vector<256x1xi32>
    %51 = vector.shape_cast %50 : vector<256x1xi1> to vector<256x1xi1>
    %52 = vector.broadcast %51 : vector<256x1xi1> to vector<256x128xi1>
    %53 = arith.select %52, %48, %42 : vector<256x128xi1>, vector<256x128xf32>
    %c4_i32_13 = arith.constant 4 : i32
    %54 = vector.broadcast %c4_i32_13 : i32 to vector<256x1xi32>
    %55 = arith.cmpi eq, %1, %54 : vector<256x1xi32>
    %56 = vector.shape_cast %55 : vector<256x1xi1> to vector<256x1xi1>
    %57 = vector.broadcast %56 : vector<256x1xi1> to vector<256x128xi1>
    %58 = arith.select %57, %48, %47 : vector<256x128xi1>, vector<256x128xf32>
    %c0_14 = arith.constant 0 : index
    %c640 = arith.constant 640 : index
    %59 = vector.load %arg2[%c0_14, %c640] : memref<256x1280xf32, #tpu.memory_space<vmem>>, vector<256x128xf32>
    %c5_i32 = arith.constant 5 : i32
    %60 = vector.broadcast %c5_i32 : i32 to vector<256x1xi32>
    %61 = arith.cmpi eq, %0, %60 : vector<256x1xi32>
    %62 = vector.shape_cast %61 : vector<256x1xi1> to vector<256x1xi1>
    %63 = vector.broadcast %62 : vector<256x1xi1> to vector<256x128xi1>
    %64 = arith.select %63, %59, %53 : vector<256x128xi1>, vector<256x128xf32>
    %c5_i32_15 = arith.constant 5 : i32
    %65 = vector.broadcast %c5_i32_15 : i32 to vector<256x1xi32>
    %66 = arith.cmpi eq, %1, %65 : vector<256x1xi32>
    %67 = vector.shape_cast %66 : vector<256x1xi1> to vector<256x1xi1>
    %68 = vector.broadcast %67 : vector<256x1xi1> to vector<256x128xi1>
    %69 = arith.select %68, %59, %58 : vector<256x128xi1>, vector<256x128xf32>
    %c0_16 = arith.constant 0 : index
    %c768 = arith.constant 768 : index
    %70 = vector.load %arg2[%c0_16, %c768] : memref<256x1280xf32, #tpu.memory_space<vmem>>, vector<256x128xf32>
    %c6_i32 = arith.constant 6 : i32
    %71 = vector.broadcast %c6_i32 : i32 to vector<256x1xi32>
    %72 = arith.cmpi eq, %0, %71 : vector<256x1xi32>
    %73 = vector.shape_cast %72 : vector<256x1xi1> to vector<256x1xi1>
    %74 = vector.broadcast %73 : vector<256x1xi1> to vector<256x128xi1>
    %75 = arith.select %74, %70, %64 : vector<256x128xi1>, vector<256x128xf32>
    %c6_i32_17 = arith.constant 6 : i32
    %76 = vector.broadcast %c6_i32_17 : i32 to vector<256x1xi32>
    %77 = arith.cmpi eq, %1, %76 : vector<256x1xi32>
    %78 = vector.shape_cast %77 : vector<256x1xi1> to vector<256x1xi1>
    %79 = vector.broadcast %78 : vector<256x1xi1> to vector<256x128xi1>
    %80 = arith.select %79, %70, %69 : vector<256x128xi1>, vector<256x128xf32>
    %c0_18 = arith.constant 0 : index
    %c896 = arith.constant 896 : index
    %81 = vector.load %arg2[%c0_18, %c896] : memref<256x1280xf32, #tpu.memory_space<vmem>>, vector<256x128xf32>
    %c7_i32 = arith.constant 7 : i32
    %82 = vector.broadcast %c7_i32 : i32 to vector<256x1xi32>
    %83 = arith.cmpi eq, %0, %82 : vector<256x1xi32>
    %84 = vector.shape_cast %83 : vector<256x1xi1> to vector<256x1xi1>
    %85 = vector.broadcast %84 : vector<256x1xi1> to vector<256x128xi1>
    %86 = arith.select %85, %81, %75 : vector<256x128xi1>, vector<256x128xf32>
    %c7_i32_19 = arith.constant 7 : i32
    %87 = vector.broadcast %c7_i32_19 : i32 to vector<256x1xi32>
    %88 = arith.cmpi eq, %1, %87 : vector<256x1xi32>
    %89 = vector.shape_cast %88 : vector<256x1xi1> to vector<256x1xi1>
    %90 = vector.broadcast %89 : vector<256x1xi1> to vector<256x128xi1>
    %91 = arith.select %90, %81, %80 : vector<256x128xi1>, vector<256x128xf32>
    %c0_20 = arith.constant 0 : index
    %c1024 = arith.constant 1024 : index
    %92 = vector.load %arg2[%c0_20, %c1024] : memref<256x1280xf32, #tpu.memory_space<vmem>>, vector<256x128xf32>
    %c8_i32 = arith.constant 8 : i32
    %93 = vector.broadcast %c8_i32 : i32 to vector<256x1xi32>
    %94 = arith.cmpi eq, %0, %93 : vector<256x1xi32>
    %95 = vector.shape_cast %94 : vector<256x1xi1> to vector<256x1xi1>
    %96 = vector.broadcast %95 : vector<256x1xi1> to vector<256x128xi1>
    %97 = arith.select %96, %92, %86 : vector<256x128xi1>, vector<256x128xf32>
    %c8_i32_21 = arith.constant 8 : i32
    %98 = vector.broadcast %c8_i32_21 : i32 to vector<256x1xi32>
    %99 = arith.cmpi eq, %1, %98 : vector<256x1xi32>
    %100 = vector.shape_cast %99 : vector<256x1xi1> to vector<256x1xi1>
    %101 = vector.broadcast %100 : vector<256x1xi1> to vector<256x128xi1>
    %102 = arith.select %101, %92, %91 : vector<256x128xi1>, vector<256x128xf32>
    %c0_22 = arith.constant 0 : index
    %c1152 = arith.constant 1152 : index
    %103 = vector.load %arg2[%c0_22, %c1152] : memref<256x1280xf32, #tpu.memory_space<vmem>>, vector<256x128xf32>
    %c9_i32 = arith.constant 9 : i32
    %104 = vector.broadcast %c9_i32 : i32 to vector<256x1xi32>
    %105 = arith.cmpi eq, %0, %104 : vector<256x1xi32>
    %106 = vector.shape_cast %105 : vector<256x1xi1> to vector<256x1xi1>
    %107 = vector.broadcast %106 : vector<256x1xi1> to vector<256x128xi1>
    %108 = arith.select %107, %103, %97 : vector<256x128xi1>, vector<256x128xf32>
    %c9_i32_23 = arith.constant 9 : i32
    %109 = vector.broadcast %c9_i32_23 : i32 to vector<256x1xi32>
    %110 = arith.cmpi eq, %1, %109 : vector<256x1xi32>
    %111 = vector.shape_cast %110 : vector<256x1xi1> to vector<256x1xi1>
    %112 = vector.broadcast %111 : vector<256x1xi1> to vector<256x128xi1>
    %113 = arith.select %112, %103, %102 : vector<256x128xi1>, vector<256x128xf32>
    %114 = tpu.concatenate %108, %113 in 1 : vector<256x128xf32>, vector<256x128xf32> -> vector<256x256xf32>
    %c0_24 = arith.constant 0 : index
    %c0_25 = arith.constant 0 : index
    %115 = vector.load %arg3[%c0_24, %c0_25] : memref<256x128xf32, #tpu.memory_space<vmem>>, vector<256x128xf32>
    %cst_26 = arith.constant dense<0.000000e+00> : vector<256x128xf32>
    %116 = tpu.matmul %114, %115, %cst_26 {dimension_numbers = #tpu.dot_dimension_numbers<[1], [0], [0], [1], [0, 0, 1, 1], [], []>} : vector<256x256xf32>, vector<256x128xf32>, vector<256x128xf32> -> vector<256x128xf32>
    %c0_27 = arith.constant 0 : index
    %c0_28 = arith.constant 0 : index
    %117 = vector.load %arg4[%c0_27, %c0_28] : memref<256x128xf32, #tpu.memory_space<vmem>>, vector<256x128xf32>
    tpu.vector_store %arg4[%c0_27, %c0_28], %116 {strides = array<i32>} : memref<256x128xf32, #tpu.memory_space<vmem>>, vector<256x128xf32>,
    return
  }
  func.func @transform_0(%arg0: i32) -> (i32, i32) {
    %c0_i32 = arith.constant 0 : i32
    %c0_i32_0 = arith.constant 0 : i32
    return %arg0, %c0_i32 : i32, i32
  }
  func.func @transform_1(%arg0: i32) -> (i32, i32) {
    %c0_i32 = arith.constant 0 : i32
    %c0_i32_0 = arith.constant 0 : i32
    return %arg0, %c0_i32 : i32, i32
  }
  func.func @transform_2(%arg0: i32) -> (i32, i32) {
    %c0_i32 = arith.constant 0 : i32
    %c0_i32_0 = arith.constant 0 : i32
    %c0_i32_1 = arith.constant 0 : i32
    return %c0_i32, %c0_i32_0 : i32, i32
  }
  func.func @transform_3(%arg0: i32) -> (i32, i32) {
    %c0_i32 = arith.constant 0 : i32
    %c0_i32_0 = arith.constant 0 : i32
    return %arg0, %c0_i32 : i32, i32
  }
}

</mosaic_0001>

<bundles_post_ra>
// kernel: tpu_custom_call.1
= control target key start
LH: loop header
LB: loop body
LE: loop exit
PB: predicated region body
PF: predicated region fallthrough
CT: control target
= control target key end

     0   :  { %8 = vsyncpa [#allocation3], 0  ;;  %s11590_s0 = inlined_call_operand.vmem [shape: s32[512,2], index: 0, kind: input, shape index: {}]   ;;  %s11591_s1 = inlined_call_operand.hbm [shape: f32[512,1280], index: 1, kind: input, shape index: {}]   ;;  %s11592_s2 = inlined_call_operand.hbm [shape: f32[256,128], index: 2, kind: input, shape index: {}]   ;;  %s11593_s3 = inlined_call_operand.hbm [shape: f32[512,128], index: 3, kind: output, shape index: {}]  }
   0x1   :  { %10 = vsyncpa [#allocation3 + $0x1], 0 }
   0x2   :  { %11 = vsyncpa [#allocation6], 0 }
   0x3   :  { %12 = vsyncpa [#allocation4], 0 }
   0x4   :  { %14 = vsyncpa [#allocation4 + $0x1], 0  ;;  %s5326_s12 = smov 0   ;;  %s5328_s13 = smov 0  }
   0x5   :  { %s5330_s14 = smov 0   ;;  %s5332_s15 = smov 0  }
   0x6 LB: > { %s5347_s16 = sadd.s32 4294967295, %s5292_s15   ;;  %s4819_s17 = sadd.s32 4294967294, %s5292_s15   ;;  %s5292_s15 = sphi %s5332_s15, %s13642_s15   ;;  %s5288_s14 = sphi %s5330_s14, %s13641_s14   ;;  %s5284_s13 = sphi %s5328_s13, %s13640_s13   ;;  %s5280_s12 = sphi %s5326_s12, %s13639_s12  }
   0x7   : > { %p66_p0 = scmp.ne.s32.totalorder %s5284_s13, %s5280_s12  ;;  %p11594_p1 = scmp.eq.s32.totalorder %s5347_s16, 0 }
   0x8   : > { %p117_p3 = scmp.eq.s32.totalorder %s4819_s17, 1  ;;  %p4820_p5 = scmp.ge.s32.totalorder %s5292_s15, 1 }
   0x9   : > { %p5356_p4 = por %p11594_p1, %p66_p0  ;;  %p124_p7 = scmp.lt.s32.totalorder %s5292_s15, 3 }
   0xa   : > { %p5361_p6 = por %p117_p3, %p66_p0  ;;  %s5294_s21 = smov [#allocation5]  }
   0xb   : > { %s12182_s18 = scalar_select %p5356_p4, 1, 0 }
   0xc   : > { %s12183_s19 = scalar_select %p5361_p6, 1, 0 }
   0xd   : > { %p5366_p8 = pnand %p4820_p5, %p124_p7  ;;  %s136_s22 = sshll.u32 %s5294_s21, 4  ;;  %s5370_s22 = int_to_ptr.vmem [resolvable:$true] %s136_s22 }
   0xe   : > { %s5382_s24 = sadd.s32 1, %s5292_s15   ;;  %s53_s25 = sadd.s32 1, %s5288_s14 }
   0xf   : > { %s12184_s20 = scalar_select %p5366_p8, 1, 0 }
  0x10   : > { %p4928_p9 = pneg %p5366_p8  ;;  %s50_s26 = ssub.s32 %s5292_s15, %s5382_s24 }
  0x11   : > { %s5164_s29 = scalar_lea.hbm %s11592_s2, 4096 }
  0x12   : > { %p5377_p11 = pnand %p4928_p9, %p11594_p1  ;;  %p5165_p12 = scmp.ne.s32.totalorder %s11592_s2, %s5164_s29 }
  0x13   : > { %p5171_p5 = scmp.lt.u32.totalorder %s5164_s29, %s11592_s2 }
  0x14   : > { %p5166_p13 = pneg %p5377_p11 }
  0x16   : > { %p5167_p0 = pnand %p5166_p13, %p5165_p12 }
  0x18   : > { %p5168_p3 = pneg %p5167_p0 }
  0x1a   : > { %p5173_p7 = pnand %p5171_p5, %p5168_p3 }
  0x1c   : > { %5176 = shalt.err (!%p5173_p7)
}
  0x1d   : > { %s5177_s7 = scalar_lea.vmem %s5370_s22, 4096  ;;  %p5185_p2 = scmp.lt.s32.totalorder %s5370_s22, %s5370_s22 }
  0x1e   : > { %p5178_p9 = scmp.ne.s32.totalorder %s5370_s22, %s5177_s7  ;;  %p5186_p6 = scmp.lt.s32.totalorder %s5177_s7, %s5177_s7 }
  0x20   : > { %p5180_p10 = pnand %p5178_p9, %p5166_p13  ;;  %p5187_p4 = por %p5186_p6, %p5185_p2 }
  0x22   : > { %p5181_p1 = pneg %p5180_p10 }
  0x24   : > { %p5188_p8 = pnand %p5187_p4, %p5181_p1 }
  0x26   : > { %5191 = shalt.err (!%p5188_p8)
}
  0x27   : > { %s5295_s8 = smov 128   ;;  %s5296_s9 = smov 8  }
  0x28   : > { %4931 = dma.hbm_to_vmem [thread:$0]  (!%p5377_p11), %s11592_s2, 4096, %s5370_s22, [#allocation6], %s5295_s8, %s5295_s8, %s5296_s9  }
  0x29   : > { %p51_p2 = scmp.eq.s32.totalorder %s50_s26, 0  ;;  %p60_p1 = scmp.ne.s32.totalorder %s5288_s14, %s5284_s13 }
  0x2a   : > { %p61_p4 = scmp.eq.s32.totalorder %s5292_s15, 0  ;;  %p4941_p6 = scmp.lt.s32.totalorder %s5292_s15, 2 }
  0x2b   : > { %s5413_s17 = scalar_select %p51_p2, %s5288_s14, %s53_s25  }
  0x2c   : > { %p62_p8 = por %p61_p4, %p60_p1  ;;  %p12186_p10 = scmp.eq.s32.totalorder %s5347_s16, 1 }
  0x2d   : > { %s159_s27 = sand.u32 1, %s5288_s14   ;;  %s4918_s28 = smul.u32 40960, %s5292_s15 }
  0x2e   : > { %p5417_p12 = por %p12186_p10, %p60_p1  ;;  %s4917_s29 = smul.u32 2560, %s159_s27 }
  0x2f   : > { %s5426_s4 = scalar_lea.hbm %s11591_s1, %s4918_s28  ;;  %p5428_p11 = pnand %p4941_p6, %p62_p8 }
  0x30   : > { %s163_s25 = scalar_lea.vmem [#allocation2], %s4917_s29  ;;  %s5434_s5 = scalar_lea.sflag [#allocation3], %s159_s27 }
  0x31   : > { %s171_s26 = sshll.u32 %s163_s25, 4  ;;  %s5192_s6 = scalar_lea.hbm %s5426_s4, 40960  ;;  %s5432_s26 = int_to_ptr.vmem [resolvable:$true] %s171_s26 }
  0x32   : > { %p5193_p13 = scmp.ne.s32.totalorder %s5426_s4, %s5192_s6  ;;  %p5194_p0 = pneg %p5428_p11 }
  0x33   : > { %s5197_s9 = scalar_lea.hbm %s11591_s1, 81920  ;;  %p5198_p7 = scmp.lt.u32.totalorder %s5426_s4, %s11591_s1 }
  0x34   : > { %p5195_p3 = pnand %p5194_p0, %p5193_p13  ;;  %p5199_p9 = scmp.lt.u32.totalorder %s5197_s9, %s5192_s6 }
  0x35   : > { %p5201_p1 = scmp.lt.u32.totalorder %s5192_s6, %s5426_s4 }
  0x36   : > { %p5196_p5 = pneg %p5195_p3  ;;  %p5200_p2 = por %p5199_p9, %p5198_p7 }
  0x38   : > { %p5202_p4 = por %p5201_p1, %p5200_p2 }
  0x3a   : > { %p5203_p6 = pnand %p5202_p4, %p5196_p5 }
  0x3c   : > { %5206 = shalt.err (!%p5203_p6)
}
  0x3d   : > { %s5207_s27 = scalar_lea.vmem %s5432_s26, 40960  ;;  %s5297_s28 = smov [#allocation2]  }
  0x3e   : > { %p5208_p8 = scmp.ne.s32.totalorder %s5432_s26, %s5207_s27  ;;  %s5212_s29 = sshll.u32 %s5297_s28, 4  ;;  %s5213_s29 = int_to_ptr.vmem [resolvable:$false] %s5212_s29 }
  0x3f   : > { %s5214_s23 = scalar_lea.vmem %s5213_s29, 81920  ;;  %p5215_p3 = scmp.lt.s32.totalorder %s5432_s26, %s5213_s29 }
  0x40   : > { %p5210_p10 = pnand %p5208_p8, %p5194_p0  ;;  %p5216_p7 = scmp.lt.s32.totalorder %s5214_s23, %s5207_s27 }
  0x42   : > { %p5211_p13 = pneg %p5210_p10  ;;  %p5217_p9 = por %p5216_p7, %p5215_p3 }
  0x44   : > { %p5218_p2 = pnand %p5217_p9, %p5211_p13 }
  0x46   : > { %5221 = shalt.err (!%p5218_p2)
}
  0x47   : > { %s5298_s30 = smov 1280   ;;  %s5299_s25 = smov 80  }
  0x48   : > { %4935 = dma.hbm_to_vmem [thread:$0]  (!%p5428_p11), %s5426_s4, 40960, %s5432_s26, %s5434_s5, %s5298_s30, %s5298_s30, %s5299_s25  }
  0x49   : > { %p12189_p0 = scmp.ne.s32.totalorder %s12184_s20, 0 }
  0x4b   : > { %183 = sbr.rel (%p12189_p0) target bundleno = 1868 (0x74c), region = 32 }
  0x52   : > { %s5465_s6 = sand.u32 1, %s5284_s13   ;;  %p12190_p5 = scmp.ne.s32.totalorder %s12182_s18, 0 }
  0x53   : > { %s4919_s7 = smul.u32 2560, %s5465_s6  ;;  %s186_s8 = scalar_lea.sflag [#allocation3], %s5465_s6 }
  0x55   : > { %s5469_s9 = scalar_lea.vmem [#allocation2], %s4919_s7 }
  0x56   : > { %5267 = dma.done.wait (%p12190_p5), %s186_s8, 40960  }
  0x57   : > { %5269 = vsyncadd (%p12190_p5), %s186_s8, 4294926336  ;;  %p12191_p11 = scmp.eq.s32.totalorder %s5347_s16, 0 }
  0x59   : > { %5271 = dma.done.wait (%p12191_p11), [#allocation6], 4096   ;;  %p12192_p1 = pmov %p12191_p11 }
  0x5a   : > { %s4829_s20 = sshll.u32 %s5347_s16, 5  ;;  %v11902_v0 = vmov 0   ;;  %s4828_s5 = sshll.u32 %s5465_s6, 8 }
  0x5b   : > { %5273 = vsyncadd (%p12192_p1), [#allocation6], 4294963200  ;;  %4987 = vset.pattern.permute.xlu1 %v11902_v0  ;;  %4986 = vset.pattern.permute.xlu0 %v11902_v0  ;;  %p222_p4 = scmp.lt.s32.totalorder %s4829_s20, 63  ;;  %s10976_s10 = scalar_lea.vmem [#allocation7], %s4828_s5 }
  0x5c   : > { %s4836_s11 = sshll.u32 %s5347_s16, 12  ;;  %s4724_s27 = sshll.u32 %s10976_s10, 4  ;;  %s11545_s27 = int_to_ptr.vmem [resolvable:$true] %s4724_s27 }
  0x5d   : > { %s13644_s20 = smov (!%p222_p4, %s4829_s20), 63  ;;  %s11543_s23 = scalar_lea.hbm %s11593_s3, %s4836_s11 }
  0x5e   : > { %s4830_s4 = sshll.u32 %s13644_s20, 3  ;;  %s4711_s30 = scalar_lea.sflag [#allocation4], %s5465_s6 }
  0x5f   : > { %s5485_s18 = scalar_lea.vmem %s11590_s0, %s4830_s4  ;;  %s5222_s25 = scalar_lea.vmem %s11545_s27, 4096 }
  0x60   : > { %v5488_v1 = vld [vmem:[%s5485_s18 + $0x10] sm:$0xff]  ;;  %v5491_v2 = vld [vmem:[%s5485_s18] sm:$0xff]  ;;  %v5494_v3 = vld [vmem:[%s5485_s18 + $0x18] sm:$0xff]  ;;  %p5223_p6 = scmp.ne.s32.totalorder %s11545_s27, %s5222_s25  ;;  %s5303_s16 = smov [#allocation7]  }
  0x61   : > { %vm295_vm0 = vcmp.eq.s32.totalorder %v5488_v1, 0  ;;  %vm293_vm1 = vcmp.eq.s32.totalorder %v5491_v2, 0  ;;  %vm296_vm2 = vcmp.eq.s32.totalorder %v5494_v3, 0  ;;  %v5500_v4 = vld [vmem:[%s5485_s18 + $0x8] sm:$0xff]  ;;  %v5513_v8 = vld [vmem:[%s5485_s18 + $0x20] sm:$0xff]  ;;  %v5526_v11 = vld [vmem:[%s5485_s18 + $0x38] sm:$0xff] }
  0x62   : > { %v5503_v5 = vsel %vm295_vm0, 1, %v11902_v0  ;;  %v5506_v6 = vsel %vm293_vm1, 1, %v11902_v0  ;;  %vm294_vm3 = vcmp.eq.s32.totalorder %v5500_v4, 0  ;;  %v5510_v7 = vld [vmem:[%s5485_s18 + $0x28] sm:$0xff]  ;;  %v5518_v9 = vsel %vm296_vm2, 1, %v11902_v0  ;;  %v5529_v12 = vld [vmem:[%s5485_s18 + $0x30] sm:$0xff]  ;;  %p5224_p8 = pnand %p5223_p6, %p5417_p12 }
  0x63   : > { %12193 = vst [vmem:[#allocation11_spill] sm:$0xff] %v5506_v6  ;;  %364 = vperm.xlu1 %4987, %v5503_v5   ;;  %358 = vperm.xlu0 %4986, %v5506_v6   ;;  %12194 = vst [vmem:[#allocation12_spill] sm:$0xff] %v5518_v9  ;;  %v5521_v10 = vsel %vm294_vm3, 1, %v11902_v0  ;;  %vm298_vm4 = vcmp.eq.s32.totalorder %v5510_v7, 0  ;;  %vm297_vm5 = vcmp.eq.s32.totalorder %v5513_v8, 0  ;;  %vm300_vm6 = vcmp.eq.s32.totalorder %v5526_v11, 0 }
  0x64   : > { %v5534_v13 = vsel %vm298_vm4, 1, %v11902_v0  ;;  %v5537_v14 = vsel %vm297_vm5, 1, %v11902_v0  ;;  %vm299_vm7 = vcmp.eq.s32.totalorder %v5529_v12, 0  ;;  %v5542_v15 = vld [vmem:[%s5485_s18 + $0x48] sm:$0xff]  ;;  %v5545_v16 = vld [vmem:[%s5485_s18 + $0x40] sm:$0xff]  ;;  %v5550_v17 = vsel %vm300_vm6, 1, %v11902_v0  ;;  %p5225_p10 = pneg %p5224_p8 }
  0x65   : > { %12195 = vst [vmem:[#allocation13_spill] sm:$0xff] %v5534_v13  ;;  %12196 = vst [vmem:[#allocation14_spill] sm:$0xff] %v5550_v17  ;;  %v5553_v18 = vsel %vm299_vm7, 1, %v11902_v0  ;;  %vm302_vm8 = vcmp.eq.s32.totalorder %v5542_v15, 0  ;;  %vm301_vm9 = vcmp.eq.s32.totalorder %v5545_v16, 0  ;;  %v5558_v19 = vld [vmem:[%s5485_s18 + $0x58] sm:$0xff] }
  0x66   : > { %v5561_v20 = vld [vmem:[%s5485_s18 + $0x50] sm:$0xff]  ;;  %v5566_v21 = vsel %vm302_vm8, 1, %v11902_v0  ;;  %v5569_v22 = vsel %vm301_vm9, 1, %v11902_v0  ;;  %vm304_vm10 = vcmp.eq.s32.totalorder %v5558_v19, 0  ;;  %v5574_v23 = vld [vmem:[%s5485_s18 + $0x68] sm:$0xff]  ;;  %v5577_v24 = vld [vmem:[%s5485_s18 + $0x60] sm:$0xff] }
  0x67   : > { %367 = vperm.xlu1 %4987, %v5518_v9   ;;  %361 = vperm.xlu0 %4986, %v5521_v10   ;;  %12197 = vst [vmem:[#allocation15_spill] sm:$0xff] %v5566_v21  ;;  %vm303_vm11 = vcmp.eq.s32.totalorder %v5561_v20, 0  ;;  %v5582_v25 = vsel %vm304_vm10, 1, %v11902_v0  ;;  %vm306_vm12 = vcmp.eq.s32.totalorder %v5574_v23, 0  ;;  %vm305_vm13 = vcmp.eq.s32.totalorder %v5577_v24, 0  ;;  %v5590_v27 = vld [vmem:[%s5485_s18 + $0x78] sm:$0xff] }
  0x68   : > { %12198 = vst [vmem:[#allocation16_spill] sm:$0xff] %v5582_v25  ;;  %v5585_v26 = vsel %vm303_vm11, 1, %v11902_v0  ;;  %v5593_v28 = vld [vmem:[%s5485_s18 + $0x70] sm:$0xff]  ;;  %v5598_v29 = vsel %vm306_vm12, 1, %v11902_v0  ;;  %v5601_v30 = vsel %vm305_vm13, 1, %v11902_v0  ;;  %vm308_vm14 = vcmp.eq.s32.totalorder %v5590_v27, 0 }
  0x69   : > { %12199 = vst [vmem:[#allocation17_spill] sm:$0xff] %v5598_v29  ;;  %vm307_vm15 = vcmp.eq.s32.totalorder %v5593_v28, 0  ;;  %v5606_v31 = vld [vmem:[%s5485_s18 + $0x88] sm:$0xff]  ;;  %v5609_v32 = vld [vmem:[%s5485_s18 + $0x80] sm:$0xff]  ;;  %v5614_v33 = vsel %vm308_vm14, 1, %v11902_v0  ;;  %v5622_v35 = vld [vmem:[%s5485_s18 + $0x98] sm:$0xff] }
  0x6a   : > { %12200 = vst [vmem:[#allocation18_spill] sm:$0xff] %v5614_v33  ;;  %v5617_v34 = vsel %vm307_vm15, 1, %v11902_v0  ;;  %vm310_vm0 = vcmp.eq.s32.totalorder %v5606_v31, 0  ;;  %vm309_vm1 = vcmp.eq.s32.totalorder %v5609_v32, 0  ;;  %v5625_v36 = vld [vmem:[%s5485_s18 + $0x90] sm:$0xff]  ;;  %vm312_vm2 = vcmp.eq.s32.totalorder %v5622_v35, 0 }
  0x6b   : > { %373 = vperm.xlu1 %4987, %v5534_v13   ;;  %370 = vperm.xlu0 %4986, %v5537_v14   ;;  %v5630_v37 = vsel %vm310_vm0, 1, %v11902_v0  ;;  %v5633_v38 = vsel %vm309_vm1, 1, %v11902_v0  ;;  %vm311_vm3 = vcmp.eq.s32.totalorder %v5625_v36, 0  ;;  %v5638_v39 = vld [vmem:[%s5485_s18 + $0xa8] sm:$0xff]  ;;  %v5641_v40 = vld [vmem:[%s5485_s18 + $0xa0] sm:$0xff]  ;;  %v5646_v41 = vsel %vm312_vm2, 1, %v11902_v0 }
  0x6c   : > { %12201 = vst [vmem:[#allocation19_spill] sm:$0xff] %v5630_v37  ;;  %12202 = vst [vmem:[#allocation20_spill] sm:$0xff] %v5646_v41  ;;  %v5649_v42 = vsel %vm311_vm3, 1, %v11902_v0  ;;  %vm314_vm4 = vcmp.eq.s32.totalorder %v5638_v39, 0  ;;  %vm313_vm5 = vcmp.eq.s32.totalorder %v5641_v40, 0  ;;  %v5654_v43 = vld [vmem:[%s5485_s18 + $0xb8] sm:$0xff] }
  0x6d   : > { %v5657_v44 = vld [vmem:[%s5485_s18 + $0xb0] sm:$0xff]  ;;  %v5662_v45 = vsel %vm314_vm4, 1, %v11902_v0  ;;  %v5665_v46 = vsel %vm313_vm5, 1, %v11902_v0  ;;  %vm316_vm6 = vcmp.eq.s32.totalorder %v5654_v43, 0  ;;  %v5670_v47 = vld [vmem:[%s5485_s18 + $0xc8] sm:$0xff]  ;;  %v5673_v48 = vld [vmem:[%s5485_s18 + $0xc0] sm:$0xff] }
  0x6e   : > { %12203 = vst [vmem:[#allocation21_spill] sm:$0xff] %v5662_v45  ;;  %vm315_vm7 = vcmp.eq.s32.totalorder %v5657_v44, 0  ;;  %v5678_v49 = vsel %vm316_vm6, 1, %v11902_v0  ;;  %vm318_vm8 = vcmp.eq.s32.totalorder %v5670_v47, 0  ;;  %vm317_vm9 = vcmp.eq.s32.totalorder %v5673_v48, 0  ;;  %v5686_v51 = vld [vmem:[%s5485_s18 + $0xd8] sm:$0xff] }
  0x6f   : > { %379 = vperm.xlu1 %4987, %v5550_v17   ;;  %376 = vperm.xlu0 %4986, %v5553_v18   ;;  %12204 = vst [vmem:[#allocation22_spill] sm:$0xff] %v5678_v49  ;;  %v5681_v50 = vsel %vm315_vm7, 1, %v11902_v0  ;;  %v5689_v52 = vld [vmem:[%s5485_s18 + $0xd0] sm:$0xff]  ;;  %v5694_v53 = vsel %vm318_vm8, 1, %v11902_v0  ;;  %v5697_v54 = vsel %vm317_vm9, 1, %v11902_v0  ;;  %vm320_vm10 = vcmp.eq.s32.totalorder %v5686_v51, 0 }
  0x70   : > { %12205 = vst [vmem:[#allocation23_spill] sm:$0xff] %v5694_v53  ;;  %vm319_vm11 = vcmp.eq.s32.totalorder %v5689_v52, 0  ;;  %v5702_v55 = vld [vmem:[%s5485_s18 + $0xe8] sm:$0xff]  ;;  %v5705_v56 = vld [vmem:[%s5485_s18 + $0xe0] sm:$0xff]  ;;  %v5710_v57 = vsel %vm320_vm10, 1, %v11902_v0  ;;  %v5718_v59 = vld [vmem:[%s5485_s18 + $0xf8] sm:$0xff] }
  0x71   : > { %12206 = vst [vmem:[#allocation24_spill] sm:$0xff] %v5710_v57  ;;  %v5713_v58 = vsel %vm319_vm11, 1, %v11902_v0  ;;  %vm322_vm12 = vcmp.eq.s32.totalorder %v5702_v55, 0  ;;  %vm321_vm13 = vcmp.eq.s32.totalorder %v5705_v56, 0  ;;  %v5721_v60 = vld [vmem:[%s5485_s18 + $0xf0] sm:$0xff]  ;;  %vm324_vm14 = vcmp.eq.s32.totalorder %v5718_v59, 0 }
  0x72   : > { %v5726_v61 = vsel %vm322_vm12, 1, %v11902_v0  ;;  %v5729_v62 = vsel %vm321_vm13, 1, %v11902_v0  ;;  %vm323_vm15 = vcmp.eq.s32.totalorder %v5721_v60, 0  ;;  %v5736_v63 = vsel %vm324_vm14, 1, %v11902_v0  ;;  %s5226_s7 = sshll.u32 %s5303_s16, 4  ;;  %s5227_s7 = int_to_ptr.vmem [resolvable:$false] %s5226_s7 }
  0x73   : > { %385 = vperm.xlu1 %4987, %v5566_v21   ;;  %382 = vperm.xlu0 %4986, %v5569_v22   ;;  %12207 = vst [vmem:[#allocation25_spill] sm:$0xff] %v5726_v61  ;;  %12208 = vst [vmem:[#allocation26_spill] sm:$0xff] %v5736_v63  ;;  %vm710_vm0 = vcmp.eq.s32.totalorder %v5500_v4, 1  ;;  %vm713_vm1 = vcmp.eq.s32.totalorder %v5513_v8, 1  ;;  %vm715_vm2 = vcmp.eq.s32.totalorder %v5529_v12, 1  ;;  %vm717_vm3 = vcmp.eq.s32.totalorder %v5545_v16, 1  ;;  %p5229_p13 = scmp.lt.s32.totalorder %s11545_s27, %s5227_s7 }
  0x74   : > { %vm719_vm4 = vcmp.eq.s32.totalorder %v5561_v20, 1  ;;  %vm721_vm5 = vcmp.eq.s32.totalorder %v5577_v24, 1  ;;  %vm723_vm6 = vcmp.eq.s32.totalorder %v5593_v28, 1  ;;  %vm725_vm7 = vcmp.eq.s32.totalorder %v5609_v32, 1  ;;  %s5228_s8 = scalar_lea.vmem %s5227_s7, 8192 }
  0x75   : > { %vm727_vm8 = vcmp.eq.s32.totalorder %v5625_v36, 1  ;;  %vm729_vm9 = vcmp.eq.s32.totalorder %v5641_v40, 1  ;;  %vm731_vm10 = vcmp.eq.s32.totalorder %v5657_v44, 1  ;;  %vm733_vm11 = vcmp.eq.s32.totalorder %v5673_v48, 1  ;;  %p5230_p3 = scmp.lt.s32.totalorder %s5228_s8, %s5222_s25 }
  0x76   : > { %vm735_vm12 = vcmp.eq.s32.totalorder %v5689_v52, 1  ;;  %vm737_vm13 = vcmp.eq.s32.totalorder %v5705_v56, 1  ;;  %vm739_vm14 = vcmp.eq.s32.totalorder %v5721_v60, 1 }
  0x77   : > { %391 = vperm.xlu1 %4987, %v5582_v25   ;;  %388 = vperm.xlu0 %4986, %v5585_v26   ;;  %p5231_p7 = por %p5230_p3, %p5229_p13 }
  0x79   : > { %p5232_p9 = pnand %p5231_p7, %p5225_p10 }
  0x7b   : > { %397 = vperm.xlu1 %4987, %v5598_v29   ;;  %394 = vperm.xlu0 %4986, %v5601_v30  }
  0x7f   : > { %403 = vperm.xlu1 %4987, %v5614_v33   ;;  %400 = vperm.xlu0 %4986, %v5617_v34  }
  0x83   : > { %409 = vperm.xlu1 %4987, %v5630_v37   ;;  %406 = vperm.xlu0 %4986, %v5633_v38  }
  0x87   : > { %415 = vperm.xlu1 %4987, %v5646_v41   ;;  %412 = vperm.xlu0 %4986, %v5649_v42  }
  0x8b   : > { %421 = vperm.xlu1 %4987, %v5662_v45   ;;  %418 = vperm.xlu0 %4986, %v5665_v46  }
  0x8f   : > { %427 = vperm.xlu1 %4987, %v5678_v49   ;;  %424 = vperm.xlu0 %4986, %v5681_v50   ;;  %v5752_v49 = vsel %vm713_vm1, 1, %v11902_v0  ;;  %vm709_vm1 = vcmp.eq.s32.totalorder %v5491_v2, 1 }
  0x93   : > { %433 = vperm.xlu1 %4987, %v5694_v53   ;;  %430 = vperm.xlu0 %4986, %v5697_v54   ;;  %v5745_v53 = vsel %vm710_vm0, 1, %v11902_v0  ;;  %vm1129_vm0 = vcmp.eq.s32.totalorder %v5513_v8, 2 }
  0x97   : > { %439 = vperm.xlu1 %4987, %v5710_v57   ;;  %436 = vperm.xlu0 %4986, %v5713_v58   ;;  %v5739_v57 = vsel %vm323_vm15, 1, %v11902_v0  ;;  %vm1126_vm15 = vcmp.eq.s32.totalorder %v5500_v4, 2 }
  0x9b   : > { %445 = vperm.xlu1 %4987, %v5726_v61   ;;  %442 = vperm.xlu0 %4986, %v5729_v62   ;;  %v11602_v61 = vmov 1  }
  0x9f   : > { %451 = vperm.xlu1 %4987, %v5736_v63   ;;  %448 = vperm.xlu0 %4986, %v5739_v57   ;;  %v5758_v63 = vsel %vm715_vm2, 1, %v11902_v0  ;;  %vm1131_vm2 = vcmp.eq.s32.totalorder %v5529_v12, 2 }
  0xa3   : > { %4988 = vset.pattern.permute.xlu1 %v11602_v61  ;;  %777 = vperm.xlu0 %4986, %v5745_v53  }
  0xa4   : > { %521 = vperm.xlu1 %4988, %v5521_v10   ;;  %v5764_v10 = vsel %vm717_vm3, 1, %v11902_v0  ;;  %vm711_vm3 = vcmp.eq.s32.totalorder %v5488_v1, 1 }
  0xa7   : > { %786 = vperm.xlu0 %4986, %v5752_v49  }
  0xa8   : > { %524 = vperm.xlu1 %4988, %v5503_v5   ;;  %v5770_v5 = vsel %vm719_vm4, 1, %v11902_v0  ;;  %vm1133_vm4 = vcmp.eq.s32.totalorder %v5545_v16, 2 }
  0xa9   : > { %v5871_v37 = vsel %vm1133_vm4, 1, %v11902_v0  ;;  %vm1149_vm4 = vcmp.eq.s32.totalorder %v5673_v48, 2 }
  0xab   : > { %792 = vperm.xlu0 %4986, %v5758_v63  }
  0xac   : > { %530 = vperm.xlu1 %4988, %v5537_v14   ;;  %v5776_v14 = vsel %vm721_vm5, 1, %v11902_v0  ;;  %vm712_vm5 = vcmp.eq.s32.totalorder %v5494_v3, 1 }
  0xaf   : > { %798 = vperm.xlu0 %4986, %v5764_v10  }
  0xb0   : > { %536 = vperm.xlu1 %4988, %v5553_v18   ;;  %v5782_v18 = vsel %vm723_vm6, 1, %v11902_v0  ;;  %vm1135_vm6 = vcmp.eq.s32.totalorder %v5561_v20, 2 }
  0xb3   : > { %804 = vperm.xlu0 %4986, %v5770_v5  }
  0xb4   : > { %542 = vperm.xlu1 %4988, %v5569_v22   ;;  %v5788_v22 = vsel %vm725_vm7, 1, %v11902_v0  ;;  %vm714_vm7 = vcmp.eq.s32.totalorder %v5510_v7, 1 }
  0xb7   : > { %810 = vperm.xlu0 %4986, %v5776_v14  }
  0xb8   : > { %548 = vperm.xlu1 %4988, %v5585_v26   ;;  %v5794_v26 = vsel %vm727_vm8, 1, %v11902_v0  ;;  %vm1137_vm8 = vcmp.eq.s32.totalorder %v5577_v24, 2 }
  0xbb   : > { %816 = vperm.xlu0 %4986, %v5782_v18  }
  0xbc   : > { %554 = vperm.xlu1 %4988, %v5601_v30   ;;  %v5800_v30 = vsel %vm729_vm9, 1, %v11902_v0  ;;  %vm716_vm9 = vcmp.eq.s32.totalorder %v5526_v11, 1 }
  0xbf   : > { %822 = vperm.xlu0 %4986, %v5788_v22  }
  0xc0   : > { %560 = vperm.xlu1 %4988, %v5617_v34   ;;  %v5806_v34 = vsel %vm731_vm10, 1, %v11902_v0  ;;  %vm1139_vm10 = vcmp.eq.s32.totalorder %v5593_v28, 2 }
  0xc3   : > { %828 = vperm.xlu0 %4986, %v5794_v26  }
  0xc4   : > { %566 = vperm.xlu1 %4988, %v5633_v38   ;;  %v5812_v38 = vsel %vm733_vm11, 1, %v11902_v0  ;;  %vm718_vm11 = vcmp.eq.s32.totalorder %v5542_v15, 1 }
  0xc7   : > { %834 = vperm.xlu0 %4986, %v5800_v30  }
  0xc8   : > { %572 = vperm.xlu1 %4988, %v5649_v42   ;;  %v5818_v42 = vsel %vm735_vm12, 1, %v11902_v0  ;;  %vm1141_vm12 = vcmp.eq.s32.totalorder %v5609_v32, 2 }
  0xcb   : > { %840 = vperm.xlu0 %4986, %v5806_v34  }
  0xcc   : > { %578 = vperm.xlu1 %4988, %v5665_v46   ;;  %v5824_v46 = vsel %vm737_vm13, 1, %v11902_v0  ;;  %vm720_vm13 = vcmp.eq.s32.totalorder %v5558_v19, 1 }
  0xcf   : > { %846 = vperm.xlu0 %4986, %v5812_v38  }
  0xd0   : > { %584 = vperm.xlu1 %4988, %v5681_v50   ;;  %v5830_v50 = vsel %vm739_vm14, 1, %v11902_v0  ;;  %vm1143_vm14 = vcmp.eq.s32.totalorder %v5625_v36, 2 }
  0xd3   : > { %852 = vperm.xlu0 %4986, %v5818_v42  }
  0xd4   : > { %590 = vperm.xlu1 %4988, %v5697_v54   ;;  %v5836_v54 = vsel %vm1126_vm15, 1, %v11902_v0  ;;  %vm722_vm15 = vcmp.eq.s32.totalorder %v5574_v23, 1 }
  0xd7   : > { %858 = vperm.xlu0 %4986, %v5824_v46  }
  0xd8   : > { %596 = vperm.xlu1 %4988, %v5713_v58   ;;  %v5843_v58 = vsel %vm1129_vm0, 1, %v11902_v0  ;;  %vm1145_vm0 = vcmp.eq.s32.totalorder %v5641_v40, 2 }
  0xdb   : > { %864 = vperm.xlu0 %4986, %v5830_v50  }
  0xdc   : > { %602 = vperm.xlu1 %4988, %v5729_v62   ;;  %v5851_v62 = vsel %vm709_vm1, 1, %v11902_v0  ;;  %vm724_vm1 = vcmp.eq.s32.totalorder %v5590_v27, 1 }
  0xdd   : > { %12211 = vst [vmem:[#allocation29_spill] sm:$0xff] %v5851_v62 }
  0xdf   : > { %1193 = vperm.xlu0 %4986, %v5836_v54  }
  0xe0   : > { %608 = vperm.xlu1 %4988, %v5739_v57   ;;  %v5857_v57 = vsel %vm1131_vm2, 1, %v11902_v0  ;;  %vm1147_vm2 = vcmp.eq.s32.totalorder %v5657_v44, 2 }
  0xe2   : > { %v5846_v61 = vpop.permute.xlu1 %364  ;;  %v5848_v45 = vpop.permute.xlu0 %358 }
  0xe3   : > { %12209 = vst [vmem:[#allocation27_spill] sm:$0xff] %v5846_v61  ;;  %12210 = vst [vmem:[#allocation28_spill] sm:$0xff] %v5848_v45  ;;  %1202 = vperm.xlu0 %4986, %v5843_v58   ;;  %v5866_v45 = vsel %vm711_vm3, 1, %v11902_v0  ;;  %vm726_vm3 = vcmp.eq.s32.totalorder %v5606_v31, 1 }
  0xe4   : > { %4989 = vset.pattern.permute.xlu1 %v11902_v0 }
  0xe5   : > { %774 = vperm.xlu1 %4989, %v5851_v62  }
  0xe6   : > { %v5861_v41 = vpop.permute.xlu1 %367  ;;  %v5863_v61 = vpop.permute.xlu0 %361 }
  0xe7   : > { %12212 = vst [vmem:[#allocation30_spill] sm:$0xff] %v5861_v41  ;;  %12213 = vst [vmem:[#allocation31_spill] sm:$0xff] %v5863_v61  ;;  %1208 = vperm.xlu0 %4986, %v5857_v57   ;;  %v5880_v61 = vsel %vm712_vm5, 1, %v11902_v0  ;;  %v5885_v41 = vsel %vm1135_vm6, 1, %v11902_v0  ;;  %vm728_vm5 = vcmp.eq.s32.totalorder %v5622_v35, 1  ;;  %vm1151_vm6 = vcmp.eq.s32.totalorder %v5689_v52, 2 }
  0xe8   : > { %12216 = vst [vmem:[#allocation34_spill] sm:$0xff] %v5880_v61 }
  0xe9   : > { %780 = vperm.xlu1 %4989, %v5866_v45  }
  0xea   : > { %v5875_v62 = vpop.permute.xlu1 %373  ;;  %v5877_v33 = vpop.permute.xlu0 %370 }
  0xeb   : > { %12214 = vst [vmem:[#allocation32_spill] sm:$0xff] %v5875_v62  ;;  %12215 = vst [vmem:[#allocation33_spill] sm:$0xff] %v5877_v33  ;;  %1214 = vperm.xlu0 %4986, %v5871_v37   ;;  %v5894_v33 = vsel %vm714_vm7, 1, %v11902_v0  ;;  %v5899_v62 = vsel %vm1137_vm8, 1, %v11902_v0  ;;  %vm730_vm7 = vcmp.eq.s32.totalorder %v5638_v39, 1  ;;  %vm1153_vm8 = vcmp.eq.s32.totalorder %v5705_v56, 2 }
  0xec   : > { %12219 = vst [vmem:[#allocation37_spill] sm:$0xff] %v5894_v33 }
  0xed   : > { %783 = vperm.xlu1 %4989, %v5880_v61  }
  0xee   : > { %v5889_v29 = vpop.permute.xlu1 %379  ;;  %v5891_v25 = vpop.permute.xlu0 %376 }
  0xef   : > { %12217 = vst [vmem:[#allocation35_spill] sm:$0xff] %v5889_v29  ;;  %12218 = vst [vmem:[#allocation36_spill] sm:$0xff] %v5891_v25  ;;  %1220 = vperm.xlu0 %4986, %v5885_v41   ;;  %v5908_v25 = vsel %vm716_vm9, 1, %v11902_v0  ;;  %v5913_v29 = vsel %vm1139_vm10, 1, %v11902_v0  ;;  %vm732_vm9 = vcmp.eq.s32.totalorder %v5654_v43, 1  ;;  %vm1155_vm10 = vcmp.eq.s32.totalorder %v5721_v60, 2 }
  0xf0   : > { %12222 = vst [vmem:[#allocation40_spill] sm:$0xff] %v5908_v25 }
  0xf1   : > { %789 = vperm.xlu1 %4989, %v5894_v33  }
  0xf2   : > { %v5903_v61 = vpop.permute.xlu1 %385  ;;  %v5905_v21 = vpop.permute.xlu0 %382 }
  0xf3   : > { %12220 = vst [vmem:[#allocation38_spill] sm:$0xff] %v5903_v61  ;;  %12221 = vst [vmem:[#allocation39_spill] sm:$0xff] %v5905_v21  ;;  %1226 = vperm.xlu0 %4986, %v5899_v62   ;;  %v5922_v21 = vsel %vm718_vm11, 1, %v11902_v0  ;;  %v5927_v61 = vsel %vm1141_vm12, 1, %v11902_v0  ;;  %vm734_vm11 = vcmp.eq.s32.totalorder %v5670_v47, 1  ;;  %vm1542_vm12 = vcmp.eq.s32.totalorder %v5500_v4, 3 }
  0xf4   : > { %12225 = vst [vmem:[#allocation43_spill] sm:$0xff] %v5922_v21  ;;  %12226 = vst [vmem:[#allocation44_spill] sm:$0xff] %v5927_v61 }
  0xf5   : > { %795 = vperm.xlu1 %4989, %v5908_v25  }
  0xf6   : > { %v5917_v33 = vpop.permute.xlu1 %391  ;;  %v5919_v17 = vpop.permute.xlu0 %388 }
  0xf7   : > { %12223 = vst [vmem:[#allocation41_spill] sm:$0xff] %v5917_v33  ;;  %12224 = vst [vmem:[#allocation42_spill] sm:$0xff] %v5919_v17  ;;  %1232 = vperm.xlu0 %4986, %v5913_v29   ;;  %v5936_v17 = vsel %vm720_vm13, 1, %v11902_v0  ;;  %v5941_v33 = vsel %vm1143_vm14, 1, %v11902_v0  ;;  %vm736_vm13 = vcmp.eq.s32.totalorder %v5686_v51, 1  ;;  %vm1545_vm14 = vcmp.eq.s32.totalorder %v5513_v8, 3 }
  0xf8   : > { %12229 = vst [vmem:[#allocation47_spill] sm:$0xff] %v5936_v17  ;;  %12230 = vst [vmem:[#allocation48_spill] sm:$0xff] %v5941_v33 }
  0xf9   : > { %801 = vperm.xlu1 %4989, %v5922_v21  }
  0xfa   : > { %v5931_v25 = vpop.permute.xlu1 %397  ;;  %v5933_v13 = vpop.permute.xlu0 %394 }
  0xfb   : > { %12227 = vst [vmem:[#allocation45_spill] sm:$0xff] %v5931_v25  ;;  %12228 = vst [vmem:[#allocation46_spill] sm:$0xff] %v5933_v13  ;;  %1238 = vperm.xlu0 %4986, %v5927_v61   ;;  %v5950_v13 = vsel %vm722_vm15, 1, %v11902_v0  ;;  %v5955_v25 = vsel %vm1145_vm0, 1, %v11902_v0  ;;  %vm738_vm15 = vcmp.eq.s32.totalorder %v5702_v55, 1  ;;  %vm1547_vm0 = vcmp.eq.s32.totalorder %v5529_v12, 3 }
  0xfc   : > { %12233 = vst [vmem:[#allocation51_spill] sm:$0xff] %v5950_v13  ;;  %12234 = vst [vmem:[#allocation52_spill] sm:$0xff] %v5955_v25  ;;  %v12272_v61 = vmov 1  }
  0xfd   : > { %807 = vperm.xlu1 %4989, %v5936_v17  }
  0xfe   : > { %v5945_v21 = vpop.permute.xlu1 %403  ;;  %v5947_v9 = vpop.permute.xlu0 %400 }
  0xff   : > { %12231 = vst [vmem:[#allocation49_spill] sm:$0xff] %v5945_v21  ;;  %12232 = vst [vmem:[#allocation50_spill] sm:$0xff] %v5947_v9  ;;  %1244 = vperm.xlu0 %4986, %v5941_v33   ;;  %v5964_v9 = vsel %vm724_vm1, 1, %v11902_v0  ;;  %v5969_v21 = vsel %vm1147_vm2, 1, %v11902_v0  ;;  %vm740_vm1 = vcmp.eq.s32.totalorder %v5718_v59, 1  ;;  %vm1549_vm2 = vcmp.eq.s32.totalorder %v5545_v16, 3 }
 0x100   : > { %12237 = vst [vmem:[#allocation55_spill] sm:$0xff] %v5964_v9  ;;  %12238 = vst [vmem:[#allocation56_spill] sm:$0xff] %v5969_v21 }
 0x101   : > { %813 = vperm.xlu1 %4989, %v5950_v13  }
 0x102   : > { %v5959_v17 = vpop.permute.xlu1 %409  ;;  %v5961_v6 = vpop.permute.xlu0 %406 }
 0x103   : > { %12235 = vst [vmem:[#allocation53_spill] sm:$0xff] %v5959_v17  ;;  %12236 = vst [vmem:[#allocation54_spill] sm:$0xff] %v5961_v6  ;;  %1250 = vperm.xlu0 %4986, %v5955_v25   ;;  %v5978_v17 = vsel %vm726_vm3, 1, %v11902_v0  ;;  %v5983_v6 = vsel %vm1149_vm4, 1, %v11902_v0  ;;  %vm1551_vm3 = vcmp.eq.s32.totalorder %v5561_v20, 3  ;;  %vm1553_vm4 = vcmp.eq.s32.totalorder %v5577_v24, 3 }
 0x104   : > { %12241 = vst [vmem:[#allocation59_spill] sm:$0xff] %v5978_v17  ;;  %12242 = vst [vmem:[#allocation60_spill] sm:$0xff] %v5983_v6 }
 0x105   : > { %819 = vperm.xlu1 %4989, %v5964_v9  }
 0x106   : > { %v5973_v13 = vpop.permute.xlu1 %415  ;;  %v5975_v33 = vpop.permute.xlu0 %412 }
 0x107   : > { %12239 = vst [vmem:[#allocation57_spill] sm:$0xff] %v5973_v13  ;;  %12240 = vst [vmem:[#allocation58_spill] sm:$0xff] %v5975_v33  ;;  %1256 = vperm.xlu0 %4986, %v5969_v21   ;;  %v5992_v33 = vsel %vm728_vm5, 1, %v11902_v0  ;;  %v5997_v13 = vsel %vm1151_vm6, 1, %v11902_v0  ;;  %vm1555_vm5 = vcmp.eq.s32.totalorder %v5593_v28, 3  ;;  %vm1557_vm6 = vcmp.eq.s32.totalorder %v5609_v32, 3 }
 0x108   : > { %12245 = vst [vmem:[#allocation63_spill] sm:$0xff] %v5992_v33  ;;  %12246 = vst [vmem:[#allocation64_spill] sm:$0xff] %v5997_v13 }
 0x109   : > { %825 = vperm.xlu1 %4989, %v5978_v17  }
 0x10a   : > { %v5987_v9 = vpop.permute.xlu1 %421  ;;  %v5989_v25 = vpop.permute.xlu0 %418 }
 0x10b   : > { %12243 = vst [vmem:[#allocation61_spill] sm:$0xff] %v5987_v9  ;;  %12244 = vst [vmem:[#allocation62_spill] sm:$0xff] %v5989_v25  ;;  %1262 = vperm.xlu0 %4986, %v5983_v6   ;;  %v6006_v25 = vsel %vm730_vm7, 1, %v11902_v0  ;;  %v6011_v9 = vsel %vm1153_vm8, 1, %v11902_v0  ;;  %vm1559_vm7 = vcmp.eq.s32.totalorder %v5625_v36, 3  ;;  %vm1561_vm8 = vcmp.eq.s32.totalorder %v5641_v40, 3 }
 0x10c   : > { %12249 = vst [vmem:[#allocation67_spill] sm:$0xff] %v6006_v25  ;;  %12250 = vst [vmem:[#allocation68_spill] sm:$0xff] %v6011_v9 }
 0x10d   : > { %831 = vperm.xlu1 %4989, %v5992_v33  }
 0x10e   : > { %v6001_v17 = vpop.permute.xlu1 %427  ;;  %v6003_v21 = vpop.permute.xlu0 %424 }
 0x10f   : > { %12247 = vst [vmem:[#allocation65_spill] sm:$0xff] %v6001_v17  ;;  %12248 = vst [vmem:[#allocation66_spill] sm:$0xff] %v6003_v21  ;;  %1268 = vperm.xlu0 %4986, %v5997_v13   ;;  %v6020_v21 = vsel %vm732_vm9, 1, %v11902_v0  ;;  %v6025_v17 = vsel %vm1155_vm10, 1, %v11902_v0  ;;  %vm1563_vm9 = vcmp.eq.s32.totalorder %v5657_v44, 3  ;;  %vm1565_vm10 = vcmp.eq.s32.totalorder %v5673_v48, 3 }
 0x110   : > { %12253 = vst [vmem:[#allocation71_spill] sm:$0xff] %v6020_v21  ;;  %12254 = vst [vmem:[#allocation72_spill] sm:$0xff] %v6025_v17 }
 0x111   : > { %837 = vperm.xlu1 %4989, %v6006_v25  }
 0x112   : > { %v6015_v33 = vpop.permute.xlu1 %433  ;;  %v6017_v6 = vpop.permute.xlu0 %430 }
 0x113   : > { %12251 = vst [vmem:[#allocation69_spill] sm:$0xff] %v6015_v33  ;;  %12252 = vst [vmem:[#allocation70_spill] sm:$0xff] %v6017_v6  ;;  %1274 = vperm.xlu0 %4986, %v6011_v9   ;;  %v6034_v6 = vsel %vm734_vm11, 1, %v11902_v0  ;;  %v6039_v33 = vsel %vm1542_vm12, 1, %v11902_v0  ;;  %vm1567_vm11 = vcmp.eq.s32.totalorder %v5689_v52, 3  ;;  %vm1569_vm12 = vcmp.eq.s32.totalorder %v5705_v56, 3 }
 0x114   : > { %12257 = vst [vmem:[#allocation75_spill] sm:$0xff] %v6034_v6  ;;  %12258 = vst [vmem:[#allocation76_spill] sm:$0xff] %v6039_v33 }
 0x115   : > { %843 = vperm.xlu1 %4989, %v6020_v21  }
 0x116   : > { %v6029_v25 = vpop.permute.xlu1 %439  ;;  %v6031_v13 = vpop.permute.xlu0 %436 }
 0x117   : > { %12255 = vst [vmem:[#allocation73_spill] sm:$0xff] %v6029_v25  ;;  %12256 = vst [vmem:[#allocation74_spill] sm:$0xff] %v6031_v13  ;;  %1280 = vperm.xlu0 %4986, %v6025_v17   ;;  %v6048_v13 = vsel %vm736_vm13, 1, %v11902_v0  ;;  %v6053_v25 = vsel %vm1545_vm14, 1, %v11902_v0  ;;  %vm1571_vm13 = vcmp.eq.s32.totalorder %v5721_v60, 3  ;;  %vm1958_vm14 = vcmp.eq.s32.totalorder %v5500_v4, 4 }
 0x118   : > { %12261 = vst [vmem:[#allocation79_spill] sm:$0xff] %v6048_v13  ;;  %12262 = vst [vmem:[#allocation80_spill] sm:$0xff] %v6053_v25 }
 0x119   : > { %849 = vperm.xlu1 %4989, %v6034_v6  }
 0x11a   : > { %v6043_v21 = vpop.permute.xlu1 %445  ;;  %v6045_v9 = vpop.permute.xlu0 %442 }
 0x11b   : > { %12259 = vst [vmem:[#allocation77_spill] sm:$0xff] %v6043_v21  ;;  %12260 = vst [vmem:[#allocation78_spill] sm:$0xff] %v6045_v9  ;;  %1609 = vperm.xlu0 %4986, %v6039_v33   ;;  %v6062_v9 = vsel %vm738_vm15, 1, %v11902_v0  ;;  %v6067_v21 = vsel %vm1547_vm0, 1, %v11902_v0  ;;  %vm1961_vm15 = vcmp.eq.s32.totalorder %v5513_v8, 4  ;;  %vm1963_vm0 = vcmp.eq.s32.totalorder %v5529_v12, 4 }
 0x11c   : > { %12265 = vst [vmem:[#allocation83_spill] sm:$0xff] %v6062_v9 }
 0x11d   : > { %855 = vperm.xlu1 %4989, %v6048_v13  }
 0x11e   : > { %v6057_v6 = vpop.permute.xlu1 %451  ;;  %v6059_v17 = vpop.permute.xlu0 %448 }
 0x11f   : > { %12263 = vst [vmem:[#allocation81_spill] sm:$0xff] %v6057_v6  ;;  %12264 = vst [vmem:[#allocation82_spill] sm:$0xff] %v6059_v17  ;;  %1618 = vperm.xlu0 %4986, %v6053_v25   ;;  %v6074_v6 = vsel %vm740_vm1, 1, %v11902_v0  ;;  %v6080_v25 = vsel %vm1549_vm2, 1, %v11902_v0  ;;  %vm1965_vm1 = vcmp.eq.s32.totalorder %v5545_v16, 4  ;;  %vm1967_vm2 = vcmp.eq.s32.totalorder %v5561_v20, 4 }
 0x120   : > { %12267 = vst [vmem:[#allocation85_spill] sm:$0xff] %v6074_v6  ;;  %12269 = vst [vmem:[#allocation87_spill] sm:$0xff] %v6080_v25 }
 0x121   : > { %861 = vperm.xlu1 %4989, %v6062_v9  }
 0x122   : > { %v6071_v13 = vpop.permute.xlu0 %777 }
 0x123   : > { %12266 = vst [vmem:[#allocation84_spill] sm:$0xff] %v6071_v13  ;;  %v6076_v17 = vpop.permute.xlu1 %521  ;;  %1624 = vperm.xlu0 %4986, %v6067_v21   ;;  %v6090_v13 = vsel %vm1551_vm3, 1, %v11902_v0  ;;  %vm1125_vm3 = vcmp.eq.s32.totalorder %v5491_v2, 2 }
 0x124   : > { %12268 = vst [vmem:[#allocation86_spill] sm:$0xff] %v6076_v17 }
 0x125   : > { %867 = vperm.xlu1 %4989, %v6074_v6  }
 0x126   : > { %v6084_v33 = vpop.permute.xlu0 %786 }
 0x127   : > { %12270 = vst [vmem:[#allocation88_spill] sm:$0xff] %v6084_v33  ;;  %v6086_v9 = vpop.permute.xlu1 %524  ;;  %1630 = vperm.xlu0 %4986, %v6080_v25   ;;  %v6101_v33 = vsel %vm1553_vm4, 1, %v11902_v0  ;;  %vm1969_vm4 = vcmp.eq.s32.totalorder %v5577_v24, 4 }
 0x128   : > { %12271 = vst [vmem:[#allocation89_spill] sm:$0xff] %v6086_v9 }
 0x129   : > { %4990 = vset.pattern.permute.xlu1 %v12272_v61 }
 0x12a   : > { %937 = vperm.xlu1 %4990, %v5745_v53   ;;  %v6095_v17 = vpop.permute.xlu0 %792  ;;  %v6111_v53 = vsel %vm1555_vm5, 1, %v11902_v0  ;;  %vm1127_vm5 = vcmp.eq.s32.totalorder %v5488_v1, 2 }
 0x12b   : > { %12273 = vst [vmem:[#allocation90_spill] sm:$0xff] %v6095_v17  ;;  %v6097_v6 = vpop.permute.xlu1 %530  ;;  %1636 = vperm.xlu0 %4986, %v6090_v13  }
 0x12c   : > { %12274 = vst [vmem:[#allocation91_spill] sm:$0xff] %v6097_v6 }
 0x12e   : > { %940 = vperm.xlu1 %4990, %v5866_v45   ;;  %v6105_v9 = vpop.permute.xlu0 %798  ;;  %v6121_v45 = vsel %vm1557_vm6, 1, %v11902_v0  ;;  %vm1971_vm6 = vcmp.eq.s32.totalorder %v5593_v28, 4 }
 0x12f   : > { %12275 = vst [vmem:[#allocation92_spill] sm:$0xff] %v6105_v9  ;;  %v6107_v25 = vpop.permute.xlu1 %536  ;;  %1642 = vperm.xlu0 %4986, %v6101_v33  }
 0x130   : > { %12276 = vst [vmem:[#allocation93_spill] sm:$0xff] %v6107_v25 }
 0x132   : > { %946 = vperm.xlu1 %4990, %v5752_v49   ;;  %v6115_v6 = vpop.permute.xlu0 %804  ;;  %v6131_v49 = vsel %vm1559_vm7, 1, %v11902_v0  ;;  %vm1128_vm7 = vcmp.eq.s32.totalorder %v5494_v3, 2 }
 0x133   : > { %12277 = vst [vmem:[#allocation94_spill] sm:$0xff] %v6115_v6  ;;  %v6117_v17 = vpop.permute.xlu1 %542  ;;  %1648 = vperm.xlu0 %4986, %v6111_v53  }
 0x134   : > { %12278 = vst [vmem:[#allocation95_spill] sm:$0xff] %v6117_v17 }
 0x136   : > { %952 = vperm.xlu1 %4990, %v5758_v63   ;;  %v6125_v25 = vpop.permute.xlu0 %810  ;;  %v6141_v63 = vsel %vm1561_vm8, 1, %v11902_v0  ;;  %vm1973_vm8 = vcmp.eq.s32.totalorder %v5609_v32, 4 }
 0x137   : > { %12279 = vst [vmem:[#allocation96_spill] sm:$0xff] %v6125_v25  ;;  %v6127_v9 = vpop.permute.xlu1 %548  ;;  %1654 = vperm.xlu0 %4986, %v6121_v45  }
 0x138   : > { %12280 = vst [vmem:[#allocation97_spill] sm:$0xff] %v6127_v9 }
 0x13a   : > { %958 = vperm.xlu1 %4990, %v5764_v10   ;;  %v6135_v17 = vpop.permute.xlu0 %816  ;;  %v6151_v10 = vsel %vm1563_vm9, 1, %v11902_v0  ;;  %vm1130_vm9 = vcmp.eq.s32.totalorder %v5510_v7, 2 }
 0x13b   : > { %12281 = vst [vmem:[#allocation98_spill] sm:$0xff] %v6135_v17  ;;  %v6137_v6 = vpop.permute.xlu1 %554  ;;  %1660 = vperm.xlu0 %4986, %v6131_v49  }
 0x13c   : > { %12282 = vst [vmem:[#allocation99_spill] sm:$0xff] %v6137_v6 }
 0x13e   : > { %964 = vperm.xlu1 %4990, %v5770_v5   ;;  %v6145_v9 = vpop.permute.xlu0 %822  ;;  %v6161_v5 = vsel %vm1565_vm10, 1, %v11902_v0  ;;  %vm1975_vm10 = vcmp.eq.s32.totalorder %v5625_v36, 4 }
 0x13f   : > { %12283 = vst [vmem:[#allocation100_spill] sm:$0xff] %v6145_v9  ;;  %v6147_v25 = vpop.permute.xlu1 %560  ;;  %1666 = vperm.xlu0 %4986, %v6141_v63  }
 0x140   : > { %12284 = vst [vmem:[#allocation101_spill] sm:$0xff] %v6147_v25 }
 0x142   : > { %970 = vperm.xlu1 %4990, %v5776_v14   ;;  %v6155_v6 = vpop.permute.xlu0 %828  ;;  %v6171_v14 = vsel %vm1567_vm11, 1, %v11902_v0  ;;  %vm1132_vm11 = vcmp.eq.s32.totalorder %v5526_v11, 2 }
 0x143   : > { %12285 = vst [vmem:[#allocation102_spill] sm:$0xff] %v6155_v6  ;;  %v6157_v17 = vpop.permute.xlu1 %566  ;;  %1672 = vperm.xlu0 %4986, %v6151_v10  }
 0x144   : > { %12286 = vst [vmem:[#allocation103_spill] sm:$0xff] %v6157_v17 }
 0x146   : > { %976 = vperm.xlu1 %4990, %v5782_v18   ;;  %v6165_v25 = vpop.permute.xlu0 %834  ;;  %v6181_v18 = vsel %vm1569_vm12, 1, %v11902_v0  ;;  %vm1977_vm12 = vcmp.eq.s32.totalorder %v5641_v40, 4 }
 0x147   : > { %12287 = vst [vmem:[#allocation104_spill] sm:$0xff] %v6165_v25  ;;  %v6167_v9 = vpop.permute.xlu1 %572  ;;  %1678 = vperm.xlu0 %4986, %v6161_v5  }
 0x148   : > { %12288 = vst [vmem:[#allocation105_spill] sm:$0xff] %v6167_v9 }
 0x14a   : > { %982 = vperm.xlu1 %4990, %v5788_v22   ;;  %v6175_v6 = vpop.permute.xlu0 %840  ;;  %v6191_v22 = vsel %vm1571_vm13, 1, %v11902_v0  ;;  %vm1134_vm13 = vcmp.eq.s32.totalorder %v5542_v15, 2 }
 0x14b   : > { %12289 = vst [vmem:[#allocation106_spill] sm:$0xff] %v6175_v6  ;;  %v6177_v17 = vpop.permute.xlu1 %578  ;;  %1684 = vperm.xlu0 %4986, %v6171_v14  }
 0x14c   : > { %12290 = vst [vmem:[#allocation107_spill] sm:$0xff] %v6177_v17 }
 0x14e   : > { %988 = vperm.xlu1 %4990, %v5794_v26   ;;  %v6185_v9 = vpop.permute.xlu0 %846  ;;  %v6201_v26 = vsel %vm1958_vm14, 1, %v11902_v0  ;;  %vm1979_vm14 = vcmp.eq.s32.totalorder %v5657_v44, 4 }
 0x14f   : > { %12291 = vst [vmem:[#allocation108_spill] sm:$0xff] %v6185_v9  ;;  %v6187_v25 = vpop.permute.xlu1 %584  ;;  %1690 = vperm.xlu0 %4986, %v6181_v18  }
 0x150   : > { %12292 = vst [vmem:[#allocation109_spill] sm:$0xff] %v6187_v25 }
 0x152   : > { %994 = vperm.xlu1 %4990, %v5800_v30   ;;  %v6195_v17 = vpop.permute.xlu0 %852  ;;  %v6211_v30 = vsel %vm1961_vm15, 1, %v11902_v0  ;;  %vm1136_vm15 = vcmp.eq.s32.totalorder %v5558_v19, 2 }
 0x153   : > { %12293 = vst [vmem:[#allocation110_spill] sm:$0xff] %v6195_v17  ;;  %v6197_v6 = vpop.permute.xlu1 %590  ;;  %1696 = vperm.xlu0 %4986, %v6191_v22  }
 0x154   : > { %12294 = vst [vmem:[#allocation111_spill] sm:$0xff] %v6197_v6 }
 0x156   : > { %1000 = vperm.xlu1 %4990, %v5806_v34   ;;  %v6205_v25 = vpop.permute.xlu0 %858  ;;  %v6221_v34 = vsel %vm1963_vm0, 1, %v11902_v0  ;;  %vm1981_vm0 = vcmp.eq.s32.totalorder %v5673_v48, 4 }
 0x157   : > { %12295 = vst [vmem:[#allocation112_spill] sm:$0xff] %v6205_v25  ;;  %v6207_v9 = vpop.permute.xlu1 %596  ;;  %2025 = vperm.xlu0 %4986, %v6201_v26  }
 0x158   : > { %12296 = vst [vmem:[#allocation113_spill] sm:$0xff] %v6207_v9 }
 0x15a   : > { %1006 = vperm.xlu1 %4990, %v5812_v38   ;;  %v6215_v6 = vpop.permute.xlu0 %864  ;;  %v6231_v38 = vsel %vm1965_vm1, 1, %v11902_v0  ;;  %vm1138_vm1 = vcmp.eq.s32.totalorder %v5574_v23, 2 }
 0x15b   : > { %12297 = vst [vmem:[#allocation114_spill] sm:$0xff] %v6215_v6  ;;  %v6217_v17 = vpop.permute.xlu1 %602  ;;  %2034 = vperm.xlu0 %4986, %v6211_v30  }
 0x15c   : > { %12298 = vst [vmem:[#allocation115_spill] sm:$0xff] %v6217_v17 }
 0x15e   : > { %1012 = vperm.xlu1 %4990, %v5818_v42   ;;  %v6225_v25 = vpop.permute.xlu0 %1193  ;;  %v6241_v42 = vsel %vm1967_vm2, 1, %v11902_v0  ;;  %vm1983_vm2 = vcmp.eq.s32.totalorder %v5689_v52, 4 }
 0x15f   : > { %12299 = vst [vmem:[#allocation116_spill] sm:$0xff] %v6225_v25  ;;  %v6227_v9 = vpop.permute.xlu1 %608  ;;  %2040 = vperm.xlu0 %4986, %v6221_v34   ;;  %v6284_v25 = vsel %vm1973_vm8, 1, %v11902_v0  ;;  %vm2374_vm8 = vcmp.eq.s32.totalorder %v5500_v4, 5 }
 0x160   : > { %12300 = vst [vmem:[#allocation117_spill] sm:$0xff] %v6227_v9 }
 0x162   : > { %1018 = vperm.xlu1 %4990, %v5824_v46   ;;  %v6235_v6 = vpop.permute.xlu0 %1202 }
 0x163   : > { %12301 = vst [vmem:[#allocation118_spill] sm:$0xff] %v6235_v6  ;;  %2046 = vperm.xlu0 %4986, %v6231_v38   ;;  %v6252_v6 = vsel %vm1125_vm3, 1, %v11902_v0  ;;  %vm1140_vm3 = vcmp.eq.s32.totalorder %v5590_v27, 2 }
 0x164   : > { %v6238_v17 = vpop.permute.xlu1 %774  ;;  %12305 = vst [vmem:[#allocation122_spill] sm:$0xff] %v6252_v6 }
 0x165   : > { %12302 = vst [vmem:[#allocation119_spill] sm:$0xff] %v6238_v17  ;;  %v6255_v17 = vsel %vm1969_vm4, 1, %v11902_v0  ;;  %vm1985_vm4 = vcmp.eq.s32.totalorder %v5705_v56, 4 }
 0x166   : > { %1024 = vperm.xlu1 %4990, %v5830_v50   ;;  %v6246_v9 = vpop.permute.xlu0 %1208 }
 0x167   : > { %12303 = vst [vmem:[#allocation120_spill] sm:$0xff] %v6246_v9  ;;  %2052 = vperm.xlu0 %4986, %v6241_v42   ;;  %v6270_v9 = vsel %vm1971_vm6, 1, %v11902_v0  ;;  %vm1987_vm6 = vcmp.eq.s32.totalorder %v5721_v60, 4 }
 0x168   : > { %v6249_v46 = vpop.permute.xlu1 %780 }
 0x169   : > { %12304 = vst [vmem:[#allocation121_spill] sm:$0xff] %v6249_v46  ;;  %v6267_v46 = vsel %vm1127_vm5, 1, %v11902_v0  ;;  %vm1142_vm5 = vcmp.eq.s32.totalorder %v5606_v31, 2 }
 0x16a   : > { %4991 = vset.pattern.permute.xlu1 %v11902_v0  ;;  %v6260_v2 = vpop.permute.xlu0 %1214 }
 0x16b   : > { %12306 = vst [vmem:[#allocation123_spill] sm:$0xff] %v6260_v2  ;;  %1190 = vperm.xlu1 %4991, %v6252_v6   ;;  %2058 = vperm.xlu0 %4986, %v6255_v17   ;;  %v6298_v6 = vsel %vm1975_vm10, 1, %v11902_v0  ;;  %vm2377_vm10 = vcmp.eq.s32.totalorder %v5513_v8, 5 }
 0x16c   : > { %v6264_v50 = vpop.permute.xlu1 %783 }
 0x16d   : > { %12307 = vst [vmem:[#allocation124_spill] sm:$0xff] %v6264_v50  ;;  %v6281_v50 = vsel %vm1128_vm7, 1, %v11902_v0  ;;  %vm1144_vm7 = vcmp.eq.s32.totalorder %v5622_v35, 2 }
 0x16e   : > { %v6274_v1 = vpop.permute.xlu0 %1220  ;;  %12310 = vst [vmem:[#allocation127_spill] sm:$0xff] %v6281_v50 }
 0x16f   : > { %12308 = vst [vmem:[#allocation125_spill] sm:$0xff] %v6274_v1  ;;  %1196 = vperm.xlu1 %4991, %v6267_v46   ;;  %2064 = vperm.xlu0 %4986, %v6270_v9  }
 0x170   : > { %v6278_v2 = vpop.permute.xlu1 %789 }
 0x171   : > { %12309 = vst [vmem:[#allocation126_spill] sm:$0xff] %v6278_v2  ;;  %v6295_v2 = vsel %vm1130_vm9, 1, %v11902_v0  ;;  %vm1146_vm9 = vcmp.eq.s32.totalorder %v5638_v39, 2 }
 0x172   : > { %v6288_v3 = vpop.permute.xlu0 %1226  ;;  %12313 = vst [vmem:[#allocation130_spill] sm:$0xff] %v6295_v2 }
 0x173   : > { %12311 = vst [vmem:[#allocation128_spill] sm:$0xff] %v6288_v3  ;;  %1199 = vperm.xlu1 %4991, %v6281_v50   ;;  %2070 = vperm.xlu0 %4986, %v6284_v25   ;;  %v6312_v50 = vsel %vm1977_vm12, 1, %v11902_v0  ;;  %vm2379_vm12 = vcmp.eq.s32.totalorder %v5529_v12, 5 }
 0x174   : > { %v6292_v1 = vpop.permute.xlu1 %795 }
 0x175   : > { %12312 = vst [vmem:[#allocation129_spill] sm:$0xff] %v6292_v1  ;;  %v6309_v1 = vsel %vm1132_vm11, 1, %v11902_v0  ;;  %vm1148_vm11 = vcmp.eq.s32.totalorder %v5654_v43, 2 }
 0x176   : > { %v6302_v7 = vpop.permute.xlu0 %1232  ;;  %12316 = vst [vmem:[#allocation133_spill] sm:$0xff] %v6309_v1 }
 0x177   : > { %12314 = vst [vmem:[#allocation131_spill] sm:$0xff] %v6302_v7  ;;  %1205 = vperm.xlu1 %4991, %v6295_v2   ;;  %2076 = vperm.xlu0 %4986, %v6298_v6   ;;  %v6326_v2 = vsel %vm1979_vm14, 1, %v11902_v0  ;;  %vm2381_vm14 = vcmp.eq.s32.totalorder %v5545_v16, 5 }
 0x178   : > { %v6306_v3 = vpop.permute.xlu1 %801  ;;  %12320 = vst [vmem:[#allocation137_spill] sm:$0xff] %v6326_v2 }
 0x179   : > { %12315 = vst [vmem:[#allocation132_spill] sm:$0xff] %v6306_v3  ;;  %v6323_v3 = vsel %vm1134_vm13, 1, %v11902_v0  ;;  %vm1150_vm13 = vcmp.eq.s32.totalorder %v5670_v47, 2 }
 0x17a   : > { %v6316_v11 = vpop.permute.xlu0 %1238  ;;  %12319 = vst [vmem:[#allocation136_spill] sm:$0xff] %v6323_v3 }
 0x17b   : > { %12317 = vst [vmem:[#allocation134_spill] sm:$0xff] %v6316_v11  ;;  %1211 = vperm.xlu1 %4991, %v6309_v1   ;;  %2082 = vperm.xlu0 %4986, %v6312_v50   ;;  %v6340_v1 = vsel %vm1981_vm0, 1, %v11902_v0  ;;  %vm2383_vm0 = vcmp.eq.s32.totalorder %v5561_v20, 5 }
 0x17c   : > { %v6320_v7 = vpop.permute.xlu1 %807  ;;  %12324 = vst [vmem:[#allocation141_spill] sm:$0xff] %v6340_v1 }
 0x17d   : > { %12318 = vst [vmem:[#allocation135_spill] sm:$0xff] %v6320_v7  ;;  %v6337_v7 = vsel %vm1136_vm15, 1, %v11902_v0  ;;  %vm1152_vm15 = vcmp.eq.s32.totalorder %v5686_v51, 2 }
 0x17e   : > { %v6330_v15 = vpop.permute.xlu0 %1244  ;;  %12323 = vst [vmem:[#allocation140_spill] sm:$0xff] %v6337_v7 }
 0x17f   : > { %12321 = vst [vmem:[#allocation138_spill] sm:$0xff] %v6330_v15  ;;  %1217 = vperm.xlu1 %4991, %v6323_v3   ;;  %2088 = vperm.xlu0 %4986, %v6326_v2   ;;  %v6354_v3 = vsel %vm1983_vm2, 1, %v11902_v0  ;;  %vm2385_vm2 = vcmp.eq.s32.totalorder %v5577_v24, 5 }
 0x180   : > { %v6334_v11 = vpop.permute.xlu1 %813  ;;  %12328 = vst [vmem:[#allocation145_spill] sm:$0xff] %v6354_v3 }
 0x181   : > { %12322 = vst [vmem:[#allocation139_spill] sm:$0xff] %v6334_v11  ;;  %v6351_v11 = vsel %vm1138_vm1, 1, %v11902_v0  ;;  %vm1154_vm1 = vcmp.eq.s32.totalorder %v5702_v55, 2 }
 0x182   : > { %v6344_v19 = vpop.permute.xlu0 %1250  ;;  %12327 = vst [vmem:[#allocation144_spill] sm:$0xff] %v6351_v11 }
 0x183   : > { %12325 = vst [vmem:[#allocation142_spill] sm:$0xff] %v6344_v19  ;;  %1223 = vperm.xlu1 %4991, %v6337_v7   ;;  %2094 = vperm.xlu0 %4986, %v6340_v1   ;;  %v6368_v7 = vsel %vm1985_vm4, 1, %v11902_v0  ;;  %vm2387_vm4 = vcmp.eq.s32.totalorder %v5593_v28, 5 }
 0x184   : > { %v6348_v15 = vpop.permute.xlu1 %819  ;;  %12332 = vst [vmem:[#allocation149_spill] sm:$0xff] %v6368_v7 }
 0x185   : > { %12326 = vst [vmem:[#allocation143_spill] sm:$0xff] %v6348_v15  ;;  %v6365_v15 = vsel %vm1140_vm3, 1, %v11902_v0  ;;  %vm1156_vm3 = vcmp.eq.s32.totalorder %v5718_v59, 2 }
 0x186   : > { %v6358_v23 = vpop.permute.xlu0 %1256  ;;  %12331 = vst [vmem:[#allocation148_spill] sm:$0xff] %v6365_v15  ;;  %v6475_v24 = vsel %vm1156_vm3, 1, %v11902_v0 }
 0x187   : > { %12329 = vst [vmem:[#allocation146_spill] sm:$0xff] %v6358_v23  ;;  %1229 = vperm.xlu1 %4991, %v6351_v11   ;;  %2100 = vperm.xlu0 %4986, %v6354_v3   ;;  %v6382_v11 = vsel %vm1987_vm6, 1, %v11902_v0  ;;  %12362 = vst [vmem:[#allocation179_spill] sm:$0xff] %v6475_v24  ;;  %vm2391_vm6 = vcmp.eq.s32.totalorder %v5625_v36, 5 }
 0x188   : > { %v6362_v19 = vpop.permute.xlu1 %825  ;;  %12336 = vst [vmem:[#allocation153_spill] sm:$0xff] %v6382_v11 }
 0x189   : > { %12330 = vst [vmem:[#allocation147_spill] sm:$0xff] %v6362_v19  ;;  %v6379_v19 = vsel %vm1142_vm5, 1, %v11902_v0  ;;  %vm2389_vm5 = vcmp.eq.s32.totalorder %v5609_v32, 5  ;;  %v6499_v32 = vsel %vm2391_vm6, 1, %v11902_v0 }
 0x18a   : > { %v6372_v27 = vpop.permute.xlu0 %1262  ;;  %12335 = vst [vmem:[#allocation152_spill] sm:$0xff] %v6379_v19  ;;  %v6488_v28 = vsel %vm2389_vm5, 1, %v11902_v0  ;;  %12369 = vst [vmem:[#allocation186_spill] sm:$0xff] %v6499_v32 }
 0x18b   : > { %12333 = vst [vmem:[#allocation150_spill] sm:$0xff] %v6372_v27  ;;  %1235 = vperm.xlu1 %4991, %v6365_v15   ;;  %2106 = vperm.xlu0 %4986, %v6368_v7   ;;  %v6396_v15 = vsel %vm2374_vm8, 1, %v11902_v0  ;;  %12366 = vst [vmem:[#allocation183_spill] sm:$0xff] %v6488_v28  ;;  %vm2395_vm8 = vcmp.eq.s32.totalorder %v5657_v44, 5 }
 0x18c   : > { %v6376_v23 = vpop.permute.xlu1 %831  ;;  %12340 = vst [vmem:[#allocation157_spill] sm:$0xff] %v6396_v15 }
 0x18d   : > { %12334 = vst [vmem:[#allocation151_spill] sm:$0xff] %v6376_v23  ;;  %v6393_v23 = vsel %vm1144_vm7, 1, %v11902_v0  ;;  %vm2393_vm7 = vcmp.eq.s32.totalorder %v5641_v40, 5  ;;  %v6519_v40 = vsel %vm2395_vm8, 1, %v11902_v0 }
 0x18e   : > { %v6386_v31 = vpop.permute.xlu0 %1268  ;;  %12339 = vst [vmem:[#allocation156_spill] sm:$0xff] %v6393_v23  ;;  %v6509_v36 = vsel %vm2393_vm7, 1, %v11902_v0  ;;  %12375 = vst [vmem:[#allocation192_spill] sm:$0xff] %v6519_v40 }
 0x18f   : > { %12337 = vst [vmem:[#allocation154_spill] sm:$0xff] %v6386_v31  ;;  %1241 = vperm.xlu1 %4991, %v6379_v19   ;;  %2112 = vperm.xlu0 %4986, %v6382_v11   ;;  %v6410_v31 = vsel %vm2377_vm10, 1, %v11902_v0  ;;  %12372 = vst [vmem:[#allocation189_spill] sm:$0xff] %v6509_v36  ;;  %vm2399_vm10 = vcmp.eq.s32.totalorder %v5689_v52, 5 }
 0x190   : > { %v6390_v27 = vpop.permute.xlu1 %837  ;;  %12344 = vst [vmem:[#allocation161_spill] sm:$0xff] %v6410_v31 }
 0x191   : > { %12338 = vst [vmem:[#allocation155_spill] sm:$0xff] %v6390_v27  ;;  %v6407_v27 = vsel %vm1146_vm9, 1, %v11902_v0  ;;  %vm2397_vm9 = vcmp.eq.s32.totalorder %v5673_v48, 5  ;;  %v6539_v48 = vsel %vm2399_vm10, 1, %v11902_v0 }
 0x192   : > { %v6400_v35 = vpop.permute.xlu0 %1274  ;;  %12343 = vst [vmem:[#allocation160_spill] sm:$0xff] %v6407_v27  ;;  %v6529_v44 = vsel %vm2397_vm9, 1, %v11902_v0  ;;  %12381 = vst [vmem:[#allocation198_spill] sm:$0xff] %v6539_v48 }
 0x193   : > { %12341 = vst [vmem:[#allocation158_spill] sm:$0xff] %v6400_v35  ;;  %1247 = vperm.xlu1 %4991, %v6393_v23   ;;  %2441 = vperm.xlu0 %4986, %v6396_v15   ;;  %v6421_v35 = vsel %vm1148_vm11, 1, %v11902_v0  ;;  %12378 = vst [vmem:[#allocation195_spill] sm:$0xff] %v6529_v44  ;;  %vm2401_vm11 = vcmp.eq.s32.totalorder %v5705_v56, 5 }
 0x194   : > { %v6404_v4 = vpop.permute.xlu1 %843  ;;  %12347 = vst [vmem:[#allocation164_spill] sm:$0xff] %v6421_v35  ;;  %v6549_v52 = vsel %vm2401_vm11, 1, %v11902_v0 }
 0x195   : > { %12342 = vst [vmem:[#allocation159_spill] sm:$0xff] %v6404_v4  ;;  %v6424_v4 = vsel %vm2379_vm12, 1, %v11902_v0  ;;  %12384 = vst [vmem:[#allocation201_spill] sm:$0xff] %v6549_v52  ;;  %vm2403_vm12 = vcmp.eq.s32.totalorder %v5721_v60, 5 }
 0x196   : > { %v6414_v39 = vpop.permute.xlu0 %1280  ;;  %12348 = vst [vmem:[#allocation165_spill] sm:$0xff] %v6424_v4  ;;  %v6559_v56 = vsel %vm2403_vm12, 1, %v11902_v0 }
 0x197   : > { %12345 = vst [vmem:[#allocation162_spill] sm:$0xff] %v6414_v39  ;;  %1253 = vperm.xlu1 %4991, %v6407_v27   ;;  %2450 = vperm.xlu0 %4986, %v6410_v31   ;;  %v6435_v39 = vsel %vm1150_vm13, 1, %v11902_v0  ;;  %12387 = vst [vmem:[#allocation204_spill] sm:$0xff] %v6559_v56 }
 0x198   : > { %v6418_v8 = vpop.permute.xlu1 %849  ;;  %12351 = vst [vmem:[#allocation168_spill] sm:$0xff] %v6435_v39 }
 0x199   : > { %12346 = vst [vmem:[#allocation163_spill] sm:$0xff] %v6418_v8  ;;  %v6438_v8 = vsel %vm2381_vm14, 1, %v11902_v0 }
 0x19a   : > { %v6428_v43 = vpop.permute.xlu0 %1609  ;;  %12352 = vst [vmem:[#allocation169_spill] sm:$0xff] %v6438_v8 }
 0x19b   : > { %12349 = vst [vmem:[#allocation166_spill] sm:$0xff] %v6428_v43  ;;  %1259 = vperm.xlu1 %4991, %v6421_v35   ;;  %2456 = vperm.xlu0 %4986, %v6424_v4   ;;  %v6452_v43 = vsel %vm2383_vm0, 1, %v11902_v0  ;;  %v6784_v4 = vld [vmem:[%s5485_s18 + $0xf0] sm:$0xff] }
 0x19c   : > { %v6432_v12 = vpop.permute.xlu1 %855  ;;  %12356 = vst [vmem:[#allocation173_spill] sm:$0xff] %v6452_v43 }
 0x19d   : > { %12350 = vst [vmem:[#allocation167_spill] sm:$0xff] %v6432_v12  ;;  %v6449_v12 = vsel %vm1152_vm15, 1, %v11902_v0 }
 0x19e   : > { %v6442_v47 = vpop.permute.xlu0 %1618  ;;  %12355 = vst [vmem:[#allocation172_spill] sm:$0xff] %v6449_v12 }
 0x19f   : > { %12353 = vst [vmem:[#allocation170_spill] sm:$0xff] %v6442_v47  ;;  %1265 = vperm.xlu1 %4991, %v6435_v39   ;;  %2462 = vperm.xlu0 %4986, %v6438_v8   ;;  %v6466_v47 = vsel %vm2385_vm2, 1, %v11902_v0  ;;  %v6764_v8 = vld [vmem:[%s5485_s18 + $0xe0] sm:$0xff] }
 0x1a0   : > { %v6446_v16 = vpop.permute.xlu1 %861  ;;  %12360 = vst [vmem:[#allocation177_spill] sm:$0xff] %v6466_v47 }
 0x1a1   : > { %12354 = vst [vmem:[#allocation171_spill] sm:$0xff] %v6446_v16  ;;  %v6463_v16 = vsel %vm1154_vm1, 1, %v11902_v0 }
 0x1a2   : > { %v6456_v51 = vpop.permute.xlu0 %1624  ;;  %12359 = vst [vmem:[#allocation176_spill] sm:$0xff] %v6463_v16 }
 0x1a3   : > { %12357 = vst [vmem:[#allocation174_spill] sm:$0xff] %v6456_v51  ;;  %1271 = vperm.xlu1 %4991, %v6449_v12   ;;  %2468 = vperm.xlu0 %4986, %v6452_v43   ;;  %v6796_v12 = vld [vmem:[%s5485_s18 + $0x58] sm:$0xff] }
 0x1a4   : > { %v6460_v20 = vpop.permute.xlu1 %867 }
 0x1a5   : > { %12358 = vst [vmem:[#allocation175_spill] sm:$0xff] %v6460_v20  ;;  %v6478_v20 = vsel %vm2387_vm4, 1, %v11902_v0 }
 0x1a6   : > { %v6470_v55 = vpop.permute.xlu0 %1630  ;;  %12363 = vst [vmem:[#allocation180_spill] sm:$0xff] %v6478_v20 }
 0x1a7   : > { %12361 = vst [vmem:[#allocation178_spill] sm:$0xff] %v6470_v55  ;;  %1277 = vperm.xlu1 %4991, %v6463_v16   ;;  %2474 = vperm.xlu0 %4986, %v6466_v47   ;;  %v6776_v16 = vld [vmem:[%s5485_s18 + $0x48] sm:$0xff] }
 0x1a9   : > { %v6480_v51 = vpop.permute.xlu1 %937 }
 0x1aa   : > { %12364 = vst [vmem:[#allocation181_spill] sm:$0xff] %v6480_v51  ;;  %v6483_v43 = vpop.permute.xlu0 %1636 }
 0x1ab   : > { %12365 = vst [vmem:[#allocation182_spill] sm:$0xff] %v6483_v43  ;;  %1283 = vperm.xlu1 %4991, %v6475_v24   ;;  %2480 = vperm.xlu0 %4986, %v6478_v20   ;;  %v6736_v20 = vld [vmem:[%s5485_s18 + $0x28] sm:$0xff]  ;;  %v6756_v24 = vld [vmem:[%s5485_s18 + $0x38] sm:$0xff] }
 0x1ac   : > { %vm1546_vm12 = vcmp.eq.s32.totalorder %v6736_v20, 3 }
 0x1ad   : > { %v6490_v59 = vpop.permute.xlu1 %940 }
 0x1ae   : > { %12367 = vst [vmem:[#allocation184_spill] sm:$0xff] %v6490_v59  ;;  %v6493_v55 = vpop.permute.xlu0 %1642  ;;  %v6603_v59 = vld [vmem:[%s5485_s18 + $0x40] sm:$0xff] }
 0x1af   : > { %12368 = vst [vmem:[#allocation185_spill] sm:$0xff] %v6493_v55  ;;  %4992 = vset.pattern.permute.xlu1 %v12272_v61  ;;  %2486 = vperm.xlu0 %4986, %v6488_v28   ;;  %vm2797_vm0 = vcmp.eq.s32.totalorder %v6603_v59, 6  ;;  %v6724_v28 = vld [vmem:[%s5485_s18 + $0xc0] sm:$0xff] }
 0x1b0   : > { %1353 = vperm.xlu1 %4992, %v5836_v54   ;;  %vm2813_vm11 = vcmp.eq.s32.totalorder %v6724_v28, 6 }
 0x1b1   : > { %v6501_v43 = vpop.permute.xlu1 %946  ;;  %v6740_v47 = vsel %vm2813_vm11, 1, %v11902_v0 }
 0x1b2   : > { %12370 = vst [vmem:[#allocation187_spill] sm:$0xff] %v6501_v43  ;;  %v6504_v51 = vpop.permute.xlu0 %1648  ;;  %v12397_v43 = vld [vmem:[#allocation48_spill] sm:$0xff]  ;;  %12433 = vst [vmem:[#allocation234_spill] sm:$0xff] %v6740_v47 }
 0x1b3   : > { %12371 = vst [vmem:[#allocation188_spill] sm:$0xff] %v6504_v51  ;;  %2492 = vperm.xlu0 %4986, %v6499_v32  }
 0x1b4   : > { %1356 = vperm.xlu1 %4992, %v6267_v46  }
 0x1b5   : > { %v6511_v55 = vpop.permute.xlu1 %952 }
 0x1b6   : > { %12373 = vst [vmem:[#allocation190_spill] sm:$0xff] %v6511_v55  ;;  %v6514_v54 = vpop.permute.xlu0 %1654 }
 0x1b7   : > { %12374 = vst [vmem:[#allocation191_spill] sm:$0xff] %v6514_v54  ;;  %2498 = vperm.xlu0 %4986, %v6509_v36   ;;  %v12401_v54 = vld [vmem:[#allocation52_spill] sm:$0xff]  ;;  %v6716_v36 = vld [vmem:[%s5485_s18 + $0x18] sm:$0xff] }
 0x1b8   : > { %1362 = vperm.xlu1 %4992, %v5843_v58   ;;  %vm1544_vm10 = vcmp.eq.s32.totalorder %v6716_v36, 3 }
 0x1b9   : > { %v6521_v51 = vpop.permute.xlu1 %958 }
 0x1ba   : > { %12376 = vst [vmem:[#allocation193_spill] sm:$0xff] %v6521_v51  ;;  %v6524_v46 = vpop.permute.xlu0 %1660  ;;  %v6590_v51 = vld [vmem:[%s5485_s18 + $0x30] sm:$0xff] }
 0x1bb   : > { %12377 = vst [vmem:[#allocation194_spill] sm:$0xff] %v6524_v46  ;;  %2504 = vperm.xlu0 %4986, %v6519_v40   ;;  %vm2795_vm15 = vcmp.eq.s32.totalorder %v6590_v51, 6 }
 0x1bc   : > { %1368 = vperm.xlu1 %4992, %v5857_v57  }
 0x1bd   : > { %v6531_v55 = vpop.permute.xlu1 %964 }
 0x1be   : > { %12379 = vst [vmem:[#allocation196_spill] sm:$0xff] %v6531_v55  ;;  %v6534_v58 = vpop.permute.xlu0 %1666  ;;  %v12393_v55 = vld [vmem:[#allocation44_spill] sm:$0xff] }
 0x1bf   : > { %12380 = vst [vmem:[#allocation197_spill] sm:$0xff] %v6534_v58  ;;  %2510 = vperm.xlu0 %4986, %v6529_v44   ;;  %v6695_v44 = vld [vmem:[%s5485_s18 + $0x10] sm:$0xff] }
 0x1c0   : > { %1374 = vperm.xlu1 %4992, %v5871_v37   ;;  %vm1543_vm8 = vcmp.eq.s32.totalorder %v6695_v44, 3 }
 0x1c1   : > { %v6541_v46 = vpop.permute.xlu1 %970  ;;  %v6712_v40 = vsel %vm1543_vm8, 1, %v11902_v0 }
 0x1c2   : > { %12382 = vst [vmem:[#allocation199_spill] sm:$0xff] %v6541_v46  ;;  %v6544_v57 = vpop.permute.xlu0 %1672 }
 0x1c3   : > { %12383 = vst [vmem:[#allocation200_spill] sm:$0xff] %v6544_v57  ;;  %2516 = vperm.xlu0 %4986, %v6539_v48   ;;  %v6683_v48 = vld [vmem:[%s5485_s18 + $0xa0] sm:$0xff] }
 0x1c4   : > { %1380 = vperm.xlu1 %4992, %v5885_v41   ;;  %v6564_v41 = vld [vmem:[%s5485_s18 + $0x8] sm:$0xff]  ;;  %vm2809_vm7 = vcmp.eq.s32.totalorder %v6683_v48, 6 }
 0x1c5   : > { %v6551_v58 = vpop.permute.xlu1 %976  ;;  %vm2790_vm13 = vcmp.eq.s32.totalorder %v6564_v41, 6 }
 0x1c6   : > { %12385 = vst [vmem:[#allocation202_spill] sm:$0xff] %v6551_v58  ;;  %v6554_v37 = vpop.permute.xlu0 %1678  ;;  %v6572_v60 = vsel %vm2790_vm13, 1, %v11902_v0  ;;  %v6577_v58 = vld [vmem:[%s5485_s18 + $0x20] sm:$0xff] }
 0x1c7   : > { %12386 = vst [vmem:[#allocation203_spill] sm:$0xff] %v6554_v37  ;;  %2522 = vperm.xlu0 %4986, %v6549_v52   ;;  %12390 = vst [vmem:[#allocation207_spill] sm:$0xff] %v6572_v60  ;;  %vm2793_vm14 = vcmp.eq.s32.totalorder %v6577_v58, 6 }
 0x1c8   : > { %1386 = vperm.xlu1 %4992, %v5899_v62  }
 0x1c9   : > { %v6561_v46 = vpop.permute.xlu1 %982 }
 0x1ca   : > { %12388 = vst [vmem:[#allocation205_spill] sm:$0xff] %v6561_v46  ;;  %v6567_v57 = vpop.permute.xlu0 %1684  ;;  %v6616_v46 = vld [vmem:[%s5485_s18 + $0x50] sm:$0xff] }
 0x1cb   : > { %12389 = vst [vmem:[#allocation206_spill] sm:$0xff] %v6567_v57  ;;  %2528 = vperm.xlu0 %4986, %v6559_v56   ;;  %v6585_v57 = vsel %vm2793_vm14, 1, %v11902_v0  ;;  %vm2799_vm1 = vcmp.eq.s32.totalorder %v6616_v46, 6  ;;  %v6655_v56 = vld [vmem:[%s5485_s18 + $0x80] sm:$0xff]  ;;  %vm1548_vm14 = vcmp.eq.s32.totalorder %v6756_v24, 3  ;;  %vm3215_vm11 = vcmp.eq.s32.totalorder %v6616_v46, 7 }
 0x1cc   : > { %1392 = vperm.xlu1 %4992, %v5913_v29   ;;  %12394 = vst [vmem:[#allocation44_spill] sm:$0xff] %v6585_v57  ;;  %vm2805_vm4 = vcmp.eq.s32.totalorder %v6655_v56, 6  ;;  %v6885_v23 = vsel %vm3215_vm11, 1, %v11902_v0  ;;  %vm3235_vm11 = vcmp.eq.s32.totalorder %v6784_v4, 7 }
 0x1cd   : > { %v6574_v62 = vpop.permute.xlu1 %988  ;;  %12465 = vst [vmem:[#allocation266_spill] sm:$0xff] %v6885_v23 }
 0x1ce   : > { %12391 = vst [vmem:[#allocation208_spill] sm:$0xff] %v6574_v62  ;;  %v6580_v37 = vpop.permute.xlu0 %1690 }
 0x1cf   : > { %12392 = vst [vmem:[#allocation209_spill] sm:$0xff] %v6580_v37  ;;  %2857 = vperm.xlu0 %4986, %v6572_v60   ;;  %v6598_v37 = vsel %vm2795_vm15, 1, %v11902_v0  ;;  %v12409_v60 = vld [vmem:[#allocation60_spill] sm:$0xff]  ;;  %vm2817_vm15 = vcmp.eq.s32.totalorder %v6764_v8, 6 }
 0x1d0   : > { %1398 = vperm.xlu1 %4992, %v12393_v55   ;;  %12398 = vst [vmem:[#allocation48_spill] sm:$0xff] %v6598_v37 }
 0x1d1   : > { %v6587_v29 = vpop.permute.xlu1 %994 }
 0x1d2   : > { %12395 = vst [vmem:[#allocation210_spill] sm:$0xff] %v6587_v29  ;;  %v6593_v62 = vpop.permute.xlu0 %1696 }
 0x1d3   : > { %12396 = vst [vmem:[#allocation211_spill] sm:$0xff] %v6593_v62  ;;  %2866 = vperm.xlu0 %4986, %v6585_v57   ;;  %v6611_v62 = vsel %vm2797_vm0, 1, %v11902_v0  ;;  %v12405_v57 = vld [vmem:[#allocation56_spill] sm:$0xff]  ;;  %vm1550_vm0 = vcmp.eq.s32.totalorder %v6776_v16, 3 }
 0x1d4   : > { %1404 = vperm.xlu1 %4992, %v12397_v43   ;;  %12402 = vst [vmem:[#allocation52_spill] sm:$0xff] %v6611_v62 }
 0x1d5   : > { %v6600_v55 = vpop.permute.xlu1 %1000 }
 0x1d6   : > { %12399 = vst [vmem:[#allocation212_spill] sm:$0xff] %v6600_v55  ;;  %v6606_v29 = vpop.permute.xlu0 %2025 }
 0x1d7   : > { %12400 = vst [vmem:[#allocation213_spill] sm:$0xff] %v6606_v29  ;;  %2872 = vperm.xlu0 %4986, %v6598_v37   ;;  %v6624_v29 = vsel %vm2799_vm1, 1, %v11902_v0  ;;  %v6629_v37 = vld [vmem:[%s5485_s18 + $0x60] sm:$0xff]  ;;  %vm2819_vm1 = vcmp.eq.s32.totalorder %v6784_v4, 6 }
 0x1d8   : > { %1410 = vperm.xlu1 %4992, %v12401_v54   ;;  %12406 = vst [vmem:[#allocation56_spill] sm:$0xff] %v6624_v29  ;;  %vm2801_vm2 = vcmp.eq.s32.totalorder %v6629_v37, 6 }
 0x1d9   : > { %v6613_v43 = vpop.permute.xlu1 %1006 }
 0x1da   : > { %12403 = vst [vmem:[#allocation214_spill] sm:$0xff] %v6613_v43  ;;  %v6619_v55 = vpop.permute.xlu0 %2034 }
 0x1db   : > { %12404 = vst [vmem:[#allocation215_spill] sm:$0xff] %v6619_v55  ;;  %2878 = vperm.xlu0 %4986, %v6611_v62   ;;  %v6637_v55 = vsel %vm2801_vm2, 1, %v11902_v0  ;;  %v6642_v62 = vld [vmem:[%s5485_s18 + $0x70] sm:$0xff]  ;;  %vm1552_vm2 = vcmp.eq.s32.totalorder %v6796_v12, 3 }
 0x1dc   : > { %1416 = vperm.xlu1 %4992, %v12405_v57   ;;  %12410 = vst [vmem:[#allocation60_spill] sm:$0xff] %v6637_v55  ;;  %vm2803_vm3 = vcmp.eq.s32.totalorder %v6642_v62, 6  ;;  %v6809_v31 = vsel %vm1552_vm2, 1, %v11902_v0 }
 0x1dd   : > { %v6626_v54 = vpop.permute.xlu1 %1012  ;;  %12448 = vst [vmem:[#allocation249_spill] sm:$0xff] %v6809_v31 }
 0x1de   : > { %12407 = vst [vmem:[#allocation216_spill] sm:$0xff] %v6626_v54  ;;  %v6632_v43 = vpop.permute.xlu0 %2040 }
 0x1df   : > { %12408 = vst [vmem:[#allocation217_spill] sm:$0xff] %v6632_v43  ;;  %2884 = vperm.xlu0 %4986, %v6624_v29   ;;  %v12413_v43 = vld [vmem:[#allocation64_spill] sm:$0xff]  ;;  %v6650_v29 = vsel %vm2803_vm3, 1, %v11902_v0  ;;  %vm3206_vm3 = vcmp.eq.s32.totalorder %v6564_v41, 7 }
 0x1e0   : > { %1422 = vperm.xlu1 %4992, %v12409_v60   ;;  %12414 = vst [vmem:[#allocation64_spill] sm:$0xff] %v6650_v29  ;;  %v6817_v39 = vsel %vm3206_vm3, 1, %v11902_v0 }
 0x1e1   : > { %v6639_v57 = vpop.permute.xlu1 %1018  ;;  %12449 = vst [vmem:[#allocation250_spill] sm:$0xff] %v6817_v39 }
 0x1e2   : > { %12411 = vst [vmem:[#allocation218_spill] sm:$0xff] %v6639_v57  ;;  %v6645_v54 = vpop.permute.xlu0 %2046 }
 0x1e3   : > { %12412 = vst [vmem:[#allocation219_spill] sm:$0xff] %v6645_v54  ;;  %2890 = vperm.xlu0 %4986, %v6637_v55   ;;  %v12417_v54 = vld [vmem:[#allocation68_spill] sm:$0xff]  ;;  %v6663_v55 = vsel %vm2805_vm4, 1, %v11902_v0 }
 0x1e4   : > { %1428 = vperm.xlu1 %4992, %v12413_v43   ;;  %12418 = vst [vmem:[#allocation68_spill] sm:$0xff] %v6663_v55  ;;  %v6666_v43 = vld [vmem:[%s5485_s18 + $0x90] sm:$0xff] }
 0x1e5   : > { %v6652_v60 = vpop.permute.xlu1 %1024  ;;  %vm2807_vm5 = vcmp.eq.s32.totalorder %v6666_v43, 6  ;;  %vm3223_vm3 = vcmp.eq.s32.totalorder %v6666_v43, 7 }
 0x1e6   : > { %12415 = vst [vmem:[#allocation220_spill] sm:$0xff] %v6652_v60  ;;  %v6658_v57 = vpop.permute.xlu0 %2052  ;;  %v6953_v3 = vsel %vm3223_vm3, 1, %v11902_v0  ;;  %vm3637_vm3 = vcmp.eq.s32.totalorder %v6655_v56, 8 }
 0x1e7   : > { %12416 = vst [vmem:[#allocation221_spill] sm:$0xff] %v6658_v57  ;;  %2896 = vperm.xlu0 %4986, %v6650_v29   ;;  %v6675_v57 = vld [vmem:[%s5485_s18] sm:$0xff]  ;;  %v6680_v29 = vsel %vm2807_vm5, 1, %v11902_v0  ;;  %vm3209_vm5 = vcmp.eq.s32.totalorder %v6577_v58, 7  ;;  %12481 = vst [vmem:[#allocation282_spill] sm:$0xff] %v6953_v3 }
 0x1e8   : > { %1434 = vperm.xlu1 %4992, %v12417_v54   ;;  %vm1541_vm6 = vcmp.eq.s32.totalorder %v6675_v57, 3  ;;  %v12421_v54 = vld [vmem:[#allocation72_spill] sm:$0xff]  ;;  %v6834_v35 = vsel %vm3209_vm5, 1, %v11902_v0  ;;  %vm3225_vm5 = vcmp.eq.s32.totalorder %v6683_v48, 7 }
 0x1e9   : > { %12422 = vst [vmem:[#allocation72_spill] sm:$0xff] %v6680_v29  ;;  %12453 = vst [vmem:[#allocation254_spill] sm:$0xff] %v6834_v35  ;;  %v6970_v1 = vsel %vm3225_vm5, 1, %v11902_v0  ;;  %vm3641_vm5 = vcmp.eq.s32.totalorder %v6683_v48, 8 }
 0x1ea   : > { %v6669_v60 = vpop.permute.xlu1 %1190  ;;  %v6671_v52 = vpop.permute.xlu0 %2058  ;;  %12485 = vst [vmem:[#allocation286_spill] sm:$0xff] %v6970_v1 }
 0x1eb   : > { %12419 = vst [vmem:[#allocation222_spill] sm:$0xff] %v6669_v60  ;;  %12420 = vst [vmem:[#allocation223_spill] sm:$0xff] %v6671_v52  ;;  %2902 = vperm.xlu0 %4986, %v6663_v55   ;;  %v6691_v55 = vsel %vm1541_vm6, 1, %v11902_v0 }
 0x1ec   : > { %1440 = vperm.xlu1 %4992, %v12421_v54   ;;  %12425 = vst [vmem:[#allocation226_spill] sm:$0xff] %v6691_v55  ;;  %v6700_v54 = vsel %vm2809_vm7, 1, %v11902_v0  ;;  %vm3211_vm7 = vcmp.eq.s32.totalorder %v6590_v51, 7 }
 0x1ed   : > { %12426 = vst [vmem:[#allocation227_spill] sm:$0xff] %v6700_v54  ;;  %v6851_v15 = vsel %vm3211_vm7, 1, %v11902_v0 }
 0x1ee   : > { %v6686_v60 = vpop.permute.xlu1 %1196  ;;  %v6688_v52 = vpop.permute.xlu0 %2064  ;;  %12457 = vst [vmem:[#allocation258_spill] sm:$0xff] %v6851_v15 }
 0x1ef   : > { %12423 = vst [vmem:[#allocation224_spill] sm:$0xff] %v6686_v60  ;;  %12424 = vst [vmem:[#allocation225_spill] sm:$0xff] %v6688_v52  ;;  %2908 = vperm.xlu0 %4986, %v6680_v29   ;;  %v6704_v60 = vld [vmem:[%s5485_s18 + $0xb0] sm:$0xff] }
 0x1f0   : > { %4993 = vset.pattern.permute.xlu1 %v11902_v0  ;;  %vm2811_vm9 = vcmp.eq.s32.totalorder %v6704_v60, 6  ;;  %vm3227_vm7 = vcmp.eq.s32.totalorder %v6704_v60, 7 }
 0x1f1   : > { %1606 = vperm.xlu1 %4993, %v6691_v55   ;;  %v6720_v32 = vsel %vm2811_vm9, 1, %v11902_v0  ;;  %v6744_v55 = vld [vmem:[%s5485_s18 + $0xd0] sm:$0xff]  ;;  %vm3213_vm9 = vcmp.eq.s32.totalorder %v6603_v59, 7 }
 0x1f2   : > { %v6707_v52 = vpop.permute.xlu1 %1199  ;;  %v6709_v29 = vpop.permute.xlu0 %2070  ;;  %12429 = vst [vmem:[#allocation230_spill] sm:$0xff] %v6720_v32  ;;  %vm2815_vm13 = vcmp.eq.s32.totalorder %v6744_v55, 6  ;;  %v6868_v27 = vsel %vm3213_vm9, 1, %v11902_v0  ;;  %vm3231_vm9 = vcmp.eq.s32.totalorder %v6744_v55, 7 }
 0x1f3   : > { %12427 = vst [vmem:[#allocation228_spill] sm:$0xff] %v6707_v52  ;;  %12428 = vst [vmem:[#allocation229_spill] sm:$0xff] %v6709_v29  ;;  %2914 = vperm.xlu0 %4986, %v6700_v54   ;;  %v6732_v54 = vsel %vm1544_vm10, 1, %v11902_v0 }
 0x1f4   : > { %12432 = vst [vmem:[#allocation233_spill] sm:$0xff] %v6732_v54  ;;  %12461 = vst [vmem:[#allocation262_spill] sm:$0xff] %v6868_v27 }
 0x1f5   : > { %1612 = vperm.xlu1 %4993, %v6712_v40  }
 0x1f6   : > { %v6727_v52 = vpop.permute.xlu1 %1205  ;;  %v6729_v29 = vpop.permute.xlu0 %2076 }
 0x1f7   : > { %12430 = vst [vmem:[#allocation231_spill] sm:$0xff] %v6727_v52  ;;  %12431 = vst [vmem:[#allocation232_spill] sm:$0xff] %v6729_v29  ;;  %2920 = vperm.xlu0 %4986, %v6720_v32   ;;  %v6752_v32 = vsel %vm1546_vm12, 1, %v11902_v0 }
 0x1f8   : > { %12436 = vst [vmem:[#allocation237_spill] sm:$0xff] %v6752_v32 }
 0x1f9   : > { %1615 = vperm.xlu1 %4993, %v6732_v54   ;;  %v6760_v54 = vsel %vm2815_vm13, 1, %v11902_v0  ;;  %vm3217_vm13 = vcmp.eq.s32.totalorder %v6629_v37, 7 }
 0x1fa   : > { %v6747_v52 = vpop.permute.xlu1 %1211  ;;  %v6749_v29 = vpop.permute.xlu0 %2082  ;;  %12437 = vst [vmem:[#allocation238_spill] sm:$0xff] %v6760_v54  ;;  %v6902_v19 = vsel %vm3217_vm13, 1, %v11902_v0  ;;  %vm3625_vm13 = vcmp.eq.s32.totalorder %v6577_v58, 8 }
 0x1fb   : > { %12434 = vst [vmem:[#allocation235_spill] sm:$0xff] %v6747_v52  ;;  %12435 = vst [vmem:[#allocation236_spill] sm:$0xff] %v6749_v29  ;;  %2926 = vperm.xlu0 %4986, %v6740_v47   ;;  %v6772_v47 = vsel %vm1548_vm14, 1, %v11902_v0 }
 0x1fc   : > { %12440 = vst [vmem:[#allocation241_spill] sm:$0xff] %v6772_v47  ;;  %12469 = vst [vmem:[#allocation270_spill] sm:$0xff] %v6902_v19 }
 0x1fd   : > { %1621 = vperm.xlu1 %4993, %v6752_v32   ;;  %v6780_v32 = vsel %vm2817_vm15, 1, %v11902_v0  ;;  %vm3219_vm15 = vcmp.eq.s32.totalorder %v6642_v62, 7 }
 0x1fe   : > { %v6767_v52 = vpop.permute.xlu1 %1217  ;;  %v6769_v29 = vpop.permute.xlu0 %2088  ;;  %12441 = vst [vmem:[#allocation242_spill] sm:$0xff] %v6780_v32  ;;  %v6919_v11 = vsel %vm3219_vm15, 1, %v11902_v0  ;;  %vm3629_vm15 = vcmp.eq.s32.totalorder %v6603_v59, 8 }
 0x1ff   : > { %12438 = vst [vmem:[#allocation239_spill] sm:$0xff] %v6767_v52  ;;  %12439 = vst [vmem:[#allocation240_spill] sm:$0xff] %v6769_v29  ;;  %2932 = vperm.xlu0 %4986, %v6760_v54   ;;  %v6792_v54 = vsel %vm1550_vm0, 1, %v11902_v0 }
 0x200   : > { %12444 = vst [vmem:[#allocation245_spill] sm:$0xff] %v6792_v54  ;;  %12473 = vst [vmem:[#allocation274_spill] sm:$0xff] %v6919_v11 }
 0x201   : > { %1627 = vperm.xlu1 %4993, %v6772_v47   ;;  %v6800_v47 = vsel %vm2819_vm1, 1, %v11902_v0  ;;  %vm3221_vm1 = vcmp.eq.s32.totalorder %v6655_v56, 7 }
 0x202   : > { %v6787_v52 = vpop.permute.xlu1 %1223  ;;  %v6789_v29 = vpop.permute.xlu0 %2094  ;;  %12445 = vst [vmem:[#allocation246_spill] sm:$0xff] %v6800_v47  ;;  %v6936_v7 = vsel %vm3221_vm1, 1, %v11902_v0  ;;  %vm3633_vm1 = vcmp.eq.s32.totalorder %v6629_v37, 8 }
 0x203   : > { %12442 = vst [vmem:[#allocation243_spill] sm:$0xff] %v6787_v52  ;;  %12443 = vst [vmem:[#allocation244_spill] sm:$0xff] %v6789_v29  ;;  %2938 = vperm.xlu0 %4986, %v6780_v32   ;;  %v6813_v32 = vld [vmem:[%s5485_s18 + $0x68] sm:$0xff] }
 0x204   : > { %vm1554_vm4 = vcmp.eq.s32.totalorder %v6813_v32, 3  ;;  %12477 = vst [vmem:[#allocation278_spill] sm:$0xff] %v6936_v7 }
 0x205   : > { %1633 = vperm.xlu1 %4993, %v6792_v54   ;;  %v6826_v54 = vsel %vm1554_vm4, 1, %v11902_v0 }
 0x206   : > { %v6804_v52 = vpop.permute.xlu1 %1229  ;;  %v6806_v29 = vpop.permute.xlu0 %2100  ;;  %12452 = vst [vmem:[#allocation253_spill] sm:$0xff] %v6826_v54 }
 0x207   : > { %12446 = vst [vmem:[#allocation247_spill] sm:$0xff] %v6804_v52  ;;  %12447 = vst [vmem:[#allocation248_spill] sm:$0xff] %v6806_v29  ;;  %2944 = vperm.xlu0 %4986, %v6800_v47   ;;  %v6830_v47 = vld [vmem:[%s5485_s18 + $0x78] sm:$0xff] }
 0x208   : > { %vm1556_vm6 = vcmp.eq.s32.totalorder %v6830_v47, 3 }
 0x209   : > { %1639 = vperm.xlu1 %4993, %v6809_v31   ;;  %v6843_v31 = vsel %vm1556_vm6, 1, %v11902_v0 }
 0x20a   : > { %v6821_v52 = vpop.permute.xlu1 %1235  ;;  %v6823_v29 = vpop.permute.xlu0 %2106  ;;  %12456 = vst [vmem:[#allocation257_spill] sm:$0xff] %v6843_v31 }
 0x20b   : > { %12450 = vst [vmem:[#allocation251_spill] sm:$0xff] %v6821_v52  ;;  %12451 = vst [vmem:[#allocation252_spill] sm:$0xff] %v6823_v29  ;;  %3273 = vperm.xlu0 %4986, %v6817_v39   ;;  %v6847_v39 = vld [vmem:[%s5485_s18 + $0x88] sm:$0xff] }
 0x20c   : > { %vm1558_vm8 = vcmp.eq.s32.totalorder %v6847_v39, 3 }
 0x20d   : > { %1645 = vperm.xlu1 %4993, %v6826_v54   ;;  %v6860_v54 = vsel %vm1558_vm8, 1, %v11902_v0  ;;  %vm3229_vm8 = vcmp.eq.s32.totalorder %v6724_v28, 7 }
 0x20e   : > { %v6838_v52 = vpop.permute.xlu1 %1241  ;;  %v6840_v29 = vpop.permute.xlu0 %2112  ;;  %12460 = vst [vmem:[#allocation261_spill] sm:$0xff] %v6860_v54 }
 0x20f   : > { %12454 = vst [vmem:[#allocation255_spill] sm:$0xff] %v6838_v52  ;;  %12455 = vst [vmem:[#allocation256_spill] sm:$0xff] %v6840_v29  ;;  %3282 = vperm.xlu0 %4986, %v6834_v35   ;;  %v6864_v35 = vld [vmem:[%s5485_s18 + $0x98] sm:$0xff] }
 0x210   : > { %vm1560_vm10 = vcmp.eq.s32.totalorder %v6864_v35, 3 }
 0x211   : > { %1651 = vperm.xlu1 %4993, %v6843_v31   ;;  %v6877_v31 = vsel %vm1560_vm10, 1, %v11902_v0  ;;  %vm3233_vm10 = vcmp.eq.s32.totalorder %v6764_v8, 7 }
 0x212   : > { %v6855_v52 = vpop.permute.xlu1 %1247  ;;  %v6857_v29 = vpop.permute.xlu0 %2441  ;;  %12464 = vst [vmem:[#allocation265_spill] sm:$0xff] %v6877_v31 }
 0x213   : > { %12458 = vst [vmem:[#allocation259_spill] sm:$0xff] %v6855_v52  ;;  %12459 = vst [vmem:[#allocation260_spill] sm:$0xff] %v6857_v29  ;;  %3288 = vperm.xlu0 %4986, %v6851_v15   ;;  %v6881_v15 = vld [vmem:[%s5485_s18 + $0xa8] sm:$0xff] }
 0x214   : > { %vm1562_vm12 = vcmp.eq.s32.totalorder %v6881_v15, 3 }
 0x215   : > { %1657 = vperm.xlu1 %4993, %v6860_v54   ;;  %v6894_v54 = vsel %vm1562_vm12, 1, %v11902_v0  ;;  %vm3622_vm12 = vcmp.eq.s32.totalorder %v6564_v41, 8 }
 0x216   : > { %v6872_v52 = vpop.permute.xlu1 %1253  ;;  %v6874_v29 = vpop.permute.xlu0 %2450  ;;  %12468 = vst [vmem:[#allocation269_spill] sm:$0xff] %v6894_v54 }
 0x217   : > { %12462 = vst [vmem:[#allocation263_spill] sm:$0xff] %v6872_v52  ;;  %12463 = vst [vmem:[#allocation264_spill] sm:$0xff] %v6874_v29  ;;  %3294 = vperm.xlu0 %4986, %v6868_v27   ;;  %v6898_v27 = vld [vmem:[%s5485_s18 + $0xb8] sm:$0xff] }
 0x218   : > { %vm1564_vm14 = vcmp.eq.s32.totalorder %v6898_v27, 3 }
 0x219   : > { %1663 = vperm.xlu1 %4993, %v6877_v31   ;;  %v6911_v31 = vsel %vm1564_vm14, 1, %v11902_v0  ;;  %vm3627_vm14 = vcmp.eq.s32.totalorder %v6590_v51, 8 }
 0x21a   : > { %v6889_v52 = vpop.permute.xlu1 %1259  ;;  %v6891_v29 = vpop.permute.xlu0 %2456  ;;  %12472 = vst [vmem:[#allocation273_spill] sm:$0xff] %v6911_v31 }
 0x21b   : > { %12466 = vst [vmem:[#allocation267_spill] sm:$0xff] %v6889_v52  ;;  %12467 = vst [vmem:[#allocation268_spill] sm:$0xff] %v6891_v29  ;;  %3300 = vperm.xlu0 %4986, %v6885_v23   ;;  %v6915_v23 = vld [vmem:[%s5485_s18 + $0xc8] sm:$0xff] }
 0x21c   : > { %vm1566_vm0 = vcmp.eq.s32.totalorder %v6915_v23, 3 }
 0x21d   : > { %1669 = vperm.xlu1 %4993, %v6894_v54   ;;  %v6928_v54 = vsel %vm1566_vm0, 1, %v11902_v0  ;;  %vm3631_vm0 = vcmp.eq.s32.totalorder %v6616_v46, 8 }
 0x21e   : > { %v6906_v52 = vpop.permute.xlu1 %1265  ;;  %v6908_v29 = vpop.permute.xlu0 %2462  ;;  %12476 = vst [vmem:[#allocation277_spill] sm:$0xff] %v6928_v54 }
 0x21f   : > { %12470 = vst [vmem:[#allocation271_spill] sm:$0xff] %v6906_v52  ;;  %12471 = vst [vmem:[#allocation272_spill] sm:$0xff] %v6908_v29  ;;  %3306 = vperm.xlu0 %4986, %v6902_v19   ;;  %v6932_v19 = vld [vmem:[%s5485_s18 + $0xd8] sm:$0xff] }
 0x220   : > { %vm1568_vm2 = vcmp.eq.s32.totalorder %v6932_v19, 3 }
 0x221   : > { %1675 = vperm.xlu1 %4993, %v6911_v31   ;;  %v6945_v31 = vsel %vm1568_vm2, 1, %v11902_v0  ;;  %vm3635_vm2 = vcmp.eq.s32.totalorder %v6642_v62, 8 }
 0x222   : > { %v6923_v52 = vpop.permute.xlu1 %1271  ;;  %v6925_v29 = vpop.permute.xlu0 %2468  ;;  %12480 = vst [vmem:[#allocation281_spill] sm:$0xff] %v6945_v31 }
 0x223   : > { %12474 = vst [vmem:[#allocation275_spill] sm:$0xff] %v6923_v52  ;;  %12475 = vst [vmem:[#allocation276_spill] sm:$0xff] %v6925_v29  ;;  %3312 = vperm.xlu0 %4986, %v6919_v11   ;;  %v6949_v11 = vld [vmem:[%s5485_s18 + $0xe8] sm:$0xff] }
 0x224   : > { %vm1570_vm4 = vcmp.eq.s32.totalorder %v6949_v11, 3 }
 0x225   : > { %1681 = vperm.xlu1 %4993, %v6928_v54  }
 0x226   : > { %v6940_v52 = vpop.permute.xlu1 %1277  ;;  %v6942_v29 = vpop.permute.xlu0 %2474 }
 0x227   : > { %12478 = vst [vmem:[#allocation279_spill] sm:$0xff] %v6940_v52  ;;  %12479 = vst [vmem:[#allocation280_spill] sm:$0xff] %v6942_v29  ;;  %3318 = vperm.xlu0 %4986, %v6936_v7   ;;  %v6962_v29 = vsel %vm1570_vm4, 1, %v11902_v0  ;;  %v6966_v7 = vld [vmem:[%s5485_s18 + $0xf8] sm:$0xff]  ;;  %vm3639_vm4 = vcmp.eq.s32.totalorder %v6666_v43, 8 }
 0x228   : > { %12484 = vst [vmem:[#allocation285_spill] sm:$0xff] %v6962_v29  ;;  %vm1572_vm6 = vcmp.eq.s32.totalorder %v6966_v7, 3 }
 0x229   : > { %1687 = vperm.xlu1 %4993, %v6945_v31  }
 0x22a   : > { %v6957_v54 = vpop.permute.xlu1 %1283  ;;  %v6959_v52 = vpop.permute.xlu0 %2480 }
 0x22b   : > { %12482 = vst [vmem:[#allocation283_spill] sm:$0xff] %v6957_v54  ;;  %12483 = vst [vmem:[#allocation284_spill] sm:$0xff] %v6959_v52  ;;  %3324 = vperm.xlu0 %4986, %v6953_v3   ;;  %v6977_v54 = vsel %vm1572_vm6, 1, %v11902_v0  ;;  %v6983_v3 = vsel %vm3227_vm7, 1, %v11902_v0  ;;  %vm3643_vm6 = vcmp.eq.s32.totalorder %v6704_v60, 8  ;;  %vm3645_vm7 = vcmp.eq.s32.totalorder %v6724_v28, 8 }
 0x22c   : > { %12487 = vst [vmem:[#allocation288_spill] sm:$0xff] %v6977_v54  ;;  %12489 = vst [vmem:[#allocation290_spill] sm:$0xff] %v6983_v3 }
 0x22d   : > { %1693 = vperm.xlu1 %4993, %v6962_v29  }
 0x22e   : > { %v6974_v31 = vpop.permute.xlu0 %2486 }
 0x22f   : > { %12486 = vst [vmem:[#allocation287_spill] sm:$0xff] %v6974_v31  ;;  %v6979_v52 = vpop.permute.xlu1 %1353  ;;  %3330 = vperm.xlu0 %4986, %v6970_v1   ;;  %v6993_v31 = vsel %vm3229_vm8, 1, %v11902_v0  ;;  %vm1957_vm8 = vcmp.eq.s32.totalorder %v6675_v57, 4 }
 0x230   : > { %12488 = vst [vmem:[#allocation289_spill] sm:$0xff] %v6979_v52  ;;  %12492 = vst [vmem:[#allocation293_spill] sm:$0xff] %v6993_v31  ;;  %v12493_v52 = vld [vmem:[#allocation76_spill] sm:$0xff] }
 0x231   : > { %1699 = vperm.xlu1 %4993, %v6977_v54  }
 0x232   : > { %v6987_v2 = vpop.permute.xlu0 %2492 }
 0x233   : > { %12490 = vst [vmem:[#allocation291_spill] sm:$0xff] %v6987_v2  ;;  %v6989_v29 = vpop.permute.xlu1 %1356  ;;  %3336 = vperm.xlu0 %4986, %v6983_v3   ;;  %v7004_v2 = vsel %vm3231_vm9, 1, %v11902_v0  ;;  %vm3647_vm9 = vcmp.eq.s32.totalorder %v6744_v55, 8 }
 0x234   : > { %12491 = vst [vmem:[#allocation292_spill] sm:$0xff] %v6989_v29  ;;  %12496 = vst [vmem:[#allocation295_spill] sm:$0xff] %v7004_v2 }
 0x235   : > { %4994 = vset.pattern.permute.xlu1 %v12272_v61 }
 0x236   : > { %1769 = vperm.xlu1 %4994, %v12493_v52   ;;  %v6998_v1 = vpop.permute.xlu0 %2498  ;;  %v7014_v52 = vsel %vm3233_vm10, 1, %v11902_v0  ;;  %vm1959_vm10 = vcmp.eq.s32.totalorder %v6695_v44, 4 }
 0x237   : > { %12494 = vst [vmem:[#allocation76_spill] sm:$0xff] %v6998_v1  ;;  %v7000_v54 = vpop.permute.xlu1 %1362  ;;  %3342 = vperm.xlu0 %4986, %v6993_v31   ;;  %12499 = vst [vmem:[#allocation298_spill] sm:$0xff] %v7014_v52 }
 0x238   : > { %12495 = vst [vmem:[#allocation294_spill] sm:$0xff] %v7000_v54  ;;  %v12500_v54 = vld [vmem:[#allocation80_spill] sm:$0xff] }
 0x23a   : > { %1772 = vperm.xlu1 %4994, %v6712_v40   ;;  %v7008_v29 = vpop.permute.xlu0 %2504  ;;  %v7024_v40 = vsel %vm3235_vm11, 1, %v11902_v0  ;;  %vm3649_vm11 = vcmp.eq.s32.totalorder %v6764_v8, 8 }
 0x23b   : > { %12497 = vst [vmem:[#allocation296_spill] sm:$0xff] %v7008_v29  ;;  %v7010_v3 = vpop.permute.xlu1 %1368  ;;  %3348 = vperm.xlu0 %4986, %v7004_v2   ;;  %12503 = vst [vmem:[#allocation300_spill] sm:$0xff] %v7024_v40 }
 0x23c   : > { %12498 = vst [vmem:[#allocation297_spill] sm:$0xff] %v7010_v3 }
 0x23e   : > { %1778 = vperm.xlu1 %4994, %v12500_v54   ;;  %v7018_v1 = vpop.permute.xlu0 %2510  ;;  %v7034_v54 = vsel %vm3622_vm12, 1, %v11902_v0  ;;  %vm1960_vm12 = vcmp.eq.s32.totalorder %v6716_v36, 4 }
 0x23f   : > { %12501 = vst [vmem:[#allocation80_spill] sm:$0xff] %v7018_v1  ;;  %v7020_v31 = vpop.permute.xlu1 %1374  ;;  %3354 = vperm.xlu0 %4986, %v7014_v52   ;;  %12506 = vst [vmem:[#allocation303_spill] sm:$0xff] %v7034_v54 }
 0x240   : > { %12502 = vst [vmem:[#allocation299_spill] sm:$0xff] %v7020_v31  ;;  %v12507_v31 = vld [vmem:[#allocation87_spill] sm:$0xff] }
 0x242   : > { %1784 = vperm.xlu1 %4994, %v6067_v21   ;;  %v7028_v3 = vpop.permute.xlu0 %2516  ;;  %v7044_v21 = vsel %vm3625_vm13, 1, %v11902_v0  ;;  %vm3651_vm13 = vcmp.eq.s32.totalorder %v6784_v4, 8 }
 0x243   : > { %12504 = vst [vmem:[#allocation301_spill] sm:$0xff] %v7028_v3  ;;  %v7030_v29 = vpop.permute.xlu1 %1380  ;;  %3360 = vperm.xlu0 %4986, %v7024_v40   ;;  %12510 = vst [vmem:[#allocation305_spill] sm:$0xff] %v7044_v21 }
 0x244   : > { %12505 = vst [vmem:[#allocation302_spill] sm:$0xff] %v7030_v29 }
 0x246   : > { %1790 = vperm.xlu1 %4994, %v12507_v31   ;;  %v7038_v1 = vpop.permute.xlu0 %2522  ;;  %v7054_v31 = vsel %vm3627_vm14, 1, %v11902_v0  ;;  %vm1962_vm14 = vcmp.eq.s32.totalorder %v6736_v20, 4 }
 0x247   : > { %12508 = vst [vmem:[#allocation87_spill] sm:$0xff] %v7038_v1  ;;  %v7040_v52 = vpop.permute.xlu1 %1386  ;;  %3689 = vperm.xlu0 %4986, %v7034_v54   ;;  %12513 = vst [vmem:[#allocation308_spill] sm:$0xff] %v7054_v31 }
 0x248   : > { %12509 = vst [vmem:[#allocation304_spill] sm:$0xff] %v7040_v52 }
 0x24a   : > { %1796 = vperm.xlu1 %4994, %v6090_v13   ;;  %v7048_v41 = vpop.permute.xlu0 %2528  ;;  %v7064_v13 = vsel %vm3629_vm15, 1, %v11902_v0  ;;  %vm4053_vm15 = vcmp.eq.s32.totalorder %v6655_v56, 9 }
 0x24b   : > { %12511 = vst [vmem:[#allocation306_spill] sm:$0xff] %v7048_v41  ;;  %v7050_v29 = vpop.permute.xlu1 %1392  ;;  %3698 = vperm.xlu0 %4986, %v7044_v21   ;;  %12516 = vst [vmem:[#allocation311_spill] sm:$0xff] %v7064_v13 }
 0x24c   : > { %12512 = vst [vmem:[#allocation307_spill] sm:$0xff] %v7050_v29 }
 0x24e   : > { %1802 = vperm.xlu1 %4994, %v6101_v33   ;;  %v7058_v58 = vpop.permute.xlu0 %2857  ;;  %v7074_v33 = vsel %vm3631_vm0, 1, %v11902_v0  ;;  %vm1964_vm0 = vcmp.eq.s32.totalorder %v6756_v24, 4 }
 0x24f   : > { %12514 = vst [vmem:[#allocation309_spill] sm:$0xff] %v7058_v58  ;;  %v7060_v1 = vpop.permute.xlu1 %1398  ;;  %3704 = vperm.xlu0 %4986, %v7054_v31   ;;  %12519 = vst [vmem:[#allocation314_spill] sm:$0xff] %v7074_v33 }
 0x250   : > { %12515 = vst [vmem:[#allocation310_spill] sm:$0xff] %v7060_v1  ;;  %v12575_v1 = vld [vmem:[#allocation13_spill] sm:$0xff] }
 0x252   : > { %1808 = vperm.xlu1 %4994, %v6111_v53   ;;  %v7068_v51 = vpop.permute.xlu0 %2866  ;;  %v7084_v53 = vsel %vm3633_vm1, 1, %v11902_v0  ;;  %vm4055_vm1 = vcmp.eq.s32.totalorder %v6666_v43, 9 }
 0x253   : > { %12517 = vst [vmem:[#allocation312_spill] sm:$0xff] %v7068_v51  ;;  %v7070_v41 = vpop.permute.xlu1 %1404  ;;  %3710 = vperm.xlu0 %4986, %v7064_v13   ;;  %12522 = vst [vmem:[#allocation317_spill] sm:$0xff] %v7084_v53  ;;  %v7173_v51 = vsel %vm3649_vm11, 1, %v11902_v0  ;;  %vm1978_vm11 = vcmp.eq.s32.totalorder %v6881_v15, 4  ;;  %v12584_v13 = vld [vmem:[#allocation16_spill] sm:$0xff] }
 0x254   : > { %12518 = vst [vmem:[#allocation313_spill] sm:$0xff] %v7070_v41  ;;  %12546 = vst [vmem:[#allocation341_spill] sm:$0xff] %v7173_v51 }
 0x256   : > { %1814 = vperm.xlu1 %4994, %v6121_v45   ;;  %v7078_v59 = vpop.permute.xlu0 %2872  ;;  %v7094_v45 = vsel %vm3635_vm2, 1, %v11902_v0  ;;  %vm1966_vm2 = vcmp.eq.s32.totalorder %v6776_v16, 4 }
 0x257   : > { %12520 = vst [vmem:[#allocation315_spill] sm:$0xff] %v7078_v59  ;;  %v7080_v29 = vpop.permute.xlu1 %1410  ;;  %3716 = vperm.xlu0 %4986, %v7074_v33   ;;  %12525 = vst [vmem:[#allocation320_spill] sm:$0xff] %v7094_v45  ;;  %v7155_v59 = vsel %vm1957_vm8, 1, %v11902_v0  ;;  %vm1972_vm8 = vcmp.eq.s32.totalorder %v6830_v47, 4  ;;  %v12581_v33 = vld [vmem:[#allocation15_spill] sm:$0xff] }
 0x258   : > { %12521 = vst [vmem:[#allocation316_spill] sm:$0xff] %v7080_v29 }
 0x25a   : > { %1820 = vperm.xlu1 %4994, %v6131_v49   ;;  %v7088_v46 = vpop.permute.xlu0 %2878  ;;  %v7104_v49 = vsel %vm3637_vm3, 1, %v11902_v0  ;;  %vm4057_vm3 = vcmp.eq.s32.totalorder %v6683_v48, 9 }
 0x25b   : > { %12523 = vst [vmem:[#allocation318_spill] sm:$0xff] %v7088_v46  ;;  %v7090_v52 = vpop.permute.xlu1 %1416  ;;  %3722 = vperm.xlu0 %4986, %v7084_v53   ;;  %12528 = vst [vmem:[#allocation323_spill] sm:$0xff] %v7104_v49  ;;  %v7184_v53 = vsel %vm1960_vm12, 1, %v11902_v0  ;;  %vm1980_vm12 = vcmp.eq.s32.totalorder %v6898_v27, 4 }
 0x25c   : > { %12524 = vst [vmem:[#allocation319_spill] sm:$0xff] %v7090_v52  ;;  %v7170_v52 = vsel %vm1959_vm10, 1, %v11902_v0  ;;  %vm1976_vm10 = vcmp.eq.s32.totalorder %v6864_v35, 4 }
 0x25e   : > { %1826 = vperm.xlu1 %4994, %v6141_v63   ;;  %v7098_v37 = vpop.permute.xlu0 %2884  ;;  %v7114_v63 = vsel %vm3639_vm4, 1, %v11902_v0  ;;  %vm1968_vm4 = vcmp.eq.s32.totalorder %v6796_v12, 4 }
 0x25f   : > { %12526 = vst [vmem:[#allocation321_spill] sm:$0xff] %v7098_v37  ;;  %v7100_v3 = vpop.permute.xlu1 %1422  ;;  %3728 = vperm.xlu0 %4986, %v7094_v45   ;;  %12531 = vst [vmem:[#allocation326_spill] sm:$0xff] %v7114_v63  ;;  %v7158_v45 = vsel %vm3647_vm9, 1, %v11902_v0  ;;  %vm1974_vm9 = vcmp.eq.s32.totalorder %v6847_v39, 4 }
 0x260   : > { %12527 = vst [vmem:[#allocation322_spill] sm:$0xff] %v7100_v3  ;;  %12543 = vst [vmem:[#allocation338_spill] sm:$0xff] %v7158_v45  ;;  %v7278_v58 = vsel %vm1974_vm9, 1, %v11902_v0  ;;  %vm2388_vm9 = vcmp.eq.s32.totalorder %v6830_v47, 5 }
 0x262   : > { %1832 = vperm.xlu1 %4994, %v6151_v10   ;;  %v7108_v62 = vpop.permute.xlu0 %2890  ;;  %v7124_v10 = vsel %vm3641_vm5, 1, %v11902_v0  ;;  %vm4059_vm5 = vcmp.eq.s32.totalorder %v6704_v60, 9 }
 0x263   : > { %12529 = vst [vmem:[#allocation324_spill] sm:$0xff] %v7108_v62  ;;  %v7110_v46 = vpop.permute.xlu1 %1428  ;;  %3734 = vperm.xlu0 %4986, %v7104_v49   ;;  %12534 = vst [vmem:[#allocation329_spill] sm:$0xff] %v7124_v10 }
 0x264   : > { %12530 = vst [vmem:[#allocation325_spill] sm:$0xff] %v7110_v46 }
 0x266   : > { %1838 = vperm.xlu1 %4994, %v6161_v5   ;;  %v7118_v37 = vpop.permute.xlu0 %2896  ;;  %v7134_v5 = vsel %vm3643_vm6, 1, %v11902_v0  ;;  %vm1970_vm6 = vcmp.eq.s32.totalorder %v6813_v32, 4 }
 0x267   : > { %12532 = vst [vmem:[#allocation327_spill] sm:$0xff] %v7118_v37  ;;  %v7120_v3 = vpop.permute.xlu1 %1434  ;;  %3740 = vperm.xlu0 %4986, %v7114_v63   ;;  %12537 = vst [vmem:[#allocation332_spill] sm:$0xff] %v7134_v5 }
 0x268   : > { %12533 = vst [vmem:[#allocation328_spill] sm:$0xff] %v7120_v3 }
 0x26a   : > { %1844 = vperm.xlu1 %4994, %v6171_v14   ;;  %v7128_v62 = vpop.permute.xlu0 %2902  ;;  %v7144_v14 = vsel %vm3645_vm7, 1, %v11902_v0  ;;  %vm4061_vm7 = vcmp.eq.s32.totalorder %v6724_v28, 9 }
 0x26b   : > { %12535 = vst [vmem:[#allocation330_spill] sm:$0xff] %v7128_v62  ;;  %v7130_v46 = vpop.permute.xlu1 %1440  ;;  %3746 = vperm.xlu0 %4986, %v7124_v10   ;;  %12540 = vst [vmem:[#allocation335_spill] sm:$0xff] %v7144_v14  ;;  %v7288_v62 = vsel %vm1976_vm10, 1, %v11902_v0  ;;  %vm2390_vm10 = vcmp.eq.s32.totalorder %v6847_v39, 5 }
 0x26c   : > { %12536 = vst [vmem:[#allocation331_spill] sm:$0xff] %v7130_v46 }
 0x26e   : > { %1850 = vperm.xlu1 %4994, %v6181_v18   ;;  %v7138_v37 = vpop.permute.xlu0 %2908 }
 0x26f   : > { %12538 = vst [vmem:[#allocation333_spill] sm:$0xff] %v7138_v37  ;;  %3752 = vperm.xlu0 %4986, %v7134_v5  }
 0x270   : > { %v7141_v3 = vpop.permute.xlu1 %1606 }
 0x271   : > { %12539 = vst [vmem:[#allocation334_spill] sm:$0xff] %v7141_v3 }
 0x272   : > { %1856 = vperm.xlu1 %4994, %v6191_v22   ;;  %v7149_v46 = vpop.permute.xlu0 %2914 }
 0x273   : > { %12541 = vst [vmem:[#allocation336_spill] sm:$0xff] %v7149_v46  ;;  %3758 = vperm.xlu0 %4986, %v7144_v14  }
 0x274   : > { %v7152_v18 = vpop.permute.xlu1 %1612 }
 0x275   : > { %12542 = vst [vmem:[#allocation337_spill] sm:$0xff] %v7152_v18 }
 0x276   : > { %4995 = vset.pattern.permute.xlu1 %v11902_v0  ;;  %v7163_v55 = vpop.permute.xlu0 %2920 }
 0x277   : > { %12544 = vst [vmem:[#allocation339_spill] sm:$0xff] %v7163_v55  ;;  %2022 = vperm.xlu1 %4995, %v7155_v59   ;;  %3764 = vperm.xlu0 %4986, %v7158_v45   ;;  %v12578_v45 = vld [vmem:[#allocation14_spill] sm:$0xff] }
 0x278   : > { %v7167_v22 = vpop.permute.xlu1 %1615 }
 0x279   : > { %12545 = vst [vmem:[#allocation340_spill] sm:$0xff] %v7167_v22  ;;  %v7187_v22 = vsel %vm3651_vm13, 1, %v11902_v0  ;;  %vm1982_vm13 = vcmp.eq.s32.totalorder %v6915_v23, 4 }
 0x27a   : > { %v7177_v8 = vpop.permute.xlu0 %2926  ;;  %12549 = vst [vmem:[#allocation344_spill] sm:$0xff] %v7187_v22 }
 0x27b   : > { %12547 = vst [vmem:[#allocation342_spill] sm:$0xff] %v7177_v8  ;;  %2028 = vperm.xlu1 %4995, %v7170_v52   ;;  %3770 = vperm.xlu0 %4986, %v7173_v51   ;;  %v7198_v8 = vsel %vm1962_vm14, 1, %v11902_v0  ;;  %vm1984_vm14 = vcmp.eq.s32.totalorder %v6932_v19, 4 }
 0x27c   : > { %v7181_v55 = vpop.permute.xlu1 %1621 }
 0x27d   : > { %12548 = vst [vmem:[#allocation343_spill] sm:$0xff] %v7181_v55  ;;  %v7201_v55 = vsel %vm4053_vm15, 1, %v11902_v0  ;;  %vm1986_vm15 = vcmp.eq.s32.totalorder %v6949_v11, 4 }
 0x27e   : > { %v7191_v46 = vpop.permute.xlu0 %2932  ;;  %12552 = vst [vmem:[#allocation347_spill] sm:$0xff] %v7201_v55 }
 0x27f   : > { %12550 = vst [vmem:[#allocation345_spill] sm:$0xff] %v7191_v46  ;;  %2031 = vperm.xlu1 %4995, %v7184_v53   ;;  %3776 = vperm.xlu0 %4986, %v7187_v22   ;;  %v7212_v46 = vsel %vm1964_vm0, 1, %v11902_v0  ;;  %vm1988_vm0 = vcmp.eq.s32.totalorder %v6966_v7, 4 }
 0x280   : > { %v7195_v4 = vpop.permute.xlu1 %1627  ;;  %v7346_v31 = vsel %vm1988_vm0, 1, %v11902_v0  ;;  %vm2402_vm0 = vcmp.eq.s32.totalorder %v6949_v11, 5 }
 0x281   : > { %12551 = vst [vmem:[#allocation346_spill] sm:$0xff] %v7195_v4  ;;  %v7215_v4 = vsel %vm4055_vm1, 1, %v11902_v0  ;;  %vm2373_vm1 = vcmp.eq.s32.totalorder %v6675_v57, 5 }
 0x282   : > { %v7205_v51 = vpop.permute.xlu0 %2938  ;;  %12555 = vst [vmem:[#allocation350_spill] sm:$0xff] %v7215_v4 }
 0x283   : > { %12553 = vst [vmem:[#allocation348_spill] sm:$0xff] %v7205_v51  ;;  %2037 = vperm.xlu1 %4995, %v7198_v8   ;;  %4150 = vperm.xlu0 %4986, %v7201_v55   ;;  %v7226_v51 = vsel %vm1966_vm2, 1, %v11902_v0  ;;  %vm2375_vm2 = vcmp.eq.s32.totalorder %v6695_v44, 5 }
 0x284   : > { %v7209_v56 = vpop.permute.xlu1 %1633 }
 0x285   : > { %12554 = vst [vmem:[#allocation349_spill] sm:$0xff] %v7209_v56  ;;  %v7229_v56 = vsel %vm4057_vm3, 1, %v11902_v0  ;;  %vm2376_vm3 = vcmp.eq.s32.totalorder %v6716_v36, 5 }
 0x286   : > { %v7219_v22 = vpop.permute.xlu0 %2944  ;;  %12558 = vst [vmem:[#allocation353_spill] sm:$0xff] %v7229_v56 }
 0x287   : > { %12556 = vst [vmem:[#allocation351_spill] sm:$0xff] %v7219_v22  ;;  %2043 = vperm.xlu1 %4995, %v7212_v46   ;;  %4156 = vperm.xlu0 %4986, %v7215_v4   ;;  %v7240_v22 = vsel %vm1968_vm4, 1, %v11902_v0  ;;  %vm2378_vm4 = vcmp.eq.s32.totalorder %v6736_v20, 5 }
 0x288   : > { %v7223_v43 = vpop.permute.xlu1 %1639 }
 0x289   : > { %12557 = vst [vmem:[#allocation352_spill] sm:$0xff] %v7223_v43  ;;  %v7243_v43 = vsel %vm4059_vm5, 1, %v11902_v0  ;;  %vm2380_vm5 = vcmp.eq.s32.totalorder %v6756_v24, 5 }
 0x28a   : > { %v7233_v29 = vpop.permute.xlu0 %3273  ;;  %12561 = vst [vmem:[#allocation356_spill] sm:$0xff] %v7243_v43 }
 0x28b   : > { %12559 = vst [vmem:[#allocation354_spill] sm:$0xff] %v7233_v29  ;;  %2049 = vperm.xlu1 %4995, %v7226_v51   ;;  %4162 = vperm.xlu0 %4986, %v7229_v56   ;;  %v7257_v29 = vsel %vm4061_vm7, 1, %v11902_v0  ;;  %vm2384_vm7 = vcmp.eq.s32.totalorder %v6796_v12, 5 }
 0x28c   : > { %v7237_v48 = vpop.permute.xlu1 %1645  ;;  %12564 = vst [vmem:[#allocation359_spill] sm:$0xff] %v7257_v29 }
 0x28d   : > { %12560 = vst [vmem:[#allocation355_spill] sm:$0xff] %v7237_v48  ;;  %v7254_v48 = vsel %vm1970_vm6, 1, %v11902_v0  ;;  %vm2382_vm6 = vcmp.eq.s32.totalorder %v6776_v16, 5 }
 0x28e   : > { %v7247_v18 = vpop.permute.xlu0 %3282 }
 0x28f   : > { %12562 = vst [vmem:[#allocation357_spill] sm:$0xff] %v7247_v18  ;;  %2055 = vperm.xlu1 %4995, %v7240_v22   ;;  %4168 = vperm.xlu0 %4986, %v7243_v43   ;;  %v7267_v18 = vsel %vm1972_vm8, 1, %v11902_v0  ;;  %vm2386_vm8 = vcmp.eq.s32.totalorder %v6813_v32, 5 }
 0x290   : > { %v7251_v60 = vpop.permute.xlu1 %1651 }
 0x291   : > { %12563 = vst [vmem:[#allocation358_spill] sm:$0xff] %v7251_v60 }
 0x292   : > { %v7260_v37 = vpop.permute.xlu0 %3288 }
 0x293   : > { %12565 = vst [vmem:[#allocation360_spill] sm:$0xff] %v7260_v37  ;;  %2061 = vperm.xlu1 %4995, %v7254_v48   ;;  %4174 = vperm.xlu0 %4986, %v7257_v29   ;;  %v12569_v37 = vld [vmem:[#allocation11_spill] sm:$0xff]  ;;  %v12587_v29 = vld [vmem:[#allocation17_spill] sm:$0xff] }
 0x294   : > { %v7264_v28 = vpop.permute.xlu1 %1657 }
 0x295   : > { %12566 = vst [vmem:[#allocation361_spill] sm:$0xff] %v7264_v28 }
 0x296   : > { %v7270_v60 = vpop.permute.xlu0 %3294 }
 0x297   : > { %12567 = vst [vmem:[#allocation362_spill] sm:$0xff] %v7270_v60  ;;  %2067 = vperm.xlu1 %4995, %v7267_v18   ;;  %5022 = vset.pattern.permute.xlu0 %v12272_v61  ;;  %v12572_v60 = vld [vmem:[#allocation12_spill] sm:$0xff] }
 0x298   : > { %v7274_v41 = vpop.permute.xlu1 %1663  ;;  %518 = vperm.xlu0 %5022, %v12569_v37  }
 0x299   : > { %12568 = vst [vmem:[#allocation363_spill] sm:$0xff] %v7274_v41 }
 0x29a   : > { %v7281_v28 = vpop.permute.xlu0 %3300 }
 0x29b   : > { %12570 = vst [vmem:[#allocation11_spill] sm:$0xff] %v7281_v28  ;;  %2073 = vperm.xlu1 %4995, %v7278_v58   ;;  %v7298_v28 = vsel %vm1978_vm11, 1, %v11902_v0  ;;  %vm2392_vm11 = vcmp.eq.s32.totalorder %v6864_v35, 5 }
 0x29c   : > { %v7284_v3 = vpop.permute.xlu1 %1669  ;;  %527 = vperm.xlu0 %5022, %v12572_v60  }
 0x29d   : > { %12571 = vst [vmem:[#allocation364_spill] sm:$0xff] %v7284_v3 }
 0x29e   : > { %v7291_v41 = vpop.permute.xlu0 %3306 }
 0x29f   : > { %12573 = vst [vmem:[#allocation12_spill] sm:$0xff] %v7291_v41  ;;  %2079 = vperm.xlu1 %4995, %v7288_v62   ;;  %v7308_v41 = vsel %vm1980_vm12, 1, %v11902_v0  ;;  %vm2394_vm12 = vcmp.eq.s32.totalorder %v6881_v15, 5 }
 0x2a0   : > { %v7294_v37 = vpop.permute.xlu1 %1675  ;;  %533 = vperm.xlu0 %5022, %v12575_v1  }
 0x2a1   : > { %12574 = vst [vmem:[#allocation365_spill] sm:$0xff] %v7294_v37 }
 0x2a2   : > { %v7301_v3 = vpop.permute.xlu0 %3312 }
 0x2a3   : > { %12576 = vst [vmem:[#allocation13_spill] sm:$0xff] %v7301_v3  ;;  %2085 = vperm.xlu1 %4995, %v7298_v28   ;;  %v7318_v3 = vsel %vm1982_vm13, 1, %v11902_v0  ;;  %vm2396_vm13 = vcmp.eq.s32.totalorder %v6898_v27, 5 }
 0x2a4   : > { %v7304_v60 = vpop.permute.xlu1 %1681  ;;  %539 = vperm.xlu0 %5022, %v12578_v45  }
 0x2a5   : > { %12577 = vst [vmem:[#allocation366_spill] sm:$0xff] %v7304_v60 }
 0x2a6   : > { %v7311_v37 = vpop.permute.xlu0 %3318 }
 0x2a7   : > { %12579 = vst [vmem:[#allocation14_spill] sm:$0xff] %v7311_v37  ;;  %2091 = vperm.xlu1 %4995, %v7308_v41   ;;  %v7328_v37 = vsel %vm1984_vm14, 1, %v11902_v0  ;;  %vm2398_vm14 = vcmp.eq.s32.totalorder %v6915_v23, 5 }
 0x2a8   : > { %v7314_v1 = vpop.permute.xlu1 %1687  ;;  %545 = vperm.xlu0 %5022, %v12581_v33  }
 0x2a9   : > { %12580 = vst [vmem:[#allocation367_spill] sm:$0xff] %v7314_v1 }
 0x2aa   : > { %v7321_v60 = vpop.permute.xlu0 %3324 }
 0x2ab   : > { %12582 = vst [vmem:[#allocation15_spill] sm:$0xff] %v7321_v60  ;;  %2097 = vperm.xlu1 %4995, %v7318_v3   ;;  %v7338_v60 = vsel %vm1986_vm15, 1, %v11902_v0  ;;  %vm2400_vm15 = vcmp.eq.s32.totalorder %v6932_v19, 5 }
 0x2ac   : > { %v7324_v45 = vpop.permute.xlu1 %1693  ;;  %551 = vperm.xlu0 %5022, %v12584_v13   ;;  %v12589_v13 = vld [vmem:[#allocation18_spill] sm:$0xff] }
 0x2ad   : > { %12583 = vst [vmem:[#allocation368_spill] sm:$0xff] %v7324_v45 }
 0x2ae   : > { %v7331_v1 = vpop.permute.xlu0 %3330 }
 0x2af   : > { %12585 = vst [vmem:[#allocation16_spill] sm:$0xff] %v7331_v1  ;;  %2103 = vperm.xlu1 %4995, %v7328_v37  }
 0x2b0   : > { %v7334_v33 = vpop.permute.xlu1 %1699  ;;  %557 = vperm.xlu0 %5022, %v12587_v29   ;;  %v12592_v29 = vld [vmem:[#allocation19_spill] sm:$0xff] }
 0x2b1   : > { %12586 = vst [vmem:[#allocation369_spill] sm:$0xff] %v7334_v33 }
 0x2b2   : > { %v7341_v45 = vpop.permute.xlu0 %3336 }
 0x2b3   : > { %12588 = vst [vmem:[#allocation17_spill] sm:$0xff] %v7341_v45  ;;  %2109 = vperm.xlu1 %4995, %v7338_v60  }
 0x2b4   : > { %563 = vperm.xlu0 %5022, %v12589_v13   ;;  %v12595_v13 = vld [vmem:[#allocation20_spill] sm:$0xff] }
 0x2b5   : > { %v7348_v1 = vpop.permute.xlu1 %1769 }
 0x2b6   : > { %12590 = vst [vmem:[#allocation18_spill] sm:$0xff] %v7348_v1  ;;  %v7350_v14 = vpop.permute.xlu0 %3342 }
 0x2b7   : > { %12591 = vst [vmem:[#allocation370_spill] sm:$0xff] %v7350_v14  ;;  %2115 = vperm.xlu1 %4995, %v7346_v31   ;;  %v12598_v14 = vld [vmem:[#allocation21_spill] sm:$0xff] }
 0x2b8   : > { %569 = vperm.xlu0 %5022, %v12592_v29  }
 0x2b9   : > { %v7354_v33 = vpop.permute.xlu1 %1772 }
 0x2ba   : > { %12593 = vst [vmem:[#allocation19_spill] sm:$0xff] %v7354_v33  ;;  %v7356_v21 = vpop.permute.xlu0 %3348 }
 0x2bb   : > { %12594 = vst [vmem:[#allocation371_spill] sm:$0xff] %v7356_v21  ;;  %4996 = vset.pattern.permute.xlu1 %v12272_v61  ;;  %v12601_v21 = vld [vmem:[#allocation22_spill] sm:$0xff] }
 0x2bc   : > { %2185 = vperm.xlu1 %4996, %v6201_v26   ;;  %575 = vperm.xlu0 %5022, %v12595_v13   ;;  %v12604_v13 = vld [vmem:[#allocation23_spill] sm:$0xff] }
 0x2bd   : > { %v7361_v0 = vpop.permute.xlu1 %1778 }
 0x2be   : > { %12596 = vst [vmem:[#allocation20_spill] sm:$0xff] %v7361_v0  ;;  %v7363_v45 = vpop.permute.xlu0 %3354 }
 0x2bf   : > { %12597 = vst [vmem:[#allocation372_spill] sm:$0xff] %v7363_v45 }
 0x2c0   : > { %2188 = vperm.xlu1 %4996, %v7170_v52   ;;  %581 = vperm.xlu0 %5022, %v12598_v14   ;;  %v12607_v14 = vld [vmem:[#allocation24_spill] sm:$0xff] }
 0x2c1   : > { %v7367_v1 = vpop.permute.xlu1 %1784 }
 0x2c2   : > { %12599 = vst [vmem:[#allocation21_spill] sm:$0xff] %v7367_v1  ;;  %v7369_v29 = vpop.permute.xlu0 %3360 }
 0x2c3   : > { %12600 = vst [vmem:[#allocation373_spill] sm:$0xff] %v7369_v29 }
 0x2c4   : > { %2194 = vperm.xlu1 %4996, %v6211_v30   ;;  %587 = vperm.xlu0 %5022, %v12601_v21   ;;  %v12610_v21 = vld [vmem:[#allocation25_spill] sm:$0xff] }
 0x2c5   : > { %v7373_v33 = vpop.permute.xlu1 %1790 }
 0x2c6   : > { %12602 = vst [vmem:[#allocation22_spill] sm:$0xff] %v7373_v33  ;;  %v7375_v26 = vpop.permute.xlu0 %3689 }
 0x2c7   : > { %12603 = vst [vmem:[#allocation374_spill] sm:$0xff] %v7375_v26 }
 0x2c8   : > { %2200 = vperm.xlu1 %4996, %v6221_v34   ;;  %593 = vperm.xlu0 %5022, %v12604_v13   ;;  %v12613_v13 = vld [vmem:[#allocation26_spill] sm:$0xff] }
 0x2c9   : > { %v7379_v45 = vpop.permute.xlu1 %1796 }
 0x2ca   : > { %12605 = vst [vmem:[#allocation23_spill] sm:$0xff] %v7379_v45  ;;  %v7381_v52 = vpop.permute.xlu0 %3698 }
 0x2cb   : > { %12606 = vst [vmem:[#allocation375_spill] sm:$0xff] %v7381_v52 }
 0x2cc   : > { %2206 = vperm.xlu1 %4996, %v6231_v38   ;;  %599 = vperm.xlu0 %5022, %v12607_v14   ;;  %v12616_v14 = vld [vmem:[#allocation29_spill] sm:$0xff] }
 0x2cd   : > { %v7385_v29 = vpop.permute.xlu1 %1802 }
 0x2ce   : > { %12608 = vst [vmem:[#allocation24_spill] sm:$0xff] %v7385_v29  ;;  %v7387_v30 = vpop.permute.xlu0 %3704 }
 0x2cf   : > { %12609 = vst [vmem:[#allocation376_spill] sm:$0xff] %v7387_v30  ;;  %v12633_v30 = vld [vmem:[#allocation47_spill] sm:$0xff] }
 0x2d0   : > { %2212 = vperm.xlu1 %4996, %v6241_v42   ;;  %605 = vperm.xlu0 %5022, %v12610_v21   ;;  %v12619_v21 = vld [vmem:[#allocation34_spill] sm:$0xff] }
 0x2d1   : > { %v7391_v33 = vpop.permute.xlu1 %1808 }
 0x2d2   : > { %12611 = vst [vmem:[#allocation25_spill] sm:$0xff] %v7391_v33  ;;  %v7393_v34 = vpop.permute.xlu0 %3710 }
 0x2d3   : > { %12612 = vst [vmem:[#allocation377_spill] sm:$0xff] %v7393_v34  ;;  %v12629_v34 = vld [vmem:[#allocation43_spill] sm:$0xff] }
 0x2d4   : > { %2218 = vperm.xlu1 %4996, %v6255_v17   ;;  %611 = vperm.xlu0 %5022, %v12613_v13   ;;  %v12622_v13 = vld [vmem:[#allocation37_spill] sm:$0xff] }
 0x2d5   : > { %v7397_v45 = vpop.permute.xlu1 %1814 }
 0x2d6   : > { %12614 = vst [vmem:[#allocation26_spill] sm:$0xff] %v7397_v45  ;;  %v7399_v38 = vpop.permute.xlu0 %3716 }
 0x2d7   : > { %12615 = vst [vmem:[#allocation378_spill] sm:$0xff] %v7399_v38 }
 0x2d8   : > { %2224 = vperm.xlu1 %4996, %v6270_v9   ;;  %934 = vperm.xlu0 %5022, %v12616_v14   ;;  %v12625_v14 = vld [vmem:[#allocation40_spill] sm:$0xff] }
 0x2d9   : > { %v7403_v29 = vpop.permute.xlu1 %1820 }
 0x2da   : > { %12617 = vst [vmem:[#allocation29_spill] sm:$0xff] %v7403_v29  ;;  %v7405_v42 = vpop.permute.xlu0 %3722 }
 0x2db   : > { %12618 = vst [vmem:[#allocation379_spill] sm:$0xff] %v7405_v42 }
 0x2dc   : > { %2230 = vperm.xlu1 %4996, %v6284_v25   ;;  %943 = vperm.xlu0 %5022, %v12619_v21   ;;  %v12628_v21 = vld [vmem:[#allocation137_spill] sm:$0xff] }
 0x2dd   : > { %v7409_v33 = vpop.permute.xlu1 %1826 }
 0x2de   : > { %12620 = vst [vmem:[#allocation34_spill] sm:$0xff] %v7409_v33  ;;  %v7411_v17 = vpop.permute.xlu0 %3728 }
 0x2df   : > { %12621 = vst [vmem:[#allocation380_spill] sm:$0xff] %v7411_v17 }
 0x2e0   : > { %2236 = vperm.xlu1 %4996, %v6298_v6   ;;  %949 = vperm.xlu0 %5022, %v12622_v13   ;;  %v12632_v13 = vld [vmem:[#allocation141_spill] sm:$0xff] }
 0x2e1   : > { %v7415_v38 = vpop.permute.xlu1 %1832 }
 0x2e2   : > { %12623 = vst [vmem:[#allocation37_spill] sm:$0xff] %v7415_v38  ;;  %v7417_v9 = vpop.permute.xlu0 %3734 }
 0x2e3   : > { %12624 = vst [vmem:[#allocation381_spill] sm:$0xff] %v7417_v9  ;;  %v12736_v9 = vld [vmem:[#allocation186_spill] sm:$0xff] }
 0x2e4   : > { %2242 = vperm.xlu1 %4996, %v6312_v50   ;;  %955 = vperm.xlu0 %5022, %v12625_v14   ;;  %v12636_v14 = vld [vmem:[#allocation145_spill] sm:$0xff] }
 0x2e5   : > { %v7421_v42 = vpop.permute.xlu1 %1838 }
 0x2e6   : > { %12626 = vst [vmem:[#allocation40_spill] sm:$0xff] %v7421_v42  ;;  %v7423_v25 = vpop.permute.xlu0 %3740  ;;  %v12637_v42 = vld [vmem:[#allocation51_spill] sm:$0xff] }
 0x2e7   : > { %12627 = vst [vmem:[#allocation382_spill] sm:$0xff] %v7423_v25 }
 0x2e8   : > { %2248 = vperm.xlu1 %4996, %v12628_v21   ;;  %961 = vperm.xlu0 %5022, %v12629_v34   ;;  %v12640_v34 = vld [vmem:[#allocation149_spill] sm:$0xff] }
 0x2e9   : > { %v7427_v17 = vpop.permute.xlu1 %1844 }
 0x2ea   : > { %12630 = vst [vmem:[#allocation137_spill] sm:$0xff] %v7427_v17  ;;  %v7429_v6 = vpop.permute.xlu0 %3746  ;;  %v12641_v17 = vld [vmem:[#allocation55_spill] sm:$0xff] }
 0x2eb   : > { %12631 = vst [vmem:[#allocation43_spill] sm:$0xff] %v7429_v6 }
 0x2ec   : > { %2254 = vperm.xlu1 %4996, %v12632_v13   ;;  %967 = vperm.xlu0 %5022, %v12633_v30   ;;  %v12644_v30 = vld [vmem:[#allocation153_spill] sm:$0xff] }
 0x2ed   : > { %v7433_v38 = vpop.permute.xlu1 %1850 }
 0x2ee   : > { %12634 = vst [vmem:[#allocation141_spill] sm:$0xff] %v7433_v38  ;;  %v7435_v50 = vpop.permute.xlu0 %3752  ;;  %v12645_v38 = vld [vmem:[#allocation59_spill] sm:$0xff] }
 0x2ef   : > { %12635 = vst [vmem:[#allocation47_spill] sm:$0xff] %v7435_v50  ;;  %v12658_v50 = vld [vmem:[#allocation75_spill] sm:$0xff] }
 0x2f0   : > { %2260 = vperm.xlu1 %4996, %v12636_v14   ;;  %973 = vperm.xlu0 %5022, %v12637_v42  }
 0x2f1   : > { %v7439_v1 = vpop.permute.xlu1 %1856 }
 0x2f2   : > { %12638 = vst [vmem:[#allocation145_spill] sm:$0xff] %v7439_v1  ;;  %v7441_v21 = vpop.permute.xlu0 %3758  ;;  %v12648_v1 = vmov 0  }
 0x2f3   : > { %12639 = vst [vmem:[#allocation51_spill] sm:$0xff] %v7441_v21  ;;  %v7457_v21 = vsel %vm2373_vm1, 1, %v12648_v1  ;;  %v7526_v12 = vsel %vm2386_vm8, 1, %v12648_v1  ;;  %v7536_v32 = vsel %vm2388_vm9, 1, %v12648_v1  ;;  %v7546_v47 = vsel %vm2390_vm10, 1, %v12648_v1 }
 0x2f4   : > { %2266 = vperm.xlu1 %4996, %v12640_v34   ;;  %979 = vperm.xlu0 %5022, %v12641_v17   ;;  %v12649_v17 = vld [vmem:[#allocation63_spill] sm:$0xff]  ;;  %v7556_v39 = vsel %vm2392_vm11, 1, %v12648_v1  ;;  %v7566_v35 = vsel %vm2394_vm12, 1, %v12648_v1  ;;  %v7576_v15 = vsel %vm2396_vm13, 1, %v12648_v1  ;;  %v7586_v27 = vsel %vm2398_vm14, 1, %v12648_v1 }
 0x2f5   : > { %v7596_v23 = vsel %vm2400_vm15, 1, %v12648_v1  ;;  %v7606_v19 = vsel %vm2402_vm0, 1, %v12648_v1  ;;  %vm2404_vm1 = vcmp.eq.s32.totalorder %v6966_v7, 5  ;;  %v12700_v7 = vld [vmem:[#allocation160_spill] sm:$0xff] }
 0x2f6   : > { %v7445_v52 = vpop.permute.xlu1 %2022  ;;  %v7447_v13 = vpop.permute.xlu0 %3764 }
 0x2f7   : > { %12642 = vst [vmem:[#allocation149_spill] sm:$0xff] %v7445_v52  ;;  %12643 = vst [vmem:[#allocation55_spill] sm:$0xff] %v7447_v13  ;;  %v12655_v13 = vld [vmem:[#allocation71_spill] sm:$0xff] }
 0x2f8   : > { %2272 = vperm.xlu1 %4996, %v12644_v30   ;;  %985 = vperm.xlu0 %5022, %v12645_v38   ;;  %v7468_v38 = vsel %vm2375_vm2, 1, %v12648_v1  ;;  %v12652_v30 = vld [vmem:[#allocation67_spill] sm:$0xff] }
 0x2fa   : > { %v7452_v14 = vpop.permute.xlu1 %2028  ;;  %v7454_v42 = vpop.permute.xlu0 %3770 }
 0x2fb   : > { %12646 = vst [vmem:[#allocation153_spill] sm:$0xff] %v7452_v14  ;;  %12647 = vst [vmem:[#allocation59_spill] sm:$0xff] %v7454_v42 }
 0x2fc   : > { %4997 = vset.pattern.permute.xlu1 %v12648_v1  ;;  %991 = vperm.xlu0 %5022, %v12649_v17   ;;  %v7478_v17 = vsel %vm2376_vm3, 1, %v12648_v1 }
 0x2fd   : > { %2438 = vperm.xlu1 %4997, %v7457_v21  }
 0x2fe   : > { %v7463_v57 = vpop.permute.xlu1 %2031  ;;  %v7465_v34 = vpop.permute.xlu0 %3776 }
 0x2ff   : > { %12650 = vst [vmem:[#allocation63_spill] sm:$0xff] %v7463_v57  ;;  %12651 = vst [vmem:[#allocation383_spill] sm:$0xff] %v7465_v34  ;;  %v12676_v57 = vld [vmem:[#allocation130_spill] sm:$0xff] }
 0x300   : > { %997 = vperm.xlu0 %5022, %v12652_v30   ;;  %v7488_v30 = vsel %vm2378_vm4, 1, %v12648_v1 }
 0x301   : > { %2444 = vperm.xlu1 %4997, %v7468_v38  }
 0x302   : > { %v7473_v44 = vpop.permute.xlu1 %2037  ;;  %v7475_v42 = vpop.permute.xlu0 %4150 }
 0x303   : > { %12653 = vst [vmem:[#allocation67_spill] sm:$0xff] %v7473_v44  ;;  %12654 = vst [vmem:[#allocation384_spill] sm:$0xff] %v7475_v42 }
 0x304   : > { %1003 = vperm.xlu0 %5022, %v12655_v13   ;;  %v7498_v13 = vsel %vm2380_vm5, 1, %v12648_v1 }
 0x305   : > { %2447 = vperm.xlu1 %4997, %v7478_v17  }
 0x306   : > { %v7483_v34 = vpop.permute.xlu1 %2043  ;;  %v7485_v36 = vpop.permute.xlu0 %4156 }
 0x307   : > { %12656 = vst [vmem:[#allocation71_spill] sm:$0xff] %v7483_v34  ;;  %12657 = vst [vmem:[#allocation385_spill] sm:$0xff] %v7485_v36  ;;  %v12661_v34 = vld [vmem:[#allocation79_spill] sm:$0xff] }
 0x308   : > { %1009 = vperm.xlu0 %5022, %v12658_v50   ;;  %v7508_v50 = vsel %vm2382_vm6, 1, %v12648_v1 }
 0x309   : > { %2453 = vperm.xlu1 %4997, %v7488_v30  }
 0x30a   : > { %v7493_v44 = vpop.permute.xlu1 %2049  ;;  %v7495_v20 = vpop.permute.xlu0 %4162 }
 0x30b   : > { %12659 = vst [vmem:[#allocation75_spill] sm:$0xff] %v7493_v44  ;;  %12660 = vst [vmem:[#allocation386_spill] sm:$0xff] %v7495_v20  ;;  %v12664_v44 = vld [vmem:[#allocation83_spill] sm:$0xff] }
 0x30c   : > { %1015 = vperm.xlu0 %5022, %v12661_v34   ;;  %v7518_v34 = vsel %vm2384_vm7, 1, %v12648_v1 }
 0x30d   : > { %2459 = vperm.xlu1 %4997, %v7498_v13  }
 0x30e   : > { %v7503_v6 = vpop.permute.xlu1 %2055  ;;  %v7505_v24 = vpop.permute.xlu0 %4168 }
 0x30f   : > { %12662 = vst [vmem:[#allocation79_spill] sm:$0xff] %v7503_v6  ;;  %12663 = vst [vmem:[#allocation387_spill] sm:$0xff] %v7505_v24  ;;  %v12667_v6 = vld [vmem:[#allocation85_spill] sm:$0xff] }
 0x310   : > { %1021 = vperm.xlu0 %5022, %v12664_v44  }
 0x311   : > { %2465 = vperm.xlu1 %4997, %v7508_v50  }
 0x312   : > { %v7513_v20 = vpop.permute.xlu1 %2061  ;;  %v7515_v16 = vpop.permute.xlu0 %4174 }
 0x313   : > { %12665 = vst [vmem:[#allocation83_spill] sm:$0xff] %v7513_v20  ;;  %12666 = vst [vmem:[#allocation388_spill] sm:$0xff] %v7515_v16  ;;  %v12670_v20 = vld [vmem:[#allocation122_spill] sm:$0xff] }
 0x314   : > { %1027 = vperm.xlu0 %5022, %v12667_v6  }
 0x315   : > { %2471 = vperm.xlu1 %4997, %v7518_v34  }
 0x316   : > { %v7523_v24 = vpop.permute.xlu1 %2067 }
 0x317   : > { %12668 = vst [vmem:[#allocation85_spill] sm:$0xff] %v7523_v24  ;;  %v7528_v44 = vpop.permute.xlu0 %518  ;;  %v12673_v24 = vld [vmem:[#allocation127_spill] sm:$0xff] }
 0x318   : > { %12669 = vst [vmem:[#allocation389_spill] sm:$0xff] %v7528_v44  ;;  %1350 = vperm.xlu0 %5022, %v12670_v20  }
 0x319   : > { %2477 = vperm.xlu1 %4997, %v7526_v12  }
 0x31a   : > { %v7533_v16 = vpop.permute.xlu1 %2073 }
 0x31b   : > { %12671 = vst [vmem:[#allocation122_spill] sm:$0xff] %v7533_v16  ;;  %v7538_v6 = vpop.permute.xlu0 %527  ;;  %v12697_v16 = vld [vmem:[#allocation156_spill] sm:$0xff] }
 0x31c   : > { %12672 = vst [vmem:[#allocation390_spill] sm:$0xff] %v7538_v6  ;;  %1359 = vperm.xlu0 %5022, %v12673_v24   ;;  %v12778_v6 = vld [vmem:[#allocation288_spill] sm:$0xff] }
 0x31d   : > { %2483 = vperm.xlu1 %4997, %v7536_v32  }
 0x31e   : > { %v7543_v33 = vpop.permute.xlu1 %2079 }
 0x31f   : > { %12674 = vst [vmem:[#allocation127_spill] sm:$0xff] %v7543_v33  ;;  %v7548_v20 = vpop.permute.xlu0 %533  ;;  %v12679_v33 = vld [vmem:[#allocation133_spill] sm:$0xff] }
 0x320   : > { %12675 = vst [vmem:[#allocation391_spill] sm:$0xff] %v7548_v20  ;;  %1365 = vperm.xlu0 %5022, %v12676_v57  }
 0x321   : > { %2489 = vperm.xlu1 %4997, %v7546_v47  }
 0x322   : > { %v7553_v0 = vpop.permute.xlu1 %2085 }
 0x323   : > { %12677 = vst [vmem:[#allocation130_spill] sm:$0xff] %v7553_v0  ;;  %v7558_v24 = vpop.permute.xlu0 %539  ;;  %v12682_v0 = vld [vmem:[#allocation136_spill] sm:$0xff] }
 0x324   : > { %12678 = vst [vmem:[#allocation392_spill] sm:$0xff] %v7558_v24  ;;  %1371 = vperm.xlu0 %5022, %v12679_v33   ;;  %v12775_v24 = vld [vmem:[#allocation285_spill] sm:$0xff] }
 0x325   : > { %2495 = vperm.xlu1 %4997, %v7556_v39  }
 0x326   : > { %v7563_v14 = vpop.permute.xlu1 %2091 }
 0x327   : > { %12680 = vst [vmem:[#allocation133_spill] sm:$0xff] %v7563_v14  ;;  %v7568_v57 = vpop.permute.xlu0 %545  ;;  %v12685_v14 = vld [vmem:[#allocation140_spill] sm:$0xff] }
 0x328   : > { %12681 = vst [vmem:[#allocation393_spill] sm:$0xff] %v7568_v57  ;;  %1377 = vperm.xlu0 %5022, %v12682_v0   ;;  %v12772_v57 = vld [vmem:[#allocation281_spill] sm:$0xff] }
 0x329   : > { %2501 = vperm.xlu1 %4997, %v7566_v35  }
 0x32a   : > { %v7573_v36 = vpop.permute.xlu1 %2097 }
 0x32b   : > { %12683 = vst [vmem:[#allocation136_spill] sm:$0xff] %v7573_v36  ;;  %v7578_v33 = vpop.permute.xlu0 %551  ;;  %v12688_v36 = vld [vmem:[#allocation144_spill] sm:$0xff] }
 0x32c   : > { %12684 = vst [vmem:[#allocation394_spill] sm:$0xff] %v7578_v33  ;;  %1383 = vperm.xlu0 %5022, %v12685_v14  }
 0x32d   : > { %2507 = vperm.xlu1 %4997, %v7576_v15  }
 0x32e   : > { %v7583_v25 = vpop.permute.xlu1 %2103 }
 0x32f   : > { %12686 = vst [vmem:[#allocation140_spill] sm:$0xff] %v7583_v25  ;;  %v7588_v0 = vpop.permute.xlu0 %557  ;;  %v12691_v25 = vld [vmem:[#allocation148_spill] sm:$0xff] }
 0x330   : > { %12687 = vst [vmem:[#allocation395_spill] sm:$0xff] %v7588_v0  ;;  %1389 = vperm.xlu0 %5022, %v12688_v36  }
 0x331   : > { %2513 = vperm.xlu1 %4997, %v7586_v27  }
 0x332   : > { %v7593_v33 = vpop.permute.xlu1 %2109 }
 0x333   : > { %12689 = vst [vmem:[#allocation144_spill] sm:$0xff] %v7593_v33  ;;  %v7598_v14 = vpop.permute.xlu0 %563  ;;  %v12694_v33 = vld [vmem:[#allocation152_spill] sm:$0xff] }
 0x334   : > { %12690 = vst [vmem:[#allocation396_spill] sm:$0xff] %v7598_v14  ;;  %1395 = vperm.xlu0 %5022, %v12691_v25   ;;  %v7614_v14 = vsel %vm2404_vm1, 1, %v12648_v1 }
 0x335   : > { %2519 = vperm.xlu1 %4997, %v7596_v23  }
 0x336   : > { %v7603_v0 = vpop.permute.xlu1 %2115 }
 0x337   : > { %12692 = vst [vmem:[#allocation148_spill] sm:$0xff] %v7603_v0  ;;  %v7608_v36 = vpop.permute.xlu0 %569 }
 0x338   : > { %12693 = vst [vmem:[#allocation397_spill] sm:$0xff] %v7608_v36  ;;  %1401 = vperm.xlu0 %5022, %v12694_v33   ;;  %v12701_v33 = vld [vmem:[#allocation157_spill] sm:$0xff] }
 0x339   : > { %2525 = vperm.xlu1 %4997, %v7606_v19  }
 0x33b   : > { %v7616_v11 = vpop.permute.xlu1 %2185  ;;  %v7618_v25 = vpop.permute.xlu0 %575 }
 0x33c   : > { %12695 = vst [vmem:[#allocation152_spill] sm:$0xff] %v7616_v11  ;;  %12696 = vst [vmem:[#allocation398_spill] sm:$0xff] %v7618_v25  ;;  %1407 = vperm.xlu0 %5022, %v12697_v16   ;;  %v12704_v11 = vld [vmem:[#allocation164_spill] sm:$0xff] }
 0x33d   : > { %2531 = vperm.xlu1 %4997, %v7614_v14  }
 0x33f   : > { %v7622_v0 = vpop.permute.xlu1 %2188  ;;  %v7624_v29 = vpop.permute.xlu0 %581 }
 0x340   : > { %12698 = vst [vmem:[#allocation156_spill] sm:$0xff] %v7622_v0  ;;  %12699 = vst [vmem:[#allocation399_spill] sm:$0xff] %v7624_v29  ;;  %1413 = vperm.xlu0 %5022, %v12700_v7   ;;  %v12707_v0 = vld [vmem:[#allocation168_spill] sm:$0xff]  ;;  %v12708_v29 = vld [vmem:[#allocation161_spill] sm:$0xff] }
 0x341   : > { %4998 = vset.pattern.permute.xlu1 %v12272_v61 }
 0x342   : > { %2601 = vperm.xlu1 %4998, %v12701_v33   ;;  %v12711_v33 = vld [vmem:[#allocation172_spill] sm:$0xff] }
 0x343   : > { %v7629_v26 = vpop.permute.xlu1 %2194  ;;  %v7631_v52 = vpop.permute.xlu0 %587 }
 0x344   : > { %12702 = vst [vmem:[#allocation160_spill] sm:$0xff] %v7629_v26  ;;  %12703 = vst [vmem:[#allocation157_spill] sm:$0xff] %v7631_v52  ;;  %1419 = vperm.xlu0 %5022, %v12704_v11   ;;  %v12712_v26 = vld [vmem:[#allocation165_spill] sm:$0xff] }
 0x346   : > { %2604 = vperm.xlu1 %4998, %v7468_v38   ;;  %v12715_v38 = vld [vmem:[#allocation176_spill] sm:$0xff] }
 0x347   : > { %v7635_v16 = vpop.permute.xlu1 %2200  ;;  %v7637_v25 = vpop.permute.xlu0 %593 }
 0x348   : > { %12705 = vst [vmem:[#allocation164_spill] sm:$0xff] %v7635_v16  ;;  %12706 = vst [vmem:[#allocation400_spill] sm:$0xff] %v7637_v25  ;;  %1425 = vperm.xlu0 %5022, %v12707_v0   ;;  %v12716_v16 = vld [vmem:[#allocation169_spill] sm:$0xff] }
 0x34a   : > { %2610 = vperm.xlu1 %4998, %v12708_v29   ;;  %v12719_v29 = vld [vmem:[#allocation179_spill] sm:$0xff] }
 0x34b   : > { %v7641_v7 = vpop.permute.xlu1 %2206  ;;  %v7643_v36 = vpop.permute.xlu0 %599 }
 0x34c   : > { %12709 = vst [vmem:[#allocation168_spill] sm:$0xff] %v7641_v7  ;;  %12710 = vst [vmem:[#allocation161_spill] sm:$0xff] %v7643_v36  ;;  %1431 = vperm.xlu0 %5022, %v12711_v33   ;;  %v12720_v7 = vld [vmem:[#allocation173_spill] sm:$0xff] }
 0x34e   : > { %2616 = vperm.xlu1 %4998, %v12712_v26   ;;  %v12723_v26 = vld [vmem:[#allocation226_spill] sm:$0xff] }
 0x34f   : > { %v7647_v52 = vpop.permute.xlu1 %2212  ;;  %v7649_v11 = vpop.permute.xlu0 %605 }
 0x350   : > { %12713 = vst [vmem:[#allocation172_spill] sm:$0xff] %v7647_v52  ;;  %12714 = vst [vmem:[#allocation165_spill] sm:$0xff] %v7649_v11  ;;  %1437 = vperm.xlu0 %5022, %v12715_v38   ;;  %v12724_v52 = vld [vmem:[#allocation177_spill] sm:$0xff] }
 0x352   : > { %2622 = vperm.xlu1 %4998, %v12716_v16   ;;  %v12727_v16 = vld [vmem:[#allocation233_spill] sm:$0xff] }
 0x353   : > { %v7653_v25 = vpop.permute.xlu1 %2218  ;;  %v7655_v0 = vpop.permute.xlu0 %611 }
 0x354   : > { %12717 = vst [vmem:[#allocation176_spill] sm:$0xff] %v7653_v25  ;;  %12718 = vst [vmem:[#allocation169_spill] sm:$0xff] %v7655_v0  ;;  %1443 = vperm.xlu0 %5022, %v12719_v29   ;;  %v12728_v25 = vld [vmem:[#allocation180_spill] sm:$0xff] }
 0x356   : > { %2628 = vperm.xlu1 %4998, %v12720_v7   ;;  %v12731_v7 = vld [vmem:[#allocation237_spill] sm:$0xff] }
 0x357   : > { %v7659_v36 = vpop.permute.xlu1 %2224  ;;  %v7661_v33 = vpop.permute.xlu0 %934 }
 0x358   : > { %12721 = vst [vmem:[#allocation179_spill] sm:$0xff] %v7659_v36  ;;  %12722 = vst [vmem:[#allocation173_spill] sm:$0xff] %v7661_v33  ;;  %1766 = vperm.xlu0 %5022, %v12723_v26   ;;  %v12732_v36 = vld [vmem:[#allocation183_spill] sm:$0xff] }
 0x35a   : > { %2634 = vperm.xlu1 %4998, %v12724_v52   ;;  %v12735_v52 = vld [vmem:[#allocation241_spill] sm:$0xff] }
 0x35b   : > { %v7665_v11 = vpop.permute.xlu1 %2230  ;;  %v7667_v38 = vpop.permute.xlu0 %943 }
 0x35c   : > { %12725 = vst [vmem:[#allocation226_spill] sm:$0xff] %v7665_v11  ;;  %12726 = vst [vmem:[#allocation177_spill] sm:$0xff] %v7667_v38  ;;  %1775 = vperm.xlu0 %5022, %v12727_v16  }
 0x35e   : > { %2640 = vperm.xlu1 %4998, %v12728_v25   ;;  %v12739_v25 = vld [vmem:[#allocation245_spill] sm:$0xff] }
 0x35f   : > { %v7671_v0 = vpop.permute.xlu1 %2236  ;;  %v7673_v29 = vpop.permute.xlu0 %949 }
 0x360   : > { %12729 = vst [vmem:[#allocation233_spill] sm:$0xff] %v7671_v0  ;;  %12730 = vst [vmem:[#allocation180_spill] sm:$0xff] %v7673_v29  ;;  %1781 = vperm.xlu0 %5022, %v12731_v7   ;;  %v12740_v0 = vld [vmem:[#allocation189_spill] sm:$0xff] }
 0x362   : > { %2646 = vperm.xlu1 %4998, %v12732_v36   ;;  %v12743_v36 = vld [vmem:[#allocation249_spill] sm:$0xff] }
 0x363   : > { %v7677_v42 = vpop.permute.xlu1 %2242  ;;  %v7679_v26 = vpop.permute.xlu0 %955 }
 0x364   : > { %12733 = vst [vmem:[#allocation237_spill] sm:$0xff] %v7677_v42  ;;  %12734 = vst [vmem:[#allocation183_spill] sm:$0xff] %v7679_v26  ;;  %1787 = vperm.xlu0 %5022, %v12735_v52   ;;  %v12744_v42 = vld [vmem:[#allocation192_spill] sm:$0xff]  ;;  %v12769_v26 = vld [vmem:[#allocation277_spill] sm:$0xff] }
 0x366   : > { %2652 = vperm.xlu1 %4998, %v12736_v9  }
 0x367   : > { %v7683_v11 = vpop.permute.xlu1 %2248  ;;  %v7685_v16 = vpop.permute.xlu0 %961 }
 0x368   : > { %12737 = vst [vmem:[#allocation241_spill] sm:$0xff] %v7683_v11  ;;  %12738 = vst [vmem:[#allocation186_spill] sm:$0xff] %v7685_v16  ;;  %1793 = vperm.xlu0 %5022, %v12739_v25   ;;  %v12747_v11 = vld [vmem:[#allocation253_spill] sm:$0xff]  ;;  %v12748_v16 = vld [vmem:[#allocation195_spill] sm:$0xff] }
 0x36a   : > { %2658 = vperm.xlu1 %4998, %v12740_v0  }
 0x36b   : > { %v7689_v45 = vpop.permute.xlu1 %2254  ;;  %v7691_v7 = vpop.permute.xlu0 %967 }
 0x36c   : > { %12741 = vst [vmem:[#allocation245_spill] sm:$0xff] %v7689_v45  ;;  %12742 = vst [vmem:[#allocation189_spill] sm:$0xff] %v7691_v7  ;;  %1799 = vperm.xlu0 %5022, %v12743_v36   ;;  %v12751_v45 = vld [vmem:[#allocation257_spill] sm:$0xff]  ;;  %v12752_v7 = vld [vmem:[#allocation198_spill] sm:$0xff] }
 0x36e   : > { %2664 = vperm.xlu1 %4998, %v12744_v42  }
 0x36f   : > { %v7695_v52 = vpop.permute.xlu1 %2260  ;;  %v7697_v9 = vpop.permute.xlu0 %973 }
 0x370   : > { %12745 = vst [vmem:[#allocation249_spill] sm:$0xff] %v7695_v52  ;;  %12746 = vst [vmem:[#allocation192_spill] sm:$0xff] %v7697_v9  ;;  %1805 = vperm.xlu0 %5022, %v12747_v11   ;;  %v12755_v52 = vld [vmem:[#allocation261_spill] sm:$0xff] }
 0x371   : > { %v12756_v9 = vld [vmem:[#allocation201_spill] sm:$0xff] }
 0x372   : > { %2670 = vperm.xlu1 %4998, %v12748_v16  }
 0x373   : > { %v7701_v25 = vpop.permute.xlu1 %2266  ;;  %v7703_v0 = vpop.permute.xlu0 %979 }
 0x374   : > { %12749 = vst [vmem:[#allocation253_spill] sm:$0xff] %v7701_v25  ;;  %12750 = vst [vmem:[#allocation195_spill] sm:$0xff] %v7703_v0  ;;  %1811 = vperm.xlu0 %5022, %v12751_v45   ;;  %v12759_v25 = vld [vmem:[#allocation265_spill] sm:$0xff]  ;;  %v7719_v0 = vld [vmem:[%s5485_s18] sm:$0xff] }
 0x375   : > { %vm2789_vm2 = vcmp.eq.s32.totalorder %v7719_v0, 6  ;;  %v12760_v45 = vld [vmem:[#allocation204_spill] sm:$0xff] }
 0x376   : > { %2676 = vperm.xlu1 %4998, %v12752_v7  }
 0x377   : > { %v7707_v36 = vpop.permute.xlu1 %2272  ;;  %v7709_v42 = vpop.permute.xlu0 %985 }
 0x378   : > { %12753 = vst [vmem:[#allocation257_spill] sm:$0xff] %v7707_v36  ;;  %12754 = vst [vmem:[#allocation198_spill] sm:$0xff] %v7709_v42  ;;  %1817 = vperm.xlu0 %5022, %v12755_v52   ;;  %v12763_v52 = vld [vmem:[#allocation269_spill] sm:$0xff] }
 0x37a   : > { %2682 = vperm.xlu1 %4998, %v12756_v9   ;;  %v7729_v9 = vsel %vm2789_vm2, 1, %v12648_v1 }
 0x37b   : > { %v7713_v11 = vpop.permute.xlu0 %991 }
 0x37c   : > { %12757 = vst [vmem:[#allocation261_spill] sm:$0xff] %v7713_v11  ;;  %v7715_v16 = vpop.permute.xlu1 %2438  ;;  %1823 = vperm.xlu0 %5022, %v12759_v25   ;;  %v7732_v11 = vld [vmem:[%s5485_s18 + $0x10] sm:$0xff] }
 0x37d   : > { %12758 = vst [vmem:[#allocation201_spill] sm:$0xff] %v7715_v16  ;;  %vm2791_vm3 = vcmp.eq.s32.totalorder %v7732_v11, 6 }
 0x37e   : > { %2688 = vperm.xlu1 %4998, %v12760_v45  }
 0x37f   : > { %v7723_v7 = vpop.permute.xlu0 %997 }
 0x380   : > { %12761 = vst [vmem:[#allocation265_spill] sm:$0xff] %v7723_v7  ;;  %v7725_v36 = vpop.permute.xlu1 %2444  ;;  %1829 = vperm.xlu0 %5022, %v12763_v52   ;;  %v12766_v7 = vld [vmem:[#allocation273_spill] sm:$0xff]  ;;  %v7743_v52 = vsel %vm2791_vm3, 1, %v12648_v1  ;;  %vm3205_vm3 = vcmp.eq.s32.totalorder %v7719_v0, 7 }
 0x381   : > { %12762 = vst [vmem:[#allocation204_spill] sm:$0xff] %v7725_v36  ;;  %v7746_v36 = vld [vmem:[%s5485_s18 + $0x18] sm:$0xff] }
 0x382   : > { %4999 = vset.pattern.permute.xlu1 %v12648_v1  ;;  %vm2792_vm4 = vcmp.eq.s32.totalorder %v7746_v36, 6 }
 0x383   : > { %2854 = vperm.xlu1 %4999, %v7729_v9   ;;  %v7737_v25 = vpop.permute.xlu0 %1003 }
 0x384   : > { %12764 = vst [vmem:[#allocation269_spill] sm:$0xff] %v7737_v25  ;;  %v7739_v45 = vpop.permute.xlu1 %2447  ;;  %1835 = vperm.xlu0 %5022, %v12766_v7   ;;  %v7756_v25 = vsel %vm2792_vm4, 1, %v12648_v1  ;;  %v7759_v7 = vld [vmem:[%s5485_s18 + $0x28] sm:$0xff]  ;;  %vm3207_vm4 = vcmp.eq.s32.totalorder %v7732_v11, 7 }
 0x385   : > { %12765 = vst [vmem:[#allocation401_spill] sm:$0xff] %v7739_v45  ;;  %vm2794_vm5 = vcmp.eq.s32.totalorder %v7759_v7, 6 }
 0x387   : > { %2860 = vperm.xlu1 %4999, %v7743_v52   ;;  %v7750_v16 = vpop.permute.xlu0 %1009 }
 0x388   : > { %12767 = vst [vmem:[#allocation273_spill] sm:$0xff] %v7750_v16  ;;  %v7752_v42 = vpop.permute.xlu1 %2453  ;;  %1841 = vperm.xlu0 %5022, %v12769_v26   ;;  %v7769_v16 = vsel %vm2794_vm5, 1, %v12648_v1  ;;  %v7772_v26 = vld [vmem:[%s5485_s18 + $0x38] sm:$0xff]  ;;  %vm3208_vm5 = vcmp.eq.s32.totalorder %v7746_v36, 7 }
 0x389   : > { %12768 = vst [vmem:[#allocation402_spill] sm:$0xff] %v7752_v42  ;;  %vm2796_vm6 = vcmp.eq.s32.totalorder %v7772_v26, 6 }
 0x38b   : > { %2863 = vperm.xlu1 %4999, %v7756_v25   ;;  %v7763_v45 = vpop.permute.xlu0 %1015 }
 0x38c   : > { %12770 = vst [vmem:[#allocation277_spill] sm:$0xff] %v7763_v45  ;;  %v7765_v29 = vpop.permute.xlu1 %2459  ;;  %1847 = vperm.xlu0 %5022, %v12772_v57   ;;  %v7782_v45 = vsel %vm2796_vm6, 1, %v12648_v1  ;;  %v7785_v57 = vld [vmem:[%s5485_s18 + $0x48] sm:$0xff]  ;;  %vm3210_vm6 = vcmp.eq.s32.totalorder %v7759_v7, 7 }
 0x38d   : > { %12771 = vst [vmem:[#allocation403_spill] sm:$0xff] %v7765_v29  ;;  %vm2798_vm7 = vcmp.eq.s32.totalorder %v7785_v57, 6 }
 0x38f   : > { %2869 = vperm.xlu1 %4999, %v7769_v16   ;;  %v7776_v42 = vpop.permute.xlu0 %1021 }
 0x390   : > { %12773 = vst [vmem:[#allocation281_spill] sm:$0xff] %v7776_v42  ;;  %v7778_v38 = vpop.permute.xlu1 %2465  ;;  %1853 = vperm.xlu0 %5022, %v12775_v24   ;;  %v7795_v42 = vsel %vm2798_vm7, 1, %v12648_v1  ;;  %v7798_v24 = vld [vmem:[%s5485_s18 + $0x58] sm:$0xff]  ;;  %vm3212_vm7 = vcmp.eq.s32.totalorder %v7772_v26, 7 }
 0x391   : > { %12774 = vst [vmem:[#allocation404_spill] sm:$0xff] %v7778_v38  ;;  %vm2800_vm8 = vcmp.eq.s32.totalorder %v7798_v24, 6 }
 0x393   : > { %2875 = vperm.xlu1 %4999, %v7782_v45   ;;  %v7789_v29 = vpop.permute.xlu0 %1027 }
 0x394   : > { %12776 = vst [vmem:[#allocation285_spill] sm:$0xff] %v7789_v29  ;;  %v7791_v20 = vpop.permute.xlu1 %2471  ;;  %1859 = vperm.xlu0 %5022, %v12778_v6   ;;  %v7808_v29 = vsel %vm2800_vm8, 1, %v12648_v1  ;;  %v7811_v6 = vld [vmem:[%s5485_s18 + $0x68] sm:$0xff]  ;;  %vm3214_vm8 = vcmp.eq.s32.totalorder %v7785_v57, 7 }
 0x395   : > { %12777 = vst [vmem:[#allocation405_spill] sm:$0xff] %v7791_v20  ;;  %vm2802_vm9 = vcmp.eq.s32.totalorder %v7811_v6, 6 }
 0x397   : > { %2881 = vperm.xlu1 %4999, %v7795_v42   ;;  %v7802_v38 = vpop.permute.xlu0 %1350 }
 0x398   : > { %12779 = vst [vmem:[#allocation288_spill] sm:$0xff] %v7802_v38  ;;  %v7804_v33 = vpop.permute.xlu1 %2477  ;;  %2182 = vperm.xlu0 %5022, %v7155_v59   ;;  %v7824_v59 = vld [vmem:[%s5485_s18 + $0x78] sm:$0xff] }
 0x399   : > { %12780 = vst [vmem:[#allocation406_spill] sm:$0xff] %v7804_v33  ;;  %v7821_v33 = vsel %vm2802_vm9, 1, %v12648_v1  ;;  %vm2804_vm10 = vcmp.eq.s32.totalorder %v7824_v59, 6  ;;  %vm3216_vm9 = vcmp.eq.s32.totalorder %v7798_v24, 7 }
 0x39b   : > { %2887 = vperm.xlu1 %4999, %v7808_v29   ;;  %v7815_v20 = vpop.permute.xlu0 %1359 }
 0x39c   : > { %12781 = vst [vmem:[#allocation407_spill] sm:$0xff] %v7815_v20  ;;  %v7817_v44 = vpop.permute.xlu1 %2483  ;;  %2191 = vperm.xlu0 %5022, %v7184_v53   ;;  %v7837_v53 = vld [vmem:[%s5485_s18 + $0x88] sm:$0xff] }
 0x39d   : > { %12782 = vst [vmem:[#allocation408_spill] sm:$0xff] %v7817_v44  ;;  %v7834_v44 = vsel %vm2804_vm10, 1, %v12648_v1  ;;  %vm2806_vm11 = vcmp.eq.s32.totalorder %v7837_v53, 6  ;;  %vm3218_vm10 = vcmp.eq.s32.totalorder %v7811_v6, 7 }
 0x39f   : > { %2893 = vperm.xlu1 %4999, %v7821_v33   ;;  %v7828_v38 = vpop.permute.xlu0 %1365 }
 0x3a0   : > { %12783 = vst [vmem:[#allocation409_spill] sm:$0xff] %v7828_v38  ;;  %v7830_v43 = vpop.permute.xlu1 %2489  ;;  %2197 = vperm.xlu0 %5022, %v7198_v8   ;;  %v7850_v8 = vld [vmem:[%s5485_s18 + $0x98] sm:$0xff] }
 0x3a1   : > { %12784 = vst [vmem:[#allocation410_spill] sm:$0xff] %v7830_v43  ;;  %v7847_v43 = vsel %vm2806_vm11, 1, %v12648_v1  ;;  %vm2808_vm12 = vcmp.eq.s32.totalorder %v7850_v8, 6  ;;  %vm3220_vm11 = vcmp.eq.s32.totalorder %v7824_v59, 7 }
 0x3a3   : > { %2899 = vperm.xlu1 %4999, %v7834_v44   ;;  %v7841_v20 = vpop.permute.xlu0 %1371 }
 0x3a4   : > { %12785 = vst [vmem:[#allocation411_spill] sm:$0xff] %v7841_v20  ;;  %v7843_v54 = vpop.permute.xlu1 %2495  ;;  %2203 = vperm.xlu0 %5022, %v7212_v46   ;;  %v7863_v46 = vld [vmem:[%s5485_s18 + $0xa8] sm:$0xff] }
 0x3a5   : > { %12786 = vst [vmem:[#allocation412_spill] sm:$0xff] %v7843_v54  ;;  %v7860_v54 = vsel %vm2808_vm12, 1, %v12648_v1  ;;  %vm2810_vm13 = vcmp.eq.s32.totalorder %v7863_v46, 6  ;;  %vm3222_vm12 = vcmp.eq.s32.totalorder %v7837_v53, 7 }
 0x3a7   : > { %2905 = vperm.xlu1 %4999, %v7847_v43   ;;  %v7854_v38 = vpop.permute.xlu0 %1377 }
 0x3a8   : > { %12787 = vst [vmem:[#allocation413_spill] sm:$0xff] %v7854_v38  ;;  %v7856_v5 = vpop.permute.xlu1 %2501  ;;  %2209 = vperm.xlu0 %5022, %v7226_v51   ;;  %v7876_v51 = vld [vmem:[%s5485_s18 + $0xb8] sm:$0xff] }
 0x3a9   : > { %12788 = vst [vmem:[#allocation414_spill] sm:$0xff] %v7856_v5  ;;  %v7873_v5 = vsel %vm2810_vm13, 1, %v12648_v1  ;;  %vm2812_vm14 = vcmp.eq.s32.totalorder %v7876_v51, 6  ;;  %vm3224_vm13 = vcmp.eq.s32.totalorder %v7850_v8, 7 }
 0x3ab   : > { %2911 = vperm.xlu1 %4999, %v7860_v54   ;;  %v7867_v20 = vpop.permute.xlu0 %1383 }
 0x3ac   : > { %12789 = vst [vmem:[#allocation415_spill] sm:$0xff] %v7867_v20  ;;  %v7869_v56 = vpop.permute.xlu1 %2507  ;;  %2215 = vperm.xlu0 %5022, %v7240_v22   ;;  %v7886_v20 = vsel %vm2812_vm14, 1, %v12648_v1  ;;  %v7889_v22 = vld [vmem:[%s5485_s18 + $0xc8] sm:$0xff]  ;;  %vm3226_vm14 = vcmp.eq.s32.totalorder %v7863_v46, 7 }
 0x3ad   : > { %12790 = vst [vmem:[#allocation416_spill] sm:$0xff] %v7869_v56  ;;  %vm2814_vm15 = vcmp.eq.s32.totalorder %v7889_v22, 6 }
 0x3af   : > { %2917 = vperm.xlu1 %4999, %v7873_v5   ;;  %v7880_v38 = vpop.permute.xlu0 %1389 }
 0x3b0   : > { %12791 = vst [vmem:[#allocation417_spill] sm:$0xff] %v7880_v38  ;;  %v7882_v10 = vpop.permute.xlu1 %2513  ;;  %2221 = vperm.xlu0 %5022, %v7254_v48   ;;  %v7899_v38 = vsel %vm2814_vm15, 1, %v12648_v1  ;;  %v7902_v48 = vld [vmem:[%s5485_s18 + $0xd8] sm:$0xff]  ;;  %vm3228_vm15 = vcmp.eq.s32.totalorder %v7876_v51, 7 }
 0x3b1   : > { %12792 = vst [vmem:[#allocation418_spill] sm:$0xff] %v7882_v10  ;;  %vm2816_vm0 = vcmp.eq.s32.totalorder %v7902_v48, 6 }
 0x3b3   : > { %2923 = vperm.xlu1 %4999, %v7886_v20   ;;  %v7893_v56 = vpop.permute.xlu0 %1395 }
 0x3b4   : > { %12793 = vst [vmem:[#allocation419_spill] sm:$0xff] %v7893_v56  ;;  %v7895_v4 = vpop.permute.xlu1 %2519  ;;  %2227 = vperm.xlu0 %5022, %v7267_v18   ;;  %v7912_v56 = vsel %vm2816_vm0, 1, %v12648_v1  ;;  %v7915_v18 = vld [vmem:[%s5485_s18 + $0xe8] sm:$0xff]  ;;  %vm3230_vm0 = vcmp.eq.s32.totalorder %v7889_v22, 7 }
 0x3b5   : > { %12794 = vst [vmem:[#allocation420_spill] sm:$0xff] %v7895_v4  ;;  %vm2818_vm1 = vcmp.eq.s32.totalorder %v7915_v18, 6 }
 0x3b7   : > { %2929 = vperm.xlu1 %4999, %v7899_v38   ;;  %v7906_v10 = vpop.permute.xlu0 %1401 }
 0x3b8   : > { %12795 = vst [vmem:[#allocation421_spill] sm:$0xff] %v7906_v10  ;;  %v7908_v63 = vpop.permute.xlu1 %2525  ;;  %2233 = vperm.xlu0 %5022, %v7278_v58   ;;  %v7925_v10 = vsel %vm2818_vm1, 1, %v12648_v1  ;;  %vm3232_vm1 = vcmp.eq.s32.totalorder %v7902_v48, 7 }
 0x3b9   : > { %12796 = vst [vmem:[#allocation422_spill] sm:$0xff] %v7908_v63  ;;  %v7928_v63 = vld [vmem:[%s5485_s18 + $0xf8] sm:$0xff] }
 0x3ba   : > { %vm2820_vm2 = vcmp.eq.s32.totalorder %v7928_v63, 6 }
 0x3bb   : > { %2935 = vperm.xlu1 %4999, %v7912_v56   ;;  %v7919_v4 = vpop.permute.xlu0 %1407  ;;  %v7936_v49 = vsel %vm2820_vm2, 1, %v12648_v1  ;;  %vm3234_vm2 = vcmp.eq.s32.totalorder %v7915_v18, 7 }
 0x3bc   : > { %12797 = vst [vmem:[#allocation423_spill] sm:$0xff] %v7919_v4  ;;  %v7921_v55 = vpop.permute.xlu1 %2531  ;;  %2239 = vperm.xlu0 %5022, %v7288_v62  }
 0x3bd   : > { %12798 = vst [vmem:[#allocation424_spill] sm:$0xff] %v7921_v55 }
 0x3bf   : > { %2941 = vperm.xlu1 %4999, %v7925_v10   ;;  %v7932_v58 = vpop.permute.xlu0 %1413 }
 0x3c0   : > { %12799 = vst [vmem:[#allocation425_spill] sm:$0xff] %v7932_v58  ;;  %2245 = vperm.xlu0 %5022, %v7298_v28   ;;  %v12804_v58 = vld [vmem:[#allocation207_spill] sm:$0xff] }
 0x3c1   : > { %v7938_v4 = vpop.permute.xlu1 %2601 }
 0x3c2   : > { %12800 = vst [vmem:[#allocation426_spill] sm:$0xff] %v7938_v4  ;;  %v8681_v4 = vld [vmem:[%s5469_s9 + $0xf8] sm:$0xff] }
 0x3c3   : > { %2947 = vperm.xlu1 %4999, %v7936_v49   ;;  %v7941_v62 = vpop.permute.xlu0 %1419 }
 0x3c4   : > { %12801 = vst [vmem:[#allocation427_spill] sm:$0xff] %v7941_v62  ;;  %2251 = vperm.xlu0 %5022, %v7308_v41  }
 0x3c5   : > { %v7944_v55 = vpop.permute.xlu1 %2604 }
 0x3c6   : > { %12802 = vst [vmem:[#allocation428_spill] sm:$0xff] %v7944_v55  ;;  %v12809_v55 = vld [vmem:[#allocation44_spill] sm:$0xff] }
 0x3c7   : > { %5000 = vset.pattern.permute.xlu1 %v12272_v61  ;;  %v7947_v40 = vpop.permute.xlu0 %1425 }
 0x3c8   : > { %12803 = vst [vmem:[#allocation429_spill] sm:$0xff] %v7947_v40  ;;  %3017 = vperm.xlu1 %5000, %v12804_v58   ;;  %2257 = vperm.xlu0 %5022, %v7318_v3   ;;  %v12812_v3 = vld [vmem:[#allocation48_spill] sm:$0xff] }
 0x3c9   : > { %v7951_v28 = vpop.permute.xlu1 %2610 }
 0x3ca   : > { %12805 = vst [vmem:[#allocation207_spill] sm:$0xff] %v7951_v28 }
 0x3cb   : > { %v7953_v2 = vpop.permute.xlu0 %1431 }
 0x3cc   : > { %12806 = vst [vmem:[#allocation430_spill] sm:$0xff] %v7953_v2  ;;  %3020 = vperm.xlu1 %5000, %v7743_v52   ;;  %2263 = vperm.xlu0 %5022, %v7328_v37   ;;  %v12814_v37 = vld [vmem:[#allocation52_spill] sm:$0xff] }
 0x3cd   : > { %v7957_v62 = vpop.permute.xlu1 %2616 }
 0x3ce   : > { %12807 = vst [vmem:[#allocation431_spill] sm:$0xff] %v7957_v62 }
 0x3cf   : > { %v7959_v41 = vpop.permute.xlu0 %1437 }
 0x3d0   : > { %12808 = vst [vmem:[#allocation432_spill] sm:$0xff] %v7959_v41  ;;  %3026 = vperm.xlu1 %5000, %v12809_v55   ;;  %2269 = vperm.xlu0 %5022, %v7338_v60   ;;  %v12816_v60 = vld [vmem:[#allocation56_spill] sm:$0xff] }
 0x3d1   : > { %v7963_v40 = vpop.permute.xlu1 %2622 }
 0x3d2   : > { %12810 = vst [vmem:[#allocation44_spill] sm:$0xff] %v7963_v40 }
 0x3d3   : > { %v7965_v58 = vpop.permute.xlu0 %1443 }
 0x3d4   : > { %12811 = vst [vmem:[#allocation433_spill] sm:$0xff] %v7965_v58  ;;  %3032 = vperm.xlu1 %5000, %v12812_v3   ;;  %2275 = vperm.xlu0 %5022, %v7346_v31   ;;  %v12818_v31 = vld [vmem:[#allocation60_spill] sm:$0xff] }
 0x3d5   : > { %v7969_v2 = vpop.permute.xlu1 %2628 }
 0x3d6   : > { %12813 = vst [vmem:[#allocation48_spill] sm:$0xff] %v7969_v2 }
 0x3d7   : > { %v7971_v52 = vpop.permute.xlu0 %1766 }
 0x3d8   : > { %3038 = vperm.xlu1 %5000, %v12814_v37   ;;  %2598 = vperm.xlu0 %5022, %v7457_v21   ;;  %v12819_v21 = vld [vmem:[#allocation64_spill] sm:$0xff] }
 0x3d9   : > { %v7975_v41 = vpop.permute.xlu1 %2634 }
 0x3da   : > { %12815 = vst [vmem:[#allocation52_spill] sm:$0xff] %v7975_v41 }
 0x3db   : > { %v7977_v55 = vpop.permute.xlu0 %1775 }
 0x3dc   : > { %3044 = vperm.xlu1 %5000, %v12816_v60   ;;  %2607 = vperm.xlu0 %5022, %v7478_v17   ;;  %v12821_v17 = vld [vmem:[#allocation68_spill] sm:$0xff] }
 0x3dd   : > { %v7981_v58 = vpop.permute.xlu1 %2640 }
 0x3de   : > { %12817 = vst [vmem:[#allocation56_spill] sm:$0xff] %v7981_v58 }
 0x3df   : > { %v7983_v3 = vpop.permute.xlu0 %1781 }
 0x3e0   : > { %3050 = vperm.xlu1 %5000, %v12818_v31   ;;  %2613 = vperm.xlu0 %5022, %v7488_v30   ;;  %v12824_v30 = vld [vmem:[#allocation72_spill] sm:$0xff] }
 0x3e1   : > { %v7987_v2 = vpop.permute.xlu1 %2646 }
 0x3e3   : > { %v7989_v37 = vpop.permute.xlu0 %1787 }
 0x3e4   : > { %3056 = vperm.xlu1 %5000, %v12819_v21   ;;  %2619 = vperm.xlu0 %5022, %v7498_v13   ;;  %v12827_v13 = vld [vmem:[#allocation227_spill] sm:$0xff] }
 0x3e5   : > { %v7993_v41 = vpop.permute.xlu1 %2652 }
 0x3e6   : > { %12820 = vst [vmem:[#allocation60_spill] sm:$0xff] %v7993_v41  ;;  %v8671_v41 = vld [vmem:[%s5469_s9 + $0x230] sm:$0xff] }
 0x3e7   : > { %v7995_v60 = vpop.permute.xlu0 %1793 }
 0x3e8   : > { %3062 = vperm.xlu1 %5000, %v12821_v17   ;;  %2625 = vperm.xlu0 %5022, %v7508_v50   ;;  %v12830_v50 = vld [vmem:[#allocation230_spill] sm:$0xff] }
 0x3e9   : > { %v7999_v58 = vpop.permute.xlu1 %2658 }
 0x3ea   : > { %12822 = vst [vmem:[#allocation64_spill] sm:$0xff] %v7999_v58  ;;  %v8146_v58 = vsel %vm3224_vm13, 1, %v12648_v1  ;;  %vm3638_vm13 = vcmp.eq.s32.totalorder %v7837_v53, 8 }
 0x3eb   : > { %v8001_v31 = vpop.permute.xlu0 %1799 }
 0x3ec   : > { %12823 = vst [vmem:[#allocation68_spill] sm:$0xff] %v8001_v31  ;;  %3068 = vperm.xlu1 %5000, %v12824_v30   ;;  %2631 = vperm.xlu0 %5022, %v7518_v34   ;;  %v12833_v34 = vld [vmem:[#allocation234_spill] sm:$0xff] }
 0x3ed   : > { %v8005_v40 = vpop.permute.xlu1 %2664 }
 0x3ee   : > { %12825 = vst [vmem:[#allocation72_spill] sm:$0xff] %v8005_v40  ;;  %v8116_v40 = vsel %vm3218_vm10, 1, %v12648_v1  ;;  %vm3632_vm10 = vcmp.eq.s32.totalorder %v7798_v24, 8  ;;  %v4447_v24 = vld [vmem:[#allocation5 + $0xd0] sm:$0xff] }
 0x3ef   : > { %v8007_v21 = vpop.permute.xlu0 %1805 }
 0x3f0   : > { %12826 = vst [vmem:[#allocation434_spill] sm:$0xff] %v8007_v21  ;;  %3074 = vperm.xlu1 %5000, %v12827_v13   ;;  %2637 = vperm.xlu0 %5022, %v7526_v12   ;;  %v12836_v12 = vld [vmem:[#allocation238_spill] sm:$0xff] }
 0x3f1   : > { %v8011_v62 = vpop.permute.xlu1 %2670 }
 0x3f2   : > { %12828 = vst [vmem:[#allocation227_spill] sm:$0xff] %v8011_v62  ;;  %v8086_v62 = vsel %vm3212_vm7, 1, %v12648_v1  ;;  %vm3626_vm7 = vcmp.eq.s32.totalorder %v7759_v7, 8  ;;  %v4441_v7 = vld [vmem:[#allocation5 + $0xa0] sm:$0xff] }
 0x3f3   : > { %v8013_v17 = vpop.permute.xlu0 %1811 }
 0x3f4   : > { %12829 = vst [vmem:[#allocation435_spill] sm:$0xff] %v8013_v17  ;;  %3080 = vperm.xlu1 %5000, %v12830_v50   ;;  %2643 = vperm.xlu0 %5022, %v7536_v32   ;;  %v12839_v32 = vld [vmem:[#allocation242_spill] sm:$0xff] }
 0x3f5   : > { %v8017_v31 = vpop.permute.xlu1 %2676 }
 0x3f6   : > { %12831 = vst [vmem:[#allocation230_spill] sm:$0xff] %v8017_v31 }
 0x3f7   : > { %v8019_v30 = vpop.permute.xlu0 %1817 }
 0x3f8   : > { %12832 = vst [vmem:[#allocation436_spill] sm:$0xff] %v8019_v30  ;;  %3086 = vperm.xlu1 %5000, %v12833_v34   ;;  %2649 = vperm.xlu0 %5022, %v7546_v47   ;;  %v12842_v47 = vld [vmem:[#allocation246_spill] sm:$0xff] }
 0x3f9   : > { %v8023_v21 = vpop.permute.xlu1 %2682 }
 0x3fa   : > { %12834 = vst [vmem:[#allocation234_spill] sm:$0xff] %v8023_v21  ;;  %v8066_v21 = vsel %vm3208_vm5, 1, %v12648_v1  ;;  %vm3623_vm5 = vcmp.eq.s32.totalorder %v7732_v11, 8  ;;  %v4437_v11 = vld [vmem:[#allocation5 + $0x80] sm:$0xff] }
 0x3fb   : > { %v8025_v13 = vpop.permute.xlu0 %1823 }
 0x3fc   : > { %12835 = vst [vmem:[#allocation437_spill] sm:$0xff] %v8025_v13  ;;  %3092 = vperm.xlu1 %5000, %v12836_v12   ;;  %2655 = vperm.xlu0 %5022, %v7556_v39   ;;  %v8045_v39 = vsel %vm3205_vm3, 1, %v12648_v1  ;;  %vm3236_vm3 = vcmp.eq.s32.totalorder %v7928_v63, 7 }
 0x3fd   : > { %v8029_v17 = vpop.permute.xlu1 %2688 }
 0x3fe   : > { %12837 = vst [vmem:[#allocation238_spill] sm:$0xff] %v8029_v17 }
 0x3ff   : > { %v8031_v50 = vpop.permute.xlu0 %1829 }
 0x400   : > { %12838 = vst [vmem:[#allocation438_spill] sm:$0xff] %v8031_v50  ;;  %3098 = vperm.xlu1 %5000, %v12839_v32   ;;  %2661 = vperm.xlu0 %5022, %v7566_v35   ;;  %v8056_v32 = vsel %vm3207_vm4, 1, %v12648_v1  ;;  %v8136_v50 = vsel %vm3222_vm12, 1, %v12648_v1  ;;  %vm3621_vm4 = vcmp.eq.s32.totalorder %v7719_v0, 8  ;;  %v4435_v0 = vld [vmem:[#allocation5 + $0x70] sm:$0xff]  ;;  %vm3636_vm12 = vcmp.eq.s32.totalorder %v7824_v59, 8 }
 0x401   : > { %v4451_v59 = vld [vmem:[#allocation5 + $0xf0] sm:$0xff] }
 0x402   : > { %v8035_v31 = vpop.permute.xlu1 %2854 }
 0x403   : > { %12840 = vst [vmem:[#allocation242_spill] sm:$0xff] %v8035_v31  ;;  %v8037_v34 = vpop.permute.xlu0 %1835 }
 0x404   : > { %12841 = vst [vmem:[#allocation439_spill] sm:$0xff] %v8037_v34  ;;  %3104 = vperm.xlu1 %5000, %v12842_v47   ;;  %2667 = vperm.xlu0 %5022, %v7576_v15   ;;  %v8106_v34 = vsel %vm3216_vm9, 1, %v12648_v1  ;;  %vm3630_vm9 = vcmp.eq.s32.totalorder %v7785_v57, 8  ;;  %v4445_v57 = vld [vmem:[#allocation5 + $0xc0] sm:$0xff] }
 0x406   : > { %v8042_v12 = vpop.permute.xlu1 %2860 }
 0x407   : > { %12843 = vst [vmem:[#allocation246_spill] sm:$0xff] %v8042_v12  ;;  %v8047_v17 = vpop.permute.xlu0 %1841 }
 0x408   : > { %12844 = vst [vmem:[#allocation440_spill] sm:$0xff] %v8047_v17  ;;  %5001 = vset.pattern.permute.xlu1 %v12648_v1  ;;  %2673 = vperm.xlu0 %5022, %v7586_v27   ;;  %v8076_v17 = vsel %vm3210_vm6, 1, %v12648_v1  ;;  %vm3624_vm6 = vcmp.eq.s32.totalorder %v7746_v36, 8  ;;  %v4439_v36 = vld [vmem:[#allocation5 + $0x90] sm:$0xff] }
 0x409   : > { %3270 = vperm.xlu1 %5001, %v8045_v39  }
 0x40a   : > { %v8053_v35 = vpop.permute.xlu1 %2863 }
 0x40b   : > { %12845 = vst [vmem:[#allocation441_spill] sm:$0xff] %v8053_v35  ;;  %v8058_v15 = vpop.permute.xlu0 %1847  ;;  %v8186_v35 = vsel %vm3232_vm1, 1, %v12648_v1  ;;  %vm3644_vm1 = vcmp.eq.s32.totalorder %v7876_v51, 8 }
 0x40c   : > { %12846 = vst [vmem:[#allocation442_spill] sm:$0xff] %v8058_v15  ;;  %2679 = vperm.xlu0 %5022, %v7596_v23  }
 0x40d   : > { %3276 = vperm.xlu1 %5001, %v8056_v32  }
 0x40e   : > { %v8063_v47 = vpop.permute.xlu1 %2869 }
 0x40f   : > { %12847 = vst [vmem:[#allocation443_spill] sm:$0xff] %v8063_v47  ;;  %v8068_v27 = vpop.permute.xlu0 %1853  ;;  %v8126_v47 = vsel %vm3220_vm11, 1, %v12648_v1  ;;  %vm3634_vm11 = vcmp.eq.s32.totalorder %v7811_v6, 8  ;;  %v4449_v6 = vld [vmem:[#allocation5 + $0xe0] sm:$0xff] }
 0x410   : > { %12848 = vst [vmem:[#allocation444_spill] sm:$0xff] %v8068_v27  ;;  %2685 = vperm.xlu0 %5022, %v7606_v19  }
 0x411   : > { %3279 = vperm.xlu1 %5001, %v8066_v21  }
 0x412   : > { %v8073_v15 = vpop.permute.xlu1 %2875 }
 0x413   : > { %12849 = vst [vmem:[#allocation445_spill] sm:$0xff] %v8073_v15  ;;  %v8078_v23 = vpop.permute.xlu0 %1859  ;;  %v8096_v15 = vsel %vm3214_vm8, 1, %v12648_v1  ;;  %vm3628_vm8 = vcmp.eq.s32.totalorder %v7772_v26, 8  ;;  %v4443_v26 = vld [vmem:[#allocation5 + $0xb0] sm:$0xff] }
 0x414   : > { %12850 = vst [vmem:[#allocation446_spill] sm:$0xff] %v8078_v23  ;;  %2691 = vperm.xlu0 %5022, %v7614_v14  }
 0x415   : > { %3285 = vperm.xlu1 %5001, %v8076_v17  }
 0x416   : > { %v8083_v27 = vpop.permute.xlu1 %2881 }
 0x417   : > { %12851 = vst [vmem:[#allocation447_spill] sm:$0xff] %v8083_v27  ;;  %v8088_v19 = vpop.permute.xlu0 %2182 }
 0x418   : > { %3014 = vperm.xlu0 %5022, %v7729_v9  }
 0x419   : > { %3291 = vperm.xlu1 %5001, %v8086_v62  }
 0x41a   : > { %v8093_v23 = vpop.permute.xlu1 %2887 }
 0x41b   : > { %12852 = vst [vmem:[#allocation448_spill] sm:$0xff] %v8093_v23  ;;  %v8098_v14 = vpop.permute.xlu0 %2191 }
 0x41c   : > { %3023 = vperm.xlu0 %5022, %v7756_v25  }
 0x41d   : > { %3297 = vperm.xlu1 %5001, %v8096_v15  }
 0x41e   : > { %v8103_v27 = vpop.permute.xlu1 %2893 }
 0x41f   : > { %12853 = vst [vmem:[#allocation449_spill] sm:$0xff] %v8103_v27  ;;  %v8108_v9 = vpop.permute.xlu0 %2197 }
 0x420   : > { %3029 = vperm.xlu0 %5022, %v7769_v16  }
 0x421   : > { %3303 = vperm.xlu1 %5001, %v8106_v34  }
 0x422   : > { %v8113_v23 = vpop.permute.xlu1 %2899 }
 0x423   : > { %12854 = vst [vmem:[#allocation450_spill] sm:$0xff] %v8113_v23  ;;  %v8118_v25 = vpop.permute.xlu0 %2203 }
 0x424   : > { %3035 = vperm.xlu0 %5022, %v7782_v45  }
 0x425   : > { %3309 = vperm.xlu1 %5001, %v8116_v40  }
 0x426   : > { %v8123_v27 = vpop.permute.xlu1 %2905 }
 0x427   : > { %12855 = vst [vmem:[#allocation451_spill] sm:$0xff] %v8123_v27  ;;  %v8128_v16 = vpop.permute.xlu0 %2209  ;;  %v5100_v27 = vld [vmem:[%s5485_s18 + $0xf0] sm:$0xff] }
 0x428   : > { %3041 = vperm.xlu0 %5022, %v7795_v42  }
 0x429   : > { %3315 = vperm.xlu1 %5001, %v8126_v47  }
 0x42a   : > { %v8133_v23 = vpop.permute.xlu1 %2911 }
 0x42b   : > { %12856 = vst [vmem:[#allocation452_spill] sm:$0xff] %v8133_v23  ;;  %v8138_v45 = vpop.permute.xlu0 %2215  ;;  %v8156_v23 = vsel %vm3226_vm14, 1, %v12648_v1  ;;  %vm4054_vm14 = vcmp.eq.s32.totalorder %v7837_v53, 9 }
 0x42c   : > { %12857 = vst [vmem:[#allocation453_spill] sm:$0xff] %v8138_v45  ;;  %3047 = vperm.xlu0 %5022, %v7808_v29  }
 0x42d   : > { %3321 = vperm.xlu1 %5001, %v8136_v50  }
 0x42e   : > { %v8143_v28 = vpop.permute.xlu1 %2917 }
 0x42f   : > { %12858 = vst [vmem:[#allocation454_spill] sm:$0xff] %v8143_v28  ;;  %v8148_v42 = vpop.permute.xlu0 %2221  ;;  %v8166_v28 = vsel %vm3228_vm15, 1, %v12648_v1  ;;  %vm3640_vm15 = vcmp.eq.s32.totalorder %v7850_v8, 8 }
 0x430   : > { %12859 = vst [vmem:[#allocation455_spill] sm:$0xff] %v8148_v42  ;;  %3053 = vperm.xlu0 %5022, %v7821_v33  }
 0x431   : > { %3327 = vperm.xlu1 %5001, %v8146_v58  }
 0x432   : > { %v8153_v45 = vpop.permute.xlu1 %2923 }
 0x433   : > { %12860 = vst [vmem:[#allocation456_spill] sm:$0xff] %v8153_v45  ;;  %v8158_v29 = vpop.permute.xlu0 %2227  ;;  %v8176_v45 = vsel %vm3230_vm0, 1, %v12648_v1  ;;  %vm3642_vm0 = vcmp.eq.s32.totalorder %v7863_v46, 8 }
 0x434   : > { %12861 = vst [vmem:[#allocation457_spill] sm:$0xff] %v8158_v29  ;;  %3059 = vperm.xlu0 %5022, %v7834_v44  }
 0x435   : > { %3333 = vperm.xlu1 %5001, %v8156_v23  }
 0x436   : > { %v8163_v42 = vpop.permute.xlu1 %2929 }
 0x437   : > { %12862 = vst [vmem:[#allocation458_spill] sm:$0xff] %v8163_v42  ;;  %v8168_v33 = vpop.permute.xlu0 %2233 }
 0x438   : > { %12863 = vst [vmem:[#allocation459_spill] sm:$0xff] %v8168_v33  ;;  %3065 = vperm.xlu0 %5022, %v7847_v43  }
 0x439   : > { %3339 = vperm.xlu1 %5001, %v8166_v28  }
 0x43a   : > { %v8173_v29 = vpop.permute.xlu1 %2935 }
 0x43b   : > { %12864 = vst [vmem:[#allocation460_spill] sm:$0xff] %v8173_v29  ;;  %v8178_v44 = vpop.permute.xlu0 %2239 }
 0x43c   : > { %12865 = vst [vmem:[#allocation461_spill] sm:$0xff] %v8178_v44  ;;  %3071 = vperm.xlu0 %5022, %v7860_v54   ;;  %v8196_v44 = vsel %vm3234_vm2, 1, %v12648_v1  ;;  %vm4056_vm2 = vcmp.eq.s32.totalorder %v7850_v8, 9 }
 0x43d   : > { %3345 = vperm.xlu1 %5001, %v8176_v45  }
 0x43e   : > { %v8183_v42 = vpop.permute.xlu1 %2941 }
 0x43f   : > { %12866 = vst [vmem:[#allocation462_spill] sm:$0xff] %v8183_v42  ;;  %v8188_v43 = vpop.permute.xlu0 %2245  ;;  %v8204_v42 = vsel %vm3236_vm3, 1, %v12648_v1  ;;  %vm3646_vm3 = vcmp.eq.s32.totalorder %v7889_v22, 8 }
 0x440   : > { %12867 = vst [vmem:[#allocation463_spill] sm:$0xff] %v8188_v43  ;;  %3077 = vperm.xlu0 %5022, %v7873_v5  }
 0x441   : > { %3351 = vperm.xlu1 %5001, %v8186_v35  }
 0x442   : > { %v8193_v29 = vpop.permute.xlu1 %2947 }
 0x443   : > { %12868 = vst [vmem:[#allocation464_spill] sm:$0xff] %v8193_v29  ;;  %v8198_v54 = vpop.permute.xlu0 %2251 }
 0x444   : > { %12869 = vst [vmem:[#allocation465_spill] sm:$0xff] %v8198_v54  ;;  %3083 = vperm.xlu0 %5022, %v7886_v20   ;;  %v12874_v20 = vld [vmem:[#allocation250_spill] sm:$0xff] }
 0x445   : > { %3357 = vperm.xlu1 %5001, %v8196_v44  }
 0x447   : > { %v8206_v43 = vpop.permute.xlu1 %3017  ;;  %v8208_v5 = vpop.permute.xlu0 %2257 }
 0x448   : > { %12870 = vst [vmem:[#allocation466_spill] sm:$0xff] %v8206_v43  ;;  %12871 = vst [vmem:[#allocation467_spill] sm:$0xff] %v8208_v5  ;;  %3089 = vperm.xlu0 %5022, %v7899_v38   ;;  %v5101_v43 = vld [vmem:[%s5485_s18 + $0x18] sm:$0xff] }
 0x449   : > { %3363 = vperm.xlu1 %5001, %v8204_v42  }
 0x44b   : > { %v8212_v29 = vpop.permute.xlu1 %3020  ;;  %v8214_v54 = vpop.permute.xlu0 %2263 }
 0x44c   : > { %12872 = vst [vmem:[#allocation468_spill] sm:$0xff] %v8212_v29  ;;  %12873 = vst [vmem:[#allocation469_spill] sm:$0xff] %v8214_v54  ;;  %3095 = vperm.xlu0 %5022, %v7912_v56   ;;  %v12879_v54 = vld [vmem:[#allocation254_spill] sm:$0xff] }
 0x44d   : > { %5002 = vset.pattern.permute.xlu1 %v12272_v61 }
 0x44e   : > { %3433 = vperm.xlu1 %5002, %v12874_v20   ;;  %v12881_v20 = vld [vmem:[#allocation258_spill] sm:$0xff] }
 0x44f   : > { %v8219_v13 = vpop.permute.xlu1 %3026  ;;  %v8221_v12 = vpop.permute.xlu0 %2269 }
 0x450   : > { %12875 = vst [vmem:[#allocation250_spill] sm:$0xff] %v8219_v13  ;;  %12876 = vst [vmem:[#allocation470_spill] sm:$0xff] %v8221_v12  ;;  %3101 = vperm.xlu0 %5022, %v7925_v10   ;;  %v12894_v13 = vld [vmem:[#allocation282_spill] sm:$0xff] }
 0x452   : > { %3436 = vperm.xlu1 %5002, %v8056_v32   ;;  %v12883_v32 = vld [vmem:[#allocation262_spill] sm:$0xff] }
 0x453   : > { %v8225_v38 = vpop.permute.xlu1 %3032  ;;  %v8227_v5 = vpop.permute.xlu0 %2275 }
 0x454   : > { %12877 = vst [vmem:[#allocation471_spill] sm:$0xff] %v8225_v38  ;;  %12878 = vst [vmem:[#allocation472_spill] sm:$0xff] %v8227_v5  ;;  %3107 = vperm.xlu0 %5022, %v7936_v49   ;;  %v4422_v38 = vld [vmem:[#allocation5 + $0x8] sm:$0xff] }
 0x456   : > { %3442 = vperm.xlu1 %5002, %v12879_v54   ;;  %v12885_v54 = vld [vmem:[#allocation266_spill] sm:$0xff] }
 0x457   : > { %v8231_v56 = vpop.permute.xlu1 %3038  ;;  %v8233_v29 = vpop.permute.xlu0 %2598 }
 0x458   : > { %12880 = vst [vmem:[#allocation254_spill] sm:$0xff] %v8231_v56  ;;  %3430 = vperm.xlu0 %5022, %v8045_v39  }
 0x45a   : > { %3448 = vperm.xlu1 %5002, %v12881_v20   ;;  %v12887_v20 = vld [vmem:[#allocation270_spill] sm:$0xff] }
 0x45b   : > { %v8237_v12 = vpop.permute.xlu1 %3044  ;;  %v8239_v10 = vpop.permute.xlu0 %2607 }
 0x45c   : > { %12882 = vst [vmem:[#allocation258_spill] sm:$0xff] %v8237_v12  ;;  %3439 = vperm.xlu0 %5022, %v8066_v21  }
 0x45e   : > { %3454 = vperm.xlu1 %5002, %v12883_v32   ;;  %v12888_v32 = vld [vmem:[#allocation274_spill] sm:$0xff] }
 0x45f   : > { %v8243_v5 = vpop.permute.xlu1 %3050  ;;  %v8245_v49 = vpop.permute.xlu0 %2613 }
 0x460   : > { %12884 = vst [vmem:[#allocation262_spill] sm:$0xff] %v8243_v5  ;;  %3445 = vperm.xlu0 %5022, %v8076_v17  }
 0x462   : > { %3460 = vperm.xlu1 %5002, %v12885_v54   ;;  %v12891_v54 = vld [vmem:[#allocation278_spill] sm:$0xff] }
 0x463   : > { %v8249_v56 = vpop.permute.xlu1 %3056  ;;  %v8251_v39 = vpop.permute.xlu0 %2619 }
 0x464   : > { %12886 = vst [vmem:[#allocation266_spill] sm:$0xff] %v8249_v56  ;;  %3451 = vperm.xlu0 %5022, %v8086_v62  }
 0x466   : > { %3466 = vperm.xlu1 %5002, %v12887_v20   ;;  %v4421_v20 = vld [vmem:[#allocation5] sm:$0xff] }
 0x467   : > { %v8255_v12 = vpop.permute.xlu1 %3062  ;;  %v8257_v21 = vpop.permute.xlu0 %2625 }
 0x468   : > { %3457 = vperm.xlu0 %5022, %v8096_v15   ;;  %v4838_v15 = vpack.c.bf16 %v4422_v38, %v4421_v20 }
 0x46a   : > { %3472 = vperm.xlu1 %5002, %v12888_v32  }
 0x46b   : > { %v8261_v5 = vpop.permute.xlu1 %3068  ;;  %v8263_v17 = vpop.permute.xlu0 %2631 }
 0x46c   : > { %12889 = vst [vmem:[#allocation270_spill] sm:$0xff] %v8261_v5  ;;  %12890 = vst [vmem:[#allocation274_spill] sm:$0xff] %v8263_v17  ;;  %3463 = vperm.xlu0 %5022, %v8106_v34   ;;  %v5302_v17 = vmov 0.0|0.0   ;;  %v4424_v34 = vld [vmem:[#allocation5 + $0x18] sm:$0xff] }
 0x46d   : > { %4885 = vmatprep.subr.bf16.mxu1 %v5302_v17  ;;  %4837 = vmatprep.subr.bf16.mxu0 %v5302_v17 }
 0x46e   : > { %3478 = vperm.xlu1 %5002, %v12891_v54   ;;  %4901 = vmatpush1.bf16.msra.mxu1 %v4838_v15  ;;  %v12897_v54 = vld [vmem:[#allocation286_spill] sm:$0xff] }
 0x46f   : > { %v8267_v56 = vpop.permute.xlu1 %3074  ;;  %v8269_v62 = vpop.permute.xlu0 %2637  ;;  %4886 = vmatprep.subr.bf16.mxu1 %v5302_v17  ;;  %4839 = vmatpush1.bf16.msra.mxu0 %v4838_v15 }
 0x470   : > { %12892 = vst [vmem:[#allocation278_spill] sm:$0xff] %v8267_v56  ;;  %12893 = vst [vmem:[#allocation473_spill] sm:$0xff] %v8269_v62  ;;  %3469 = vperm.xlu0 %5022, %v8116_v40   ;;  %v4423_v40 = vld [vmem:[#allocation5 + $0x10] sm:$0xff]  ;;  %4840 = vmatprep.subr.bf16.mxu0 %v5302_v17  ;;  %v12900_v62 = vld [vmem:[#allocation290_spill] sm:$0xff] }
 0x472   : > { %3484 = vperm.xlu1 %5002, %v12894_v13   ;;  %v4841_v13 = vpack.c.bf16 %v4424_v34, %v4423_v40 }
 0x473   : > { %v8273_v32 = vpop.permute.xlu1 %3080  ;;  %v8275_v5 = vpop.permute.xlu0 %2643 }
 0x474   : > { %12895 = vst [vmem:[#allocation282_spill] sm:$0xff] %v8273_v32  ;;  %12896 = vst [vmem:[#allocation474_spill] sm:$0xff] %v8275_v5  ;;  %3475 = vperm.xlu0 %5022, %v8126_v47   ;;  %4902 = vmatpush1.bf16.msra.mxu1 %v4841_v13  ;;  %v4425_v47 = vld [vmem:[#allocation5 + $0x20] sm:$0xff]  ;;  %v4426_v5 = vld [vmem:[#allocation5 + $0x28] sm:$0xff] }
 0x475   : > { %4887 = vmatprep.subr.bf16.mxu1 %v5302_v17  ;;  %4842 = vmatpush1.bf16.msra.mxu0 %v4841_v13  ;;  %v4844_v15 = vpack.c.bf16 %v4426_v5, %v4425_v47  ;;  %v4430_v47 = vld [vmem:[#allocation5 + $0x48] sm:$0xff]  ;;  %v12945_v32 = vld [vmem:[#allocation329_spill] sm:$0xff] }
 0x476   : > { %3490 = vperm.xlu1 %5002, %v12897_v54   ;;  %4843 = vmatprep.subr.bf16.mxu0 %v5302_v17  ;;  %v4428_v54 = vld [vmem:[#allocation5 + $0x38] sm:$0xff] }
 0x477   : > { %v8283_v38 = vpop.permute.xlu1 %3086  ;;  %v8285_v20 = vpop.permute.xlu0 %2649 }
 0x478   : > { %12898 = vst [vmem:[#allocation286_spill] sm:$0xff] %v8283_v38  ;;  %12899 = vst [vmem:[#allocation475_spill] sm:$0xff] %v8285_v20  ;;  %3481 = vperm.xlu0 %5022, %v8136_v50   ;;  %4903 = vmatpush1.bf16.msra.mxu1 %v4844_v15  ;;  %v4427_v50 = vld [vmem:[#allocation5 + $0x30] sm:$0xff]  ;;  %v8722_v20 = vld [vmem:[%s5469_s9 + $0x20] sm:$0xff] }
 0x479   : > { %4888 = vmatprep.subr.bf16.mxu1 %v5302_v17  ;;  %4845 = vmatpush1.bf16.msra.mxu0 %v4844_v15  ;;  %v12903_v38 = vld [vmem:[#allocation293_spill] sm:$0xff]  ;;  %v4847_v13 = vpack.c.bf16 %v4428_v54, %v4427_v50  ;;  %v4432_v54 = vld [vmem:[#allocation5 + $0x58] sm:$0xff]  ;;  %13015 = vst [vmem:[#allocation529_spill] sm:$0xff] %v8722_v20 }
 0x47a   : > { %3496 = vperm.xlu1 %5002, %v12900_v62   ;;  %4846 = vmatprep.subr.bf16.mxu0 %v5302_v17 }
 0x47b   : > { %v8291_v40 = vpop.permute.xlu1 %3092  ;;  %v8293_v34 = vpop.permute.xlu0 %2655 }
 0x47c   : > { %12901 = vst [vmem:[#allocation290_spill] sm:$0xff] %v8291_v40  ;;  %12902 = vst [vmem:[#allocation476_spill] sm:$0xff] %v8293_v34  ;;  %3487 = vperm.xlu0 %5022, %v8146_v58   ;;  %4904 = vmatpush1.bf16.msra.mxu1 %v4847_v13  ;;  %v4429_v58 = vld [vmem:[#allocation5 + $0x40] sm:$0xff]  ;;  %v5090_v34 = vld [vmem:[%s5485_s18 + $0x58] sm:$0xff] }
 0x47d   : > { %4889 = vmatprep.subr.bf16.mxu1 %v5302_v17  ;;  %4848 = vmatpush1.bf16.msra.mxu0 %v4847_v13  ;;  %v12906_v40 = vld [vmem:[#allocation295_spill] sm:$0xff]  ;;  %v4850_v15 = vpack.c.bf16 %v4430_v47, %v4429_v58  ;;  %v4434_v47 = vld [vmem:[#allocation5 + $0x68] sm:$0xff] }
 0x47e   : > { %3502 = vperm.xlu1 %5002, %v12903_v38   ;;  %4849 = vmatprep.subr.bf16.mxu0 %v5302_v17 }
 0x47f   : > { %v8299_v5 = vpop.permute.xlu1 %3098  ;;  %v8301_v62 = vpop.permute.xlu0 %2661 }
 0x480   : > { %12904 = vst [vmem:[#allocation293_spill] sm:$0xff] %v8299_v5  ;;  %12905 = vst [vmem:[#allocation477_spill] sm:$0xff] %v8301_v62  ;;  %3493 = vperm.xlu0 %5022, %v8156_v23   ;;  %4905 = vmatpush1.bf16.msra.mxu1 %v4850_v15  ;;  %v4431_v23 = vld [vmem:[#allocation5 + $0x50] sm:$0xff]  ;;  %v12909_v5 = vld [vmem:[#allocation298_spill] sm:$0xff] }
 0x481   : > { %4890 = vmatprep.subr.bf16.mxu1 %v5302_v17  ;;  %4851 = vmatpush1.bf16.msra.mxu0 %v4850_v15  ;;  %v4853_v13 = vpack.c.bf16 %v4432_v54, %v4431_v23  ;;  %v12912_v15 = vld [vmem:[#allocation300_spill] sm:$0xff] }
 0x482   : > { %3508 = vperm.xlu1 %5002, %v12906_v40   ;;  %4852 = vmatprep.subr.bf16.mxu0 %v5302_v17 }
 0x483   : > { %v8307_v38 = vpop.permute.xlu1 %3104  ;;  %v8309_v50 = vpop.permute.xlu0 %2667 }
 0x484   : > { %12907 = vst [vmem:[#allocation295_spill] sm:$0xff] %v8307_v38  ;;  %12908 = vst [vmem:[#allocation478_spill] sm:$0xff] %v8309_v50  ;;  %3499 = vperm.xlu0 %5022, %v8166_v28   ;;  %4906 = vmatpush1.bf16.msra.mxu1 %v4853_v13  ;;  %v4433_v28 = vld [vmem:[#allocation5 + $0x60] sm:$0xff]  ;;  %v8454_v50 = vsel %vm3644_vm1, 1, %v12648_v1 }
 0x485   : > { %4891 = vmatprep.subr.bf16.mxu1 %v5302_v17  ;;  %4854 = vmatpush1.bf16.msra.mxu0 %v4853_v13  ;;  %v4436_v13 = vld [vmem:[#allocation5 + $0x78] sm:$0xff] }
 0x486   : > { %3514 = vperm.xlu1 %5002, %v12909_v5   ;;  %v4856_v5 = vpack.c.bf16 %v4434_v47, %v4433_v28  ;;  %4855 = vmatprep.subr.bf16.mxu0 %v5302_v17  ;;  %v4859_v28 = vpack.c.bf16 %v4436_v13, %v4435_v0 }
 0x487   : > { %v8315_v40 = vpop.permute.xlu0 %2673 }
 0x488   : > { %12910 = vst [vmem:[#allocation298_spill] sm:$0xff] %v8315_v40  ;;  %v8317_v58 = vpop.permute.xlu1 %3270  ;;  %3505 = vperm.xlu0 %5022, %v8176_v45   ;;  %v3653_v45 = vsel %vm3621_vm4, 1, %v12648_v1  ;;  %4907 = vmatpush1.bf16.msra.mxu1 %v4856_v5  ;;  %v8420_v40 = vsel %vm3638_vm13, 1, %v12648_v1  ;;  %vm3648_vm4 = vcmp.eq.s32.totalorder %v7902_v48, 8 }
 0x489   : > { %12911 = vst [vmem:[#allocation479_spill] sm:$0xff] %v8317_v58  ;;  %4892 = vmatprep.subr.bf16.mxu1 %v5302_v17  ;;  %4857 = vmatpush1.bf16.msra.mxu0 %v4856_v5  ;;  %v4438_v5 = vld [vmem:[#allocation5 + $0x88] sm:$0xff] }
 0x48a   : > { %3520 = vperm.xlu1 %5002, %v12912_v15   ;;  %4858 = vmatprep.subr.bf16.mxu0 %v5302_v17  ;;  %v4862_v0 = vpack.c.bf16 %v4438_v5, %v4437_v11  ;;  %v8740_v58 = vld [vmem:[%s5469_s9 + $0x28] sm:$0xff] }
 0x48b   : > { %v8324_v23 = vpop.permute.xlu0 %2679 }
 0x48c   : > { %12913 = vst [vmem:[#allocation300_spill] sm:$0xff] %v8324_v23  ;;  %v8326_v54 = vpop.permute.xlu1 %3276  ;;  %3511 = vperm.xlu0 %5022, %v8186_v35   ;;  %v8340_v35 = vsel %vm3623_vm5, 1, %v12648_v1  ;;  %4908 = vmatpush1.bf16.msra.mxu1 %v4859_v28  ;;  %v4444_v23 = vld [vmem:[#allocation5 + $0xb8] sm:$0xff]  ;;  %vm3650_vm5 = vcmp.eq.s32.totalorder %v7915_v18, 8 }
 0x48d   : > { %12914 = vst [vmem:[#allocation480_spill] sm:$0xff] %v8326_v54  ;;  %4893 = vmatprep.subr.bf16.mxu1 %v5302_v17  ;;  %4860 = vmatpush1.bf16.msra.mxu0 %v4859_v28  ;;  %v4440_v28 = vld [vmem:[#allocation5 + $0x98] sm:$0xff] }
 0x48e   : > { %5003 = vset.pattern.permute.xlu1 %v12648_v1  ;;  %4861 = vmatprep.subr.bf16.mxu0 %v5302_v17  ;;  %v4865_v11 = vpack.c.bf16 %v4440_v28, %v4439_v36 }
 0x48f   : > { %3686 = vperm.xlu1 %5003, %v3653_v45   ;;  %v8334_v47 = vpop.permute.xlu0 %2685 }
 0x490   : > { %12915 = vst [vmem:[#allocation481_spill] sm:$0xff] %v8334_v47  ;;  %v8336_v15 = vpop.permute.xlu1 %3279  ;;  %3517 = vperm.xlu0 %5022, %v8196_v44   ;;  %v3656_v44 = vsel %vm3624_vm6, 1, %v12648_v1  ;;  %4909 = vmatpush1.bf16.msra.mxu1 %v4862_v0  ;;  %v4442_v47 = vld [vmem:[#allocation5 + $0xa8] sm:$0xff]  ;;  %vm4058_vm6 = vcmp.eq.s32.totalorder %v7863_v46, 9 }
 0x491   : > { %12916 = vst [vmem:[#allocation482_spill] sm:$0xff] %v8336_v15  ;;  %4894 = vmatprep.subr.bf16.mxu1 %v5302_v17  ;;  %4863 = vmatpush1.bf16.msra.mxu0 %v4862_v0  ;;  %v4868_v0 = vpack.c.bf16 %v4442_v47, %v4441_v7 }
 0x492   : > { %4864 = vmatprep.subr.bf16.mxu0 %v5302_v17 }
 0x493   : > { %3692 = vperm.xlu1 %5003, %v8340_v35   ;;  %v8346_v13 = vpop.permute.xlu0 %2691 }
 0x494   : > { %12917 = vst [vmem:[#allocation483_spill] sm:$0xff] %v8346_v13  ;;  %v8348_v38 = vpop.permute.xlu1 %3285  ;;  %3523 = vperm.xlu0 %5022, %v8204_v42   ;;  %v3658_v42 = vsel %vm3626_vm7, 1, %v12648_v1  ;;  %4910 = vmatpush1.bf16.msra.mxu1 %v4865_v11  ;;  %vm3652_vm7 = vcmp.eq.s32.totalorder %v7928_v63, 8 }
 0x495   : > { %12918 = vst [vmem:[#allocation484_spill] sm:$0xff] %v8348_v38  ;;  %4895 = vmatprep.subr.bf16.mxu1 %v5302_v17  ;;  %4866 = vmatpush1.bf16.msra.mxu0 %v4865_v11  ;;  %v4871_v11 = vpack.c.bf16 %v4444_v23, %v4443_v26  ;;  %v8477_v38 = vsel %vm3648_vm4, 1, %v12648_v1  ;;  %v8499_v46 = vsel %vm3652_vm7, 1, %v12648_v1 }
 0x496   : > { %4867 = vmatprep.subr.bf16.mxu0 %v5302_v17  ;;  %12946 = vst [vmem:[#allocation329_spill] sm:$0xff] %v8477_v38  ;;  %12952 = vst [vmem:[#allocation506_spill] sm:$0xff] %v8499_v46 }
 0x497   : > { %3695 = vperm.xlu1 %5003, %v3656_v44   ;;  %v8355_v5 = vpop.permute.xlu0 %3014 }
 0x498   : > { %v8357_v13 = vpop.permute.xlu1 %3291  ;;  %3846 = vperm.xlu0 %5022, %v3653_v45   ;;  %v3660_v45 = vsel %vm3628_vm8, 1, %v12648_v1  ;;  %4911 = vmatpush1.bf16.msra.mxu1 %v4868_v0  ;;  %vm4060_vm8 = vcmp.eq.s32.totalorder %v7876_v51, 9 }
 0x499   : > { %12919 = vst [vmem:[#allocation485_spill] sm:$0xff] %v8357_v13  ;;  %4896 = vmatprep.subr.bf16.mxu1 %v5302_v17  ;;  %4869 = vmatpush1.bf16.msra.mxu0 %v4868_v0  ;;  %v8423_v13 = vsel %vm4054_vm14, 1, %v12648_v1 }
 0x49a   : > { %4870 = vmatprep.subr.bf16.mxu0 %v5302_v17 }
 0x49b   : > { %3701 = vperm.xlu1 %5003, %v3658_v42   ;;  %v8363_v36 = vpop.permute.xlu0 %3023 }
 0x49c   : > { %v8365_v28 = vpop.permute.xlu1 %3297  ;;  %3855 = vperm.xlu0 %5022, %v3656_v44   ;;  %v3662_v44 = vsel %vm3630_vm9, 1, %v12648_v1  ;;  %4912 = vmatpush1.bf16.msra.mxu1 %v4871_v11  ;;  %vm4062_vm9 = vcmp.eq.s32.totalorder %v7889_v22, 9  ;;  %v5088_v22 = vld [vmem:[%s5485_s18] sm:$0xff] }
 0x49d   : > { %12920 = vst [vmem:[#allocation486_spill] sm:$0xff] %v8365_v28  ;;  %4897 = vmatprep.subr.bf16.mxu1 %v5302_v17  ;;  %v4446_v28 = vld [vmem:[#allocation5 + $0xc8] sm:$0xff]  ;;  %4872 = vmatpush1.bf16.msra.mxu0 %v4871_v11 }
 0x49e   : > { %v4874_v0 = vpack.c.bf16 %v4446_v28, %v4445_v57  ;;  %4873 = vmatprep.subr.bf16.mxu0 %v5302_v17 }
 0x49f   : > { %3707 = vperm.xlu1 %5003, %v3660_v45   ;;  %v8371_v47 = vpop.permute.xlu0 %3029 }
 0x4a0   : > { %v8373_v7 = vpop.permute.xlu1 %3303  ;;  %3861 = vperm.xlu0 %5022, %v3658_v42   ;;  %v8384_v42 = vsel %vm3632_vm10, 1, %v12648_v1  ;;  %4913 = vmatpush1.bf16.msra.mxu1 %v4874_v0  ;;  %vm4037_vm10 = vcmp.eq.s32.totalorder %v5088_v22, 9 }
 0x4a1   : > { %12921 = vst [vmem:[#allocation487_spill] sm:$0xff] %v8373_v7  ;;  %12923 = vst [vmem:[#allocation489_spill] sm:$0xff] %v8384_v42  ;;  %4898 = vmatprep.subr.bf16.mxu1 %v5302_v17  ;;  %v4448_v7 = vld [vmem:[#allocation5 + $0xd8] sm:$0xff]  ;;  %4875 = vmatpush1.bf16.msra.mxu0 %v4874_v0  ;;  %v4450_v0 = vld [vmem:[#allocation5 + $0xe8] sm:$0xff] }
 0x4a2   : > { %v4877_v28 = vpack.c.bf16 %v4448_v7, %v4447_v24  ;;  %4876 = vmatprep.subr.bf16.mxu0 %v5302_v17  ;;  %v4880_v7 = vpack.c.bf16 %v4450_v0, %v4449_v6 }
 0x4a3   : > { %3713 = vperm.xlu1 %5003, %v3662_v44   ;;  %v8379_v23 = vpop.permute.xlu0 %3035 }
 0x4a4   : > { %v8381_v26 = vpop.permute.xlu1 %3309  ;;  %3867 = vperm.xlu0 %5022, %v3660_v45   ;;  %v8395_v45 = vsel %vm3634_vm11, 1, %v12648_v1  ;;  %4914 = vmatpush1.bf16.msra.mxu1 %v4877_v28 }
 0x4a5   : > { %12922 = vst [vmem:[#allocation488_spill] sm:$0xff] %v8381_v26  ;;  %12925 = vst [vmem:[#allocation491_spill] sm:$0xff] %v8395_v45  ;;  %4899 = vmatprep.subr.bf16.mxu1 %v5302_v17  ;;  %4878 = vmatpush1.bf16.msra.mxu0 %v4877_v28  ;;  %v8407_v26 = vsel %vm3636_vm12, 1, %v12648_v1  ;;  %v4452_v28 = vld [vmem:[#allocation5 + $0xf8] sm:$0xff]  ;;  %vm4048_vm12 = vcmp.eq.s32.totalorder %v5090_v34, 9 }
 0x4a6   : > { %4879 = vmatprep.subr.bf16.mxu0 %v5302_v17  ;;  %v4883_v6 = vpack.c.bf16 %v4452_v28, %v4451_v59  ;;  %v12937_v28 = vld [vmem:[#allocation326_spill] sm:$0xff] }
 0x4a7   : > { %3719 = vperm.xlu1 %5003, %v8384_v42   ;;  %v8390_v11 = vpop.permute.xlu0 %3041 }
 0x4a8   : > { %v8392_v57 = vpop.permute.xlu1 %3315  ;;  %3873 = vperm.xlu0 %5022, %v3662_v44   ;;  %v12928_v44 = vld [vmem:[#allocation323_spill] sm:$0xff]  ;;  %4915 = vmatpush1.bf16.msra.mxu1 %v4880_v7 }
 0x4a9   : > { %12924 = vst [vmem:[#allocation490_spill] sm:$0xff] %v8392_v57  ;;  %12929 = vst [vmem:[#allocation323_spill] sm:$0xff] %v8407_v26  ;;  %4900 = vmatprep.subr.bf16.mxu1 %v5302_v17  ;;  %4881 = vmatpush1.bf16.msra.mxu0 %v4880_v7  ;;  %v8433_v7 = vsel %vm3640_vm15, 1, %v12648_v1 }
 0x4aa   : > { %4882 = vmatprep.subr.bf16.mxu0 %v5302_v17 }
 0x4ab   : > { %3725 = vperm.xlu1 %5003, %v8395_v45   ;;  %v8401_v24 = vpop.permute.xlu0 %3047 }
 0x4ac   : > { %12926 = vst [vmem:[#allocation492_spill] sm:$0xff] %v8401_v24  ;;  %v8403_v57 = vpop.permute.xlu1 %3321  ;;  %3894 = vperm.xlu0 %5022, %v12928_v44   ;;  %v12932_v24 = vld [vmem:[#allocation347_spill] sm:$0xff]  ;;  %4916 = vmatpush1.bf16.msra.mxu1 %v4883_v6 }
 0x4ad   : > { %12927 = vst [vmem:[#allocation493_spill] sm:$0xff] %v8403_v57  ;;  %4884 = vmatpush1.bf16.msra.mxu0 %v4883_v6  ;;  %v8443_v6 = vsel %vm3642_vm0, 1, %v12648_v1 }
 0x4af   : > { %3731 = vperm.xlu1 %5003, %v8407_v26   ;;  %v8414_v0 = vpop.permute.xlu0 %3053  ;;  %v12940_v26 = vld [vmem:[#allocation350_spill] sm:$0xff] }
 0x4b0   : > { %12930 = vst [vmem:[#allocation494_spill] sm:$0xff] %v8414_v0  ;;  %v8416_v44 = vpop.permute.xlu1 %3327  ;;  %4310 = vperm.xlu0 %5022, %v12932_v24  }
 0x4b1   : > { %12931 = vst [vmem:[#allocation495_spill] sm:$0xff] %v8416_v44 }
 0x4b3   : > { %3737 = vperm.xlu1 %5003, %v8420_v40   ;;  %v8427_v53 = vpop.permute.xlu0 %3059 }
 0x4b4   : > { %12933 = vst [vmem:[#allocation347_spill] sm:$0xff] %v8427_v53  ;;  %v8429_v17 = vpop.permute.xlu1 %3333  ;;  %4313 = vperm.xlu0 %5022, %v8423_v13  }
 0x4b5   : > { %12934 = vst [vmem:[#allocation496_spill] sm:$0xff] %v8429_v17 }
 0x4b7   : > { %3743 = vperm.xlu1 %5003, %v8433_v7   ;;  %v8437_v24 = vpop.permute.xlu0 %3065 }
 0x4b8   : > { %12935 = vst [vmem:[#allocation497_spill] sm:$0xff] %v8437_v24  ;;  %v8439_v59 = vpop.permute.xlu1 %3339  ;;  %3900 = vperm.xlu0 %5022, %v12937_v28   ;;  %v8457_v28 = vsel %vm4056_vm2, 1, %v12648_v1  ;;  %v8706_v24 = vld [vmem:[%s5469_s9 + $0x2d0] sm:$0xff] }
 0x4b9   : > { %12936 = vst [vmem:[#allocation498_spill] sm:$0xff] %v8439_v59 }
 0x4bb   : > { %3749 = vperm.xlu1 %5003, %v8443_v6   ;;  %v8448_v53 = vpop.permute.xlu0 %3071 }
 0x4bc   : > { %12938 = vst [vmem:[#allocation326_spill] sm:$0xff] %v8448_v53  ;;  %v8450_v0 = vpop.permute.xlu1 %3345  ;;  %4316 = vperm.xlu0 %5022, %v12940_v26   ;;  %v4069_v53 = vsel %vm4037_vm10, 1, %v12648_v1 }
 0x4bd   : > { %12939 = vst [vmem:[#allocation499_spill] sm:$0xff] %v8450_v0  ;;  %v8467_v0 = vsel %vm3646_vm3, 1, %v12648_v1 }
 0x4bf   : > { %3755 = vperm.xlu1 %5003, %v8454_v50   ;;  %v8461_v59 = vpop.permute.xlu0 %3077 }
 0x4c0   : > { %12941 = vst [vmem:[#allocation350_spill] sm:$0xff] %v8461_v59  ;;  %v8463_v8 = vpop.permute.xlu1 %3351  ;;  %4319 = vperm.xlu0 %5022, %v8457_v28   ;;  %v12949_v59 = vld [vmem:[#allocation353_spill] sm:$0xff] }
 0x4c1   : > { %12942 = vst [vmem:[#allocation500_spill] sm:$0xff] %v8463_v8 }
 0x4c3   : > { %3761 = vperm.xlu1 %5003, %v8467_v0   ;;  %v8471_v26 = vpop.permute.xlu0 %3083 }
 0x4c4   : > { %12943 = vst [vmem:[#allocation501_spill] sm:$0xff] %v8471_v26  ;;  %v8473_v17 = vpop.permute.xlu1 %3357  ;;  %3906 = vperm.xlu0 %5022, %v12945_v32   ;;  %v8488_v26 = vsel %vm3650_vm5, 1, %v12648_v1  ;;  %v8491_v32 = vsel %vm4058_vm6, 1, %v12648_v1 }
 0x4c5   : > { %12944 = vst [vmem:[#allocation502_spill] sm:$0xff] %v8473_v17  ;;  %12950 = vst [vmem:[#allocation353_spill] sm:$0xff] %v8488_v26  ;;  %v12955_v17 = vld [vmem:[#allocation332_spill] sm:$0xff] }
 0x4c7   : > { %3767 = vperm.xlu1 %5003, %v8477_v38   ;;  %v8482_v8 = vpop.permute.xlu0 %3089 }
 0x4c8   : > { %12947 = vst [vmem:[#allocation503_spill] sm:$0xff] %v8482_v8  ;;  %v8484_v48 = vpop.permute.xlu1 %3363  ;;  %4322 = vperm.xlu0 %5022, %v12949_v59  }
 0x4c9   : > { %12948 = vst [vmem:[#allocation504_spill] sm:$0xff] %v8484_v48 }
 0x4cb   : > { %3773 = vperm.xlu1 %5003, %v8488_v26   ;;  %v8495_v18 = vpop.permute.xlu0 %3095  ;;  %v12959_v26 = vld [vmem:[#allocation356_spill] sm:$0xff] }
 0x4cc   : > { %12951 = vst [vmem:[#allocation505_spill] sm:$0xff] %v8495_v18  ;;  %4325 = vperm.xlu0 %5022, %v8491_v32   ;;  %v12958_v18 = vld [vmem:[#allocation303_spill] sm:$0xff] }
 0x4cd   : > { %v8501_v48 = vpop.permute.xlu1 %3433 }
 0x4ce   : > { %12953 = vst [vmem:[#allocation507_spill] sm:$0xff] %v8501_v48 }
 0x4cf   : > { %3779 = vperm.xlu1 %5003, %v8499_v46   ;;  %v8504_v59 = vpop.permute.xlu0 %3101  ;;  %v8518_v46 = vsel %vm4060_vm8, 1, %v12648_v1 }
 0x4d0   : > { %12954 = vst [vmem:[#allocation508_spill] sm:$0xff] %v8504_v59  ;;  %3912 = vperm.xlu0 %5022, %v12955_v17  }
 0x4d1   : > { %v8507_v8 = vpop.permute.xlu1 %3436 }
 0x4d2   : > { %12956 = vst [vmem:[#allocation332_spill] sm:$0xff] %v8507_v8 }
 0x4d3   : > { %5004 = vset.pattern.permute.xlu1 %v12272_v61  ;;  %v8511_v63 = vpop.permute.xlu0 %3107 }
 0x4d4   : > { %12957 = vst [vmem:[#allocation509_spill] sm:$0xff] %v8511_v63  ;;  %3849 = vperm.xlu1 %5004, %v12958_v18   ;;  %4328 = vperm.xlu0 %5022, %v12959_v26   ;;  %v12962_v63 = vld [vmem:[#allocation305_spill] sm:$0xff]  ;;  %v12963_v26 = vld [vmem:[#allocation335_spill] sm:$0xff] }
 0x4d5   : > { %v8515_v62 = vpop.permute.xlu1 %3442 }
 0x4d6   : > { %12960 = vst [vmem:[#allocation303_spill] sm:$0xff] %v8515_v62  ;;  %v12965_v62 = vld [vmem:[#allocation308_spill] sm:$0xff] }
 0x4d7   : > { %v8520_v59 = vpop.permute.xlu0 %3430 }
 0x4d8   : > { %3852 = vperm.xlu1 %5004, %v8340_v35   ;;  %4331 = vperm.xlu0 %5022, %v8518_v46   ;;  %v12966_v35 = vld [vmem:[#allocation359_spill] sm:$0xff] }
 0x4d9   : > { %v8524_v51 = vpop.permute.xlu1 %3448 }
 0x4da   : > { %12961 = vst [vmem:[#allocation356_spill] sm:$0xff] %v8524_v51  ;;  %v8540_v51 = vsel %vm4062_vm9, 1, %v12648_v1 }
 0x4db   : > { %v8526_v17 = vpop.permute.xlu0 %3439  ;;  %12968 = vst [vmem:[#allocation308_spill] sm:$0xff] %v8540_v51 }
 0x4dc   : > { %3858 = vperm.xlu1 %5004, %v12962_v63   ;;  %3918 = vperm.xlu0 %5022, %v12963_v26   ;;  %v12969_v63 = vld [vmem:[#allocation311_spill] sm:$0xff] }
 0x4dd   : > { %v8530_v18 = vpop.permute.xlu1 %3454 }
 0x4de   : > { %12964 = vst [vmem:[#allocation305_spill] sm:$0xff] %v8530_v18  ;;  %v12972_v18 = vld [vmem:[#allocation338_spill] sm:$0xff] }
 0x4df   : > { %v8533_v45 = vpop.permute.xlu0 %3445 }
 0x4e0   : > { %3864 = vperm.xlu1 %5004, %v12965_v62   ;;  %4334 = vperm.xlu0 %5022, %v12966_v35   ;;  %v5089_v62 = vld [vmem:[%s5485_s18 + $0xd0] sm:$0xff] }
 0x4e1   : > { %v8537_v44 = vpop.permute.xlu1 %3460  ;;  %vm4063_vm11 = vcmp.eq.s32.totalorder %v5089_v62, 9 }
 0x4e2   : > { %12967 = vst [vmem:[#allocation335_spill] sm:$0xff] %v8537_v44  ;;  %v12971_v44 = vld [vmem:[#allocation314_spill] sm:$0xff] }
 0x4e3   : > { %v8542_v56 = vpop.permute.xlu0 %3451 }
 0x4e4   : > { %3870 = vperm.xlu1 %5004, %v12969_v63   ;;  %4337 = vperm.xlu0 %5022, %v8540_v51   ;;  %v4095_v63 = vsel %vm4063_vm11, 1, %v12648_v1  ;;  %v13008_v51 = vld [vmem:[#allocation393_spill] sm:$0xff] }
 0x4e5   : > { %v8546_v26 = vpop.permute.xlu1 %3466 }
 0x4e6   : > { %12970 = vst [vmem:[#allocation359_spill] sm:$0xff] %v8546_v26 }
 0x4e7   : > { %v8550_v35 = vpop.permute.xlu0 %3457 }
 0x4e8   : > { %3876 = vperm.xlu1 %5004, %v12971_v44   ;;  %3924 = vperm.xlu0 %5022, %v12972_v18   ;;  %v8564_v44 = vsel %vm4048_vm12, 1, %v12648_v1  ;;  %v5091_v18 = vld [vmem:[%s5485_s18 + $0x60] sm:$0xff] }
 0x4e9   : > { %v8554_v15 = vpop.permute.xlu1 %3472  ;;  %12975 = vst [vmem:[#allocation338_spill] sm:$0xff] %v8564_v44  ;;  %vm4049_vm13 = vcmp.eq.s32.totalorder %v5091_v18, 9  ;;  %v5093_v18 = vld [vmem:[%s5485_s18 + $0x8] sm:$0xff] }
 0x4ea   : > { %12973 = vst [vmem:[#allocation311_spill] sm:$0xff] %v8554_v15  ;;  %v8574_v15 = vsel %vm4049_vm13, 1, %v12648_v1  ;;  %vm4038_vm15 = vcmp.eq.s32.totalorder %v5093_v18, 9  ;;  %vm4067_vm13 = vcmp.eq.s32.totalorder %v5100_v27, 9  ;;  %v8719_v27 = vld [vmem:[%s5469_s9 + $0x198] sm:$0xff] }
 0x4eb   : > { %v8559_v26 = vpop.permute.xlu0 %3463  ;;  %12978 = vst [vmem:[#allocation512_spill] sm:$0xff] %v8574_v15 }
 0x4ec   : > { %12974 = vst [vmem:[#allocation314_spill] sm:$0xff] %v8559_v26  ;;  %4262 = vperm.xlu1 %5004, %v4069_v53   ;;  %4340 = vperm.xlu0 %5022, %v4095_v63   ;;  %v5092_v26 = vld [vmem:[%s5485_s18 + $0x68] sm:$0xff] }
 0x4ed   : > { %v8561_v22 = vpop.permute.xlu1 %3478  ;;  %vm4050_vm14 = vcmp.eq.s32.totalorder %v5092_v26, 9  ;;  %v4070_v26 = vsel %vm4038_vm15, 1, %v12648_v1  ;;  %vm622_vm15 = vcmp.eq.s32.totalorder %v13008_v51, 1 }
 0x4ee   : > { %v8727_v33 = vsel %vm622_vm15, %v8706_v24, 0.0  ;;  %vm3112_vm15 = vcmp.eq.s32.totalorder %v8363_v36, 1 }
 0x4ef   : > { %v8567_v62 = vpop.permute.xlu0 %3469 }
 0x4f0   : > { %12976 = vst [vmem:[#allocation510_spill] sm:$0xff] %v8567_v62  ;;  %5005 = vset.pattern.permute.xlu1 %v12648_v1  ;;  %4295 = vperm.xlu0 %5022, %v8564_v44   ;;  %v5094_v44 = vld [vmem:[%s5485_s18 + $0x70] sm:$0xff] }
 0x4f1   : > { %4102 = vperm.xlu1 %5005, %v4069_v53   ;;  %v8571_v34 = vpop.permute.xlu1 %3484  ;;  %v8585_v53 = vsel %vm4050_vm14, 1, %v12648_v1  ;;  %vm4051_vm0 = vcmp.eq.s32.totalorder %v5094_v44, 9  ;;  %vm4040_vm14 = vcmp.eq.s32.totalorder %v5101_v43, 9  ;;  %v1096_v43 = vld [vmem:[%s5469_s9 + $0x100] sm:$0xff] }
 0x4f2   : > { %12977 = vst [vmem:[#allocation511_spill] sm:$0xff] %v8571_v34  ;;  %12981 = vst [vmem:[#allocation515_spill] sm:$0xff] %v8585_v53  ;;  %v8596_v18 = vsel %vm4051_vm0, 1, %v12648_v1  ;;  %v8663_v34 = vld [vmem:[%s5469_s9 + $0x190] sm:$0xff]  ;;  %vm1861_vm0 = vcmp.eq.s32.totalorder %v7971_v52, 1  ;;  %v1512_v52 = vld [vmem:[%s5469_s9 + $0x108] sm:$0xff] }
 0x4f3   : > { %v8577_v54 = vpop.permute.xlu0 %3475  ;;  %12984 = vst [vmem:[#allocation518_spill] sm:$0xff] %v8596_v18 }
 0x4f4   : > { %12979 = vst [vmem:[#allocation513_spill] sm:$0xff] %v8577_v54  ;;  %4298 = vperm.xlu0 %5022, %v8574_v15   ;;  %v5095_v15 = vld [vmem:[%s5485_s18 + $0x78] sm:$0xff] }
 0x4f5   : > { %5006 = vset.pattern.permute.xlu1 %v12272_v61  ;;  %v8582_v62 = vpop.permute.xlu1 %3490  ;;  %vm4052_vm1 = vcmp.eq.s32.totalorder %v5095_v15, 9  ;;  %v5096_v15 = vld [vmem:[%s5485_s18 + $0x10] sm:$0xff] }
 0x4f6   : > { %12980 = vst [vmem:[#allocation514_spill] sm:$0xff] %v8582_v62  ;;  %3897 = vperm.xlu1 %5006, %v8420_v40   ;;  %v8605_v44 = vsel %vm4052_vm1, 1, %v12648_v1  ;;  %vm4039_vm2 = vcmp.eq.s32.totalorder %v5096_v15, 9 }
 0x4f7   : > { %v8589_v38 = vpop.permute.xlu0 %3481  ;;  %12987 = vst [vmem:[#allocation521_spill] sm:$0xff] %v8605_v44 }
 0x4f8   : > { %12982 = vst [vmem:[#allocation516_spill] sm:$0xff] %v8589_v38  ;;  %4301 = vperm.xlu0 %5022, %v8585_v53  }
 0x4f9   : > { %v8593_v54 = vpop.permute.xlu1 %3496 }
 0x4fa   : > { %12983 = vst [vmem:[#allocation517_spill] sm:$0xff] %v8593_v54  ;;  %4265 = vperm.xlu1 %5006, %v4070_v26  }
 0x4fb   : > { %v8599_v62 = vpop.permute.xlu0 %3487 }
 0x4fc   : > { %12985 = vst [vmem:[#allocation519_spill] sm:$0xff] %v8599_v62  ;;  %4304 = vperm.xlu0 %5022, %v8596_v18  }
 0x4fd   : > { %v8602_v40 = vpop.permute.xlu1 %3502 }
 0x4fe   : > { %12986 = vst [vmem:[#allocation520_spill] sm:$0xff] %v8602_v40  ;;  %5007 = vset.pattern.permute.xlu1 %v12648_v1  ;;  %v5097_v40 = vld [vmem:[%s5485_s18 + $0xd8] sm:$0xff] }
 0x4ff   : > { %4105 = vperm.xlu1 %5007, %v4070_v26   ;;  %v8608_v54 = vpop.permute.xlu0 %3493  ;;  %vm4064_vm3 = vcmp.eq.s32.totalorder %v5097_v40, 9  ;;  %v4071_v26 = vsel %vm4039_vm2, 1, %v12648_v1  ;;  %vm2277_vm2 = vcmp.eq.s32.totalorder %v8088_v19, 1 }
 0x500   : > { %12988 = vst [vmem:[#allocation522_spill] sm:$0xff] %v8608_v54  ;;  %4307 = vperm.xlu0 %5022, %v8605_v44   ;;  %v8623_v44 = vsel %vm4064_vm3, 1, %v12648_v1  ;;  %v12997_v54 = vld [vmem:[#allocation173_spill] sm:$0xff] }
 0x501   : > { %v8611_v53 = vpop.permute.xlu1 %3508  ;;  %12992 = vst [vmem:[#allocation526_spill] sm:$0xff] %v8623_v44  ;;  %vm1029_vm6 = vcmp.eq.s32.totalorder %v12997_v54, 1  ;;  %v8652_v54 = vld [vmem:[%s5469_s9 + $0xf0] sm:$0xff] }
 0x502   : > { %12989 = vst [vmem:[#allocation523_spill] sm:$0xff] %v8611_v53  ;;  %v12994_v53 = vld [vmem:[#allocation389_spill] sm:$0xff] }
 0x503   : > { %4153 = vperm.xlu1 %5007, %v8423_v13   ;;  %v8615_v18 = vpop.permute.xlu0 %3499  ;;  %v5098_v13 = vld [vmem:[%s5485_s18 + $0xe0] sm:$0xff]  ;;  %vm613_vm5 = vcmp.eq.s32.totalorder %v12994_v53, 1  ;;  %v12999_v53 = vld [vmem:[#allocation390_spill] sm:$0xff] }
 0x504   : > { %12990 = vst [vmem:[#allocation524_spill] sm:$0xff] %v8615_v18  ;;  %5036 = vset.pattern.permute.xlu0 %v12648_v1  ;;  %vm4065_vm4 = vcmp.eq.s32.totalorder %v5098_v13, 9  ;;  %v5099_v13 = vld [vmem:[%s5485_s18 + $0xe8] sm:$0xff]  ;;  %vm616_vm8 = vcmp.eq.s32.totalorder %v12999_v53, 1 }
 0x505   : > { %v8619_v62 = vpop.permute.xlu1 %3514  ;;  %4180 = vperm.xlu0 %5036, %v4095_v63   ;;  %v8634_v63 = vld [vmem:[%s5469_s9] sm:$0xff]  ;;  %vm4066_vm7 = vcmp.eq.s32.totalorder %v5099_v13, 9  ;;  %v13002_v53 = vld [vmem:[#allocation288_spill] sm:$0xff] }
 0x506   : > { %12991 = vst [vmem:[#allocation525_spill] sm:$0xff] %v8619_v62  ;;  %v8637_v62 = vsel %vm4065_vm4, 1, %v12648_v1  ;;  %v645_v18 = vsel %vm613_vm5, %v8634_v63, 0.0  ;;  %vm1445_vm11 = vcmp.eq.s32.totalorder %v13002_v53, 1  ;;  %v8660_v42 = vsel %vm4066_vm7, 1, %v12648_v1 }
 0x507   : > { %5008 = vset.pattern.permute.xlu1 %v12272_v61  ;;  %v8626_v15 = vpop.permute.xlu0 %3505  ;;  %12996 = vst [vmem:[#allocation528_spill] sm:$0xff] %v8637_v62  ;;  %v8703_v53 = vsel %vm4067_vm13, 1, %v12648_v1  ;;  %vm2693_vm4 = vcmp.eq.s32.totalorder %v8233_v29, 1  ;;  %vm3109_vm7 = vcmp.eq.s32.totalorder %v8355_v5, 1  ;;  %vm2696_vm13 = vcmp.eq.s32.totalorder %v8239_v10, 1  ;;  %v8769_v29 = vld [vmem:[%s5469_s9 + $0x38] sm:$0xff] }
 0x508   : > { %12993 = vst [vmem:[#allocation527_spill] sm:$0xff] %v8626_v15  ;;  %4268 = vperm.xlu1 %5008, %v4071_v26   ;;  %13011 = vst [vmem:[#allocation393_spill] sm:$0xff] %v8703_v53 }
 0x509   : > { %v8630_v40 = vpop.permute.xlu1 %3520  ;;  %4183 = vperm.xlu0 %5036, %v8623_v44   ;;  %v13000_v44 = vld [vmem:[#allocation391_spill] sm:$0xff] }
 0x50a   : > { %12995 = vst [vmem:[#allocation389_spill] sm:$0xff] %v8630_v40  ;;  %v8647_v40 = vld [vmem:[%s5469_s9 + $0x8] sm:$0xff]  ;;  %vm618_vm9 = vcmp.eq.s32.totalorder %v13000_v44, 1  ;;  %13004 = vst [vmem:[#allocation391_spill] sm:$0xff] %v8660_v42 }
 0x50b   : > { %v8641_v15 = vpop.permute.xlu0 %3511  ;;  %v1061_v13 = vsel %vm1029_vm6, %v8647_v40, %v645_v18  ;;  %v8674_v18 = vld [vmem:[%s5469_s9 + $0x10] sm:$0xff]  ;;  %v650_v48 = vsel %vm618_vm9, %v8663_v34, 0.0  ;;  %vm1864_vm6 = vcmp.eq.s32.totalorder %v7977_v55, 1  ;;  %vm3525_vm9 = vcmp.eq.s32.totalorder %v8520_v59, 1 }
 0x50c   : > { %12998 = vst [vmem:[#allocation173_spill] sm:$0xff] %v8641_v15  ;;  %5009 = vset.pattern.permute.xlu1 %v12648_v1  ;;  %v13001_v15 = vld [vmem:[#allocation392_spill] sm:$0xff]  ;;  %13007 = vst [vmem:[#allocation288_spill] sm:$0xff] %v8674_v18  ;;  %v1477_v38 = vsel %vm1445_vm11, %v8674_v18, %v1061_v13  ;;  %v13118_v18 = vld [vmem:[#allocation107_spill] sm:$0xff] }
 0x50d   : > { %4108 = vperm.xlu1 %5009, %v4071_v26   ;;  %4186 = vperm.xlu0 %5036, %v8637_v62   ;;  %vm620_vm10 = vcmp.eq.s32.totalorder %v13001_v15, 1  ;;  %v648_v26 = vsel %vm616_vm8, %v8652_v54, 0.0  ;;  %v13005_v62 = vld [vmem:[#allocation177_spill] sm:$0xff]  ;;  %v13009_v15 = vld [vmem:[#allocation180_spill] sm:$0xff] }
 0x50e   : > { %v8657_v8 = vpop.permute.xlu1 %3686  ;;  %vm1032_vm12 = vcmp.eq.s32.totalorder %v13005_v62, 1  ;;  %vm1034_vm1 = vcmp.eq.s32.totalorder %v13009_v15, 1  ;;  %v13013_v62 = vld [vmem:[#allocation407_spill] sm:$0xff] }
 0x50f   : > { %13003 = vst [vmem:[#allocation390_spill] sm:$0xff] %v8657_v8  ;;  %v8667_v57 = vpop.permute.xlu0 %3517  ;;  %v1064_v44 = vsel %vm1032_vm12, %v8681_v4, %v648_v26  ;;  %vm1448_vm3 = vcmp.eq.s32.totalorder %v13013_v62, 1  ;;  %v1066_v30 = vsel %vm1034_vm1, %v8719_v27, %v650_v48  ;;  %v13016_v8 = vld [vmem:[#allocation183_spill] sm:$0xff]  ;;  %v8751_v48 = vld [vmem:[%s5469_s9 + $0x30] sm:$0xff]  ;;  %v13021_v62 = vld [vmem:[#allocation54_spill] sm:$0xff]  ;;  %vm3528_vm1 = vcmp.eq.s32.totalorder %v8526_v17, 1 }
 0x510   : > { %13006 = vst [vmem:[#allocation392_spill] sm:$0xff] %v8667_v57  ;;  %v652_v57 = vsel %vm620_vm10, %v8671_v41, 0.0  ;;  %vm1036_vm8 = vcmp.eq.s32.totalorder %v13016_v8, 1  ;;  %13017 = vst [vmem:[#allocation183_spill] sm:$0xff] %v8740_v58  ;;  %vm2280_vm10 = vcmp.eq.s32.totalorder %v8098_v14, 1  ;;  %vm469_vm11 = vcmp.eq.s32.totalorder %v13021_v62, 1 }
 0x511   : > { %5010 = vset.pattern.permute.xlu1 %v12272_v61  ;;  %4189 = vperm.xlu0 %5036, %v8660_v42   ;;  %v8709_v42 = vld [vmem:[%s5469_s9 + $0x18] sm:$0xff]  ;;  %13018 = vst [vmem:[#allocation530_spill] sm:$0xff] %v8751_v48  ;;  %13023 = vst [vmem:[#allocation54_spill] sm:$0xff] %v8769_v29  ;;  %v2760_v8 = vld [vmem:[%s5469_s9 + $0x120] sm:$0xff] }
 0x512   : > { %3903 = vperm.xlu1 %5010, %v8433_v7   ;;  %v8699_v13 = vpop.permute.xlu1 %3692  ;;  %13012 = vst [vmem:[#allocation180_spill] sm:$0xff] %v8709_v42  ;;  %v4072_v7 = vsel %vm4040_vm14, 1, %v12648_v1  ;;  %vm1866_vm14 = vcmp.eq.s32.totalorder %v7983_v3, 1  ;;  %v1516_v17 = vld [vmem:[%s5469_s9 + $0x248] sm:$0xff] }
 0x513   : > { %13010 = vst [vmem:[#allocation177_spill] sm:$0xff] %v8699_v13  ;;  %v8713_v26 = vpop.permute.xlu0 %3523  ;;  %v5102_v13 = vld [vmem:[%s5485_s18 + $0xf8] sm:$0xff] }
 0x514   : > { %13014 = vst [vmem:[#allocation407_spill] sm:$0xff] %v8713_v26  ;;  %vm4068_vm5 = vcmp.eq.s32.totalorder %v5102_v13, 9  ;;  %v1893_v26 = vsel %vm1861_vm0, %v8709_v42, %v1477_v38  ;;  %v1480_v38 = vsel %vm1448_vm3, %v1096_v43, %v1064_v44  ;;  %v13022_v44 = vld [vmem:[#allocation409_spill] sm:$0xff]  ;;  %vm2282_vm3 = vcmp.eq.s32.totalorder %v8108_v9, 1  ;;  %v699_v42 = vld [vmem:[%s5469_s9 + $0x6e8] sm:$0xff] }
 0x515   : > { %v2309_v51 = vsel %vm2277_vm2, %v8722_v20, %v1893_v26  ;;  %4192 = vperm.xlu0 %5036, %v8703_v53   ;;  %v8761_v26 = vsel %vm4068_vm5, 1, %v12648_v1  ;;  %vm1450_vm12 = vcmp.eq.s32.totalorder %v13022_v44, 1  ;;  %v1896_v43 = vsel %vm1864_vm6, %v1512_v52, %v1480_v38  ;;  %v8775_v53 = vld [vmem:[%s5469_s9 + $0x238] sm:$0xff]  ;;  %v8784_v52 = vld [vmem:[%s5469_s9 + $0x40] sm:$0xff]  ;;  %v9274_v20 = vld [vmem:[%s5469_s9 + $0x648] sm:$0xff] }
 0x516   : > { %v2725_v19 = vsel %vm2693_vm4, %v8740_v58, %v2309_v51  ;;  %4271 = vperm.xlu1 %5010, %v4072_v7   ;;  %v8757_v15 = vpop.permute.xlu1 %3695  ;;  %13020 = vst [vmem:[#allocation532_spill] sm:$0xff] %v8761_v26  ;;  %13024 = vst [vmem:[#allocation409_spill] sm:$0xff] %v8784_v52  ;;  %v1098_v38 = vld [vmem:[%s5469_s9 + $0x1a0] sm:$0xff]  ;;  %v1068_v5 = vsel %vm1036_vm8, %v8775_v53, %v652_v57  ;;  %vm2698_vm5 = vcmp.eq.s32.totalorder %v8245_v49, 1  ;;  %vm1868_vm6 = vcmp.eq.s32.totalorder %v7989_v37, 1 }
 0x517   : > { %13019 = vst [vmem:[#allocation531_spill] sm:$0xff] %v8757_v15  ;;  %v3141_v51 = vsel %vm3109_vm7, %v8751_v48, %v2725_v19  ;;  %v3847_v13 = vpop.permute.xlu0 %3846  ;;  %v1928_v15 = vld [vmem:[%s5469_s9 + $0x110] sm:$0xff]  ;;  %v2344_v19 = vld [vmem:[%s5469_s9 + $0x118] sm:$0xff]  ;;  %v1482_v57 = vsel %vm1450_vm12, %v1098_v38, %v1066_v30  ;;  %v3176_v30 = vld [vmem:[%s5469_s9 + $0x128] sm:$0xff]  ;;  %vm3114_vm7 = vcmp.eq.s32.totalorder %v8371_v47, 1 }
 0x518   : > { %v3557_v55 = vsel %vm3525_vm9, %v8769_v29, %v3141_v51  ;;  %vm3941_vm0 = vcmp.eq.s32.totalorder %v3847_v13, 1  ;;  %v2312_v48 = vsel %vm2280_vm10, %v1928_v15, %v1896_v43  ;;  %v1514_v51 = vld [vmem:[%s5469_s9 + $0x1a8] sm:$0xff]  ;;  %v13026_v13 = vld [vmem:[#allocation186_spill] sm:$0xff]  ;;  %v13028_v43 = vld [vmem:[#allocation411_spill] sm:$0xff]  ;;  %vm3530_vm9 = vcmp.eq.s32.totalorder %v8533_v45, 1 }
 0x519   : > { %4195 = vperm.xlu0 %5036, %v8761_v26   ;;  %v8796_v59 = vsel %vm3941_vm0, %v8784_v52, %v3557_v55  ;;  %vm1038_vm2 = vcmp.eq.s32.totalorder %v13026_v13, 1  ;;  %v2728_v14 = vsel %vm2696_vm13, %v2344_v19, %v2312_v48  ;;  %vm1452_vm4 = vcmp.eq.s32.totalorder %v13028_v43, 1  ;;  %v8817_v48 = vld [vmem:[%s5469_s9 + $0x2d8] sm:$0xff]  ;;  %v1930_v38 = vld [vmem:[%s5469_s9 + $0x1b0] sm:$0xff]  ;;  %v5103_v13 = vld [vmem:[%s5485_s18 + $0x20] sm:$0xff] }
 0x51a   : > { %13025 = vst [vmem:[#allocation533_spill] sm:$0xff] %v8796_v59  ;;  %5011 = vset.pattern.permute.xlu1 %v12648_v1  ;;  %v8807_v15 = vpop.permute.xlu1 %3701  ;;  %v1898_v55 = vsel %vm1866_vm14, %v1514_v51, %v1482_v57  ;;  %v3144_v44 = vsel %vm3112_vm15, %v2760_v8, %v2728_v14  ;;  %v3592_v19 = vld [vmem:[%s5469_s9 + $0x130] sm:$0xff]  ;;  %v1100_v51 = vld [vmem:[%s5469_s9 + $0x240] sm:$0xff]  ;;  %v1070_v36 = vsel %vm1038_vm2, %v8817_v48, %v8727_v33  ;;  %vm2284_vm10 = vcmp.eq.s32.totalorder %v8118_v25, 1  ;;  %v2348_v47 = vld [vmem:[%s5469_s9 + $0x258] sm:$0xff] }
 0x51b   : > { %13027 = vst [vmem:[#allocation186_spill] sm:$0xff] %v8807_v15  ;;  %4111 = vperm.xlu1 %5011, %v4072_v7   ;;  %v3856_v10 = vpop.permute.xlu0 %3855  ;;  %v3560_v3 = vsel %vm3528_vm1, %v3176_v30, %v3144_v44  ;;  %v2346_v7 = vld [vmem:[%s5469_s9 + $0x1b8] sm:$0xff]  ;;  %v2314_v57 = vsel %vm2282_vm3, %v1930_v38, %v1898_v55  ;;  %v1484_v14 = vsel %vm1452_vm4, %v1100_v51, %v1068_v5  ;;  %v2762_v30 = vld [vmem:[%s5469_s9 + $0x1c0] sm:$0xff]  ;;  %vm4041_vm12 = vcmp.eq.s32.totalorder %v5103_v13, 9  ;;  %v13031_v55 = vld [vmem:[#allocation413_spill] sm:$0xff] }
 0x51c   : > { %vm3944_vm8 = vcmp.eq.s32.totalorder %v3856_v10, 1  ;;  %v2730_v9 = vsel %vm2698_vm5, %v2346_v7, %v2314_v57  ;;  %vm1454_vm13 = vcmp.eq.s32.totalorder %v13031_v55, 1  ;;  %v1900_v44 = vsel %vm1868_vm6, %v1516_v17, %v1484_v14  ;;  %v3178_v5 = vld [vmem:[%s5469_s9 + $0x1c8] sm:$0xff]  ;;  %v1932_v10 = vld [vmem:[%s5469_s9 + $0x250] sm:$0xff]  ;;  %v1102_v57 = vld [vmem:[%s5469_s9 + $0x2e0] sm:$0xff] }
 0x51d   : > { %v8834_v8 = vsel %vm3944_vm8, %v3592_v19, %v3560_v3  ;;  %5038 = vset.pattern.permute.xlu0 %v12272_v61  ;;  %vm2700_vm14 = vcmp.eq.s32.totalorder %v8251_v39, 1  ;;  %v3146_v43 = vsel %vm3114_vm7, %v2762_v30, %v2730_v9  ;;  %vm1870_vm15 = vcmp.eq.s32.totalorder %v7995_v60, 1  ;;  %v3594_v38 = vld [vmem:[%s5469_s9 + $0x1d0] sm:$0xff]  ;;  %v277_v3 = vld [vmem:[%s5469_s9 + $0x500] sm:$0xff]  ;;  %v13033_v7 = vld [vmem:[#allocation100_spill] sm:$0xff] }
 0x51e   : > { %13029 = vst [vmem:[#allocation411_spill] sm:$0xff] %v8834_v8  ;;  %v8844_v33 = vpop.permute.xlu1 %3707  ;;  %vm3116_vm0 = vcmp.eq.s32.totalorder %v8379_v23, 1  ;;  %v3562_v37 = vsel %vm3530_vm9, %v3178_v5, %v3146_v43  ;;  %vm3532_vm2 = vcmp.eq.s32.totalorder %v8542_v56, 1  ;;  %v4073_v51 = vsel %vm4041_vm12, 1, %v12648_v1  ;;  %v2764_v17 = vld [vmem:[%s5469_s9 + $0x260] sm:$0xff]  ;;  %v693_v30 = vld [vmem:[%s5469_s9 + $0x508] sm:$0xff] }
 0x51f   : > { %13030 = vst [vmem:[#allocation534_spill] sm:$0xff] %v8844_v33  ;;  %4159 = vperm.xlu1 %5011, %v8457_v28   ;;  %v3862_v49 = vpop.permute.xlu0 %3861  ;;  %v2316_v28 = vsel %vm2284_vm10, %v1932_v10, %v1900_v44  ;;  %v501_v45 = vsel %vm469_vm11, %v277_v3, 0.0  ;;  %vm885_vm3 = vcmp.eq.s32.totalorder %v13033_v7, 1  ;;  %vm2286_vm4 = vcmp.eq.s32.totalorder %v8128_v16, 1  ;;  %v13035_v9 = vld [vmem:[#allocation103_spill] sm:$0xff]  ;;  %v1518_v13 = vld [vmem:[%s5469_s9 + $0x2e8] sm:$0xff] }
 0x520   : > { %vm3946_vm1 = vcmp.eq.s32.totalorder %v3862_v49, 1  ;;  %v2732_v25 = vsel %vm2700_vm14, %v2348_v47, %v2316_v28  ;;  %vm629_vm5 = vcmp.eq.s32.totalorder %v13035_v9, 1  ;;  %v1486_v62 = vsel %vm1454_vm13, %v1102_v57, %v1070_v36  ;;  %v3180_v44 = vld [vmem:[%s5469_s9 + $0x268] sm:$0xff]  ;;  %v1934_v43 = vld [vmem:[%s5469_s9 + $0x2f0] sm:$0xff]  ;;  %v2350_v23 = vld [vmem:[%s5469_s9 + $0x2f8] sm:$0xff] }
 0x521   : > { %v8866_v19 = vsel %vm3946_vm1, %v3594_v38, %v3562_v37  ;;  %vm2702_vm11 = vcmp.eq.s32.totalorder %v8257_v21, 1  ;;  %v3148_v5 = vsel %vm3116_vm0, %v2764_v17, %v2732_v25  ;;  %v1902_v49 = vsel %vm1870_vm15, %v1518_v13, %v1486_v62  ;;  %v3596_v55 = vld [vmem:[%s5469_s9 + $0x270] sm:$0xff]  ;;  %v2766_v56 = vld [vmem:[%s5469_s9 + $0x300] sm:$0xff]  ;;  %v13039_v17 = vld [vmem:[#allocation134_spill] sm:$0xff] }
 0x522   : > { %13032 = vst [vmem:[#allocation413_spill] sm:$0xff] %v8866_v19  ;;  %v8878_v14 = vpop.permute.xlu1 %3713  ;;  %vm3118_vm6 = vcmp.eq.s32.totalorder %v8390_v11, 1  ;;  %v3564_v36 = vsel %vm3532_vm2, %v3180_v44, %v3148_v5  ;;  %v2318_v10 = vsel %vm2286_vm4, %v1934_v43, %v1902_v49  ;;  %vm3534_vm8 = vcmp.eq.s32.totalorder %v8550_v35, 1  ;;  %v13037_v38 = vld [vmem:[#allocation205_spill] sm:$0xff]  ;;  %v13040_v25 = vld [vmem:[#allocation310_spill] sm:$0xff]  ;;  %v3182_v7 = vld [vmem:[%s5469_s9 + $0x308] sm:$0xff] }
 0x523   : > { %13034 = vst [vmem:[#allocation100_spill] sm:$0xff] %v8878_v14  ;;  %5012 = vset.pattern.permute.xlu1 %v12272_v61  ;;  %v3868_v39 = vpop.permute.xlu0 %3867  ;;  %v917_v60 = vsel %vm885_vm3, %v693_v30, %v501_v45  ;;  %vm1045_vm9 = vcmp.eq.s32.totalorder %v13037_v38, 1  ;;  %v2734_v47 = vsel %vm2702_vm11, %v2350_v23, %v2318_v10  ;;  %v661_v16 = vsel %vm629_vm5, %v277_v3, 0.0  ;;  %v1109_v57 = vld [vmem:[%s5469_s9 + $0x510] sm:$0xff]  ;;  %v1525_v62 = vld [vmem:[%s5469_s9 + $0x518] sm:$0xff]  ;;  %v13041_v44 = vld [vmem:[#allocation191_spill] sm:$0xff] }
 0x524   : > { %vm3948_vm7 = vcmp.eq.s32.totalorder %v3868_v39, 1  ;;  %4274 = vperm.xlu1 %5012, %v4073_v51   ;;  %vm1301_vm10 = vcmp.eq.s32.totalorder %v13039_v17, 1  ;;  %vm1461_vm12 = vcmp.eq.s32.totalorder %v13040_v25, 1  ;;  %v3150_v45 = vsel %vm3118_vm6, %v2766_v56, %v2734_v47  ;;  %v13042_v21 = vld [vmem:[#allocation26_spill] sm:$0xff]  ;;  %v3598_v9 = vld [vmem:[%s5469_s9 + $0x310] sm:$0xff]  ;;  %v1941_v35 = vld [vmem:[%s5469_s9 + $0x520] sm:$0xff] }
 0x525   : > { %v8901_v37 = vsel %vm3948_vm7, %v3596_v55, %v3564_v36  ;;  %vm1717_vm13 = vcmp.eq.s32.totalorder %v13041_v44, 1  ;;  %vm1877_vm14 = vcmp.eq.s32.totalorder %v13042_v21, 1  ;;  %v3566_v3 = vsel %vm3534_vm8, %v3182_v7, %v3150_v45  ;;  %v13043_v39 = vld [vmem:[#allocation226_spill] sm:$0xff]  ;;  %v13045_v49 = vld [vmem:[#allocation229_spill] sm:$0xff]  ;;  %v2357_v23 = vld [vmem:[%s5469_s9 + $0x528] sm:$0xff] }
 0x526   : > { %13036 = vst [vmem:[#allocation103_spill] sm:$0xff] %v8901_v37  ;;  %v8909_v28 = vpop.permute.xlu1 %3719  ;;  %v1077_v5 = vsel %vm1045_vm9, %v693_v30, %v661_v16  ;;  %vm2293_vm0 = vcmp.eq.s32.totalorder %v13043_v39, 1  ;;  %v1333_v43 = vsel %vm1301_vm10, %v1109_v57, %v917_v60  ;;  %vm2133_vm1 = vcmp.eq.s32.totalorder %v13045_v49, 1  ;;  %v2773_v38 = vld [vmem:[%s5469_s9 + $0x530] sm:$0xff]  ;;  %v13048_v56 = vld [vmem:[#allocation330_spill] sm:$0xff]  ;;  %v5104_v16 = vld [vmem:[%s5485_s18 + $0x28] sm:$0xff] }
 0x527   : > { %13038 = vst [vmem:[#allocation205_spill] sm:$0xff] %v8909_v28  ;;  %v3874_v13 = vpop.permute.xlu0 %3873  ;;  %v1493_v36 = vsel %vm1461_vm12, %v1109_v57, %v1077_v5  ;;  %vm2709_vm2 = vcmp.eq.s32.totalorder %v7987_v2, 1  ;;  %v1749_v55 = vsel %vm1717_vm13, %v1525_v62, %v1333_v43  ;;  %vm3125_vm4 = vcmp.eq.s32.totalorder %v8255_v12, 1  ;;  %v3189_v17 = vld [vmem:[%s5469_s9 + $0x538] sm:$0xff]  ;;  %v3605_v21 = vld [vmem:[%s5469_s9 + $0x540] sm:$0xff]  ;;  %v4021_v12 = vld [vmem:[%s5469_s9 + $0x548] sm:$0xff] }
 0x528   : > { %vm3950_vm15 = vcmp.eq.s32.totalorder %v3874_v13, 1  ;;  %5013 = vset.pattern.permute.xlu1 %v12648_v1  ;;  %v1909_v10 = vsel %vm1877_vm14, %v1525_v62, %v1493_v36  ;;  %vm2965_vm5 = vcmp.eq.s32.totalorder %v13048_v56, 1  ;;  %vm3541_vm11 = vcmp.eq.s32.totalorder %v8561_v22, 1  ;;  %v13049_v25 = vld [vmem:[#allocation14_spill] sm:$0xff]  ;;  %v13050_v13 = vld [vmem:[#allocation381_spill] sm:$0xff]  ;;  %v13059_v56 = vld [vmem:[#allocation32_spill] sm:$0xff] }
 0x529   : > { %v8929_v11 = vsel %vm3950_vm15, %v3598_v9, %v3566_v3  ;;  %4114 = vperm.xlu1 %5013, %v4073_v51   ;;  %v13047_v51 = vld [vmem:[#allocation287_spill] sm:$0xff]  ;;  %v2325_v47 = vsel %vm2293_vm0, %v1941_v35, %v1909_v10  ;;  %vm4042_vm6 = vcmp.eq.s32.totalorder %v5104_v16, 9  ;;  %v2165_v57 = vsel %vm2133_vm1, %v1941_v35, %v1749_v55  ;;  %v13052_v3 = vld [vmem:[#allocation384_spill] sm:$0xff]  ;;  %v13083_v14 = vld [vmem:[#allocation65_spill] sm:$0xff] }
 0x52a   : > { %13044 = vst [vmem:[#allocation134_spill] sm:$0xff] %v8929_v11  ;;  %v8938_v30 = vpop.permute.xlu1 %3725  ;;  %vm2549_vm3 = vcmp.eq.s32.totalorder %v13047_v51, 1  ;;  %vm3381_vm7 = vcmp.eq.s32.totalorder %v13049_v25, 1  ;;  %v2741_v7 = vsel %vm2709_vm2, %v2357_v23, %v2325_v47  ;;  %vm3797_vm9 = vcmp.eq.s32.totalorder %v13050_v13, 1  ;;  %v13055_v51 = vld [vmem:[#allocation27_spill] sm:$0xff]  ;;  %v13056_v10 = vld [vmem:[#allocation28_spill] sm:$0xff] }
 0x52b   : > { %13046 = vst [vmem:[#allocation310_spill] sm:$0xff] %v8938_v30  ;;  %v3895_v60 = vpop.permute.xlu0 %3894  ;;  %v2581_v45 = vsel %vm2549_vm3, %v2357_v23, %v2165_v57  ;;  %v3157_v62 = vsel %vm3125_vm4, %v2773_v38, %v2741_v7  ;;  %vm4213_vm10 = vcmp.eq.s32.totalorder %v13052_v3, 1  ;;  %v4074_v39 = vsel %vm4042_vm6, 1, %v12648_v1  ;;  %v8986_v23 = vld [vmem:[%s5469_s9 + $0xa0] sm:$0xff]  ;;  %v9000_v57 = vld [vmem:[%s5469_s9 + $0x50] sm:$0xff]  ;;  %v13064_v3 = vld [vmem:[#allocation38_spill] sm:$0xff] }
 0x52c   : > { %vm3957_vm8 = vcmp.eq.s32.totalorder %v3895_v60, 1  ;;  %v2997_v2 = vsel %vm2965_vm5, %v2773_v38, %v2581_v45  ;;  %v3573_v9 = vsel %vm3541_vm11, %v3189_v17, %v3157_v62  ;;  %vm455_vm13 = vcmp.eq.s32.totalorder %v13055_v51, 1  ;;  %v13057_v60 = vld [vmem:[#allocation30_spill] sm:$0xff]  ;;  %v13058_v38 = vld [vmem:[#allocation31_spill] sm:$0xff]  ;;  %v5105_v7 = vld [vmem:[%s5485_s18 + $0x30] sm:$0xff] }
 0x52d   : > { %5014 = vset.pattern.permute.xlu1 %v12272_v61  ;;  %v3989_v43 = vsel %vm3957_vm8, %v3605_v21, %v3573_v9  ;;  %vm453_vm14 = vcmp.eq.s32.totalorder %v13056_v10, 1  ;;  %vm456_vm15 = vcmp.eq.s32.totalorder %v13057_v60, 1  ;;  %vm454_vm0 = vcmp.eq.s32.totalorder %v13058_v38, 1  ;;  %v13062_v62 = vld [vmem:[#allocation35_spill] sm:$0xff]  ;;  %v272_v9 = vld [vmem:[%s5469_s9 + $0x370] sm:$0xff]  ;;  %v13069_v51 = vld [vmem:[#allocation46_spill] sm:$0xff] }
 0x52e   : > { %3909 = vperm.xlu1 %5014, %v8443_v6   ;;  %v8966_v44 = vpop.permute.xlu1 %3731  ;;  %v3413_v6 = vsel %vm3381_vm7, %v3189_v17, %v2997_v2  ;;  %vm458_vm1 = vcmp.eq.s32.totalorder %v13059_v56, 1  ;;  %v8994_v47 = vsel %vm455_vm13, %v8986_v23, 0.0  ;;  %v8997_v16 = vsel %vm453_vm14, %v8634_v63, 0.0  ;;  %v13060_v17 = vld [vmem:[#allocation33_spill] sm:$0xff]  ;;  %v13063_v63 = vld [vmem:[#allocation36_spill] sm:$0xff]  ;;  %v9019_v2 = vld [vmem:[%s5469_s9 + $0x140] sm:$0xff] }
 0x52f   : > { %13051 = vst [vmem:[#allocation191_spill] sm:$0xff] %v8966_v44  ;;  %v4311_v5 = vpop.permute.xlu0 %4310  ;;  %v3829_v49 = vsel %vm3797_vm9, %v3605_v21, %v3413_v6  ;;  %vm457_vm2 = vcmp.eq.s32.totalorder %v13060_v17, 1  ;;  %vm4043_vm3 = vcmp.eq.s32.totalorder %v5105_v7, 9  ;;  %v9007_v45 = vsel %vm456_vm15, %v8652_v54, 0.0  ;;  %v13065_v54 = vld [vmem:[#allocation39_spill] sm:$0xff]  ;;  %v13068_v6 = vld [vmem:[#allocation45_spill] sm:$0xff] }
 0x530   : > { %vm4373_vm12 = vcmp.eq.s32.totalorder %v4311_v5, 1  ;;  %v4245_v22 = vsel %vm4213_vm10, %v4021_v12, %v3829_v49  ;;  %v9010_v13 = vsel %vm454_vm0, %v9000_v57, 0.0  ;;  %vm460_vm4 = vcmp.eq.s32.totalorder %v13062_v62, 1  ;;  %v13066_v5 = vld [vmem:[#allocation41_spill] sm:$0xff]  ;;  %v9065_v7 = vld [vmem:[%s5469_s9 + $0x320] sm:$0xff]  ;;  %v13080_v44 = vld [vmem:[#allocation58_spill] sm:$0xff] }
 0x531   : > { %v4405_v35 = vsel %vm4373_vm12, %v4021_v12, %v3989_v43  ;;  %vm459_vm5 = vcmp.eq.s32.totalorder %v13063_v63, 1  ;;  %v9016_v21 = vsel %vm458_vm1, %v8663_v34, 0.0  ;;  %vm462_vm11 = vcmp.eq.s32.totalorder %v13064_v3, 1  ;;  %v9029_v12 = vld [vmem:[%s5469_s9 + $0x1e0] sm:$0xff]  ;;  %v274_v34 = vld [vmem:[%s5469_s9 + $0x410] sm:$0xff]  ;;  %v13073_v63 = vld [vmem:[#allocation50_spill] sm:$0xff] }
 0x532   : > { %4277 = vperm.xlu1 %5014, %v4074_v39   ;;  %v8980_v36 = vpop.permute.xlu1 %3737  ;;  %4597 = vmatprep.mubr.f32.mxu1 %v4405_v35  ;;  %vm461_vm6 = vcmp.eq.s32.totalorder %v13065_v54, 1  ;;  %vm464_vm7 = vcmp.eq.s32.totalorder %v13066_v5, 1  ;;  %vm466_vm9 = vcmp.eq.s32.totalorder %v13068_v6, 1  ;;  %v4075_v43 = vsel %vm4043_vm3, 1, %v12648_v1  ;;  %v276_v10 = vld [vmem:[%s5469_s9 + $0x4b0] sm:$0xff]  ;;  %v273_v62 = vld [vmem:[%s5469_s9 + $0x3c0] sm:$0xff] }
 0x533   : > { %13053 = vst [vmem:[#allocation26_spill] sm:$0xff] %v8980_v36  ;;  %4598 = vmatmul.mubr.f32.vlgmr.msra.gmra.mrb[0].mxu1 %v4245_v22  ;;  %v9037_v35 = vsel %vm460_vm4, %v8671_v41, 0.0  ;;  %v9040_v49 = vsel %vm459_vm5, %v9029_v12, 0.0  ;;  %v9043_v22 = vld [vmem:[%s5469_s9 + $0x280] sm:$0xff]  ;;  %vm465_vm10 = vcmp.eq.s32.totalorder %v13069_v51, 1  ;;  %v13070_v60 = vld [vmem:[#allocation49_spill] sm:$0xff] }
 0x534   : > { %vm468_vm12 = vcmp.eq.s32.totalorder %v13070_v60, 1  ;;  %v9053_v56 = vsel %vm462_vm11, %v8706_v24, 0.0  ;;  %v9058_v41 = vsel %vm461_vm6, %v9043_v22, 0.0  ;;  %v9062_v17 = vsel %vm464_vm7, %v272_v9, 0.0  ;;  %v9080_v54 = vld [vmem:[%s5469_s9 + $0x550] sm:$0xff]  ;;  %v13082_v51 = vld [vmem:[#allocation62_spill] sm:$0xff] }
 0x535   : > { %13072 = vst [vmem:[#allocation330_spill] sm:$0xff] %v9062_v17  ;;  %vm467_vm13 = vcmp.eq.s32.totalorder %v13073_v63, 1  ;;  %v9077_v3 = vsel %vm466_vm9, %v274_v34, 0.0  ;;  %13075 = vst [vmem:[#allocation381_spill] sm:$0xff] %v9080_v54  ;;  %v13076_v9 = vld [vmem:[#allocation53_spill] sm:$0xff]  ;;  %v9093_v6 = vsel %vm468_vm12, %v276_v10, 0.0 }
 0x536   : > { %5015 = vset.pattern.permute.xlu1 %v12648_v1  ;;  %v8983_v55 = vpop.permute.xlu1 %3743  ;;  %13074 = vst [vmem:[#allocation14_spill] sm:$0xff] %v9077_v3  ;;  %vm470_vm14 = vcmp.eq.s32.totalorder %v13076_v9, 1  ;;  %v9084_v5 = vld [vmem:[%s5469_s9 + $0x5f0] sm:$0xff]  ;;  %13079 = vst [vmem:[#allocation27_spill] sm:$0xff] %v9093_v6  ;;  %v275_v34 = vld [vmem:[%s5469_s9 + $0x460] sm:$0xff]  ;;  %vm471_vm0 = vcmp.eq.s32.totalorder %v13080_v44, 1 }
 0x537   : > { %13054 = vst [vmem:[#allocation226_spill] sm:$0xff] %v8983_v55  ;;  %4117 = vperm.xlu1 %5015, %v4074_v39   ;;  %v9026_v39 = vsel %vm457_vm2, %v9019_v2, 0.0  ;;  %13077 = vst [vmem:[#allocation384_spill] sm:$0xff] %v9084_v5  ;;  %v13078_v63 = vld [vmem:[#allocation57_spill] sm:$0xff]  ;;  %v9099_v28 = vsel %vm467_vm13, %v275_v34, 0.0  ;;  %v9102_v17 = vld [vmem:[%s5469_s9 + $0x5a0] sm:$0xff] }
 0x538   : > { %vm472_vm15 = vcmp.eq.s32.totalorder %v13078_v63, 1  ;;  %v282_v30 = vld [vmem:[%s5469_s9 + $0x690] sm:$0xff]  ;;  %vm473_vm2 = vcmp.eq.s32.totalorder %v13082_v51, 1  ;;  %vm476_vm3 = vcmp.eq.s32.totalorder %v13083_v14, 1  ;;  %v13084_v60 = vld [vmem:[#allocation66_spill] sm:$0xff]  ;;  %v9113_v6 = vsel %vm470_vm14, %v9080_v54, 0.0 }
 0x539   : > { %v13081_v3 = vld [vmem:[#allocation61_spill] sm:$0xff]  ;;  %vm475_vm4 = vcmp.eq.s32.totalorder %v13084_v60, 1  ;;  %v9121_v34 = vld [vmem:[%s5469_s9 + $0x640] sm:$0xff]  ;;  %v13087_v26 = vld [vmem:[#allocation70_spill] sm:$0xff]  ;;  %v9129_v9 = vsel %vm471_vm0, %v9102_v17, 0.0 }
 0x53a   : > { %v9003_v25 = vpop.permute.xlu1 %3749  ;;  %vm474_vm1 = vcmp.eq.s32.totalorder %v13081_v3, 1  ;;  %v9118_v3 = vsel %vm472_vm15, %v9084_v5, 0.0  ;;  %v286_v11 = vld [vmem:[%s5469_s9 + $0x7d0] sm:$0xff]  ;;  %vm477_vm11 = vcmp.eq.s32.totalorder %v13087_v26, 1  ;;  %v9134_v63 = vld [vmem:[%s5469_s9 + $0x6e0] sm:$0xff]  ;;  %v9143_v15 = vsel %vm473_vm2, %v9121_v34, 0.0 }
 0x53b   : > { %13061 = vst [vmem:[#allocation229_spill] sm:$0xff] %v9003_v25  ;;  %4165 = vperm.xlu1 %5015, %v8491_v32   ;;  %v13067_v32 = vld [vmem:[#allocation42_spill] sm:$0xff]  ;;  %v288_v33 = vld [vmem:[%s5469_s9 + $0x870] sm:$0xff]  ;;  %v9152_v44 = vsel %vm475_vm4, %v9134_v63, 0.0  ;;  %v9155_v19 = vld [vmem:[%s5469_s9 + $0x780] sm:$0xff] }
 0x53c   : > { %vm463_vm8 = vcmp.eq.s32.totalorder %v13067_v32, 1  ;;  %v9089_v32 = vsel %vm465_vm10, %v273_v62, 0.0  ;;  %v284_v62 = vld [vmem:[%s5469_s9 + $0x730] sm:$0xff]  ;;  %v13089_v25 = vld [vmem:[#allocation74_spill] sm:$0xff]  ;;  %v9166_v14 = vsel %vm477_vm11, %v9155_v19, 0.0 }
 0x53d   : > { %v9073_v24 = vsel %vm463_vm8, %v9065_v7, 0.0  ;;  %v13088_v37 = vld [vmem:[#allocation73_spill] sm:$0xff]  ;;  %vm479_vm7 = vcmp.eq.s32.totalorder %v13089_v25, 1  ;;  %v13091_v60 = vld [vmem:[#allocation78_spill] sm:$0xff] }
 0x53e   : > { %v9048_v38 = vpop.permute.xlu1 %3755  ;;  %vm480_vm6 = vcmp.eq.s32.totalorder %v13088_v37, 1  ;;  %v290_v55 = vld [vmem:[%s5469_s9 + $0x910] sm:$0xff]  ;;  %vm481_vm9 = vcmp.eq.s32.totalorder %v13091_v60, 1  ;;  %v13092_v5 = vld [vmem:[#allocation82_spill] sm:$0xff]  ;;  %v9194_v37 = vld [vmem:[%s5469_s9 + $0x148] sm:$0xff] }
 0x53f   : > { %13071 = vst [vmem:[#allocation287_spill] sm:$0xff] %v9048_v38  ;;  %5016 = vset.pattern.permute.xlu1 %v12272_v61  ;;  %v13086_v38 = vld [vmem:[#allocation69_spill] sm:$0xff]  ;;  %vm483_vm10 = vcmp.eq.s32.totalorder %v13092_v5, 1  ;;  %v13096_v52 = vld [vmem:[#allocation86_spill] sm:$0xff] }
 0x540   : > { %4280 = vperm.xlu1 %5016, %v4075_v43   ;;  %vm478_vm5 = vcmp.eq.s32.totalorder %v13086_v38, 1  ;;  %v13090_v8 = vld [vmem:[#allocation77_spill] sm:$0xff]  ;;  %v13095_v38 = vld [vmem:[#allocation84_spill] sm:$0xff]  ;;  %vm614_vm13 = vcmp.eq.s32.totalorder %v13096_v52, 1  ;;  %v5106_v25 = vld [vmem:[%s5485_s18 + $0x38] sm:$0xff] }
 0x541   : > { %vm482_vm8 = vcmp.eq.s32.totalorder %v13090_v8, 1  ;;  %v9161_v51 = vsel %vm478_vm5, %v286_v11, 0.0  ;;  %v9177_v8 = vsel %vm480_vm6, %v288_v33, 0.0  ;;  %v289_v11 = vld [vmem:[%s5469_s9 + $0x8c0] sm:$0xff]  ;;  %vm870_vm12 = vcmp.eq.s32.totalorder %v13095_v38, 1  ;;  %v13098_v33 = vld [vmem:[#allocation88_spill] sm:$0xff] }
 0x542   : > { %v9108_v10 = vpop.permute.xlu1 %3761  ;;  %13094 = vst [vmem:[#allocation31_spill] sm:$0xff] %v9177_v8  ;;  %v9190_v29 = vsel %vm482_vm8, %v290_v55, 0.0  ;;  %vm873_vm14 = vcmp.eq.s32.totalorder %v13098_v33, 1  ;;  %v13099_v8 = vld [vmem:[#allocation89_spill] sm:$0xff]  ;;  %vm4044_vm0 = vcmp.eq.s32.totalorder %v5106_v25, 9  ;;  %v9201_v58 = vsel %vm481_vm9, %v289_v11, 0.0 }
 0x543   : > { %13085 = vst [vmem:[#allocation28_spill] sm:$0xff] %v9108_v10  ;;  %v9131_v10 = vsel %vm474_vm1, %v282_v30, 0.0  ;;  %v9147_v30 = vsel %vm476_vm3, %v284_v62, 0.0  ;;  %v9169_v62 = vld [vmem:[%s5469_s9 + $0x820] sm:$0xff]  ;;  %13097 = vst [vmem:[#allocation32_spill] sm:$0xff] %v9190_v29  ;;  %vm615_vm15 = vcmp.eq.s32.totalorder %v13099_v8, 1 }
 0x544   : > { %5017 = vset.pattern.permute.xlu1 %v12648_v1  ;;  %v9182_v26 = vsel %vm479_vm7, %v9169_v62, 0.0  ;;  %13100 = vst [vmem:[#allocation33_spill] sm:$0xff] %v9201_v58  ;;  %v9208_v55 = vld [vmem:[%s5469_s9 + $0x1e8] sm:$0xff]  ;;  %v13102_v38 = vld [vmem:[#allocation90_spill] sm:$0xff]  ;;  %v13103_v29 = vld [vmem:[#allocation91_spill] sm:$0xff]  ;;  %v9218_v60 = vsel %vm614_vm13, %v9000_v57, 0.0 }
 0x545   : > { %4120 = vperm.xlu1 %5017, %v4075_v43   ;;  %v9186_v43 = vld [vmem:[%s5469_s9 + $0x58] sm:$0xff]  ;;  %vm875_vm1 = vcmp.eq.s32.totalorder %v13102_v38, 1  ;;  %vm617_vm2 = vcmp.eq.s32.totalorder %v13103_v29, 1  ;;  %v9221_v11 = vld [vmem:[%s5469_s9 + $0x288] sm:$0xff]  ;;  %v13105_v5 = vld [vmem:[#allocation93_spill] sm:$0xff]  ;;  %v9237_v57 = vsel %vm615_vm15, %v8986_v23, 0.0 }
 0x546   : > { %v9173_v36 = vpop.permute.xlu1 %3767  ;;  %v9215_v59 = vsel %vm870_vm12, %v9186_v43, %v9010_v13  ;;  %vm619_vm4 = vcmp.eq.s32.totalorder %v13105_v5, 1  ;;  %v9232_v13 = vsel %vm873_vm14, %v9194_v37, %v9026_v39  ;;  %v9240_v38 = vld [vmem:[%s5469_s9 + $0x328] sm:$0xff]  ;;  %v9247_v5 = vsel %vm875_vm1, %v9208_v55, %v9040_v49  ;;  %v13108_v33 = vld [vmem:[#allocation95_spill] sm:$0xff]  ;;  %v13117_v54 = vld [vmem:[#allocation106_spill] sm:$0xff] }
 0x547   : > { %13093 = vst [vmem:[#allocation30_spill] sm:$0xff] %v9173_v36  ;;  %v291_v36 = vld [vmem:[%s5469_s9 + $0x960] sm:$0xff]  ;;  %v9250_v39 = vsel %vm617_vm2, %v9019_v2, 0.0  ;;  %vm621_vm11 = vcmp.eq.s32.totalorder %v13108_v33, 1  ;;  %v689_v8 = vld [vmem:[%s5469_s9 + $0x3c8] sm:$0xff]  ;;  %v9260_v25 = vsel %vm619_vm4, %v9029_v12, 0.0 }
 0x548   : > { %v9205_v52 = vsel %vm483_vm10, %v291_v36, 0.0  ;;  %v13104_v36 = vld [vmem:[#allocation92_spill] sm:$0xff]  ;;  %v13114_v12 = vld [vmem:[#allocation105_spill] sm:$0xff]  ;;  %vm891_vm13 = vcmp.eq.s32.totalorder %v13117_v54, 1  ;;  %vm633_vm14 = vcmp.eq.s32.totalorder %v13118_v18, 1 }
 0x549   : > { %13101 = vst [vmem:[#allocation35_spill] sm:$0xff] %v9205_v52  ;;  %5018 = vset.pattern.permute.xlu1 %v12272_v61  ;;  %vm877_vm3 = vcmp.eq.s32.totalorder %v13104_v36, 1  ;;  %v13107_v36 = vld [vmem:[#allocation94_spill] sm:$0xff]  ;;  %v13109_v23 = vld [vmem:[#allocation96_spill] sm:$0xff]  ;;  %vm631_vm12 = vcmp.eq.s32.totalorder %v13114_v12, 1 }
 0x54a   : > { %3915 = vperm.xlu1 %5018, %v8454_v50   ;;  %v9226_v29 = vpop.permute.xlu1 %3773  ;;  %vm879_vm5 = vcmp.eq.s32.totalorder %v13107_v36, 1  ;;  %v4076_v50 = vsel %vm4044_vm0, 1, %v12648_v1  ;;  %vm881_vm6 = vcmp.eq.s32.totalorder %v13109_v23, 1  ;;  %v13110_v36 = vld [vmem:[#allocation97_spill] sm:$0xff]  ;;  %v691_v49 = vld [vmem:[%s5469_s9 + $0x468] sm:$0xff]  ;;  %v13111_v52 = vld [vmem:[#allocation98_spill] sm:$0xff] }
 0x54b   : > { %13106 = vst [vmem:[#allocation36_spill] sm:$0xff] %v9226_v29  ;;  %v9257_v29 = vsel %vm877_vm3, %v9221_v11, %v9058_v41  ;;  %vm623_vm7 = vcmp.eq.s32.totalorder %v13110_v36, 1  ;;  %vm883_vm8 = vcmp.eq.s32.totalorder %v13111_v52, 1  ;;  %v9267_v2 = vsel %vm879_vm5, %v9240_v38, %v9073_v24  ;;  %v9270_v58 = vld [vmem:[%s5469_s9 + $0x5a8] sm:$0xff]  ;;  %v13112_v23 = vld [vmem:[#allocation102_spill] sm:$0xff]  ;;  %v13123_v36 = vld [vmem:[#allocation111_spill] sm:$0xff] }
 0x54c   : > { %vm887_vm9 = vcmp.eq.s32.totalorder %v13112_v23, 1  ;;  %v13113_v41 = vld [vmem:[#allocation104_spill] sm:$0xff]  ;;  %v9283_v52 = vsel %vm621_vm11, %v9043_v22, 0.0  ;;  %v9286_v24 = vsel %vm881_vm6, %v689_v8, %v9089_v32  ;;  %v9297_v12 = vsel %vm883_vm8, %v691_v49, %v9099_v28  ;;  %v13122_v32 = vld [vmem:[#allocation110_spill] sm:$0xff]  ;;  %v9333_v49 = vld [vmem:[%s5469_s9 + $0x60] sm:$0xff] }
 0x54d   : > { %vm889_vm10 = vcmp.eq.s32.totalorder %v13113_v41, 1  ;;  %13116 = vst [vmem:[#allocation39_spill] sm:$0xff] %v9286_v24  ;;  %v9294_v41 = vsel %vm623_vm7, %v9065_v7, 0.0  ;;  %13119 = vst [vmem:[#allocation41_spill] sm:$0xff] %v9297_v12  ;;  %v701_v33 = vld [vmem:[%s5469_s9 + $0x788] sm:$0xff]  ;;  %v9306_v18 = vsel %vm887_vm9, %v9270_v58, %v9129_v9  ;;  %v9313_v28 = vsel %vm631_vm12, %v9102_v17, 0.0 }
 0x54e   : > { %4283 = vperm.xlu1 %5018, %v4076_v50   ;;  %v9278_v31 = vpop.permute.xlu1 %3779  ;;  %v13120_v22 = vld [vmem:[#allocation108_spill] sm:$0xff]  ;;  %v9310_v7 = vsel %vm889_vm10, %v9274_v20, %v9143_v15  ;;  %vm895_vm1 = vcmp.eq.s32.totalorder %v13122_v32, 1  ;;  %v9318_v8 = vsel %vm891_vm13, %v699_v42, %v9152_v44  ;;  %vm637_vm2 = vcmp.eq.s32.totalorder %v13123_v36, 1  ;;  %v13124_v9 = vld [vmem:[#allocation113_spill] sm:$0xff]  ;;  %v13126_v44 = vld [vmem:[#allocation118_spill] sm:$0xff] }
 0x54f   : > { %13115 = vst [vmem:[#allocation38_spill] sm:$0xff] %v9278_v31  ;;  %vm893_vm15 = vcmp.eq.s32.totalorder %v13120_v22, 1  ;;  %v13121_v31 = vld [vmem:[#allocation109_spill] sm:$0xff]  ;;  %v703_v54 = vld [vmem:[%s5469_s9 + $0x828] sm:$0xff]  ;;  %vm639_vm3 = vcmp.eq.s32.totalorder %v13124_v9, 1  ;;  %vm1289_vm5 = vcmp.eq.s32.totalorder %v13126_v44, 1 }
 0x550   : > { %vm635_vm0 = vcmp.eq.s32.totalorder %v13121_v31, 1  ;;  %v9321_v31 = vsel %vm633_vm14, %v9121_v34, 0.0  ;;  %v9327_v15 = vsel %vm893_vm15, %v701_v33, %v9166_v14  ;;  %v13125_v42 = vld [vmem:[#allocation116_spill] sm:$0xff]  ;;  %v9337_v34 = vld [vmem:[%s5469_s9 + $0x150] sm:$0xff]  ;;  %v927_v14 = vsel %vm895_vm1, %v703_v54, %v9182_v26  ;;  %v13127_v33 = vld [vmem:[#allocation119_spill] sm:$0xff] }
 0x551   : > { %v9330_v17 = vsel %vm635_vm0, %v9134_v63, 0.0  ;;  %vm1286_vm4 = vcmp.eq.s32.totalorder %v13125_v42, 1  ;;  %vm869_vm11 = vcmp.eq.s32.totalorder %v13127_v33, 1  ;;  %v1099_v22 = vld [vmem:[%s5469_s9 + $0x1f0] sm:$0xff]  ;;  %v13128_v63 = vld [vmem:[#allocation120_spill] sm:$0xff]  ;;  %v9353_v44 = vsel %vm637_vm2, %v9155_v19, 0.0 }
 0x552   : > { %5019 = vset.pattern.permute.xlu1 %v12648_v1  ;;  %vm1291_vm6 = vcmp.eq.s32.totalorder %v13128_v63, 1  ;;  %v9347_v32 = vld [vmem:[%s5469_s9 + $0xa8] sm:$0xff]  ;;  %v13129_v12 = vld [vmem:[#allocation121_spill] sm:$0xff]  ;;  %13130 = vst [vmem:[#allocation42_spill] sm:$0xff] %v9353_v44  ;;  %v13132_v54 = vld [vmem:[#allocation123_spill] sm:$0xff]  ;;  %v9371_v19 = vsel %vm1289_vm5, %v9337_v34, %v9232_v13 }
 0x553   : > { %4123 = vperm.xlu1 %5019, %v4076_v50   ;;  %v9340_v23 = vpop.permute.xlu1 %3849  ;;  %vm871_vm7 = vcmp.eq.s32.totalorder %v13129_v12, 1  ;;  %v9358_v50 = vsel %vm639_vm3, %v9169_v62, 0.0  ;;  %v1101_v26 = vld [vmem:[%s5469_s9 + $0x290] sm:$0xff]  ;;  %vm1293_vm8 = vcmp.eq.s32.totalorder %v13132_v54, 1  ;;  %v13133_v24 = vld [vmem:[#allocation124_spill] sm:$0xff]  ;;  %v9367_v12 = vsel %vm1286_vm4, %v9333_v49, %v9215_v59  ;;  %v5107_v62 = vld [vmem:[%s5485_s18 + $0x40] sm:$0xff] }
 0x554   : > { %13131 = vst [vmem:[#allocation45_spill] sm:$0xff] %v9358_v50  ;;  %vm872_vm9 = vcmp.eq.s32.totalorder %v13133_v24, 1  ;;  %v1103_v36 = vld [vmem:[%s5469_s9 + $0x330] sm:$0xff]  ;;  %vm4045_vm12 = vcmp.eq.s32.totalorder %v5107_v62, 9  ;;  %v9380_v24 = vsel %vm869_vm11, %v8647_v40, %v8997_v16  ;;  %v9383_v59 = vsel %vm1291_vm6, %v1099_v22, %v9247_v5  ;;  %v13135_v42 = vld [vmem:[#allocation126_spill] sm:$0xff]  ;;  %v13137_v5 = vld [vmem:[#allocation132_spill] sm:$0xff] }
 0x555   : > { %v13134_v9 = vld [vmem:[#allocation125_spill] sm:$0xff]  ;;  %v9387_v13 = vsel %vm871_vm7, %v9347_v32, %v8994_v47  ;;  %vm874_vm13 = vcmp.eq.s32.totalorder %v13135_v42, 1  ;;  %v9394_v33 = vsel %vm1293_vm8, %v1101_v26, %v9257_v29  ;;  %v9398_v40 = vsel %vm872_vm9, %v8681_v4, %v9007_v45  ;;  %v13139_v29 = vld [vmem:[#allocation142_spill] sm:$0xff] }
 0x556   : > { %vm1295_vm10 = vcmp.eq.s32.totalorder %v13134_v9, 1  ;;  %v13136_v16 = vld [vmem:[#allocation129_spill] sm:$0xff]  ;;  %vm878_vm15 = vcmp.eq.s32.totalorder %v13137_v5, 1  ;;  %vm1305_vm1 = vcmp.eq.s32.totalorder %v13139_v29, 1  ;;  %v4077_v4 = vsel %vm4045_vm12, 1, %v12648_v1  ;;  %v13142_v9 = vld [vmem:[#allocation147_spill] sm:$0xff] }
 0x557   : > { %4171 = vperm.xlu1 %5019, %v8518_v46   ;;  %v9391_v63 = vpop.permute.xlu1 %3852  ;;  %vm876_vm14 = vcmp.eq.s32.totalorder %v13136_v16, 1  ;;  %v9403_v47 = vsel %vm1295_vm10, %v1103_v36, %v9267_v2  ;;  %v9406_v22 = vld [vmem:[%s5469_s9 + $0x5b0] sm:$0xff]  ;;  %v13138_v46 = vld [vmem:[#allocation138_spill] sm:$0xff]  ;;  %v9417_v45 = vsel %vm874_vm13, %v8719_v27, %v9016_v21  ;;  %vm886_vm3 = vcmp.eq.s32.totalorder %v13142_v9, 1  ;;  %v13146_v5 = vld [vmem:[#allocation151_spill] sm:$0xff] }
 0x558   : > { %vm1303_vm0 = vcmp.eq.s32.totalorder %v13138_v46, 1  ;;  %v9410_v54 = vld [vmem:[%s5469_s9 + $0x650] sm:$0xff]  ;;  %13140 = vst [vmem:[#allocation46_spill] sm:$0xff] %v9417_v45  ;;  %v13141_v2 = vld [vmem:[#allocation146_spill] sm:$0xff]  ;;  %v9431_v62 = vsel %vm876_vm14, %v8775_v53, %v9037_v35  ;;  %v9435_v27 = vsel %vm878_vm15, %v8817_v48, %v9053_v56  ;;  %vm888_vm5 = vcmp.eq.s32.totalorder %v13146_v5, 1  ;;  %v13148_v56 = vld [vmem:[#allocation155_spill] sm:$0xff] }
 0x559   : > { %v9420_v26 = vld [vmem:[%s5469_s9 + $0x6f0] sm:$0xff]  ;;  %vm1307_vm2 = vcmp.eq.s32.totalorder %v13141_v2, 1  ;;  %v9424_v36 = vld [vmem:[%s5469_s9 + $0x558] sm:$0xff]  ;;  %13144 = vst [vmem:[#allocation49_spill] sm:$0xff] %v9431_v62  ;;  %13145 = vst [vmem:[#allocation50_spill] sm:$0xff] %v9435_v27  ;;  %v1335_v53 = vsel %vm1303_vm0, %v9406_v22, %v9306_v18  ;;  %v9454_v48 = vsel %vm1305_vm1, %v9410_v54, %v9310_v7  ;;  %vm890_vm6 = vcmp.eq.s32.totalorder %v13148_v56, 1 }
 0x55a   : > { %v1117_v42 = vld [vmem:[%s5469_s9 + $0x790] sm:$0xff]  ;;  %v13143_v16 = vld [vmem:[#allocation150_spill] sm:$0xff]  ;;  %v13149_v62 = vld [vmem:[#allocation159_spill] sm:$0xff]  ;;  %v9466_v18 = vsel %vm1307_vm2, %v9420_v26, %v9318_v8  ;;  %v9472_v7 = vsel %vm886_vm3, %v9424_v36, %v9113_v6 }
 0x55b   : > { %vm1309_vm4 = vcmp.eq.s32.totalorder %v13143_v16, 1  ;;  %v9438_v21 = vld [vmem:[%s5469_s9 + $0x5f8] sm:$0xff]  ;;  %v1119_v50 = vld [vmem:[%s5469_s9 + $0x830] sm:$0xff]  ;;  %5020 = vset.pattern.permute.xlu1 %v12272_v61  ;;  %v9444_v45 = vpop.permute.xlu1 %3858  ;;  %vm892_vm7 = vcmp.eq.s32.totalorder %v13149_v62, 1  ;;  %v13150_v62 = vld [vmem:[#allocation163_spill] sm:$0xff] }
 0x55c   : > { %v13147_v44 = vld [vmem:[#allocation154_spill] sm:$0xff]  ;;  %4286 = vperm.xlu1 %5020, %v4077_v4   ;;  %v9477_v46 = vsel %vm1309_vm4, %v1117_v42, %v9327_v15  ;;  %vm894_vm8 = vcmp.eq.s32.totalorder %v13150_v62, 1  ;;  %v9485_v8 = vsel %vm888_vm5, %v9438_v21, %v9118_v3  ;;  %v9492_v6 = vld [vmem:[%s5469_s9 + $0x68] sm:$0xff] }
 0x55d   : > { %vm1311_vm11 = vcmp.eq.s32.totalorder %v13147_v44, 1  ;;  %v9457_v35 = vld [vmem:[%s5469_s9 + $0x698] sm:$0xff] }
 0x55e   : > { %v700_v27 = vld [vmem:[%s5469_s9 + $0x738] sm:$0xff]  ;;  %v9489_v2 = vsel %vm1311_vm11, %v1119_v50, %v927_v14  ;;  %v9501_v16 = vsel %vm890_vm6, %v9457_v35, %v9131_v10 }
 0x55f   : > { %v702_v29 = vld [vmem:[%s5469_s9 + $0x7d8] sm:$0xff]  ;;  %13151 = vst [vmem:[#allocation53_spill] sm:$0xff] %v9489_v2  ;;  %v9504_v5 = vsel %vm892_vm7, %v700_v27, %v9147_v30  ;;  %v9512_v56 = vpop.permute.xlu1 %3864  ;;  %v13160_v30 = vld [vmem:[#allocation184_spill] sm:$0xff] }
 0x560   : > { %v13152_v9 = vld [vmem:[#allocation166_spill] sm:$0xff]  ;;  %13154 = vst [vmem:[#allocation57_spill] sm:$0xff] %v9504_v5  ;;  %v9515_v62 = vsel %vm894_vm8, %v702_v29, %v9161_v51  ;;  %vm1031_vm0 = vcmp.eq.s32.totalorder %v13160_v30, 1  ;;  %5021 = vset.pattern.permute.xlu1 %v12648_v1  ;;  %v13161_v51 = vld [vmem:[#allocation187_spill] sm:$0xff]  ;;  %v13222_v5 = vld [vmem:[#allocation337_spill] sm:$0xff] }
 0x561   : > { %vm1702_vm9 = vcmp.eq.s32.totalorder %v13152_v9, 1  ;;  %v9496_v15 = vld [vmem:[%s5469_s9 + $0x158] sm:$0xff]  ;;  %13157 = vst [vmem:[#allocation58_spill] sm:$0xff] %v9515_v62  ;;  %vm1033_vm1 = vcmp.eq.s32.totalorder %v13161_v51, 1  ;;  %4126 = vperm.xlu1 %5021, %v4077_v4   ;;  %v13165_v9 = vld [vmem:[#allocation193_spill] sm:$0xff]  ;;  %v13168_v4 = vld [vmem:[#allocation196_spill] sm:$0xff] }
 0x562   : > { %v13153_v42 = vld [vmem:[#allocation170_spill] sm:$0xff]  ;;  %v1734_v27 = vsel %vm1702_vm9, %v9492_v6, %v9367_v12  ;;  %vm1037_vm3 = vcmp.eq.s32.totalorder %v13165_v9, 1  ;;  %vm1039_vm5 = vcmp.eq.s32.totalorder %v13168_v4, 1  ;;  %v13179_v4 = vld [vmem:[#allocation260_spill] sm:$0xff] }
 0x563   : > { %vm1705_vm10 = vcmp.eq.s32.totalorder %v13153_v42, 1  ;;  %v9507_v3 = vld [vmem:[%s5469_s9 + $0x1f8] sm:$0xff]  ;;  %v13158_v42 = vld [vmem:[#allocation181_spill] sm:$0xff] }
 0x564   : > { %v13155_v44 = vld [vmem:[#allocation174_spill] sm:$0xff]  ;;  %vm1030_vm14 = vcmp.eq.s32.totalorder %v13158_v42, 1 }
 0x565   : > { %vm1707_vm12 = vcmp.eq.s32.totalorder %v13155_v44, 1  ;;  %v1517_v14 = vld [vmem:[%s5469_s9 + $0x298] sm:$0xff]  ;;  %v9528_v44 = vsel %vm1705_vm10, %v9496_v15, %v9371_v19  ;;  %v1062_v42 = vsel %vm1030_vm14, %v9186_v43, %v9218_v60  ;;  %5023 = vset.pattern.permute.xlu1 %v12272_v61  ;;  %vm2534_vm14 = vcmp.eq.s32.totalorder %v13179_v4, 1  ;;  %v13183_v4 = vld [vmem:[#allocation288_spill] sm:$0xff] }
 0x566   : > { %v13156_v50 = vld [vmem:[#allocation178_spill] sm:$0xff]  ;;  %3921 = vperm.xlu1 %5023, %v8467_v0  }
 0x567   : > { %vm1709_vm13 = vcmp.eq.s32.totalorder %v13156_v50, 1  ;;  %v1519_v10 = vld [vmem:[%s5469_s9 + $0x338] sm:$0xff] }
 0x568   : > { %v13159_v2 = vld [vmem:[#allocation182_spill] sm:$0xff]  ;;  %v9537_v50 = vsel %vm1709_vm13, %v1517_v14, %v9394_v33  ;;  %v9554_v33 = vpop.permute.xlu1 %3870  ;;  %v9558_v14 = vsel %vm1033_vm1, %v9194_v37, %v9250_v39  ;;  %v13172_v39 = vld [vmem:[#allocation208_spill] sm:$0xff] }
 0x569   : > { %vm1711_vm15 = vcmp.eq.s32.totalorder %v13159_v2, 1  ;;  %v13162_v29 = vld [vmem:[#allocation190_spill] sm:$0xff]  ;;  %v9534_v2 = vsel %vm1707_vm12, %v9507_v3, %v9383_v59  ;;  %13164 = vst [vmem:[#allocation62_spill] sm:$0xff] %v9537_v50  ;;  %v9551_v59 = vsel %vm1031_vm0, %v9347_v32, %v9237_v57  ;;  %13169 = vst [vmem:[#allocation66_spill] sm:$0xff] %v9554_v33  ;;  %v5108_v57 = vld [vmem:[%s5485_s18 + $0x48] sm:$0xff]  ;;  %v9571_v32 = vsel %vm1037_vm3, %v9221_v11, %v9283_v52 }
 0x56a   : > { %vm1035_vm2 = vcmp.eq.s32.totalorder %v13162_v29, 1  ;;  %13163 = vst [vmem:[#allocation61_spill] sm:$0xff] %v9534_v2  ;;  %v9541_v12 = vld [vmem:[%s5469_s9 + $0x5b8] sm:$0xff]  ;;  %v9547_v30 = vsel %vm1711_vm15, %v1519_v10, %v9403_v47  ;;  %v13170_v47 = vld [vmem:[#allocation197_spill] sm:$0xff]  ;;  %vm4046_vm6 = vcmp.eq.s32.totalorder %v5108_v57, 9  ;;  %13171 = vst [vmem:[#allocation69_spill] sm:$0xff] %v9571_v32 }
 0x56b   : > { %v13166_v19 = vld [vmem:[#allocation194_spill] sm:$0xff]  ;;  %13167 = vst [vmem:[#allocation65_spill] sm:$0xff] %v9547_v30  ;;  %v9562_v43 = vsel %vm1035_vm2, %v9208_v55, %v9260_v25  ;;  %vm1721_vm11 = vcmp.eq.s32.totalorder %v13170_v47, 1  ;;  %vm1047_vm7 = vcmp.eq.s32.totalorder %v13172_v39, 1  ;;  %v9576_v10 = vld [vmem:[%s5469_s9 + $0x70] sm:$0xff]  ;;  %v9582_v25 = vsel %vm1039_vm5, %v9240_v38, %v9294_v41  ;;  %v13176_v11 = vld [vmem:[#allocation224_spill] sm:$0xff] }
 0x56c   : > { %vm1719_vm4 = vcmp.eq.s32.totalorder %v13166_v19, 1  ;;  %v9565_v60 = vld [vmem:[%s5469_s9 + $0x658] sm:$0xff]  ;;  %v13173_v55 = vld [vmem:[#allocation213_spill] sm:$0xff]  ;;  %13174 = vst [vmem:[#allocation70_spill] sm:$0xff] %v9582_v25  ;;  %vm1287_vm10 = vcmp.eq.s32.totalorder %v13176_v11, 1  ;;  %v9588_v52 = vld [vmem:[%s5469_s9 + $0x5c0] sm:$0xff]  ;;  %v9604_v25 = vpop.permute.xlu1 %3876 }
 0x56d   : > { %v1751_v37 = vsel %vm1719_vm4, %v9541_v12, %v1335_v53  ;;  %vm2118_vm8 = vcmp.eq.s32.totalorder %v13173_v55, 1  ;;  %v13175_v51 = vld [vmem:[#allocation222_spill] sm:$0xff]  ;;  %v1095_v29 = vld [vmem:[%s5469_s9 + $0xb0] sm:$0xff]  ;;  %v13177_v53 = vld [vmem:[#allocation232_spill] sm:$0xff]  ;;  %v9596_v9 = vsel %vm1721_vm11, %v9565_v60, %v9454_v48  ;;  %13180 = vst [vmem:[#allocation73_spill] sm:$0xff] %v9604_v25  ;;  %v4078_v0 = vsel %vm4046_vm6, 1, %v12648_v1 }
 0x56e   : > { %vm1285_vm9 = vcmp.eq.s32.totalorder %v13175_v51, 1  ;;  %vm2135_vm12 = vcmp.eq.s32.totalorder %v13177_v53, 1  ;;  %v1110_v19 = vld [vmem:[%s5469_s9 + $0x560] sm:$0xff]  ;;  %v9601_v41 = vld [vmem:[%s5469_s9 + $0x78] sm:$0xff]  ;;  %v9612_v48 = vsel %vm1047_vm7, %v9270_v58, %v9313_v28  ;;  %v2150_v47 = vsel %vm2118_vm8, %v9576_v10, %v1734_v27  ;;  %v13181_v53 = vld [vmem:[#allocation289_spill] sm:$0xff]  ;;  %4289 = vperm.xlu1 %5023, %v4078_v0  }
 0x56f   : > { %v13178_v38 = vld [vmem:[#allocation255_spill] sm:$0xff]  ;;  %vm1446_vm15 = vcmp.eq.s32.totalorder %v13181_v53, 1  ;;  %v1317_v57 = vsel %vm1285_vm9, %v13183_v4, %v9380_v24  ;;  %v9626_v25 = vsel %vm1287_vm10, %v1095_v29, %v9387_v13  ;;  %v2167_v58 = vsel %vm2135_vm12, %v9588_v52, %v1751_v37  ;;  %v13184_v28 = vld [vmem:[#allocation334_spill] sm:$0xff]  ;;  %v9635_v55 = vld [vmem:[%s5469_s9 + $0x5c8] sm:$0xff] }
 0x570   : > { %vm1302_vm13 = vcmp.eq.s32.totalorder %v13178_v38, 1  ;;  %v13182_v38 = vld [vmem:[#allocation397_spill] sm:$0xff]  ;;  %vm1701_vm1 = vcmp.eq.s32.totalorder %v13184_v28, 1  ;;  %v2566_v39 = vsel %vm2534_vm14, %v9601_v41, %v2150_v47  ;;  %v13185_v53 = vld [vmem:[#allocation291_spill] sm:$0xff]  ;;  %v4005_v24 = vld [vmem:[%s5469_s9 + $0x48] sm:$0xff]  ;;  %v1478_v13 = vsel %vm1446_vm15, %v9333_v49, %v1062_v42 }
 0x571   : > { %vm630_vm0 = vcmp.eq.s32.totalorder %v13182_v38, 1  ;;  %v9631_v27 = vsel %vm1302_vm13, %v1110_v19, %v9472_v7  ;;  %vm2551_vm2 = vcmp.eq.s32.totalorder %v13185_v53, 1  ;;  %v13186_v51 = vld [vmem:[#allocation149_spill] sm:$0xff]  ;;  %v13188_v37 = vld [vmem:[#allocation198_spill] sm:$0xff]  ;;  %v4263_v7 = vpop.permute.xlu1 %4262  ;;  %v13190_v28 = vld [vmem:[#allocation292_spill] sm:$0xff] }
 0x572   : > { %vm2117_vm3 = vcmp.eq.s32.totalorder %v13186_v51, 1  ;;  %v13187_v11 = vld [vmem:[#allocation381_spill] sm:$0xff]  ;;  %vm1046_vm4 = vcmp.eq.s32.totalorder %v13188_v37, 1  ;;  %vm1447_vm11 = vcmp.eq.s32.totalorder %v13190_v28, 1  ;;  %v13191_v47 = vld [vmem:[#allocation180_spill] sm:$0xff]  ;;  %v13192_v30 = vld [vmem:[#allocation242_spill] sm:$0xff]  ;;  %v9648_v53 = vsel %vm2551_vm2, %v9635_v55, %v2167_v58  ;;  %5024 = vset.pattern.permute.xlu1 %v12648_v1 }
 0x573   : > { %v662_v38 = vsel %vm630_vm0, %v13187_v11, 0.0  ;;  %v13189_v4 = vld [vmem:[#allocation201_spill] sm:$0xff]  ;;  %v1733_v62 = vsel %vm1701_vm1, %v13191_v47, %v1317_v57  ;;  %vm2949_vm6 = vcmp.eq.s32.totalorder %v13192_v30, 1  ;;  %vm4357_vm7 = vcmp.eq.s32.totalorder %v4263_v7, 1  ;;  %v13194_v42 = vld [vmem:[#allocation479_spill] sm:$0xff]  ;;  %v13198_v57 = vld [vmem:[#allocation390_spill] sm:$0xff]  ;;  %4129 = vperm.xlu1 %5024, %v4078_v0  }
 0x574   : > { %vm2533_vm5 = vcmp.eq.s32.totalorder %v13189_v4, 1  ;;  %v13193_v51 = vld [vmem:[#allocation529_spill] sm:$0xff]  ;;  %vm3365_vm8 = vcmp.eq.s32.totalorder %v13194_v42, 1  ;;  %v1078_v4 = vsel %vm1046_vm4, %v9424_v36, %v662_v38  ;;  %v13196_v50 = vld [vmem:[#allocation183_spill] sm:$0xff]  ;;  %vm3781_vm10 = vcmp.eq.s32.totalorder %v13198_v57, 1  ;;  %v13200_v58 = vld [vmem:[#allocation436_spill] sm:$0xff] }
 0x575   : > { %v2149_v49 = vsel %vm2117_vm3, %v13193_v51, %v1733_v62  ;;  %v13195_v11 = vld [vmem:[#allocation533_spill] sm:$0xff]  ;;  %v9659_v30 = vsel %vm1447_vm11, %v1095_v29, %v9551_v59  ;;  %vm1878_vm13 = vcmp.eq.s32.totalorder %v13200_v58, 1  ;;  %v13201_v7 = vld [vmem:[#allocation530_spill] sm:$0xff]  ;;  %v13204_v51 = vld [vmem:[#allocation459_spill] sm:$0xff]  ;;  %v4103_v29 = vpop.permute.xlu1 %4102 }
 0x576   : > { %v4389_v37 = vsel %vm4357_vm7, %v4005_v24, %v13195_v11  ;;  %v2565_v33 = vsel %vm2533_vm5, %v13196_v50, %v2149_v49  ;;  %v13197_v28 = vld [vmem:[#allocation421_spill] sm:$0xff]  ;;  %v2758_v50 = vld [vmem:[%s5469_s9 + $0x80] sm:$0xff]  ;;  %v13203_v47 = vld [vmem:[#allocation18_spill] sm:$0xff]  ;;  %vm2294_vm0 = vcmp.eq.s32.totalorder %v13204_v51, 1  ;;  %vm4197_vm2 = vcmp.eq.s32.totalorder %v4103_v29, 1  ;;  %v4314_v29 = vpop.permute.xlu0 %4313 }
 0x577   : > { %vm1462_vm9 = vcmp.eq.s32.totalorder %v13197_v28, 1  ;;  %4517 = vmatprep.mubr.f32.mxu0 %v4389_v37  ;;  %v13199_v62 = vld [vmem:[#allocation309_spill] sm:$0xff]  ;;  %v2981_v36 = vsel %vm2949_vm6, %v13201_v7, %v2565_v33  ;;  %vm1862_vm15 = vcmp.eq.s32.totalorder %v13203_v47, 1  ;;  %v13205_v49 = vld [vmem:[#allocation54_spill] sm:$0xff]  ;;  %v9672_v11 = vld [vmem:[%s5469_s9 + $0x568] sm:$0xff] }
 0x578   : > { %vm2950_vm12 = vcmp.eq.s32.totalorder %v13199_v62, 1  ;;  %v13202_v38 = vld [vmem:[#allocation313_spill] sm:$0xff]  ;;  %v3397_v59 = vsel %vm3365_vm8, %v13205_v49, %v2981_v36  ;;  %v1494_v33 = vsel %vm1462_vm9, %v1110_v19, %v1078_v4  ;;  %v13206_v0 = vld [vmem:[#allocation475_spill] sm:$0xff]  ;;  %v13209_v4 = vld [vmem:[#allocation152_spill] sm:$0xff] }
 0x579   : > { %vm1463_vm14 = vcmp.eq.s32.totalorder %v13202_v38, 1  ;;  %vm2710_vm1 = vcmp.eq.s32.totalorder %v13206_v0, 1  ;;  %v13207_v37 = vld [vmem:[#allocation409_spill] sm:$0xff]  ;;  %v1910_v32 = vsel %vm1878_vm13, %v9672_v11, %v1494_v33  ;;  %v2982_v19 = vsel %vm2950_vm12, %v2758_v50, %v2566_v39  ;;  %v9690_v28 = vld [vmem:[%s5469_s9 + $0x578] sm:$0xff]  ;;  %v3898_v38 = vpop.permute.xlu1 %3897 }
 0x57a   : > { %v3813_v58 = vsel %vm3781_vm10, %v13207_v37, %v3397_v59  ;;  %v9681_v7 = vld [vmem:[%s5469_s9 + $0x570] sm:$0xff]  ;;  %vm2278_vm5 = vcmp.eq.s32.totalorder %v13209_v4, 1  ;;  %v13210_v59 = vld [vmem:[#allocation516_spill] sm:$0xff]  ;;  %v1495_v39 = vsel %vm1463_vm14, %v9406_v22, %v9612_v48  ;;  %v13213_v33 = vld [vmem:[#allocation426_spill] sm:$0xff]  ;;  %vm3958_vm10 = vcmp.eq.s32.totalorder %v3898_v38, 1 }
 0x57b   : > { %v13208_v42 = vld [vmem:[#allocation497_spill] sm:$0xff]  ;;  %v4229_v36 = vsel %vm4197_vm2, %v4005_v24, %v3813_v58  ;;  %v2326_v57 = vsel %vm2294_vm0, %v9681_v7, %v1910_v32  ;;  %vm3542_vm11 = vcmp.eq.s32.totalorder %v13210_v59, 1  ;;  %v13211_v24 = vld [vmem:[#allocation308_spill] sm:$0xff]  ;;  %vm2694_vm7 = vcmp.eq.s32.totalorder %v13213_v33, 1  ;;  %v9704_v37 = vld [vmem:[%s5469_s9 + $0x580] sm:$0xff] }
 0x57c   : > { %vm3126_vm3 = vcmp.eq.s32.totalorder %v13208_v42, 1  ;;  %v5109_v49 = vld [vmem:[%s5485_s18 + $0x50] sm:$0xff]  ;;  %4177 = vperm.xlu1 %5024, %v13211_v24   ;;  %4518 = vmatmul.mubr.f32.vlgmr.msra.gmra.mrb[0].mxu0 %v4229_v36  ;;  %v2742_v32 = vsel %vm2710_vm1, %v9690_v28, %v2326_v57  ;;  %v1894_v58 = vsel %vm1862_vm15, %v9492_v6, %v1478_v13  ;;  %v13214_v36 = vld [vmem:[#allocation466_spill] sm:$0xff]  ;;  %v9717_v22 = vld [vmem:[%s5469_s9 + $0x588] sm:$0xff]  ;;  %vm4374_vm12 = vcmp.eq.s32.totalorder %v4314_v29, 1 }
 0x57d   : > { %vm4047_vm4 = vcmp.eq.s32.totalorder %v5109_v49, 9  ;;  %v13212_v62 = vld [vmem:[#allocation333_spill] sm:$0xff]  ;;  %vm3110_vm8 = vcmp.eq.s32.totalorder %v13214_v36, 1  ;;  %v3158_v48 = vsel %vm3126_vm3, %v9704_v37, %v2742_v32  ;;  %v9725_v57 = vld [vmem:[%s5469_s9 + $0x598] sm:$0xff]  ;;  %v2310_v47 = vsel %vm2278_vm5, %v9576_v10, %v1894_v58  ;;  %v13215_v6 = vld [vmem:[#allocation507_spill] sm:$0xff] }
 0x57e   : > { %vm2967_vm6 = vcmp.eq.s32.totalorder %v13212_v62, 1  ;;  %v9710_v51 = vld [vmem:[%s5469_s9 + $0x5d0] sm:$0xff]  ;;  %v4079_v0 = vsel %vm4047_vm4, 1, %v12648_v1  ;;  %vm3526_vm9 = vcmp.eq.s32.totalorder %v13215_v6, 1  ;;  %v3574_v13 = vsel %vm3542_vm11, %v9717_v22, %v3158_v48  ;;  %v3174_v59 = vld [vmem:[%s5469_s9 + $0x88] sm:$0xff]  ;;  %v13216_v24 = vld [vmem:[#allocation354_spill] sm:$0xff]  ;;  %v3901_v62 = vpop.permute.xlu0 %3900 }
 0x57f   : > { %v9735_v42 = vld [vmem:[%s5469_s9 + $0x590] sm:$0xff]  ;;  %v2726_v49 = vsel %vm2694_vm7, %v9601_v41, %v2310_v47  ;;  %vm3942_vm13 = vcmp.eq.s32.totalorder %v9340_v23, 1  ;;  %v2999_v4 = vsel %vm2967_vm6, %v9710_v51, %v9648_v53  ;;  %vm3366_vm14 = vcmp.eq.s32.totalorder %v13216_v24, 1  ;;  %v4006_v29 = vld [vmem:[%s5469_s9 + $0x98] sm:$0xff]  ;;  %v13218_v48 = vld [vmem:[#allocation15_spill] sm:$0xff]  ;;  %v4266_v47 = vpop.permute.xlu1 %4265 }
 0x580   : > { %5025 = vset.pattern.permute.xlu1 %v12272_v61  ;;  %v3990_v10 = vsel %vm3958_vm10, %v9735_v42, %v3574_v13  ;;  %v3142_v33 = vsel %vm3110_vm8, %v2758_v50, %v2726_v49  ;;  %v13217_v32 = vld [vmem:[#allocation361_spill] sm:$0xff]  ;;  %v3191_v58 = vld [vmem:[%s5469_s9 + $0x5d8] sm:$0xff]  ;;  %vm3383_vm0 = vcmp.eq.s32.totalorder %v13218_v48, 1  ;;  %v13219_v38 = vld [vmem:[#allocation19_spill] sm:$0xff]  ;;  %vm4358_vm4 = vcmp.eq.s32.totalorder %v4266_v47, 1 }
 0x581   : > { %4292 = vperm.xlu1 %5025, %v4079_v0   ;;  %v4406_v41 = vsel %vm4374_vm12, %v9725_v57, %v3990_v10  ;;  %vm1718_vm15 = vcmp.eq.s32.totalorder %v13217_v32, 1  ;;  %vm1863_vm1 = vcmp.eq.s32.totalorder %v13219_v38, 1  ;;  %v3558_v53 = vsel %vm3526_vm9, %v3174_v59, %v3142_v33  ;;  %v3590_v36 = vld [vmem:[%s5469_s9 + $0x90] sm:$0xff]  ;;  %v13220_v50 = vld [vmem:[#allocation374_spill] sm:$0xff]  ;;  %v13229_v32 = vld [vmem:[#allocation60_spill] sm:$0xff] }
 0x582   : > { %4602 = vmatprep.mubr.f32.mxu1 %v4406_v41  ;;  %vm3782_vm2 = vcmp.eq.s32.totalorder %v13220_v50, 1  ;;  %v13221_v13 = vld [vmem:[#allocation29_spill] sm:$0xff]  ;;  %v3974_v49 = vsel %vm3942_vm13, %v3590_v36, %v3558_v53  ;;  %v9765_v10 = vld [vmem:[%s5469_s9 + $0xb8] sm:$0xff]  ;;  %vm1703_vm5 = vcmp.eq.s32.totalorder %v13222_v5, 1  ;;  %v3398_v6 = vsel %vm3366_vm14, %v3174_v59, %v2982_v19  ;;  %v13230_v48 = vld [vmem:[#allocation451_spill] sm:$0xff] }
 0x583   : > { %vm1879_vm3 = vcmp.eq.s32.totalorder %v13221_v13, 1  ;;  %v13223_v33 = vld [vmem:[#allocation122_spill] sm:$0xff]  ;;  %v4390_v2 = vsel %vm4358_vm4, %v4006_v29, %v3974_v49  ;;  %v1750_v41 = vsel %vm1718_vm15, %v9672_v11, %v9631_v27  ;;  %v9777_v47 = vsel %vm3383_vm0, %v3191_v58, %v2999_v4  ;;  %v13224_v53 = vld [vmem:[#allocation233_spill] sm:$0xff]  ;;  %v13227_v11 = vld [vmem:[#allocation200_spill] sm:$0xff] }
 0x584   : > { %vm2134_vm11 = vcmp.eq.s32.totalorder %v13223_v33, 1  ;;  %v1895_v23 = vsel %vm1863_vm1, %v9765_v10, %v9659_v30  ;;  %vm2295_vm6 = vcmp.eq.s32.totalorder %v13224_v53, 1  ;;  %4522 = vmatprep.mubr.f32.mxu0 %v4390_v2  ;;  %v1911_v19 = vsel %vm1879_vm3, %v9541_v12, %v1495_v39  ;;  %v13225_v59 = vld [vmem:[#allocation382_spill] sm:$0xff]  ;;  %v4106_v2 = vpop.permute.xlu1 %4105  ;;  %v13232_v38 = vld [vmem:[#allocation493_spill] sm:$0xff]  ;;  %v13233_v50 = vld [vmem:[#allocation511_spill] sm:$0xff] }
 0x585   : > { %5026 = vset.pattern.permute.xlu1 %v12648_v1  ;;  %vm3799_vm7 = vcmp.eq.s32.totalorder %v13225_v59, 1  ;;  %v13226_v24 = vld [vmem:[#allocation410_spill] sm:$0xff]  ;;  %v3814_v27 = vsel %vm3782_vm2, %v3590_v36, %v3398_v6  ;;  %vm1723_vm9 = vcmp.eq.s32.totalorder %v13227_v11, 1  ;;  %v2166_v4 = vsel %vm2134_vm11, %v9681_v7, %v1750_v41  ;;  %v13235_v49 = vld [vmem:[#allocation156_spill] sm:$0xff]  ;;  %v13244_v5 = vld [vmem:[#allocation261_spill] sm:$0xff] }
 0x586   : > { %vm2550_vm8 = vcmp.eq.s32.totalorder %v13226_v24, 1  ;;  %4132 = vperm.xlu1 %5026, %v4079_v0   ;;  %v13228_v30 = vld [vmem:[#allocation398_spill] sm:$0xff]  ;;  %vm2711_vm12 = vcmp.eq.s32.totalorder %v13229_v32, 1  ;;  %vm2966_vm13 = vcmp.eq.s32.totalorder %v13230_v48, 1  ;;  %v2327_v12 = vsel %vm2295_vm6, %v9588_v52, %v1911_v19  ;;  %v4317_v0 = vpop.permute.xlu0 %4316  ;;  %v13236_v33 = vld [vmem:[#allocation428_spill] sm:$0xff]  ;;  %v3607_v24 = vld [vmem:[%s5469_s9 + $0x5e0] sm:$0xff] }
 0x587   : > { %vm632_vm10 = vcmp.eq.s32.totalorder %v13228_v30, 1  ;;  %v13231_v39 = vld [vmem:[#allocation270_spill] sm:$0xff]  ;;  %vm3382_vm15 = vcmp.eq.s32.totalorder %v13232_v38, 1  ;;  %vm4198_vm0 = vcmp.eq.s32.totalorder %v4106_v2, 1  ;;  %v2582_v36 = vsel %vm2550_vm8, %v9690_v28, %v2166_v4  ;;  %v13238_v19 = vld [vmem:[#allocation468_spill] sm:$0xff]  ;;  %v13240_v2 = vld [vmem:[#allocation385_spill] sm:$0xff] }
 0x588   : > { %vm3127_vm14 = vcmp.eq.s32.totalorder %v13231_v39, 1  ;;  %vm3543_vm1 = vcmp.eq.s32.totalorder %v13233_v50, 1  ;;  %v13234_v7 = vld [vmem:[#allocation26_spill] sm:$0xff]  ;;  %v4230_v13 = vsel %vm4198_vm0, %v4006_v29, %v3814_v27  ;;  %vm2279_vm3 = vcmp.eq.s32.totalorder %v13235_v49, 1  ;;  %v13237_v29 = vld [vmem:[#allocation489_spill] sm:$0xff]  ;;  %v4154_v53 = vpop.permute.xlu1 %4153  ;;  %v2343_v27 = vld [vmem:[%s5469_s9 + $0xc8] sm:$0xff] }
 0x589   : > { %vm3798_vm2 = vcmp.eq.s32.totalorder %v13234_v7, 1  ;;  %v2743_v6 = vsel %vm2711_vm12, %v9635_v55, %v2327_v12  ;;  %v2998_v52 = vsel %vm2966_vm13, %v9704_v37, %v2582_v36  ;;  %vm3959_vm4 = vcmp.eq.s32.totalorder %v3901_v62, 1  ;;  %4523 = vmatmul.mubr.f32.gmra.mrb[2].mxu0 %v4230_v13  ;;  %v1927_v55 = vld [vmem:[%s5469_s9 + $0xc0] sm:$0xff]  ;;  %v13239_v4 = vld [vmem:[#allocation332_spill] sm:$0xff]  ;;  %v2759_v39 = vld [vmem:[%s5469_s9 + $0xd0] sm:$0xff] }
 0x58a   : > { %5027 = vset.pattern.permute.xlu1 %v12272_v61  ;;  %vm2695_vm11 = vcmp.eq.s32.totalorder %v13236_v33, 1  ;;  %v3159_v28 = vsel %vm3127_vm14, %v9710_v51, %v2743_v6  ;;  %v3414_v41 = vsel %vm3382_vm15, %v9717_v22, %v2998_v52  ;;  %vm4375_vm6 = vcmp.eq.s32.totalorder %v4317_v0, 1  ;;  %v13241_v62 = vld [vmem:[#allocation153_spill] sm:$0xff]  ;;  %v3175_v36 = vld [vmem:[%s5469_s9 + $0xd8] sm:$0xff]  ;;  %v4007_v7 = vld [vmem:[%s5469_s9 + $0xe8] sm:$0xff] }
 0x58b   : > { %3879 = vperm.xlu1 %5027, %v13237_v29   ;;  %vm3111_vm8 = vcmp.eq.s32.totalorder %v13238_v19, 1  ;;  %v3575_v37 = vsel %vm3543_vm1, %v3191_v58, %v3159_v28  ;;  %vm4214_vm12 = vcmp.eq.s32.totalorder %v4154_v53, 1  ;;  %v3830_v51 = vsel %vm3798_vm2, %v9735_v42, %v3414_v41  ;;  %v4023_v58 = vld [vmem:[%s5469_s9 + $0x5e8] sm:$0xff]  ;;  %v13242_v50 = vld [vmem:[#allocation329_spill] sm:$0xff]  ;;  %v3591_v52 = vld [vmem:[%s5469_s9 + $0xe0] sm:$0xff] }
 0x58c   : > { %v2311_v22 = vsel %vm2279_vm3, %v1927_v55, %v1895_v23  ;;  %vm3527_vm13 = vcmp.eq.s32.totalorder %v13239_v4, 1  ;;  %v3991_v32 = vsel %vm3959_vm4, %v3607_v24, %v3575_v37  ;;  %v4246_v48 = vsel %vm4214_vm12, %v9725_v57, %v3830_v51  ;;  %v9831_v23 = vld [vmem:[%s5469_s9 + $0x6f8] sm:$0xff]  ;;  %v13243_v13 = vld [vmem:[#allocation384_spill] sm:$0xff]  ;;  %v4269_v6 = vpop.permute.xlu1 %4268  ;;  %v13248_v37 = vld [vmem:[#allocation423_spill] sm:$0xff] }
 0x58d   : > { %vm4215_vm14 = vcmp.eq.s32.totalorder %v13240_v2, 1  ;;  %v2727_v12 = vsel %vm2695_vm11, %v2343_v27, %v2311_v22  ;;  %vm3943_vm15 = vcmp.eq.s32.totalorder %v9391_v63, 1  ;;  %4603 = vmatmul.mubr.f32.gmra.mrb[2].mxu1 %v4246_v48  ;;  %v4407_v42 = vsel %vm4375_vm6, %v4023_v58, %v3991_v32  ;;  %v13246_v33 = vld [vmem:[#allocation246_spill] sm:$0xff]  ;;  %v13247_v41 = vld [vmem:[#allocation480_spill] sm:$0xff]  ;;  %v13249_v63 = vld [vmem:[#allocation177_spill] sm:$0xff]  ;;  %v4320_v48 = vpop.permute.xlu0 %4319 }
 0x58e   : > { %v1735_v57 = vsel %vm1703_vm5, %v9765_v10, %v9626_v25  ;;  %vm2119_vm0 = vcmp.eq.s32.totalorder %v13241_v62, 1  ;;  %v3143_v38 = vsel %vm3111_vm8, %v2759_v39, %v2727_v12  ;;  %4607 = vmatprep.mubr.f32.mxu1 %v4407_v42  ;;  %v3831_v0 = vsel %vm3799_vm7, %v3607_v24, %v9777_v47  ;;  %v13245_v25 = vld [vmem:[#allocation204_spill] sm:$0xff]  ;;  %v13250_v11 = vld [vmem:[#allocation526_spill] sm:$0xff]  ;;  %v1112_v22 = vld [vmem:[%s5469_s9 + $0x600] sm:$0xff] }
 0x58f   : > { %3927 = vperm.xlu1 %5027, %v13242_v50   ;;  %v664_v49 = vsel %vm632_vm10, %v13243_v13, 0.0  ;;  %vm1048_vm5 = vcmp.eq.s32.totalorder %v13244_v5, 1  ;;  %vm2535_vm1 = vcmp.eq.s32.totalorder %v13245_v25, 1  ;;  %v3559_v10 = vsel %vm3527_vm13, %v3175_v36, %v3143_v38  ;;  %v13252_v24 = vld [vmem:[#allocation228_spill] sm:$0xff]  ;;  %v13256_v4 = vld [vmem:[#allocation461_spill] sm:$0xff]  ;;  %v9884_v2 = vld [vmem:[%s5469_s9 + $0x660] sm:$0xff] }
 0x590   : > { %vm2951_vm2 = vcmp.eq.s32.totalorder %v13246_v33, 1  ;;  %vm4359_vm3 = vcmp.eq.s32.totalorder %v4269_v6, 1  ;;  %v4247_v47 = vsel %vm4215_vm14, %v4023_v58, %v3831_v0  ;;  %v3975_v59 = vsel %vm3943_vm15, %v3591_v52, %v3559_v10  ;;  %v13254_v51 = vld [vmem:[#allocation236_spill] sm:$0xff]  ;;  %v4109_v58 = vpop.permute.xlu1 %4108  ;;  %v13259_v0 = vld [vmem:[#allocation326_spill] sm:$0xff]  ;;  %v5110_v5 = vld [vmem:[%s5469_s9 + $0x100] sm:$0xff] }
 0x591   : > { %v9863_v30 = vsel %vm1723_vm9, %v9831_v23, %v9466_v18  ;;  %v2151_v28 = vsel %vm2119_vm0, %v1927_v55, %v1735_v57  ;;  %vm3367_vm7 = vcmp.eq.s32.totalorder %v13247_v41, 1  ;;  %4608 = vmatmul.mubr.f32.gmra.mrb[4].mxu1 %v4247_v47  ;;  %v4391_v29 = vsel %vm4359_vm3, %v4007_v7, %v3975_v59  ;;  %v13251_v18 = vld [vmem:[#allocation210_spill] sm:$0xff]  ;;  %v13253_v55 = vld [vmem:[#allocation437_spill] sm:$0xff]  ;;  %v1528_v12 = vld [vmem:[%s5469_s9 + $0x608] sm:$0xff] }
 0x592   : > { %v1080_v53 = vsel %vm1048_vm5, %v9438_v21, %v664_v49  ;;  %v2567_v19 = vsel %vm2535_vm1, %v2343_v27, %v2151_v28  ;;  %vm1464_vm10 = vcmp.eq.s32.totalorder %v13248_v37, 1  ;;  %vm3783_vm4 = vcmp.eq.s32.totalorder %v13249_v63, 1  ;;  %4527 = vmatprep.mubr.f32.mxu0 %v4391_v29  ;;  %v13255_v27 = vld [vmem:[#allocation259_spill] sm:$0xff]  ;;  %v13257_v42 = vld [vmem:[#allocation476_spill] sm:$0xff]  ;;  %v9912_v10 = vld [vmem:[%s5469_s9 + $0x618] sm:$0xff] }
 0x593   : > { %4343 = vperm.xlu1 %5027, %v13250_v11   ;;  %vm1049_vm9 = vcmp.eq.s32.totalorder %v13251_v18, 1  ;;  %vm1288_vm11 = vcmp.eq.s32.totalorder %v13252_v24, 1  ;;  %vm1880_vm6 = vcmp.eq.s32.totalorder %v13253_v55, 1  ;;  %v2983_v21 = vsel %vm2951_vm2, %v2759_v39, %v2567_v19  ;;  %v9893_v62 = vld [vmem:[%s5469_s9 + $0x668] sm:$0xff]  ;;  %v9928_v33 = vld [vmem:[%s5469_s9 + $0x620] sm:$0xff]  ;;  %v9948_v19 = vld [vmem:[%s5469_s9 + $0x638] sm:$0xff]  ;;  %v9955_v18 = vpop.permute.xlu0 %3906 }
 0x594   : > { %vm2137_vm8 = vcmp.eq.s32.totalorder %v13254_v51, 1  ;;  %vm1304_vm12 = vcmp.eq.s32.totalorder %v13255_v27, 1  ;;  %vm2296_vm13 = vcmp.eq.s32.totalorder %v13256_v4, 1  ;;  %v3399_v32 = vsel %vm3367_vm7, %v3175_v36, %v2983_v21  ;;  %v13258_v38 = vld [vmem:[#allocation76_spill] sm:$0xff]  ;;  %v9897_v36 = vld [vmem:[%s5469_s9 + $0x610] sm:$0xff]  ;;  %v13266_v63 = vld [vmem:[#allocation363_spill] sm:$0xff] }
 0x595   : > { %v1496_v39 = vsel %vm1464_vm10, %v1112_v22, %v1080_v53  ;;  %vm2712_vm14 = vcmp.eq.s32.totalorder %v13257_v42, 1  ;;  %vm4199_vm15 = vcmp.eq.s32.totalorder %v4109_v58, 1  ;;  %v3815_v57 = vsel %vm3783_vm4, %v3591_v52, %v3399_v32  ;;  %v13260_v52 = vld [vmem:[#allocation519_spill] sm:$0xff]  ;;  %v13263_v28 = vld [vmem:[#allocation316_spill] sm:$0xff]  ;;  %v3904_v53 = vpop.permute.xlu1 %3903  ;;  %v9958_v24 = vld [vmem:[%s5469_s9 + $0x630] sm:$0xff] }
 0x596   : > { %vm2553_vm0 = vcmp.eq.s32.totalorder %v13258_v38, 1  ;;  %v1912_v50 = vsel %vm1880_vm6, %v1528_v12, %v1496_v39  ;;  %vm3128_vm5 = vcmp.eq.s32.totalorder %v13259_v0, 1  ;;  %v4231_v13 = vsel %vm4199_vm15, %v4007_v7, %v3815_v57  ;;  %v13261_v7 = vld [vmem:[#allocation338_spill] sm:$0xff]  ;;  %v13264_v41 = vld [vmem:[#allocation336_spill] sm:$0xff]  ;;  %v13268_v4 = vld [vmem:[#allocation63_spill] sm:$0xff] }
 0x597   : > { %5028 = vset.pattern.permute.xlu1 %v12648_v1  ;;  %v1081_v49 = vsel %vm1049_vm9, %v9274_v20, %v9321_v31  ;;  %v1320_v25 = vsel %vm1288_vm11, %v5110_v5, %v9398_v40  ;;  %v2328_v6 = vsel %vm2296_vm13, %v9897_v36, %v1912_v50  ;;  %vm3544_vm1 = vcmp.eq.s32.totalorder %v13260_v52, 1  ;;  %4528 = vmatmul.mubr.f32.gmra.mrb[4].mxu0 %v4231_v13  ;;  %v13262_v40 = vld [vmem:[#allocation294_spill] sm:$0xff]  ;;  %v13265_v37 = vld [vmem:[#allocation340_spill] sm:$0xff]  ;;  %v13269_v32 = vld [vmem:[#allocation317_spill] sm:$0xff] }
 0x598   : > { %4135 = vperm.xlu1 %5028, %v13261_v7   ;;  %v2169_v20 = vsel %vm2137_vm8, %v9884_v2, %v9596_v9  ;;  %v1336_v31 = vsel %vm1304_vm12, %v1112_v22, %v9485_v8  ;;  %vm1449_vm2 = vcmp.eq.s32.totalorder %v13262_v40, 1  ;;  %v2744_v47 = vsel %vm2712_vm14, %v9912_v10, %v2328_v6  ;;  %v9938_v9 = vld [vmem:[%s5469_s9 + $0x670] sm:$0xff]  ;;  %v9942_v8 = vld [vmem:[%s5469_s9 + $0x628] sm:$0xff]  ;;  %v13270_v39 = vld [vmem:[#allocation34_spill] sm:$0xff] }
 0x599   : > { %v2585_v59 = vsel %vm2553_vm0, %v9893_v62, %v2169_v20  ;;  %vm1465_vm3 = vcmp.eq.s32.totalorder %v13263_v28, 1  ;;  %vm2969_vm7 = vcmp.eq.s32.totalorder %v13264_v41, 1  ;;  %v3160_v29 = vsel %vm3128_vm5, %v9928_v33, %v2744_v47  ;;  %v13267_v21 = vld [vmem:[#allocation20_spill] sm:$0xff]  ;;  %v13271_v42 = vld [vmem:[#allocation401_spill] sm:$0xff]  ;;  %v4272_v57 = vpop.permute.xlu1 %4271  ;;  %v13272_v50 = vld [vmem:[#allocation127_spill] sm:$0xff]  ;;  %v4323_v47 = vpop.permute.xlu0 %4322 }
 0x59a   : > { %vm1704_vm10 = vcmp.eq.s32.totalorder %v13265_v37, 1  ;;  %vm1720_vm4 = vcmp.eq.s32.totalorder %v13266_v63, 1  ;;  %v3576_v11 = vsel %vm3544_vm1, %v9942_v8, %v3160_v29  ;;  %vm3960_vm9 = vcmp.eq.s32.totalorder %v3904_v53, 1  ;;  %v13273_v0 = vld [vmem:[#allocation441_spill] sm:$0xff]  ;;  %v13274_v13 = vld [vmem:[#allocation16_spill] sm:$0xff]  ;;  %v13277_v6 = vld [vmem:[#allocation411_spill] sm:$0xff] }
 0x59b   : > { %v1481_v55 = vsel %vm1449_vm2, %v9337_v34, %v9558_v14  ;;  %vm1865_vm11 = vcmp.eq.s32.totalorder %v13267_v21, 1  ;;  %vm4376_vm6 = vcmp.eq.s32.totalorder %v4320_v48, 1  ;;  %v3992_v51 = vsel %vm3960_vm9, %v9958_v24, %v3576_v11  ;;  %v4008_v14 = vld [vmem:[%s5469_s9 + $0x138] sm:$0xff]  ;;  %v5111_v48 = vld [vmem:[%s5469_s9 + $0x108] sm:$0xff]  ;;  %v13275_v5 = vld [vmem:[#allocation237_spill] sm:$0xff] }
 0x59c   : > { %5029 = vset.pattern.permute.xlu1 %v12272_v61  ;;  %v1497_v22 = vsel %vm1465_vm3, %v9410_v54, %v1081_v49  ;;  %v9973_v27 = vsel %vm2969_vm7, %v9938_v9, %v2585_v59  ;;  %vm2120_vm8 = vcmp.eq.s32.totalorder %v13268_v4, 1  ;;  %v4408_v34 = vsel %vm4376_vm6, %v9948_v19, %v3992_v51  ;;  %v5112_v49 = vld [vmem:[%s5469_s9 + $0x110] sm:$0xff]  ;;  %v13278_v7 = vld [vmem:[#allocation43_spill] sm:$0xff]  ;;  %v5113_v20 = vld [vmem:[%s5469_s9 + $0x118] sm:$0xff] }
 0x59d   : > { %3882 = vperm.xlu1 %5029, %v13269_v32   ;;  %v1736_v58 = vsel %vm1704_vm10, %v5111_v48, %v1320_v25  ;;  %v1752_v54 = vsel %vm1720_vm4, %v1528_v12, %v1336_v31  ;;  %vm1881_vm12 = vcmp.eq.s32.totalorder %v13270_v39, 1  ;;  %vm2536_vm13 = vcmp.eq.s32.totalorder %v13271_v42, 1  ;;  %4612 = vmatprep.mubr.f32.mxu1 %v4408_v34  ;;  %v13276_v25 = vld [vmem:[#allocation482_spill] sm:$0xff]  ;;  %v13279_v40 = vld [vmem:[#allocation531_spill] sm:$0xff]  ;;  %v13280_v59 = vld [vmem:[#allocation341_spill] sm:$0xff]  ;;  %v4112_v51 = vpop.permute.xlu1 %4111 }
 0x59e   : > { %v1897_v38 = vsel %vm1865_vm11, %v9496_v15, %v1481_v55  ;;  %vm2136_vm14 = vcmp.eq.s32.totalorder %v13272_v50, 1  ;;  %vm2952_vm15 = vcmp.eq.s32.totalorder %v13273_v0, 1  ;;  %vm4360_vm0 = vcmp.eq.s32.totalorder %v4272_v57, 1  ;;  %v13281_v41 = vld [vmem:[#allocation399_spill] sm:$0xff]  ;;  %v13284_v11 = vld [vmem:[#allocation64_spill] sm:$0xff]  ;;  %v5116_v32 = vld [vmem:[%s5469_s9 + $0x130] sm:$0xff] }
 0x59f   : > { %vm3385_vm5 = vcmp.eq.s32.totalorder %v13274_v13, 1  ;;  %v2152_v12 = vsel %vm2120_vm8, %v5112_v49, %v1736_v58  ;;  %vm2297_vm1 = vcmp.eq.s32.totalorder %v13275_v5, 1  ;;  %vm3368_vm2 = vcmp.eq.s32.totalorder %v13276_v25, 1  ;;  %v5114_v29 = vld [vmem:[%s5469_s9 + $0x120] sm:$0xff]  ;;  %v13285_v55 = vld [vmem:[#allocation452_spill] sm:$0xff]  ;;  %v13288_v48 = vld [vmem:[#allocation514_spill] sm:$0xff] }
 0x5a0   : > { %v4392_v52 = vsel %vm4360_vm0, %v4008_v14, %v13277_v6  ;;  %v1913_v15 = vsel %vm1881_vm12, %v9565_v60, %v1497_v22  ;;  %vm3801_vm3 = vcmp.eq.s32.totalorder %v13278_v7, 1  ;;  %v2568_v31 = vsel %vm2536_vm13, %v5113_v20, %v2152_v12  ;;  %v13282_v60 = vld [vmem:[#allocation412_spill] sm:$0xff]  ;;  %v13283_v37 = vld [vmem:[#allocation203_spill] sm:$0xff]  ;;  %v13286_v22 = vld [vmem:[#allocation278_spill] sm:$0xff] }
 0x5a1   : > { %vm3784_vm7 = vcmp.eq.s32.totalorder %v13279_v40, 1  ;;  %3930 = vperm.xlu1 %5029, %v13280_v59   ;;  %4532 = vmatprep.mubr.f32.mxu0 %v4392_v52  ;;  %v2168_v28 = vsel %vm2136_vm14, %v9897_v36, %v1752_v54  ;;  %vm634_vm10 = vcmp.eq.s32.totalorder %v13281_v41, 1  ;;  %vm2552_vm4 = vcmp.eq.s32.totalorder %v13282_v60, 1  ;;  %v5115_v21 = vld [vmem:[%s5469_s9 + $0x128] sm:$0xff]  ;;  %v13287_v4 = vld [vmem:[#allocation495_spill] sm:$0xff]  ;;  %v13289_v58 = vld [vmem:[#allocation226_spill] sm:$0xff] }
 0x5a2   : > { %v2984_v53 = vsel %vm2952_vm15, %v5114_v29, %v2568_v31  ;;  %vm1725_vm9 = vcmp.eq.s32.totalorder %v13283_v37, 1  ;;  %v2329_v63 = vsel %vm2297_vm1, %v9884_v2, %v1913_v15  ;;  %vm2713_vm11 = vcmp.eq.s32.totalorder %v13284_v11, 1  ;;  %v13290_v54 = vld [vmem:[#allocation528_spill] sm:$0xff]  ;;  %v13292_v0 = vld [vmem:[#allocation207_spill] sm:$0xff]  ;;  %v13293_v5 = vld [vmem:[#allocation250_spill] sm:$0xff] }
 0x5a3   : > { %vm2968_vm6 = vcmp.eq.s32.totalorder %v13285_v55, 1  ;;  %v3400_v36 = vsel %vm3368_vm2, %v5115_v21, %v2984_v53  ;;  %vm3129_vm8 = vcmp.eq.s32.totalorder %v13286_v22, 1  ;;  %vm3384_vm12 = vcmp.eq.s32.totalorder %v13287_v4, 1  ;;  %v13291_v42 = vld [vmem:[#allocation160_spill] sm:$0xff]  ;;  %v1929_v12 = vld [vmem:[%s5469_s9 + $0x160] sm:$0xff]  ;;  %v2761_v59 = vld [vmem:[%s5469_s9 + $0x170] sm:$0xff] }
 0x5a4   : > { %vm4200_vm13 = vcmp.eq.s32.totalorder %v4112_v51, 1  ;;  %v3816_v34 = vsel %vm3784_vm7, %v5116_v32, %v3400_v36  ;;  %v2584_v2 = vsel %vm2552_vm4, %v9912_v10, %v2168_v28  ;;  %vm3545_vm14 = vcmp.eq.s32.totalorder %v13288_v48, 1  ;;  %v3193_v10 = vld [vmem:[%s5469_s9 + $0x678] sm:$0xff]  ;;  %v3609_v6 = vld [vmem:[%s5469_s9 + $0x680] sm:$0xff]  ;;  %v4025_v40 = vld [vmem:[%s5469_s9 + $0x688] sm:$0xff] }
 0x5a5   : > { %vm3800_vm15 = vcmp.eq.s32.totalorder %v13289_v58, 1  ;;  %4346 = vperm.xlu1 %5029, %v13290_v54   ;;  %v4232_v39 = vsel %vm4200_vm13, %v4008_v14, %v3816_v34  ;;  %vm2281_vm0 = vcmp.eq.s32.totalorder %v13291_v42, 1  ;;  %v2745_v57 = vsel %vm2713_vm11, %v9893_v62, %v2329_v63  ;;  %v10047_v62 = vpop.permute.xlu0 %4325  ;;  %v13294_v15 = vld [vmem:[#allocation303_spill] sm:$0xff]  ;;  %v13295_v28 = vld [vmem:[#allocation386_spill] sm:$0xff]  ;;  %v13298_v29 = vld [vmem:[#allocation264_spill] sm:$0xff] }
 0x5a6   : > { %v3000_v50 = vsel %vm2968_vm6, %v9928_v33, %v2584_v2  ;;  %vm3961_vm1 = vcmp.eq.s32.totalorder %v9955_v18, 1  ;;  %4533 = vmatmul.mubr.f32.gmra.mrb[6].mxu0 %v4232_v39  ;;  %vm2697_vm2 = vcmp.eq.s32.totalorder %v13292_v0, 1  ;;  %v3161_v14 = vsel %vm3129_vm8, %v9938_v9, %v2745_v57  ;;  %v4160_v33 = vpop.permute.xlu1 %4159  ;;  %v10074_v60 = vld [vmem:[%s5469_s9 + $0x798] sm:$0xff]  ;;  %v4009_v55 = vld [vmem:[%s5469_s9 + $0x188] sm:$0xff]  ;;  %v5117_v21 = vld [vmem:[%s5469_s9 + $0x690] sm:$0xff] }
 0x5a7   : > { %v3416_v49 = vsel %vm3384_vm12, %v9942_v8, %v3000_v50  ;;  %vm4377_vm7 = vcmp.eq.s32.totalorder %v4323_v47, 1  ;;  %vm3113_vm4 = vcmp.eq.s32.totalorder %v13293_v5, 1  ;;  %v3577_v25 = vsel %vm3545_vm14, %v3193_v10, %v3161_v14  ;;  %v2345_v8 = vld [vmem:[%s5469_s9 + $0x168] sm:$0xff]  ;;  %v3177_v53 = vld [vmem:[%s5469_s9 + $0x178] sm:$0xff]  ;;  %v13299_v36 = vld [vmem:[#allocation265_spill] sm:$0xff] }
 0x5a8   : > { %vm4216_vm11 = vcmp.eq.s32.totalorder %v4160_v33, 1  ;;  %v3832_v9 = vsel %vm3800_vm15, %v9958_v24, %v3416_v49  ;;  %v2313_v52 = vsel %vm2281_vm0, %v1929_v12, %v1897_v38  ;;  %vm3529_vm6 = vcmp.eq.s32.totalorder %v13294_v15, 1  ;;  %v13296_v38 = vld [vmem:[#allocation512_spill] sm:$0xff]  ;;  %v3593_v13 = vld [vmem:[%s5469_s9 + $0x180] sm:$0xff]  ;;  %v13301_v48 = vld [vmem:[#allocation357_spill] sm:$0xff] }
 0x5a9   : > { %v3993_v20 = vsel %vm3961_vm1, %v3609_v6, %v3577_v25  ;;  %5030 = vset.pattern.permute.xlu1 %v12648_v1  ;;  %v4248_v31 = vsel %vm4216_vm11, %v9948_v19, %v3832_v9  ;;  %vm4217_vm8 = vcmp.eq.s32.totalorder %v13295_v28, 1  ;;  %v2729_v24 = vsel %vm2697_vm2, %v2345_v8, %v2313_v52  ;;  %v13297_v19 = vld [vmem:[#allocation215_spill] sm:$0xff]  ;;  %v10095_v32 = vpop.permute.xlu0 %3912  ;;  %v13303_v37 = vld [vmem:[#allocation425_spill] sm:$0xff]  ;;  %v13305_v39 = vld [vmem:[#allocation212_spill] sm:$0xff] }
 0x5aa   : > { %vm3945_vm12 = vcmp.eq.s32.totalorder %v9444_v45, 1  ;;  %4138 = vperm.xlu1 %5030, %v13296_v38   ;;  %4613 = vmatmul.mubr.f32.gmra.mrb[6].mxu1 %v4248_v31  ;;  %v4409_v18 = vsel %vm4377_vm7, %v4025_v40, %v3993_v20  ;;  %vm2121_vm13 = vcmp.eq.s32.totalorder %v13297_v19, 1  ;;  %vm2537_vm14 = vcmp.eq.s32.totalorder %v13298_v29, 1  ;;  %v4275_v22 = vpop.permute.xlu1 %4274  ;;  %v13302_v54 = vld [vmem:[#allocation375_spill] sm:$0xff]  ;;  %v13307_v50 = vld [vmem:[#allocation438_spill] sm:$0xff]  ;;  %v1530_v5 = vld [vmem:[%s5469_s9 + $0x6a8] sm:$0xff] }
 0x5ab   : > { %v3417_v63 = vsel %vm3385_vm5, %v3193_v10, %v9973_v27  ;;  %v3145_v11 = vsel %vm3113_vm4, %v2761_v59, %v2729_v24  ;;  %4617 = vmatprep.mubr.f32.mxu1 %v4409_v18  ;;  %v666_v47 = vsel %vm634_vm10, %v5117_v21, 0.0  ;;  %vm1050_vm15 = vcmp.eq.s32.totalorder %v13299_v36, 1  ;;  %v13300_v27 = vld [vmem:[#allocation312_spill] sm:$0xff]  ;;  %v13306_v42 = vld [vmem:[#allocation231_spill] sm:$0xff]  ;;  %v10143_v15 = vld [vmem:[%s5469_s9 + $0x6b0] sm:$0xff] }
 0x5ac   : > { %v3561_v51 = vsel %vm3529_vm6, %v3177_v53, %v3145_v11  ;;  %v3833_v4 = vsel %vm3801_vm3, %v3609_v6, %v3417_v63  ;;  %vm2953_vm5 = vcmp.eq.s32.totalorder %v13300_v27, 1  ;;  %vm4361_vm0 = vcmp.eq.s32.totalorder %v4275_v22, 1  ;;  %v13308_v10 = vld [vmem:[#allocation240_spill] sm:$0xff]  ;;  %v1114_v0 = vld [vmem:[%s5469_s9 + $0x6a0] sm:$0xff]  ;;  %v13311_v6 = vld [vmem:[#allocation477_spill] sm:$0xff] }
 0x5ad   : > { %v4249_v34 = vsel %vm4217_vm8, %v4025_v40, %v3833_v4  ;;  %v3977_v41 = vsel %vm3945_vm12, %v3593_v13, %v3561_v51  ;;  %v10105_v2 = vsel %vm1725_vm9, %v10074_v60, %v9477_v46  ;;  %v2153_v7 = vsel %vm2121_vm13, %v1929_v12, %v9528_v44  ;;  %v13304_v44 = vld [vmem:[#allocation491_spill] sm:$0xff]  ;;  %v13312_v52 = vld [vmem:[#allocation296_spill] sm:$0xff]  ;;  %v13313_v31 = vld [vmem:[#allocation350_spill] sm:$0xff]  ;;  %v10148_v40 = vpop.permute.xlu0 %4328 }
 0x5ae   : > { %vm3369_vm3 = vcmp.eq.s32.totalorder %v13301_v48, 1  ;;  %5031 = vset.pattern.permute.xlu1 %v12272_v61  ;;  %4618 = vmatmul.mubr.f32.gmra.mrb[8].mxu1 %v4249_v34  ;;  %v4393_v58 = vsel %vm4361_vm0, %v4009_v55, %v3977_v41  ;;  %v2569_v45 = vsel %vm2537_vm14, %v2345_v8, %v2153_v7  ;;  %vm3785_vm10 = vcmp.eq.s32.totalorder %v13302_v54, 1  ;;  %v13310_v49 = vld [vmem:[#allocation463_spill] sm:$0xff]  ;;  %v4115_v33 = vpop.permute.xlu1 %4114  ;;  %v10139_v8 = vld [vmem:[%s5469_s9 + $0x708] sm:$0xff]  ;;  %v13315_v19 = vld [vmem:[#allocation46_spill] sm:$0xff] }
 0x5af   : > { %v1082_v46 = vsel %vm1050_vm15, %v9457_v35, %v666_v47  ;;  %vm1466_vm9 = vcmp.eq.s32.totalorder %v13303_v37, 1  ;;  %3885 = vperm.xlu1 %5031, %v13304_v44   ;;  %4537 = vmatprep.mubr.f32.mxu0 %v4393_v58  ;;  %vm1051_vm1 = vcmp.eq.s32.totalorder %v13305_v39, 1  ;;  %vm1290_vm2 = vcmp.eq.s32.totalorder %v13306_v42, 1  ;;  %v13309_v35 = vld [vmem:[#allocation263_spill] sm:$0xff]  ;;  %v5118_v24 = vld [vmem:[%s5469_s9 + $0x6e8] sm:$0xff]  ;;  %v13316_v11 = vld [vmem:[#allocation522_spill] sm:$0xff] }
 0x5b0   : > { %v2985_v57 = vsel %vm2953_vm5, %v2761_v59, %v2569_v45  ;;  %vm1882_vm7 = vcmp.eq.s32.totalorder %v13307_v50, 1  ;;  %vm2139_vm4 = vcmp.eq.s32.totalorder %v13308_v10, 1  ;;  %vm1306_vm11 = vcmp.eq.s32.totalorder %v13309_v35, 1  ;;  %v10132_v12 = vld [vmem:[%s5469_s9 + $0x700] sm:$0xff]  ;;  %v13314_v59 = vld [vmem:[#allocation353_spill] sm:$0xff]  ;;  %v10195_v34 = vld [vmem:[%s5469_s9 + $0x6d8] sm:$0xff] }
 0x5b1   : > { %v3401_v14 = vsel %vm3369_vm3, %v3177_v53, %v2985_v57  ;;  %vm2298_vm6 = vcmp.eq.s32.totalorder %v13310_v49, 1  ;;  %v1498_v25 = vsel %vm1466_vm9, %v1114_v0, %v1082_v46  ;;  %vm2714_vm8 = vcmp.eq.s32.totalorder %v13311_v6, 1  ;;  %v5119_v18 = vld [vmem:[%s5469_s9 + $0x1a0] sm:$0xff]  ;;  %v10160_v53 = vld [vmem:[%s5469_s9 + $0x6b8] sm:$0xff]  ;;  %v13317_v21 = vld [vmem:[#allocation297_spill] sm:$0xff]  ;;  %v10222_v50 = vpop.permute.xlu0 %4331 }
 0x5b2   : > { %vm4201_vm12 = vcmp.eq.s32.totalorder %v4115_v33, 1  ;;  %v3817_v9 = vsel %vm3785_vm10, %v3593_v13, %v3401_v14  ;;  %vm2555_vm13 = vcmp.eq.s32.totalorder %v13312_v52, 1  ;;  %v1914_v20 = vsel %vm1882_vm7, %v1530_v5, %v1498_v25  ;;  %v10175_v47 = vld [vmem:[%s5469_s9 + $0x6c0] sm:$0xff]  ;;  %v3910_v27 = vpop.permute.xlu1 %3909  ;;  %v13321_v7 = vld [vmem:[#allocation364_spill] sm:$0xff]  ;;  %v10203_v58 = vld [vmem:[%s5469_s9 + $0x6d0] sm:$0xff] }
 0x5b3   : > { %vm3130_vm14 = vcmp.eq.s32.totalorder %v13313_v31, 1  ;;  %3933 = vperm.xlu1 %5031, %v13314_v59   ;;  %v4233_v28 = vsel %vm4201_vm12, %v4009_v55, %v3817_v9  ;;  %v1083_v38 = vsel %vm1051_vm1, %v5118_v24, %v9330_v17  ;;  %v1322_v29 = vsel %vm1290_vm2, %v5119_v18, %v13315_v19  ;;  %v13318_v22 = vld [vmem:[#allocation319_spill] sm:$0xff]  ;;  %v5120_v54 = vld [vmem:[%s5469_s9 + $0x1f0] sm:$0xff]  ;;  %v4010_v10 = vld [vmem:[%s5469_s9 + $0x1d8] sm:$0xff] }
 0x5b4   : > { %v2330_v63 = vsel %vm2298_vm6, %v10143_v15, %v1914_v20  ;;  %vm3546_vm15 = vcmp.eq.s32.totalorder %v13316_v11, 1  ;;  %4538 = vmatmul.mubr.f32.gmra.mrb[8].mxu0 %v4233_v28  ;;  %v2171_v17 = vsel %vm2139_vm4, %v10132_v12, %v9863_v30  ;;  %v1338_v55 = vsel %vm1306_vm11, %v1114_v0, %v9501_v16  ;;  %v10185_v30 = vld [vmem:[%s5469_s9 + $0x710] sm:$0xff]  ;;  %v13319_v4 = vld [vmem:[#allocation339_spill] sm:$0xff]  ;;  %v10189_v16 = vld [vmem:[%s5469_s9 + $0x6c8] sm:$0xff] }
 0x5b5   : > { %vm1451_vm5 = vcmp.eq.s32.totalorder %v13317_v21, 1  ;;  %v2746_v36 = vsel %vm2714_vm8, %v10160_v53, %v2330_v63  ;;  %v2587_v51 = vsel %vm2555_vm13, %v10139_v8, %v2171_v17  ;;  %vm1467_vm0 = vcmp.eq.s32.totalorder %v13318_v22, 1  ;;  %v13320_v41 = vld [vmem:[#allocation343_spill] sm:$0xff]  ;;  %v13323_v37 = vld [vmem:[#allocation21_spill] sm:$0xff]  ;;  %v13326_v14 = vld [vmem:[#allocation402_spill] sm:$0xff] }
 0x5b6   : > { %vm2971_vm3 = vcmp.eq.s32.totalorder %v13319_v4, 1  ;;  %v3162_v13 = vsel %vm3130_vm14, %v10175_v47, %v2746_v36  ;;  %vm1706_vm10 = vcmp.eq.s32.totalorder %v13320_v41, 1  ;;  %vm1722_vm9 = vcmp.eq.s32.totalorder %v13321_v7, 1  ;;  %v13322_v45 = vld [vmem:[#allocation391_spill] sm:$0xff]  ;;  %v13325_v35 = vld [vmem:[#allocation37_spill] sm:$0xff]  ;;  %v4278_v49 = vpop.permute.xlu1 %4277  ;;  %v13327_v25 = vld [vmem:[#allocation130_spill] sm:$0xff] }
 0x5b7   : > { %v3578_v48 = vsel %vm3546_vm15, %v10189_v16, %v3162_v13  ;;  %vm3962_vm1 = vcmp.eq.s32.totalorder %v3910_v27, 1  ;;  %4349 = vperm.xlu1 %5031, %v13322_v45   ;;  %v1483_v46 = vsel %vm1451_vm5, %v5120_v54, %v9562_v43  ;;  %vm1867_vm2 = vcmp.eq.s32.totalorder %v13323_v37, 1  ;;  %v13324_v57 = vld [vmem:[#allocation67_spill] sm:$0xff]  ;;  %v13329_v9 = vld [vmem:[#allocation17_spill] sm:$0xff]  ;;  %v13331_v31 = vld [vmem:[#allocation484_spill] sm:$0xff]  ;;  %v10272_v13 = vpop.permute.xlu0 %3918 }
 0x5b8   : > { %vm4378_vm7 = vcmp.eq.s32.totalorder %v10047_v62, 1  ;;  %v3994_v44 = vsel %vm3962_vm1, %v10203_v58, %v3578_v48  ;;  %v1499_v39 = vsel %vm1467_vm0, %v9420_v26, %v1083_v38  ;;  %v10219_v42 = vsel %vm2971_vm3, %v10185_v30, %v2587_v51  ;;  %v5121_v62 = vld [vmem:[%s5469_s9 + $0x1a8] sm:$0xff]  ;;  %v13328_v6 = vld [vmem:[#allocation443_spill] sm:$0xff]  ;;  %v13330_v20 = vld [vmem:[#allocation241_spill] sm:$0xff] }
 0x5b9   : > { %vm2122_vm4 = vcmp.eq.s32.totalorder %v13324_v57, 1  ;;  %v4410_v43 = vsel %vm4378_vm7, %v10195_v34, %v3994_v44  ;;  %v1738_v0 = vsel %vm1706_vm10, %v5121_v62, %v1322_v29  ;;  %v1754_v26 = vsel %vm1722_vm9, %v1530_v5, %v1338_v55  ;;  %v5122_v5 = vld [vmem:[%s5469_s9 + $0x1b0] sm:$0xff]  ;;  %v13332_v59 = vld [vmem:[#allocation515_spill] sm:$0xff]  ;;  %v5123_v18 = vld [vmem:[%s5469_s9 + $0x1b8] sm:$0xff] }
 0x5ba   : > { %vm1883_vm11 = vcmp.eq.s32.totalorder %v13325_v35, 1  ;;  %vm2538_vm6 = vcmp.eq.s32.totalorder %v13326_v14, 1  ;;  %4622 = vmatprep.mubr.f32.mxu1 %v4410_v43  ;;  %v1899_v33 = vsel %vm1867_vm2, %v9507_v3, %v1483_v46  ;;  %vm2138_vm8 = vcmp.eq.s32.totalorder %v13327_v25, 1  ;;  %v13333_v3 = vld [vmem:[#allocation413_spill] sm:$0xff]  ;;  %v13334_v38 = vld [vmem:[#allocation47_spill] sm:$0xff]  ;;  %v13335_v29 = vld [vmem:[#allocation186_spill] sm:$0xff]  ;;  %v4118_v27 = vpop.permute.xlu1 %4117 }
 0x5bb   : > { %vm2954_vm12 = vcmp.eq.s32.totalorder %v13328_v6, 1  ;;  %vm4362_vm13 = vcmp.eq.s32.totalorder %v4278_v49, 1  ;;  %5032 = vset.pattern.permute.xlu1 %v12648_v1  ;;  %vm3387_vm14 = vcmp.eq.s32.totalorder %v13329_v9, 1  ;;  %v2154_v52 = vsel %vm2122_vm4, %v5122_v5, %v1738_v0  ;;  %v13336_v11 = vld [vmem:[#allocation157_spill] sm:$0xff]  ;;  %v13337_v17 = vld [vmem:[#allocation414_spill] sm:$0xff]  ;;  %v5124_v55 = vld [vmem:[%s5469_s9 + $0x1c0] sm:$0xff]  ;;  %v10317_v5 = vpop.permute.xlu0 %4334 }
 0x5bc   : > { %vm2299_vm15 = vcmp.eq.s32.totalorder %v13330_v20, 1  ;;  %vm3370_vm5 = vcmp.eq.s32.totalorder %v13331_v31, 1  ;;  %4141 = vperm.xlu1 %5032, %v13332_v59   ;;  %v4394_v28 = vsel %vm4362_vm13, %v4010_v10, %v13333_v3  ;;  %v1915_v24 = vsel %vm1883_vm11, %v9831_v23, %v1499_v39  ;;  %v13338_v21 = vld [vmem:[#allocation206_spill] sm:$0xff]  ;;  %v13339_v51 = vld [vmem:[#allocation72_spill] sm:$0xff]  ;;  %v13343_v54 = vld [vmem:[#allocation517_spill] sm:$0xff] }
 0x5bd   : > { %vm3803_vm0 = vcmp.eq.s32.totalorder %v13334_v38, 1  ;;  %v2570_v19 = vsel %vm2538_vm6, %v5123_v18, %v2154_v52  ;;  %vm3786_vm3 = vcmp.eq.s32.totalorder %v13335_v29, 1  ;;  %4542 = vmatprep.mubr.f32.mxu0 %v4394_v28  ;;  %v2170_v63 = vsel %vm2138_vm8, %v10143_v15, %v1754_v26  ;;  %v13340_v22 = vld [vmem:[#allocation454_spill] sm:$0xff]  ;;  %v5125_v15 = vld [vmem:[%s5469_s9 + $0x1c8] sm:$0xff]  ;;  %v13344_v46 = vld [vmem:[#allocation229_spill] sm:$0xff] }
 0x5be   : > { %vm636_vm10 = vcmp.eq.s32.totalorder %v13336_v11, 1  ;;  %vm2554_vm9 = vcmp.eq.s32.totalorder %v13337_v17, 1  ;;  %v2986_v23 = vsel %vm2954_vm12, %v5124_v55, %v2570_v19  ;;  %vm1727_vm1 = vcmp.eq.s32.totalorder %v13338_v21, 1  ;;  %v13341_v41 = vld [vmem:[#allocation282_spill] sm:$0xff]  ;;  %v13342_v7 = vld [vmem:[#allocation496_spill] sm:$0xff]  ;;  %v13347_v62 = vld [vmem:[#allocation431_spill] sm:$0xff] }
 0x5bf   : > { %v2331_v36 = vsel %vm2299_vm15, %v10132_v12, %v1915_v24  ;;  %vm2715_vm2 = vcmp.eq.s32.totalorder %v13339_v51, 1  ;;  %vm2970_vm7 = vcmp.eq.s32.totalorder %v13340_v22, 1  ;;  %v3402_v4 = vsel %vm3370_vm5, %v5125_v15, %v2986_v23  ;;  %v5126_v12 = vld [vmem:[%s5469_s9 + $0x1d0] sm:$0xff]  ;;  %v13345_v37 = vld [vmem:[#allocation320_spill] sm:$0xff]  ;;  %v3195_v43 = vld [vmem:[%s5469_s9 + $0x718] sm:$0xff] }
 0x5c0   : > { %vm3131_vm4 = vcmp.eq.s32.totalorder %v13341_v41, 1  ;;  %vm3386_vm11 = vcmp.eq.s32.totalorder %v13342_v7, 1  ;;  %vm4202_vm6 = vcmp.eq.s32.totalorder %v4118_v27, 1  ;;  %5033 = vset.pattern.permute.xlu1 %v12272_v61  ;;  %v3818_v48 = vsel %vm3786_vm3, %v5126_v12, %v3402_v4  ;;  %v13346_v39 = vld [vmem:[#allocation164_spill] sm:$0xff]  ;;  %v13348_v26 = vld [vmem:[#allocation471_spill] sm:$0xff]  ;;  %v10330_v3 = vld [vmem:[%s5469_s9 + $0x838] sm:$0xff] }
 0x5c1   : > { %v2586_v45 = vsel %vm2554_vm9, %v10160_v53, %v2170_v63  ;;  %vm3547_vm8 = vcmp.eq.s32.totalorder %v13343_v54, 1  ;;  %vm3802_vm12 = vcmp.eq.s32.totalorder %v13344_v46, 1  ;;  %3888 = vperm.xlu1 %5033, %v13345_v37   ;;  %v4234_v44 = vsel %vm4202_vm6, %v4010_v10, %v3818_v48  ;;  %v3611_v14 = vld [vmem:[%s5469_s9 + $0x720] sm:$0xff]  ;;  %v2347_v49 = vld [vmem:[%s5469_s9 + $0x208] sm:$0xff]  ;;  %v13352_v28 = vld [vmem:[#allocation217_spill] sm:$0xff]  ;;  %v10373_v54 = vpop.permute.xlu0 %4337 }
 0x5c2   : > { %vm2283_vm13 = vcmp.eq.s32.totalorder %v13346_v39, 1  ;;  %v2747_v57 = vsel %vm2715_vm2, %v10139_v8, %v2331_v36  ;;  %v3002_v53 = vsel %vm2970_vm7, %v10175_v47, %v2586_v45  ;;  %vm3963_vm15 = vcmp.eq.s32.totalorder %v10095_v32, 1  ;;  %4543 = vmatmul.mubr.f32.gmra.mrb[10].mxu0 %v4234_v44  ;;  %v4166_v8 = vpop.permute.xlu1 %4165  ;;  %v1931_v47 = vld [vmem:[%s5469_s9 + $0x200] sm:$0xff]  ;;  %v13349_v25 = vld [vmem:[#allocation356_spill] sm:$0xff]  ;;  %v3179_v24 = vld [vmem:[%s5469_s9 + $0x218] sm:$0xff] }
 0x5c3   : > { %vm2699_vm5 = vcmp.eq.s32.totalorder %v13347_v62, 1  ;;  %v3163_v10 = vsel %vm3131_vm4, %v10185_v30, %v2747_v57  ;;  %v3418_v0 = vsel %vm3386_vm11, %v10189_v16, %v3002_v53  ;;  %vm4379_vm3 = vcmp.eq.s32.totalorder %v10148_v40, 1  ;;  %v13350_v52 = vld [vmem:[#allocation344_spill] sm:$0xff]  ;;  %v13351_v59 = vld [vmem:[#allocation387_spill] sm:$0xff]  ;;  %v5127_v63 = vld [vmem:[%s5469_s9 + $0x730] sm:$0xff] }
 0x5c4   : > { %vm3115_vm9 = vcmp.eq.s32.totalorder %v13348_v26, 1  ;;  %v3579_v35 = vsel %vm3547_vm8, %v3195_v43, %v3163_v10  ;;  %vm4218_vm2 = vcmp.eq.s32.totalorder %v4166_v8, 1  ;;  %v3834_v30 = vsel %vm3802_vm12, %v10203_v58, %v3418_v0  ;;  %v4027_v31 = vld [vmem:[%s5469_s9 + $0x728] sm:$0xff]  ;;  %v2763_v58 = vld [vmem:[%s5469_s9 + $0x210] sm:$0xff]  ;;  %v13355_v36 = vld [vmem:[#allocation315_spill] sm:$0xff] }
 0x5c5   : > { %v2315_v16 = vsel %vm2283_vm13, %v1931_v47, %v1899_v33  ;;  %vm3531_vm7 = vcmp.eq.s32.totalorder %v13349_v25, 1  ;;  %v3995_v6 = vsel %vm3963_vm15, %v3611_v14, %v3579_v35  ;;  %3936 = vperm.xlu1 %5033, %v13350_v52   ;;  %v4250_v20 = vsel %vm4218_vm2, %v10195_v34, %v3834_v30  ;;  %v13353_v34 = vld [vmem:[#allocation268_spill] sm:$0xff]  ;;  %v13354_v17 = vld [vmem:[#allocation269_spill] sm:$0xff]  ;;  %v5128_v48 = vld [vmem:[%s5469_s9 + $0x738] sm:$0xff] }
 0x5c6   : > { %vm4219_vm4 = vcmp.eq.s32.totalorder %v13351_v59, 1  ;;  %v2731_v33 = vsel %vm2699_vm5, %v2347_v49, %v2315_v16  ;;  %vm3947_vm11 = vcmp.eq.s32.totalorder %v9512_v56, 1  ;;  %4623 = vmatmul.mubr.f32.gmra.mrb[10].mxu1 %v4250_v20  ;;  %v4411_v32 = vsel %vm4379_vm3, %v4027_v31, %v3995_v6  ;;  %v4011_v29 = vld [vmem:[%s5469_s9 + $0x228] sm:$0xff]  ;;  %v4281_v23 = vpop.permute.xlu1 %4280  ;;  %v13356_v51 = vld [vmem:[#allocation393_spill] sm:$0xff]  ;;  %v13361_v45 = vld [vmem:[#allocation427_spill] sm:$0xff] }
 0x5c7   : > { %vm2123_vm6 = vcmp.eq.s32.totalorder %v13352_v28, 1  ;;  %vm2539_vm8 = vcmp.eq.s32.totalorder %v13353_v34, 1  ;;  %v3419_v18 = vsel %vm3387_vm14, %v3195_v43, %v10219_v42  ;;  %v3147_v19 = vsel %vm3115_vm9, %v2763_v58, %v2731_v33  ;;  %4627 = vmatprep.mubr.f32.mxu1 %v4411_v32  ;;  %v3595_v42 = vld [vmem:[%s5469_s9 + $0x220] sm:$0xff]  ;;  %v13357_v15 = vld [vmem:[#allocation53_spill] sm:$0xff]  ;;  %v13359_v41 = vld [vmem:[#allocation360_spill] sm:$0xff] }
 0x5c8   : > { %v668_v40 = vsel %vm636_vm10, %v5127_v63, 0.0  ;;  %vm1052_vm12 = vcmp.eq.s32.totalorder %v13354_v17, 1  ;;  %v3563_v55 = vsel %vm3531_vm7, %v3179_v24, %v3147_v19  ;;  %v3835_v9 = vsel %vm3803_vm0, %v3611_v14, %v3419_v18  ;;  %v13358_v38 = vld [vmem:[#allocation61_spill] sm:$0xff]  ;;  %v13360_v56 = vld [vmem:[#allocation376_spill] sm:$0xff]  ;;  %v13362_v46 = vld [vmem:[#allocation214_spill] sm:$0xff] }
 0x5c9   : > { %vm2955_vm14 = vcmp.eq.s32.totalorder %v13355_v36, 1  ;;  %vm4363_vm13 = vcmp.eq.s32.totalorder %v4281_v23, 1  ;;  %4352 = vperm.xlu1 %5033, %v13356_v51   ;;  %v4251_v11 = vsel %vm4219_vm4, %v4027_v31, %v3835_v9  ;;  %v3979_v22 = vsel %vm3947_vm11, %v3595_v42, %v3563_v55  ;;  %v13363_v37 = vld [vmem:[#allocation235_spill] sm:$0xff]  ;;  %v13365_v57 = vld [vmem:[#allocation244_spill] sm:$0xff]  ;;  %v13367_v10 = vld [vmem:[#allocation465_spill] sm:$0xff]  ;;  %v10436_v23 = vpop.permute.xlu0 %3924 }
 0x5ca   : > { %v10360_v4 = vsel %vm1727_vm1, %v10330_v3, %v13357_v15  ;;  %v2155_v27 = vsel %vm2123_vm6, %v1931_v47, %v13358_v38  ;;  %vm3371_vm0 = vcmp.eq.s32.totalorder %v13359_v41, 1  ;;  %4628 = vmatmul.mubr.f32.gmra.mrb[12].mxu1 %v4251_v11  ;;  %v4395_v7 = vsel %vm4363_vm13, %v4011_v29, %v3979_v22  ;;  %v13364_v39 = vld [vmem:[#allocation439_spill] sm:$0xff]  ;;  %v4121_v0 = vpop.permute.xlu1 %4120  ;;  %v1532_v47 = vld [vmem:[%s5469_s9 + $0x748] sm:$0xff]  ;;  %v13368_v35 = vld [vmem:[#allocation478_spill] sm:$0xff] }
 0x5cb   : > { %v2571_v12 = vsel %vm2539_vm8, %v2347_v49, %v2155_v27  ;;  %vm3787_vm10 = vcmp.eq.s32.totalorder %v13360_v56, 1  ;;  %v1084_v21 = vsel %vm1052_vm12, %v5128_v48, %v668_v40  ;;  %vm1468_vm1 = vcmp.eq.s32.totalorder %v13361_v45, 1  ;;  %4547 = vmatprep.mubr.f32.mxu0 %v4395_v7  ;;  %v1116_v53 = vld [vmem:[%s5469_s9 + $0x740] sm:$0xff]  ;;  %v13369_v14 = vld [vmem:[#allocation518_spill] sm:$0xff]  ;;  %v10398_v49 = vld [vmem:[%s5469_s9 + $0x7a8] sm:$0xff] }
 0x5cc   : > { %vm1053_vm15 = vcmp.eq.s32.totalorder %v13362_v46, 1  ;;  %vm1292_vm5 = vcmp.eq.s32.totalorder %v13363_v37, 1  ;;  %v2987_v44 = vsel %vm2955_vm14, %v2763_v58, %v2571_v12  ;;  %vm1884_vm3 = vcmp.eq.s32.totalorder %v13364_v39, 1  ;;  %v13366_v43 = vld [vmem:[#allocation267_spill] sm:$0xff]  ;;  %v13370_v16 = vld [vmem:[#allocation80_spill] sm:$0xff]  ;;  %v10402_v25 = vld [vmem:[%s5469_s9 + $0x750] sm:$0xff] }
 0x5cd   : > { %vm2141_vm9 = vcmp.eq.s32.totalorder %v13365_v57, 1  ;;  %vm1308_vm2 = vcmp.eq.s32.totalorder %v13366_v43, 1  ;;  %v3403_v62 = vsel %vm3371_vm0, %v3179_v24, %v2987_v44  ;;  %vm2300_vm7 = vcmp.eq.s32.totalorder %v13367_v10, 1  ;;  %5034 = vset.pattern.permute.xlu1 %v12648_v1  ;;  %v10388_v8 = vld [vmem:[%s5469_s9 + $0x7a0] sm:$0xff]  ;;  %v13371_v52 = vld [vmem:[#allocation501_spill] sm:$0xff]  ;;  %v5129_v31 = vld [vmem:[%s5469_s9 + $0x788] sm:$0xff] }
 0x5ce   : > { %v1500_v26 = vsel %vm1468_vm1, %v1116_v53, %v1084_v21  ;;  %vm2716_vm4 = vcmp.eq.s32.totalorder %v13368_v35, 1  ;;  %vm4203_vm11 = vcmp.eq.s32.totalorder %v4121_v0, 1  ;;  %4144 = vperm.xlu1 %5034, %v13369_v14   ;;  %v3819_v30 = vsel %vm3787_vm10, %v3595_v42, %v3403_v62  ;;  %v13372_v58 = vld [vmem:[#allocation42_spill] sm:$0xff]  ;;  %v5130_v33 = vld [vmem:[%s5469_s9 + $0x240] sm:$0xff]  ;;  %v13373_v32 = vld [vmem:[#allocation49_spill] sm:$0xff]  ;;  %v3916_v22 = vpop.permute.xlu1 %3915 }
 0x5cf   : > { %vm2557_vm6 = vcmp.eq.s32.totalorder %v13370_v16, 1  ;;  %v1916_v6 = vsel %vm1884_vm3, %v1532_v47, %v1500_v26  ;;  %vm3132_vm8 = vcmp.eq.s32.totalorder %v13371_v52, 1  ;;  %v4235_v20 = vsel %vm4203_vm11, %v4011_v29, %v3819_v30  ;;  %v10416_v34 = vld [vmem:[%s5469_s9 + $0x758] sm:$0xff]  ;;  %v13374_v18 = vld [vmem:[#allocation524_spill] sm:$0xff]  ;;  %v13375_v29 = vld [vmem:[#allocation57_spill] sm:$0xff] }
 0x5d0   : > { %v1085_v59 = vsel %vm1053_vm15, %v5129_v31, %v13372_v58  ;;  %v1324_v28 = vsel %vm1292_vm5, %v5130_v33, %v13373_v32  ;;  %v2332_v24 = vsel %vm2300_vm7, %v10402_v25, %v1916_v6  ;;  %vm3548_vm12 = vcmp.eq.s32.totalorder %v13374_v18, 1  ;;  %4548 = vmatmul.mubr.f32.gmra.mrb[12].mxu0 %v4235_v20  ;;  %v13376_v40 = vld [vmem:[#allocation299_spill] sm:$0xff]  ;;  %v13377_v9 = vld [vmem:[#allocation322_spill] sm:$0xff]  ;;  %v10443_v42 = vld [vmem:[%s5469_s9 + $0x7b0] sm:$0xff]  ;;  %v10495_v6 = vpop.permute.xlu0 %4340 }
 0x5d1   : > { %v2173_v19 = vsel %vm2141_vm9, %v10388_v8, %v10105_v2  ;;  %v1340_v63 = vsel %vm1308_vm2, %v1116_v53, %v13375_v29  ;;  %vm1453_vm14 = vcmp.eq.s32.totalorder %v13376_v40, 1  ;;  %v10431_v17 = vld [vmem:[%s5469_s9 + $0x760] sm:$0xff]  ;;  %v2748_v55 = vsel %vm2716_vm4, %v10416_v34, %v2332_v24  ;;  %v13378_v36 = vld [vmem:[#allocation342_spill] sm:$0xff]  ;;  %v10447_v51 = vld [vmem:[%s5469_s9 + $0x768] sm:$0xff] }
 0x5d2   : > { %v2589_v2 = vsel %vm2557_vm6, %v10398_v49, %v2173_v19  ;;  %vm1469_vm13 = vcmp.eq.s32.totalorder %v13377_v9, 1  ;;  %vm2973_vm0 = vcmp.eq.s32.totalorder %v13378_v36, 1  ;;  %v3164_v11 = vsel %vm3132_vm8, %v10431_v17, %v2748_v55  ;;  %5035 = vset.pattern.permute.xlu1 %v12272_v61  ;;  %v10454_v15 = vld [vmem:[%s5469_s9 + $0x778] sm:$0xff]  ;;  %v13380_v27 = vld [vmem:[#allocation365_spill] sm:$0xff]  ;;  %v13381_v12 = vld [vmem:[#allocation323_spill] sm:$0xff]  ;;  %v4284_v26 = vpop.permute.xlu1 %4283 }
 0x5d3   : > { %v13379_v38 = vld [vmem:[#allocation346_spill] sm:$0xff]  ;;  %vm1724_vm1 = vcmp.eq.s32.totalorder %v13380_v27, 1  ;;  %v3580_v41 = vsel %vm3548_vm12, %v10447_v51, %v3164_v11  ;;  %v10462_v7 = vld [vmem:[%s5469_s9 + $0x770] sm:$0xff]  ;;  %vm3964_vm15 = vcmp.eq.s32.totalorder %v3916_v22, 1  ;;  %3891 = vperm.xlu1 %5035, %v13381_v12   ;;  %vm4380_vm3 = vcmp.eq.s32.totalorder %v10222_v50, 1  ;;  %v13384_v39 = vld [vmem:[#allocation71_spill] sm:$0xff] }
 0x5d4   : > { %vm1708_vm10 = vcmp.eq.s32.totalorder %v13379_v38, 1  ;;  %v5131_v56 = vld [vmem:[%s5469_s9 + $0x290] sm:$0xff]  ;;  %v13383_v21 = vld [vmem:[#allocation22_spill] sm:$0xff]  ;;  %v3996_v45 = vsel %vm3964_vm15, %v10462_v7, %v3580_v41  ;;  %v10478_v44 = vsel %vm2973_vm0, %v10443_v42, %v2589_v2  ;;  %vm2124_vm9 = vcmp.eq.s32.totalorder %v13384_v39, 1  ;;  %v5133_v43 = vld [vmem:[%s5469_s9 + $0x248] sm:$0xff] }
 0x5d5   : > { %v13382_v61 = vld [vmem:[#allocation69_spill] sm:$0xff]  ;;  %vm1869_vm5 = vcmp.eq.s32.totalorder %v13383_v21, 1  ;;  %v4412_v57 = vsel %vm4380_vm3, %v10454_v15, %v3996_v45  ;;  %v4012_v53 = vld [vmem:[%s5469_s9 + $0x278] sm:$0xff]  ;;  %v1740_v50 = vsel %vm1708_vm10, %v5133_v43, %v1324_v28  ;;  %v1756_v62 = vsel %vm1724_vm1, %v1532_v47, %v1340_v63  ;;  %v13385_v10 = vld [vmem:[#allocation40_spill] sm:$0xff] }
 0x5d6   : > { %v1485_v48 = vsel %vm1453_vm14, %v5131_v56, %v13382_v61  ;;  %v5132_v46 = vld [vmem:[%s5469_s9 + $0x790] sm:$0xff]  ;;  %vm1885_vm2 = vcmp.eq.s32.totalorder %v13385_v10, 1  ;;  %v13386_v0 = vld [vmem:[#allocation403_spill] sm:$0xff]  ;;  %4632 = vmatprep.mubr.f32.mxu1 %v4412_v57  ;;  %v5134_v35 = vld [vmem:[%s5469_s9 + $0x298] sm:$0xff]  ;;  %vm4364_vm6 = vcmp.eq.s32.totalorder %v4284_v26, 1  ;;  %v4124_v41 = vpop.permute.xlu1 %4123 }
 0x5d7   : > { %v1501_v37 = vsel %vm1469_vm13, %v5132_v46, %v1085_v59  ;;  %vm2540_vm7 = vcmp.eq.s32.totalorder %v13386_v0, 1  ;;  %v1901_v14 = vsel %vm1869_vm5, %v5134_v35, %v1485_v48  ;;  %v13387_v30 = vld [vmem:[#allocation133_spill] sm:$0xff]  ;;  %v13389_v52 = vld [vmem:[#allocation506_spill] sm:$0xff]  ;;  %v13393_v33 = vld [vmem:[#allocation103_spill] sm:$0xff]  ;;  %v10539_v46 = vpop.permute.xlu0 %4295 }
 0x5d8   : > { %vm2140_vm4 = vcmp.eq.s32.totalorder %v13387_v30, 1  ;;  %v13388_v16 = vld [vmem:[#allocation445_spill] sm:$0xff]  ;;  %3939 = vperm.xlu1 %5035, %v13389_v52   ;;  %v13390_v47 = vld [vmem:[#allocation370_spill] sm:$0xff]  ;;  %v4396_v32 = vsel %vm4364_vm6, %v4012_v53, %v13393_v33  ;;  %v1917_v28 = vsel %vm1885_vm2, %v10074_v60, %v1501_v37  ;;  %v13394_v24 = vld [vmem:[#allocation51_spill] sm:$0xff] }
 0x5d9   : > { %vm2956_vm11 = vcmp.eq.s32.totalorder %v13388_v16, 1  ;;  %vm3389_vm8 = vcmp.eq.s32.totalorder %v13390_v47, 1  ;;  %v5135_v20 = vld [vmem:[%s5469_s9 + $0x250] sm:$0xff]  ;;  %vm3805_vm13 = vcmp.eq.s32.totalorder %v13394_v24, 1  ;;  %v5136_v18 = vld [vmem:[%s5469_s9 + $0x258] sm:$0xff]  ;;  %4552 = vmatprep.mubr.f32.mxu0 %v4396_v32  ;;  %v2172_v63 = vsel %vm2140_vm4, %v10402_v25, %v1756_v62  ;;  %v13396_v40 = vld [vmem:[#allocation400_spill] sm:$0xff] }
 0x5da   : > { %v2156_v31 = vsel %vm2124_vm9, %v5135_v20, %v1740_v50  ;;  %v13391_v58 = vld [vmem:[#allocation245_spill] sm:$0xff]  ;;  %v13395_v29 = vld [vmem:[#allocation534_spill] sm:$0xff]  ;;  %vm638_vm10 = vcmp.eq.s32.totalorder %v13396_v40, 1  ;;  %v13397_v55 = vld [vmem:[#allocation416_spill] sm:$0xff] }
 0x5db   : > { %vm2301_vm12 = vcmp.eq.s32.totalorder %v13391_v58, 1  ;;  %v13392_v59 = vld [vmem:[#allocation485_spill] sm:$0xff]  ;;  %v2572_v19 = vsel %vm2540_vm7, %v5136_v18, %v2156_v31  ;;  %vm3788_vm0 = vcmp.eq.s32.totalorder %v13395_v29, 1  ;;  %vm2556_vm1 = vcmp.eq.s32.totalorder %v13397_v55, 1  ;;  %v5137_v2 = vld [vmem:[%s5469_s9 + $0x260] sm:$0xff]  ;;  %v13398_v9 = vld [vmem:[#allocation216_spill] sm:$0xff]  ;;  %v10591_v18 = vpop.permute.xlu0 %4298 }
 0x5dc   : > { %vm3372_vm14 = vcmp.eq.s32.totalorder %v13392_v59, 1  ;;  %v2988_v60 = vsel %vm2956_vm11, %v5137_v2, %v2572_v19  ;;  %vm1055_vm15 = vcmp.eq.s32.totalorder %v13398_v9, 1  ;;  %v2333_v36 = vsel %vm2301_vm12, %v10388_v8, %v1917_v28  ;;  %v13399_v11 = vld [vmem:[#allocation227_spill] sm:$0xff]  ;;  %v13400_v22 = vld [vmem:[#allocation456_spill] sm:$0xff]  ;;  %v13402_v12 = vld [vmem:[#allocation286_spill] sm:$0xff] }
 0x5dd   : > { %vm2717_vm5 = vcmp.eq.s32.totalorder %v13399_v11, 1  ;;  %vm2972_vm3 = vcmp.eq.s32.totalorder %v13400_v22, 1  ;;  %v5138_v38 = vld [vmem:[%s5469_s9 + $0x268] sm:$0xff]  ;;  %vm3133_vm9 = vcmp.eq.s32.totalorder %v13402_v12, 1  ;;  %v13403_v56 = vld [vmem:[#allocation498_spill] sm:$0xff]  ;;  %vm4204_vm7 = vcmp.eq.s32.totalorder %v4124_v41, 1 }
 0x5de   : > { %v3404_v25 = vsel %vm3372_vm14, %v5138_v38, %v2988_v60  ;;  %v13401_v27 = vld [vmem:[#allocation532_spill] sm:$0xff]  ;;  %vm3388_vm2 = vcmp.eq.s32.totalorder %v13403_v56, 1  ;;  %v5139_v61 = vld [vmem:[%s5469_s9 + $0x270] sm:$0xff]  ;;  %v2588_v48 = vsel %vm2556_vm1, %v10416_v34, %v2172_v63  ;;  %v13405_v45 = vld [vmem:[#allocation287_spill] sm:$0xff]  ;;  %v2749_v57 = vsel %vm2717_vm5, %v10398_v49, %v2333_v36  ;;  %v4172_v49 = vpop.permute.xlu1 %4171 }
 0x5df   : > { %4355 = vperm.xlu1 %5035, %v13401_v27   ;;  %v3820_v8 = vsel %vm3788_vm0, %v5139_v61, %v3404_v25  ;;  %v13404_v21 = vld [vmem:[#allocation520_spill] sm:$0xff]  ;;  %vm3804_vm11 = vcmp.eq.s32.totalorder %v13405_v45, 1  ;;  %v3004_v43 = vsel %vm2972_vm3, %v10431_v17, %v2588_v48  ;;  %vm3965_vm12 = vcmp.eq.s32.totalorder %v10272_v13, 1  ;;  %v3197_v34 = vld [vmem:[%s5469_s9 + $0x7b8] sm:$0xff]  ;;  %v1933_v17 = vld [vmem:[%s5469_s9 + $0x2a0] sm:$0xff] }
 0x5e0   : > { %vm3549_vm4 = vcmp.eq.s32.totalorder %v13404_v21, 1  ;;  %v4236_v37 = vsel %vm4204_vm7, %v4012_v53, %v3820_v8  ;;  %v13406_v39 = vld [vmem:[#allocation168_spill] sm:$0xff]  ;;  %v3165_v53 = vsel %vm3133_vm9, %v10443_v42, %v2749_v57  ;;  %v3420_v62 = vsel %vm3388_vm2, %v10447_v51, %v3004_v43  ;;  %v13408_v10 = vld [vmem:[#allocation254_spill] sm:$0xff]  ;;  %v3613_v26 = vld [vmem:[%s5469_s9 + $0x7c0] sm:$0xff] }
 0x5e1   : > { %vm2285_vm6 = vcmp.eq.s32.totalorder %v13406_v39, 1  ;;  %4553 = vmatmul.mubr.f32.gmra.mrb[14].mxu0 %v4236_v37  ;;  %v13407_v50 = vld [vmem:[#allocation44_spill] sm:$0xff]  ;;  %vm4381_vm0 = vcmp.eq.s32.totalorder %v10317_v5, 1  ;;  %vm3117_vm1 = vcmp.eq.s32.totalorder %v13408_v10, 1  ;;  %v3581_v0 = vsel %vm3549_vm4, %v3197_v34, %v3165_v53  ;;  %v13409_v42 = vld [vmem:[#allocation521_spill] sm:$0xff]  ;;  %v13412_v59 = vld [vmem:[#allocation66_spill] sm:$0xff] }
 0x5e2   : > { %vm2701_vm14 = vcmp.eq.s32.totalorder %v13407_v50, 1  ;;  %vm4220_vm5 = vcmp.eq.s32.totalorder %v4172_v49, 1  ;;  %v3836_v51 = vsel %vm3804_vm11, %v10462_v7, %v3420_v62  ;;  %v2349_v35 = vld [vmem:[%s5469_s9 + $0x2a8] sm:$0xff]  ;;  %v13410_v30 = vld [vmem:[#allocation305_spill] sm:$0xff]  ;;  %v3997_v16 = vsel %vm3965_vm12, %v3613_v26, %v3581_v0  ;;  %v13413_v13 = vld [vmem:[#allocation219_spill] sm:$0xff]  ;;  %v4287_v47 = vpop.permute.xlu1 %4286  ;;  %v10639_v62 = vpop.permute.xlu0 %4301 }
 0x5e3   : > { %5037 = vset.pattern.permute.xlu1 %v12648_v1  ;;  %v2317_v1 = vsel %vm2285_vm6, %v1933_v17, %v1901_v14  ;;  %vm3533_vm3 = vcmp.eq.s32.totalorder %v13410_v30, 1  ;;  %v4252_v52 = vsel %vm4220_vm5, %v10454_v15, %v3836_v51  ;;  %v4029_v20 = vld [vmem:[%s5469_s9 + $0x7c8] sm:$0xff]  ;;  %v2765_v31 = vld [vmem:[%s5469_s9 + $0x2b0] sm:$0xff]  ;;  %vm3949_vm2 = vcmp.eq.s32.totalorder %v13412_v59, 1  ;;  %v3181_v15 = vld [vmem:[%s5469_s9 + $0x2b8] sm:$0xff] }
 0x5e4   : > { %4147 = vperm.xlu1 %5037, %v13409_v42   ;;  %v13411_v58 = vld [vmem:[#allocation388_spill] sm:$0xff]  ;;  %v2733_v7 = vsel %vm2701_vm14, %v2349_v35, %v2317_v1  ;;  %4633 = vmatmul.mubr.f32.gmra.mrb[14].mxu1 %v4252_v52  ;;  %v4413_v14 = vsel %vm4381_vm0, %v4029_v20, %v3997_v16  ;;  %vm2125_vm7 = vcmp.eq.s32.totalorder %v13413_v13, 1  ;;  %v3421_v32 = vsel %vm3389_vm8, %v3197_v34, %v10478_v44  ;;  %v5140_v5 = vld [vmem:[%s5469_s9 + $0x7d0] sm:$0xff]  ;;  %v3597_v2 = vld [vmem:[%s5469_s9 + $0x2c0] sm:$0xff] }
 0x5e5   : > { %vm4221_vm9 = vcmp.eq.s32.totalorder %v13411_v58, 1  ;;  %v13414_v33 = vld [vmem:[#allocation272_spill] sm:$0xff]  ;;  %v3149_v28 = vsel %vm3117_vm1, %v2765_v31, %v2733_v7  ;;  %4637 = vmatprep.mubr.f32.mxu1 %v4413_v14  ;;  %v670_v29 = vsel %vm638_vm10, %v5140_v5, 0.0  ;;  %v13415_v63 = vld [vmem:[#allocation273_spill] sm:$0xff]  ;;  %v3837_v44 = vsel %vm3805_vm13, %v3613_v26, %v3421_v32  ;;  %v13416_v60 = vld [vmem:[#allocation318_spill] sm:$0xff] }
 0x5e6   : > { %vm2541_vm4 = vcmp.eq.s32.totalorder %v13414_v33, 1  ;;  %v4013_v19 = vld [vmem:[%s5469_s9 + $0x2c8] sm:$0xff]  ;;  %vm1054_vm11 = vcmp.eq.s32.totalorder %v13415_v63, 1  ;;  %v3565_v55 = vsel %vm3533_vm3, %v3181_v15, %v3149_v28  ;;  %vm2957_vm8 = vcmp.eq.s32.totalorder %v13416_v60, 1  ;;  %v13417_v22 = vld [vmem:[#allocation45_spill] sm:$0xff]  ;;  %v13418_v25 = vld [vmem:[#allocation62_spill] sm:$0xff]  ;;  %v4127_v49 = vpop.permute.xlu1 %4126 }
 0x5e7   : > { %vm4365_vm6 = vcmp.eq.s32.totalorder %v4287_v47, 1  ;;  %v4253_v36 = vsel %vm4221_vm9, %v4029_v20, %v3837_v44  ;;  %v3981_v40 = vsel %vm3949_vm2, %v3597_v2, %v3565_v55  ;;  %v5141_v11 = vld [vmem:[%s5469_s9 + $0x828] sm:$0xff]  ;;  %v2157_v24 = vsel %vm2125_vm7, %v1933_v17, %v13418_v25  ;;  %v13419_v27 = vld [vmem:[#allocation362_spill] sm:$0xff]  ;;  %v13420_v56 = vld [vmem:[#allocation377_spill] sm:$0xff]  ;;  %v10713_v25 = vpop.permute.xlu0 %4304 }
 0x5e8   : > { %v10612_v38 = vsel %vm1055_vm15, %v5141_v11, %v13417_v22  ;;  %vm3373_vm13 = vcmp.eq.s32.totalorder %v13419_v27, 1  ;;  %4638 = vmatmul.mubr.f32.gmra.mrb[16].mxu1 %v4253_v36  ;;  %v4397_v41 = vsel %vm4365_vm6, %v4013_v19, %v3981_v40  ;;  %v2573_v12 = vsel %vm2541_vm4, %v2349_v35, %v2157_v24  ;;  %v5142_v61 = vld [vmem:[%s5469_s9 + $0x7d8] sm:$0xff]  ;;  %v13421_v8 = vld [vmem:[#allocation429_spill] sm:$0xff]  ;;  %v13423_v21 = vld [vmem:[#allocation239_spill] sm:$0xff] }
 0x5e9   : > { %vm3789_vm10 = vcmp.eq.s32.totalorder %v13420_v56, 1  ;;  %v1086_v9 = vsel %vm1054_vm11, %v5142_v61, %v670_v29  ;;  %vm1470_vm15 = vcmp.eq.s32.totalorder %v13421_v8, 1  ;;  %4557 = vmatprep.mubr.f32.mxu0 %v4397_v41  ;;  %v13422_v48 = vld [vmem:[#allocation221_spill] sm:$0xff]  ;;  %vm1294_vm14 = vcmp.eq.s32.totalorder %v13423_v21, 1  ;;  %v13424_v37 = vld [vmem:[#allocation440_spill] sm:$0xff]  ;;  %v10631_v39 = vld [vmem:[%s5469_s9 + $0x340] sm:$0xff] }
 0x5ea   : > { %vm2127_vm12 = vcmp.eq.s32.totalorder %v13422_v48, 1  ;;  %v2989_v45 = vsel %vm2957_vm8, %v2765_v31, %v2573_v12  ;;  %vm1886_vm0 = vcmp.eq.s32.totalorder %v13424_v37, 1  ;;  %v13425_v57 = vld [vmem:[#allocation248_spill] sm:$0xff]  ;;  %v1118_v43 = vld [vmem:[%s5469_s9 + $0x7e0] sm:$0xff]  ;;  %v13428_v26 = vld [vmem:[#allocation298_spill] sm:$0xff]  ;;  %vm4205_vm2 = vcmp.eq.s32.totalorder %v4127_v49, 1  ;;  %v3922_v60 = vpop.permute.xlu1 %3921 }
 0x5eb   : > { %vm2143_vm1 = vcmp.eq.s32.totalorder %v13425_v57, 1  ;;  %v13426_v34 = vld [vmem:[#allocation271_spill] sm:$0xff]  ;;  %v3405_v50 = vsel %vm3373_vm13, %v3181_v15, %v2989_v45  ;;  %v1534_v10 = vld [vmem:[%s5469_s9 + $0x7e8] sm:$0xff]  ;;  %v1502_v0 = vsel %vm1470_vm15, %v1118_v43, %v1086_v9  ;;  %vm2718_vm9 = vcmp.eq.s32.totalorder %v13428_v26, 1  ;;  %v13429_v35 = vld [vmem:[#allocation301_spill] sm:$0xff] }
 0x5ec   : > { %vm1310_vm5 = vcmp.eq.s32.totalorder %v13426_v34, 1  ;;  %v13427_v53 = vld [vmem:[#allocation467_spill] sm:$0xff]  ;;  %v3821_v42 = vsel %vm3789_vm10, %v3597_v2, %v3405_v50  ;;  %v10651_v51 = vld [vmem:[%s5469_s9 + $0x848] sm:$0xff]  ;;  %vm2559_vm7 = vcmp.eq.s32.totalorder %v13429_v35, 1  ;;  %v10655_v1 = vld [vmem:[%s5469_s9 + $0x7f0] sm:$0xff]  ;;  %v1918_v30 = vsel %vm1886_vm0, %v1534_v10, %v1502_v0 }
 0x5ed   : > { %vm2302_vm3 = vcmp.eq.s32.totalorder %v13427_v53, 1  ;;  %v10642_v17 = vld [vmem:[%s5469_s9 + $0x840] sm:$0xff]  ;;  %v4237_v52 = vsel %vm4205_vm2, %v4013_v19, %v3821_v42  ;;  %v13431_v20 = vld [vmem:[#allocation65_spill] sm:$0xff]  ;;  %v13432_v7 = vld [vmem:[#allocation50_spill] sm:$0xff]  ;;  %vm4382_vm0 = vcmp.eq.s32.totalorder %v10373_v54, 1 }
 0x5ee   : > { %v13430_v16 = vld [vmem:[#allocation503_spill] sm:$0xff]  ;;  %v10664_v31 = vsel %vm2127_vm12, %v10631_v39, %v13431_v20  ;;  %v10671_v14 = vld [vmem:[%s5469_s9 + $0x7f8] sm:$0xff]  ;;  %v2334_v13 = vsel %vm2302_vm3, %v10655_v1, %v1918_v30  ;;  %4558 = vmatmul.mubr.f32.gmra.mrb[16].mxu0 %v4237_v52  ;;  %v2175_v15 = vsel %vm2143_vm1, %v10642_v17, %v10360_v4  ;;  %v13436_v55 = vld [vmem:[#allocation325_spill] sm:$0xff]  ;;  %vm3966_vm12 = vcmp.eq.s32.totalorder %v3922_v60, 1  ;;  %v4290_v50 = vpop.permute.xlu1 %4289 }
 0x5ef   : > { %vm3134_vm4 = vcmp.eq.s32.totalorder %v13430_v16, 1  ;;  %v5143_v58 = vld [vmem:[%s5469_s9 + $0x2e0] sm:$0xff]  ;;  %v13434_v32 = vld [vmem:[#allocation58_spill] sm:$0xff]  ;;  %v2750_v29 = vsel %vm2718_vm9, %v10671_v14, %v2334_v13  ;;  %v2591_v63 = vsel %vm2559_vm7, %v10651_v51, %v2175_v15  ;;  %vm1471_vm6 = vcmp.eq.s32.totalorder %v13436_v55, 1  ;;  %v10696_v4 = vld [vmem:[%s5469_s9 + $0x850] sm:$0xff]  ;;  %v10762_v15 = vpop.permute.xlu0 %4307 }
 0x5f0   : > { %v1326_v59 = vsel %vm1294_vm14, %v5143_v58, %v13432_v7  ;;  %v13433_v33 = vld [vmem:[#allocation527_spill] sm:$0xff]  ;;  %v1342_v28 = vsel %vm1310_vm5, %v1118_v43, %v13434_v32  ;;  %v13435_v19 = vld [vmem:[#allocation302_spill] sm:$0xff]  ;;  %v13437_v47 = vld [vmem:[#allocation345_spill] sm:$0xff]  ;;  %vm4366_vm7 = vcmp.eq.s32.totalorder %v4290_v50, 1 }
 0x5f1   : > { %vm3550_vm11 = vcmp.eq.s32.totalorder %v13433_v33, 1  ;;  %vm1455_vm8 = vcmp.eq.s32.totalorder %v13435_v19, 1  ;;  %v10686_v5 = vld [vmem:[%s5469_s9 + $0x800] sm:$0xff]  ;;  %vm2975_vm13 = vcmp.eq.s32.totalorder %v13437_v47, 1  ;;  %v10700_v44 = vld [vmem:[%s5469_s9 + $0x808] sm:$0xff]  ;;  %v10706_v36 = vld [vmem:[%s5469_s9 + $0x818] sm:$0xff] }
 0x5f2   : > { %v3166_v2 = vsel %vm3134_vm4, %v10686_v5, %v2750_v29  ;;  %v13438_v40 = vld [vmem:[#allocation349_spill] sm:$0xff]  ;;  %v13439_v11 = vld [vmem:[#allocation366_spill] sm:$0xff]  ;;  %v13441_v56 = vld [vmem:[#allocation23_spill] sm:$0xff]  ;;  %v10732_v48 = vsel %vm2975_vm13, %v10696_v4, %v2591_v63 }
 0x5f3   : > { %vm1710_vm10 = vcmp.eq.s32.totalorder %v13438_v40, 1  ;;  %vm1726_vm15 = vcmp.eq.s32.totalorder %v13439_v11, 1  ;;  %v3582_v22 = vsel %vm3550_vm11, %v10700_v44, %v3166_v2  ;;  %v10716_v24 = vld [vmem:[%s5469_s9 + $0x810] sm:$0xff]  ;;  %v13440_v41 = vld [vmem:[#allocation70_spill] sm:$0xff]  ;;  %vm1871_vm14 = vcmp.eq.s32.totalorder %v13441_v56, 1  ;;  %v13442_v21 = vld [vmem:[#allocation75_spill] sm:$0xff] }
 0x5f4   : > { %v5144_v27 = vld [vmem:[%s5469_s9 + $0x330] sm:$0xff]  ;;  %v3998_v61 = vsel %vm3966_vm12, %v10716_v24, %v3582_v22  ;;  %vm2126_vm1 = vcmp.eq.s32.totalorder %v13442_v21, 1  ;;  %v4014_v37 = vld [vmem:[%s5469_s9 + $0x318] sm:$0xff]  ;;  %v5146_v57 = vld [vmem:[%s5469_s9 + $0x2e8] sm:$0xff]  ;;  %v1758_v43 = vsel %vm1726_vm15, %v1534_v10, %v1342_v28 }
 0x5f5   : > { %v1487_v12 = vsel %vm1455_vm8, %v5144_v27, %v13440_v41  ;;  %v5145_v9 = vld [vmem:[%s5469_s9 + $0x830] sm:$0xff]  ;;  %v4414_v45 = vsel %vm4382_vm0, %v10706_v36, %v3998_v61  ;;  %v1742_v54 = vsel %vm1710_vm10, %v5146_v57, %v1326_v59  ;;  %v5147_v53 = vld [vmem:[%s5469_s9 + $0x338] sm:$0xff]  ;;  %v13445_v0 = vld [vmem:[#allocation136_spill] sm:$0xff] }
 0x5f6   : > { %v1503_v8 = vsel %vm1471_vm6, %v5145_v9, %v10612_v38  ;;  %v13443_v34 = vld [vmem:[#allocation137_spill] sm:$0xff]  ;;  %v13444_v38 = vld [vmem:[#allocation404_spill] sm:$0xff]  ;;  %4642 = vmatprep.mubr.f32.mxu1 %v4414_v45  ;;  %v1903_v49 = vsel %vm1871_vm14, %v5147_v53, %v1487_v12  ;;  %vm2142_vm9 = vcmp.eq.s32.totalorder %v13445_v0, 1  ;;  %v13446_v26 = vld [vmem:[#allocation447_spill] sm:$0xff] }
 0x5f7   : > { %vm1887_vm5 = vcmp.eq.s32.totalorder %v13443_v34, 1  ;;  %vm2542_vm3 = vcmp.eq.s32.totalorder %v13444_v38, 1  ;;  %vm2958_vm2 = vcmp.eq.s32.totalorder %v13446_v26, 1  ;;  %v13447_v42 = vld [vmem:[#allocation371_spill] sm:$0xff]  ;;  %v5148_v10 = vld [vmem:[%s5469_s9 + $0x2f0] sm:$0xff]  ;;  %v13449_v16 = vld [vmem:[#allocation486_spill] sm:$0xff]  ;;  %v2174_v32 = vsel %vm2142_vm9, %v10655_v1, %v1758_v43  ;;  %v4130_v1 = vpop.permute.xlu1 %4129 }
 0x5f8   : > { %vm3391_vm4 = vcmp.eq.s32.totalorder %v13447_v42, 1  ;;  %v2158_v35 = vsel %vm2126_vm1, %v5148_v10, %v1742_v54  ;;  %v13448_v30 = vld [vmem:[#allocation249_spill] sm:$0xff]  ;;  %vm3374_vm8 = vcmp.eq.s32.totalorder %v13449_v16, 1  ;;  %v13450_v52 = vld [vmem:[#allocation134_spill] sm:$0xff]  ;;  %v1919_v58 = vsel %vm1887_vm5, %v10330_v3, %v1503_v8  ;;  %v13451_v7 = vld [vmem:[#allocation55_spill] sm:$0xff] }
 0x5f9   : > { %vm2303_vm11 = vcmp.eq.s32.totalorder %v13448_v30, 1  ;;  %v4398_v20 = vsel %vm4366_vm7, %v4014_v37, %v13450_v52  ;;  %vm3807_vm6 = vcmp.eq.s32.totalorder %v13451_v7, 1  ;;  %v5149_v59 = vld [vmem:[%s5469_s9 + $0x2f8] sm:$0xff]  ;;  %v13452_v33 = vld [vmem:[#allocation100_spill] sm:$0xff]  ;;  %v5150_v3 = vld [vmem:[%s5469_s9 + $0x300] sm:$0xff]  ;;  %vm4206_vm5 = vcmp.eq.s32.totalorder %v4130_v1, 1 }
 0x5fa   : > { %v2574_v13 = vsel %vm2542_vm3, %v5149_v59, %v2158_v35  ;;  %vm3790_vm13 = vcmp.eq.s32.totalorder %v13452_v33, 1  ;;  %4562 = vmatprep.mubr.f32.mxu0 %v4398_v20  ;;  %v13453_v28 = vld [vmem:[#allocation394_spill] sm:$0xff]  ;;  %v2335_v63 = vsel %vm2303_vm11, %v10642_v17, %v1919_v58  ;;  %v5151_v2 = vld [vmem:[%s5469_s9 + $0x308] sm:$0xff]  ;;  %v13458_v11 = vld [vmem:[#allocation499_spill] sm:$0xff]  ;;  %vm3967_vm7 = vcmp.eq.s32.totalorder %v10436_v23, 1 }
 0x5fb   : > { %vm624_vm10 = vcmp.eq.s32.totalorder %v13453_v28, 1  ;;  %v13454_v19 = vld [vmem:[#allocation418_spill] sm:$0xff]  ;;  %v2990_v29 = vsel %vm2958_vm2, %v5150_v3, %v2574_v13  ;;  %vm3390_vm1 = vcmp.eq.s32.totalorder %v13458_v11, 1  ;;  %v5152_v22 = vld [vmem:[%s5469_s9 + $0x310] sm:$0xff]  ;;  %v13459_v41 = vld [vmem:[#allocation523_spill] sm:$0xff] }
 0x5fc   : > { %vm2558_vm15 = vcmp.eq.s32.totalorder %v13454_v19, 1  ;;  %v13455_v55 = vld [vmem:[#allocation230_spill] sm:$0xff]  ;;  %v3406_v60 = vsel %vm3374_vm8, %v5151_v2, %v2990_v29  ;;  %vm3551_vm3 = vcmp.eq.s32.totalorder %v13459_v41, 1  ;;  %v13460_v12 = vld [vmem:[#allocation28_spill] sm:$0xff]  ;;  %vm4383_vm8 = vcmp.eq.s32.totalorder %v10495_v6, 1  ;;  %v3615_v34 = vld [vmem:[%s5469_s9 + $0x860] sm:$0xff] }
 0x5fd   : > { %vm2719_vm12 = vcmp.eq.s32.totalorder %v13455_v55, 1  ;;  %v13456_v47 = vld [vmem:[#allocation458_spill] sm:$0xff]  ;;  %v3822_v27 = vsel %vm3790_vm13, %v5152_v22, %v3406_v60  ;;  %v2590_v17 = vsel %vm2558_vm15, %v10671_v14, %v2174_v32  ;;  %vm3806_vm9 = vcmp.eq.s32.totalorder %v13460_v12, 1  ;;  %v13461_v61 = vld [vmem:[#allocation172_spill] sm:$0xff]  ;;  %v13464_v38 = vld [vmem:[#allocation99_spill] sm:$0xff] }
 0x5fe   : > { %vm2974_vm14 = vcmp.eq.s32.totalorder %v13456_v47, 1  ;;  %v13457_v40 = vld [vmem:[#allocation290_spill] sm:$0xff]  ;;  %v4238_v56 = vsel %vm4206_vm5, %v4014_v37, %v3822_v27  ;;  %vm2287_vm2 = vcmp.eq.s32.totalorder %v13461_v61, 1  ;;  %v2751_v9 = vsel %vm2719_vm12, %v10651_v51, %v2335_v63  ;;  %v13462_v45 = vld [vmem:[#allocation48_spill] sm:$0xff]  ;;  %v4181_v51 = vpop.permute.xlu0 %4180  ;;  %v13465_v53 = vld [vmem:[#allocation335_spill] sm:$0xff] }
 0x5ff   : > { %vm3135_vm0 = vcmp.eq.s32.totalorder %v13457_v40, 1  ;;  %v3006_v8 = vsel %vm2974_vm14, %v10686_v5, %v2590_v17  ;;  %4563 = vmatmul.mubr.f32.gmra.mrb[18].mxu0 %v4238_v56  ;;  %v3199_v21 = vld [vmem:[%s5469_s9 + $0x858] sm:$0xff]  ;;  %vm2703_vm11 = vcmp.eq.s32.totalorder %v13462_v45, 1  ;;  %v4178_v5 = vpop.permute.xlu1 %4177  ;;  %v4031_v57 = vld [vmem:[%s5469_s9 + $0x868] sm:$0xff]  ;;  %vm625_vm12 = vcmp.eq.s32.totalorder %v13464_v38, 1  ;;  %v2767_v10 = vld [vmem:[%s5469_s9 + $0x350] sm:$0xff] }
 0x600   : > { %v3167_v14 = vsel %vm3135_vm0, %v10696_v4, %v2751_v9  ;;  %v3422_v37 = vsel %vm3390_vm1, %v10700_v44, %v3006_v8  ;;  %v13463_v54 = vld [vmem:[#allocation258_spill] sm:$0xff]  ;;  %vm4222_vm15 = vcmp.eq.s32.totalorder %v4178_v5, 1  ;;  %v2351_v44 = vld [vmem:[%s5469_s9 + $0x348] sm:$0xff]  ;;  %v2319_v50 = vsel %vm2287_vm2, %v10631_v39, %v1903_v49  ;;  %v13466_v35 = vld [vmem:[#allocation73_spill] sm:$0xff] }
 0x601   : > { %vm3119_vm13 = vcmp.eq.s32.totalorder %v13463_v54, 1  ;;  %v3583_v43 = vsel %vm3551_vm3, %v3199_v21, %v3167_v14  ;;  %v3838_v4 = vsel %vm3806_vm9, %v10716_v24, %v3422_v37  ;;  %vm3535_vm14 = vcmp.eq.s32.totalorder %v13465_v53, 1  ;;  %v13467_v49 = vld [vmem:[#allocation276_spill] sm:$0xff]  ;;  %v13468_v30 = vld [vmem:[#allocation321_spill] sm:$0xff]  ;;  %v3183_v23 = vld [vmem:[%s5469_s9 + $0x358] sm:$0xff] }
 0x602   : > { %v3999_v0 = vsel %vm3967_vm7, %v3615_v34, %v3583_v43  ;;  %v4254_v26 = vsel %vm4222_vm15, %v10706_v36, %v3838_v4  ;;  %v2735_v24 = vsel %vm2703_vm11, %v2351_v44, %v2319_v50  ;;  %vm3951_vm0 = vcmp.eq.s32.totalorder %v13466_v35, 1  ;;  %v4015_v52 = vld [vmem:[%s5469_s9 + $0x368] sm:$0xff]  ;;  %v5153_v20 = vld [vmem:[%s5469_s9 + $0x370] sm:$0xff]  ;;  %v13470_v33 = vld [vmem:[#allocation11_spill] sm:$0xff] }
 0x603   : > { %vm4223_vm1 = vcmp.eq.s32.totalorder %v4181_v51, 1  ;;  %4643 = vmatmul.mubr.f32.gmra.mrb[18].mxu1 %v4254_v26  ;;  %v4415_v39 = vsel %vm4383_vm8, %v4031_v57, %v3999_v0  ;;  %vm2543_vm5 = vcmp.eq.s32.totalorder %v13467_v49, 1  ;;  %vm2959_vm3 = vcmp.eq.s32.totalorder %v13468_v30, 1  ;;  %v13469_v58 = vld [vmem:[#allocation189_spill] sm:$0xff]  ;;  %v4293_v13 = vpop.permute.xlu1 %4292  ;;  %v13471_v28 = vld [vmem:[#allocation112_spill] sm:$0xff]  ;;  %v688_v3 = vld [vmem:[%s5469_s9 + $0x378] sm:$0xff] }
 0x604   : > { %v3423_v36 = vsel %vm3391_vm4, %v3199_v21, %v10732_v48  ;;  %v3151_v16 = vsel %vm3119_vm13, %v2767_v10, %v2735_v24  ;;  %4647 = vmatprep.mubr.f32.mxu1 %v4415_v39  ;;  %v656_v6 = vsel %vm624_vm10, %v5153_v20, 0.0  ;;  %vm1040_vm9 = vcmp.eq.s32.totalorder %v13469_v58, 1  ;;  %v3599_v48 = vld [vmem:[%s5469_s9 + $0x360] sm:$0xff]  ;;  %v13472_v63 = vld [vmem:[#allocation378_spill] sm:$0xff]  ;;  %v13473_v47 = vld [vmem:[#allocation161_spill] sm:$0xff] }
 0x605   : > { %v3567_v59 = vsel %vm3535_vm14, %v3183_v23, %v3151_v16  ;;  %v3839_v42 = vsel %vm3807_vm6, %v3615_v34, %v3423_v36  ;;  %vm3375_vm4 = vcmp.eq.s32.totalorder %v13470_v33, 1  ;;  %vm4367_vm2 = vcmp.eq.s32.totalorder %v4293_v13, 1  ;;  %v13474_v60 = vld [vmem:[#allocation415_spill] sm:$0xff]  ;;  %v13477_v11 = vld [vmem:[#allocation68_spill] sm:$0xff]  ;;  %v13480_v41 = vld [vmem:[#allocation453_spill] sm:$0xff] }
 0x606   : > { %v4255_v32 = vsel %vm4223_vm1, %v4031_v57, %v3839_v42  ;;  %v3983_v19 = vsel %vm3951_vm0, %v3599_v48, %v3567_v59  ;;  %vm897_vm10 = vcmp.eq.s32.totalorder %v13471_v28, 1  ;;  %v2575_v29 = vsel %vm2543_vm5, %v2351_v44, %v10664_v31  ;;  %v13475_v31 = vld [vmem:[#allocation135_spill] sm:$0xff]  ;;  %v10868_v61 = vld [vmem:[%s5469_s9 + $0x8c8] sm:$0xff]  ;;  %v704_v9 = vld [vmem:[%s5469_s9 + $0x878] sm:$0xff] }
 0x607   : > { %vm3791_vm7 = vcmp.eq.s32.totalorder %v13472_v63, 1  ;;  %4648 = vmatmul.mubr.f32.gmra.mrb[20].mxu1 %v4255_v32  ;;  %v4399_v7 = vsel %vm4367_vm2, %v4015_v52, %v3983_v19  ;;  %v2991_v55 = vsel %vm2959_vm3, %v2767_v10, %v2575_v29  ;;  %vm640_vm6 = vcmp.eq.s32.totalorder %v13473_v47, 1  ;;  %v13476_v1 = vld [vmem:[#allocation167_spill] sm:$0xff]  ;;  %v4133_v12 = vpop.permute.xlu1 %4132  ;;  %v1520_v8 = vld [vmem:[%s5469_s9 + $0x388] sm:$0xff]  ;;  %v5154_v21 = vld [vmem:[%s5469_s9 + $0x870] sm:$0xff] }
 0x608   : > { %v1072_v2 = vsel %vm1040_vm9, %v688_v3, %v656_v6  ;;  %vm1456_vm11 = vcmp.eq.s32.totalorder %v13474_v60, 1  ;;  %4567 = vmatprep.mubr.f32.mxu0 %v4399_v7  ;;  %vm880_vm8 = vcmp.eq.s32.totalorder %v13475_v31, 1  ;;  %vm896_vm13 = vcmp.eq.s32.totalorder %v13476_v1, 1  ;;  %v1104_v22 = vld [vmem:[%s5469_s9 + $0x380] sm:$0xff]  ;;  %v13481_v37 = vld [vmem:[#allocation274_spill] sm:$0xff]  ;;  %v10880_v5 = vld [vmem:[%s5469_s9 + $0x390] sm:$0xff] }
 0x609   : > { %v3407_v40 = vsel %vm3375_vm4, %v3183_v23, %v2991_v55  ;;  %vm1872_vm15 = vcmp.eq.s32.totalorder %v13477_v11, 1  ;;  %v13478_v27 = vld [vmem:[#allocation243_spill] sm:$0xff]  ;;  %vm2288_vm1 = vcmp.eq.s32.totalorder %v13480_v41, 1  ;;  %v672_v45 = vsel %vm640_vm6, %v5154_v21, 0.0  ;;  %v13482_v57 = vld [vmem:[#allocation277_spill] sm:$0xff]  ;;  %v13483_v43 = vld [vmem:[#allocation492_spill] sm:$0xff] }
 0x60a   : > { %vm1296_vm14 = vcmp.eq.s32.totalorder %v13478_v27, 1  ;;  %v13479_v17 = vld [vmem:[#allocation275_spill] sm:$0xff]  ;;  %v3823_v56 = vsel %vm3791_vm7, %v3599_v48, %v3407_v40  ;;  %v1488_v14 = vsel %vm1456_vm11, %v1104_v22, %v1072_v2  ;;  %vm2704_vm5 = vcmp.eq.s32.totalorder %v13481_v37, 1  ;;  %v13484_v50 = vld [vmem:[#allocation330_spill] sm:$0xff]  ;;  %v13486_v24 = vld [vmem:[#allocation33_spill] sm:$0xff]  ;;  %v4599_v21 = vpop.f32.mrb[0].mxu1 }
 0x60b   : > { %vm1312_vm0 = vcmp.eq.s32.totalorder %v13479_v17, 1  ;;  %vm4207_vm3 = vcmp.eq.s32.totalorder %v4133_v12, 1  ;;  %v1120_v51 = vld [vmem:[%s5469_s9 + $0x880] sm:$0xff]  ;;  %vm1056_vm9 = vcmp.eq.s32.totalorder %v13482_v57, 1  ;;  %v1904_v54 = vsel %vm1872_vm15, %v1520_v8, %v1488_v14  ;;  %v10895_v0 = vld [vmem:[%s5469_s9 + $0x398] sm:$0xff]  ;;  %v10924_v20 = vld [vmem:[%s5469_s9 + $0x3a8] sm:$0xff]  ;;  %v3880_v58 = vpop.permute.xlu1 %3879 }
 0x60c   : > { %vm3120_vm4 = vcmp.eq.s32.totalorder %v13483_v43, 1  ;;  %v4239_v34 = vsel %vm4207_vm3, %v4015_v52, %v3823_v56  ;;  %v5155_v4 = vld [vmem:[%s5469_s9 + $0x3c0] sm:$0xff]  ;;  %v912_v53 = vsel %vm880_vm8, %v688_v3, %v13484_v50  ;;  %v2320_v26 = vsel %vm2288_vm1, %v10880_v5, %v1904_v54  ;;  %v13485_v10 = vld [vmem:[#allocation314_spill] sm:$0xff]  ;;  %v13490_v42 = vld [vmem:[#allocation352_spill] sm:$0xff]  ;;  %4694 = vst [vmem:[%s10976_s10 + $0x80] sm:$0xff] %v4599_v21  ;;  %v4601_v54 = vpop.f32.mrb[1].mxu1 }
 0x60d   : > { %v10889_v44 = vsel %vm625_vm12, %v5155_v4, 0.0  ;;  %vm3536_vm2 = vcmp.eq.s32.totalorder %v13485_v10, 1  ;;  %4568 = vmatmul.mubr.f32.gmra.mrb[20].mxu0 %v4239_v34  ;;  %v10905_v38 = vsel %vm897_vm10, %v10868_v61, %v13486_v24  ;;  %v13487_v35 = vld [vmem:[#allocation31_spill] sm:$0xff]  ;;  %v1328_v49 = vsel %vm1296_vm14, %v1104_v22, %v912_v53  ;;  %v13488_v52 = vld [vmem:[#allocation430_spill] sm:$0xff]  ;;  %v10940_v32 = vld [vmem:[%s5469_s9 + $0x3b0] sm:$0xff] }
 0x60e   : > { %v928_v39 = vsel %vm896_vm13, %v704_v9, %v13487_v35  ;;  %v10913_v30 = vld [vmem:[%s5469_s9 + $0x3a0] sm:$0xff]  ;;  %v2736_v23 = vsel %vm2704_vm5, %v10895_v0, %v2320_v26  ;;  %v1088_v16 = vsel %vm1056_vm9, %v704_v9, %v672_v45  ;;  %vm1472_vm12 = vcmp.eq.s32.totalorder %v13488_v52, 1  ;;  %v10930_v59 = vld [vmem:[%s5469_s9 + $0x3b8] sm:$0xff]  ;;  %v1536_v19 = vld [vmem:[%s5469_s9 + $0x888] sm:$0xff] }
 0x60f   : > { %v1344_v36 = vsel %vm1312_vm0, %v1120_v51, %v928_v39  ;;  %v3152_v6 = vsel %vm3120_vm4, %v10913_v30, %v2736_v23  ;;  %v13489_v13 = vld [vmem:[#allocation199_spill] sm:$0xff]  ;;  %vm1712_vm7 = vcmp.eq.s32.totalorder %v13490_v42, 1  ;;  %v13491_v48 = vld [vmem:[#allocation442_spill] sm:$0xff]  ;;  %vm3952_vm11 = vcmp.eq.s32.totalorder %v3880_v58, 1  ;;  %v13493_v3 = vld [vmem:[#allocation469_spill] sm:$0xff]  ;;  %v3928_v11 = vpop.permute.xlu1 %3927 }
 0x610   : > { %vm1041_vm10 = vcmp.eq.s32.totalorder %v13489_v13, 1  ;;  %vm1888_vm6 = vcmp.eq.s32.totalorder %v13491_v48, 1  ;;  %v3568_v33 = vsel %vm3536_vm2, %v10924_v20, %v3152_v6  ;;  %v13492_v28 = vld [vmem:[#allocation367_spill] sm:$0xff]  ;;  %vm2304_vm13 = vcmp.eq.s32.totalorder %v13493_v3, 1  ;;  %v1952_v63 = vld [vmem:[%s5469_s9 + $0x890] sm:$0xff]  ;;  %v13494_v7 = vld [vmem:[#allocation140_spill] sm:$0xff] }
 0x611   : > { %vm1728_vm8 = vcmp.eq.s32.totalorder %v13492_v28, 1  ;;  %vm4368_vm15 = vcmp.eq.s32.totalorder %v10539_v46, 1  ;;  %v3984_v29 = vsel %vm3952_vm11, %v10940_v32, %v3568_v33  ;;  %vm2144_vm14 = vcmp.eq.s32.totalorder %v13494_v7, 1  ;;  %v13495_v47 = vld [vmem:[#allocation300_spill] sm:$0xff]  ;;  %v2368_v31 = vld [vmem:[%s5469_s9 + $0x898] sm:$0xff]  ;;  %v13497_v40 = vld [vmem:[#allocation505_spill] sm:$0xff] }
 0x612   : > { %v1504_v55 = vsel %vm1472_vm12, %v1120_v51, %v1088_v16  ;;  %vm2720_vm0 = vcmp.eq.s32.totalorder %v13495_v47, 1  ;;  %v4400_v2 = vsel %vm4368_vm15, %v10930_v59, %v3984_v29  ;;  %v1744_v60 = vsel %vm1712_vm7, %v1520_v8, %v1328_v49  ;;  %v13496_v1 = vld [vmem:[#allocation420_spill] sm:$0xff]  ;;  %v13499_v27 = vld [vmem:[#allocation158_spill] sm:$0xff]  ;;  %v2784_v41 = vld [vmem:[%s5469_s9 + $0x8a0] sm:$0xff]  ;;  %v4184_v8 = vpop.permute.xlu0 %4183 }
 0x613   : > { %vm2560_vm1 = vcmp.eq.s32.totalorder %v13496_v1, 1  ;;  %v1920_v46 = vsel %vm1888_vm6, %v1536_v19, %v1504_v55  ;;  %vm3136_vm5 = vcmp.eq.s32.totalorder %v13497_v40, 1  ;;  %4572 = vmatprep.mubr.f32.mxu0 %v4400_v2  ;;  %v13498_v22 = vld [vmem:[#allocation128_spill] sm:$0xff]  ;;  %vm1313_vm9 = vcmp.eq.s32.totalorder %v13499_v27, 1  ;;  %v13501_v9 = vld [vmem:[#allocation173_spill] sm:$0xff]  ;;  %v13502_v45 = vld [vmem:[#allocation115_spill] sm:$0xff]  ;;  %v4344_v35 = vpop.permute.xlu1 %4343 }
 0x614   : > { %vm1297_vm3 = vcmp.eq.s32.totalorder %v13498_v22, 1  ;;  %v1760_v17 = vsel %vm1728_vm8, %v1536_v19, %v1344_v36  ;;  %v13500_v12 = vld [vmem:[#allocation460_spill] sm:$0xff]  ;;  %v2336_v56 = vsel %vm2304_vm13, %v1952_v63, %v1920_v46  ;;  %vm3552_vm2 = vcmp.eq.s32.totalorder %v13501_v9, 1  ;;  %v13504_v43 = vld [vmem:[#allocation79_spill] sm:$0xff]  ;;  %v13505_v50 = vld [vmem:[#allocation30_spill] sm:$0xff] }
 0x615   : > { %vm2976_vm4 = vcmp.eq.s32.totalorder %v13500_v12, 1  ;;  %vm641_vm12 = vcmp.eq.s32.totalorder %v13502_v45, 1  ;;  %v2176_v14 = vsel %vm2144_vm14, %v1952_v63, %v1760_v17  ;;  %v2752_v37 = vsel %vm2720_vm0, %v2368_v31, %v2336_v56  ;;  %v3200_v51 = vld [vmem:[%s5469_s9 + $0x8a8] sm:$0xff]  ;;  %v3616_v53 = vld [vmem:[%s5469_s9 + $0x8b0] sm:$0xff]  ;;  %v4032_v39 = vld [vmem:[%s5469_s9 + $0x8b8] sm:$0xff] }
 0x616   : > { %v13503_v57 = vld [vmem:[#allocation500_spill] sm:$0xff]  ;;  %vm3968_vm6 = vcmp.eq.s32.totalorder %v3928_v11, 1  ;;  %vm2128_vm11 = vcmp.eq.s32.totalorder %v13504_v43, 1  ;;  %v2592_v34 = vsel %vm2560_vm1, %v2368_v31, %v2176_v14  ;;  %v3168_v4 = vsel %vm3136_vm5, %v2784_v41, %v2752_v37  ;;  %v13506_v26 = vld [vmem:[#allocation405_spill] sm:$0xff]  ;;  %v13508_v52 = vld [vmem:[#allocation487_spill] sm:$0xff] }
 0x617   : > { %vm3392_vm7 = vcmp.eq.s32.totalorder %v13503_v57, 1  ;;  %vm3808_vm8 = vcmp.eq.s32.totalorder %v13505_v50, 1  ;;  %vm2544_vm13 = vcmp.eq.s32.totalorder %v13506_v26, 1  ;;  %v3008_v10 = vsel %vm2976_vm4, %v2784_v41, %v2592_v34  ;;  %v13507_v49 = vld [vmem:[#allocation448_spill] sm:$0xff]  ;;  %v13510_v33 = vld [vmem:[#allocation205_spill] sm:$0xff]  ;;  %v13514_v47 = vld [vmem:[#allocation218_spill] sm:$0xff]  ;;  %v4136_v13 = vpop.permute.xlu1 %4135 }
 0x618   : > { %v3584_v24 = vsel %vm3552_vm2, %v3200_v51, %v3168_v4  ;;  %vm4224_vm15 = vcmp.eq.s32.totalorder %v4184_v8, 1  ;;  %vm2960_vm14 = vcmp.eq.s32.totalorder %v13507_v49, 1  ;;  %v3424_v23 = vsel %vm3392_vm7, %v3200_v51, %v3008_v10  ;;  %v13509_v42 = vld [vmem:[#allocation304_spill] sm:$0xff]  ;;  %v13511_v28 = vld [vmem:[#allocation185_spill] sm:$0xff]  ;;  %v1537_v31 = vld [vmem:[%s5469_s9 + $0x8d8] sm:$0xff] }
 0x619   : > { %v4000_v36 = vsel %vm3968_vm6, %v3616_v53, %v3584_v24  ;;  %vm4384_vm0 = vcmp.eq.s32.totalorder %v4344_v35, 1  ;;  %v2160_v16 = vsel %vm2128_vm11, %v10880_v5, %v1744_v60  ;;  %vm3376_vm1 = vcmp.eq.s32.totalorder %v13508_v52, 1  ;;  %v5156_v3 = vld [vmem:[%s5469_s9 + $0x3c8] sm:$0xff]  ;;  %v1105_v63 = vld [vmem:[%s5469_s9 + $0x3d0] sm:$0xff]  ;;  %v1521_v60 = vld [vmem:[%s5469_s9 + $0x3d8] sm:$0xff] }
 0x61a   : > { %v4416_v6 = vsel %vm4384_vm0, %v4032_v39, %v4000_v36  ;;  %v3840_v58 = vsel %vm3808_vm8, %v3616_v53, %v3424_v23  ;;  %vm1457_vm5 = vcmp.eq.s32.totalorder %v13509_v42, 1  ;;  %v2576_v48 = vsel %vm2544_vm13, %v10895_v0, %v2160_v16  ;;  %v13512_v29 = vld [vmem:[#allocation24_spill] sm:$0xff]  ;;  %v1121_v7 = vld [vmem:[%s5469_s9 + $0x8d0] sm:$0xff]  ;;  %v1937_v40 = vld [vmem:[%s5469_s9 + $0x3e0] sm:$0xff] }
 0x61b   : > { %vm3792_vm4 = vcmp.eq.s32.totalorder %v13510_v33, 1  ;;  %4652 = vmatprep.mubr.f32.mxu1 %v4416_v6  ;;  %v4256_v19 = vsel %vm4224_vm15, %v4032_v39, %v3840_v58  ;;  %vm1713_vm2 = vcmp.eq.s32.totalorder %v13511_v28, 1  ;;  %v1073_v5 = vsel %vm1041_vm10, %v5156_v3, %v10889_v44  ;;  %v13513_v55 = vld [vmem:[#allocation209_spill] sm:$0xff]  ;;  %v13515_v2 = vld [vmem:[#allocation176_spill] sm:$0xff]  ;;  %v13517_v11 = vld [vmem:[#allocation223_spill] sm:$0xff] }
 0x61c   : > { %vm1873_vm7 = vcmp.eq.s32.totalorder %v13512_v29, 1  ;;  %v2992_v0 = vsel %vm2960_vm14, %v10913_v30, %v2576_v48  ;;  %4653 = vmatmul.mubr.f32.gmra.mrb[22].mxu1 %v4256_v19  ;;  %vm1729_vm6 = vcmp.eq.s32.totalorder %v13513_v55, 1  ;;  %vm1057_vm11 = vcmp.eq.s32.totalorder %v13514_v47, 1  ;;  %v13516_v1 = vld [vmem:[#allocation52_spill] sm:$0xff]  ;;  %v13518_v17 = vld [vmem:[#allocation262_spill] sm:$0xff]  ;;  %v13519_v12 = vld [vmem:[#allocation39_spill] sm:$0xff]  ;;  %v3883_v34 = vpop.permute.xlu1 %3882 }
 0x61d   : > { %vm2289_vm8 = vcmp.eq.s32.totalorder %v13515_v2, 1  ;;  %v3408_v44 = vsel %vm3376_vm1, %v10924_v20, %v2992_v0  ;;  %v1489_v30 = vsel %vm1457_vm5, %v1105_v63, %v1073_v5  ;;  %vm2705_vm10 = vcmp.eq.s32.totalorder %v13516_v1, 1  ;;  %v2353_v9 = vld [vmem:[%s5469_s9 + $0x3e8] sm:$0xff]  ;;  %v13520_v21 = vld [vmem:[#allocation359_spill] sm:$0xff]  ;;  %v2769_v27 = vld [vmem:[%s5469_s9 + $0x3f0] sm:$0xff]  ;;  %v4187_v0 = vpop.permute.xlu0 %4186 }
 0x61e   : > { %vm4208_vm13 = vcmp.eq.s32.totalorder %v4136_v13, 1  ;;  %v3824_v46 = vsel %vm3792_vm4, %v10940_v32, %v3408_v44  ;;  %vm2129_vm15 = vcmp.eq.s32.totalorder %v13517_v11, 1  ;;  %v1905_v20 = vsel %vm1873_vm7, %v1521_v60, %v1489_v30  ;;  %v5157_v14 = vld [vmem:[%s5469_s9 + $0x8c0] sm:$0xff]  ;;  %v13521_v45 = vld [vmem:[#allocation328_spill] sm:$0xff]  ;;  %v11059_v54 = vld [vmem:[%s5469_s9 + $0x3f8] sm:$0xff] }
 0x61f   : > { %vm3121_vm14 = vcmp.eq.s32.totalorder %v13518_v17, 1  ;;  %v4240_v41 = vsel %vm4208_vm13, %v10930_v59, %v3824_v46  ;;  %v1329_v56 = vsel %vm1297_vm3, %v1105_v63, %v13519_v12  ;;  %v1345_v32 = vsel %vm1313_vm9, %v1121_v7, %v10905_v38  ;;  %v11064_v4 = vld [vmem:[%s5469_s9 + $0x408] sm:$0xff]  ;;  %v1953_v50 = vld [vmem:[%s5469_s9 + $0x8e0] sm:$0xff]  ;;  %v13523_v26 = vld [vmem:[#allocation141_spill] sm:$0xff] }
 0x620   : > { %v2321_v8 = vsel %vm2289_vm8, %v1937_v40, %v1905_v20  ;;  %vm3537_vm0 = vcmp.eq.s32.totalorder %v13520_v21, 1  ;;  %4573 = vmatmul.mubr.f32.gmra.mrb[22].mxu0 %v4240_v41  ;;  %v673_v59 = vsel %vm641_vm12, %v5157_v14, 0.0  ;;  %v1745_v22 = vsel %vm1713_vm2, %v1521_v60, %v1329_v56  ;;  %v13522_v53 = vld [vmem:[#allocation252_spill] sm:$0xff]  ;;  %v11073_v10 = vld [vmem:[%s5469_s9 + $0x400] sm:$0xff]  ;;  %v13525_v35 = vld [vmem:[#allocation253_spill] sm:$0xff]  ;;  %v3931_v33 = vpop.permute.xlu1 %3930 }
 0x621   : > { %v1761_v38 = vsel %vm1729_vm6, %v1537_v31, %v1345_v32  ;;  %v2737_v37 = vsel %vm2705_vm10, %v2353_v9, %v2321_v8  ;;  %v1089_v51 = vsel %vm1057_vm11, %v10868_v61, %v673_v59  ;;  %v2161_v57 = vsel %vm2129_vm15, %v1937_v40, %v1745_v22  ;;  %v13524_v24 = vld [vmem:[#allocation280_spill] sm:$0xff]  ;;  %v13526_v23 = vld [vmem:[#allocation87_spill] sm:$0xff]  ;;  %v13527_v16 = vld [vmem:[#allocation234_spill] sm:$0xff] }
 0x622   : > { %vm1473_vm3 = vcmp.eq.s32.totalorder %v13521_v45, 1  ;;  %v3153_v43 = vsel %vm3121_vm14, %v2769_v27, %v2737_v37  ;;  %vm2145_vm9 = vcmp.eq.s32.totalorder %v13522_v53, 1  ;;  %vm1889_vm12 = vcmp.eq.s32.totalorder %v13523_v26, 1  ;;  %v2369_v49 = vld [vmem:[%s5469_s9 + $0x8e8] sm:$0xff]  ;;  %v2785_v58 = vld [vmem:[%s5469_s9 + $0x8f0] sm:$0xff]  ;;  %v13531_v3 = vld [vmem:[#allocation395_spill] sm:$0xff] }
 0x623   : > { %v3569_v61 = vsel %vm3537_vm0, %v11059_v54, %v3153_v43  ;;  %vm3953_vm1 = vcmp.eq.s32.totalorder %v3883_v34, 1  ;;  %vm2545_vm5 = vcmp.eq.s32.totalorder %v13524_v24, 1  ;;  %vm2305_vm4 = vcmp.eq.s32.totalorder %v13525_v35, 1  ;;  %v13528_v42 = vld [vmem:[#allocation348_spill] sm:$0xff]  ;;  %v13529_v48 = vld [vmem:[#allocation293_spill] sm:$0xff]  ;;  %v13533_v63 = vld [vmem:[#allocation114_spill] sm:$0xff] }
 0x624   : > { %vm4369_vm2 = vcmp.eq.s32.totalorder %v10591_v18, 1  ;;  %v3985_v39 = vsel %vm3953_vm1, %v11073_v10, %v3569_v61  ;;  %vm2561_vm7 = vcmp.eq.s32.totalorder %v13526_v23, 1  ;;  %v1505_v36 = vsel %vm1473_vm3, %v1121_v7, %v1089_v51  ;;  %v13530_v19 = vld [vmem:[#allocation101_spill] sm:$0xff]  ;;  %v3201_v55 = vld [vmem:[%s5469_s9 + $0x8f8] sm:$0xff]  ;;  %v13534_v47 = vld [vmem:[#allocation372_spill] sm:$0xff]  ;;  %v4347_v20 = vpop.permute.xlu1 %4346 }
 0x625   : > { %vm2721_vm6 = vcmp.eq.s32.totalorder %v13527_v16, 1  ;;  %v4401_v52 = vsel %vm4369_vm2, %v11064_v4, %v3985_v39  ;;  %v2177_v6 = vsel %vm2145_vm9, %v1953_v50, %v1761_v38  ;;  %vm2977_vm11 = vcmp.eq.s32.totalorder %v13528_v42, 1  ;;  %v13532_v29 = vld [vmem:[#allocation525_spill] sm:$0xff]  ;;  %v13535_v44 = vld [vmem:[#allocation324_spill] sm:$0xff]  ;;  %v13536_v60 = vld [vmem:[#allocation59_spill] sm:$0xff] }
 0x626   : > { %v1921_v18 = vsel %vm1889_vm12, %v1537_v31, %v1505_v36  ;;  %vm3137_vm8 = vcmp.eq.s32.totalorder %v13529_v48, 1  ;;  %4577 = vmatprep.mubr.f32.mxu0 %v4401_v52  ;;  %vm627_vm10 = vcmp.eq.s32.totalorder %v13530_v19, 1  ;;  %v2577_v28 = vsel %vm2545_vm5, %v2353_v9, %v2161_v57  ;;  %v3617_v30 = vld [vmem:[%s5469_s9 + $0x900] sm:$0xff]  ;;  %v5158_v1 = vld [vmem:[%s5469_s9 + $0x410] sm:$0xff]  ;;  %v13537_v40 = vld [vmem:[#allocation192_spill] sm:$0xff] }
 0x627   : > { %vm626_vm13 = vcmp.eq.s32.totalorder %v13531_v3, 1  ;;  %v2337_v5 = vsel %vm2305_vm4, %v1953_v50, %v1921_v18  ;;  %vm3553_vm15 = vcmp.eq.s32.totalorder %v13532_v29, 1  ;;  %vm899_vm14 = vcmp.eq.s32.totalorder %v13533_v63, 1  ;;  %v4033_v17 = vld [vmem:[%s5469_s9 + $0x908] sm:$0xff]  ;;  %v690_v32 = vld [vmem:[%s5469_s9 + $0x418] sm:$0xff]  ;;  %v13539_v8 = vld [vmem:[#allocation379_spill] sm:$0xff] }
 0x628   : > { %v2593_v7 = vsel %vm2561_vm7, %v2369_v49, %v2177_v6  ;;  %vm3393_vm0 = vcmp.eq.s32.totalorder %v13534_v47, 1  ;;  %v2753_v2 = vsel %vm2721_vm6, %v2369_v49, %v2337_v5  ;;  %vm3969_vm3 = vcmp.eq.s32.totalorder %v3931_v33, 1  ;;  %v13538_v41 = vld [vmem:[#allocation12_spill] sm:$0xff]  ;;  %v13540_v59 = vld [vmem:[#allocation165_spill] sm:$0xff]  ;;  %v13542_v51 = vld [vmem:[#allocation139_spill] sm:$0xff] }
 0x629   : > { %vm2961_vm9 = vcmp.eq.s32.totalorder %v13535_v44, 1  ;;  %v3009_v13 = vsel %vm2977_vm11, %v2785_v58, %v2593_v7  ;;  %vm3809_vm12 = vcmp.eq.s32.totalorder %v13536_v60, 1  ;;  %v3169_v31 = vsel %vm3137_vm8, %v2785_v58, %v2753_v2  ;;  %v13541_v38 = vld [vmem:[#allocation417_spill] sm:$0xff]  ;;  %v13544_v45 = vld [vmem:[#allocation434_spill] sm:$0xff]  ;;  %v1106_v43 = vld [vmem:[%s5469_s9 + $0x420] sm:$0xff]  ;;  %v4139_v26 = vpop.permute.xlu1 %4138 }
 0x62a   : > { %v658_v46 = vsel %vm626_vm13, %v5158_v1, 0.0  ;;  %vm1042_vm1 = vcmp.eq.s32.totalorder %v13537_v40, 1  ;;  %v3585_v11 = vsel %vm3553_vm15, %v3201_v55, %v3169_v31  ;;  %vm4225_vm5 = vcmp.eq.s32.totalorder %v4187_v0, 1  ;;  %v13545_v34 = vld [vmem:[#allocation247_spill] sm:$0xff]  ;;  %v11144_v24 = vld [vmem:[%s5469_s9 + $0x968] sm:$0xff]  ;;  %v5159_v39 = vld [vmem:[%s5469_s9 + $0x910] sm:$0xff] }
 0x62b   : > { %vm3377_vm4 = vcmp.eq.s32.totalorder %v13538_v41, 1  ;;  %v3425_v12 = vsel %vm3393_vm0, %v3201_v55, %v3009_v13  ;;  %v4001_v56 = vsel %vm3969_vm3, %v3617_v30, %v3585_v11  ;;  %vm4385_vm2 = vcmp.eq.s32.totalorder %v4347_v20, 1  ;;  %v13546_v50 = vld [vmem:[#allocation279_spill] sm:$0xff]  ;;  %v1522_v35 = vld [vmem:[%s5469_s9 + $0x428] sm:$0xff]  ;;  %v13548_v36 = vld [vmem:[#allocation473_spill] sm:$0xff] }
 0x62c   : > { %v2993_v9 = vsel %vm2961_vm9, %v2769_v27, %v2577_v28  ;;  %vm3793_vm7 = vcmp.eq.s32.totalorder %v13539_v8, 1  ;;  %v4417_v21 = vsel %vm4385_vm2, %v4033_v17, %v4001_v56  ;;  %v3841_v14 = vsel %vm3809_vm12, %v3617_v30, %v3425_v12  ;;  %v13543_v27 = vld [vmem:[#allocation171_spill] sm:$0xff]  ;;  %v11156_v52 = vld [vmem:[%s5469_s9 + $0x430] sm:$0xff]  ;;  %v13550_v58 = vld [vmem:[#allocation494_spill] sm:$0xff] }
 0x62d   : > { %vm642_vm6 = vcmp.eq.s32.totalorder %v13540_v59, 1  ;;  %v1074_v22 = vsel %vm1042_vm1, %v690_v32, %v658_v46  ;;  %vm1458_vm11 = vcmp.eq.s32.totalorder %v13541_v38, 1  ;;  %4657 = vmatprep.mubr.f32.mxu1 %v4417_v21  ;;  %v4257_v37 = vsel %vm4225_vm5, %v4033_v17, %v3841_v14  ;;  %v13547_v53 = vld [vmem:[#allocation455_spill] sm:$0xff]  ;;  %v13551_v33 = vld [vmem:[#allocation14_spill] sm:$0xff]  ;;  %v13554_v0 = vld [vmem:[#allocation32_spill] sm:$0xff] }
 0x62e   : > { %vm882_vm8 = vcmp.eq.s32.totalorder %v13542_v51, 1  ;;  %vm898_vm13 = vcmp.eq.s32.totalorder %v13543_v27, 1  ;;  %v3409_v57 = vsel %vm3377_vm4, %v11059_v54, %v2993_v9  ;;  %vm1874_vm15 = vcmp.eq.s32.totalorder %v13544_v45, 1  ;;  %4658 = vmatmul.mubr.f32.gmra.mrb[24].mxu1 %v4257_v37  ;;  %v706_v54 = vld [vmem:[%s5469_s9 + $0x918] sm:$0xff]  ;;  %v1122_v16 = vld [vmem:[%s5469_s9 + $0x920] sm:$0xff]  ;;  %v13555_v13 = vld [vmem:[#allocation432_spill] sm:$0xff]  ;;  %v3886_v30 = vpop.permute.xlu1 %3885 }
 0x62f   : > { %vm1298_vm0 = vcmp.eq.s32.totalorder %v13545_v34, 1  ;;  %vm1314_vm3 = vcmp.eq.s32.totalorder %v13546_v50, 1  ;;  %vm2290_vm9 = vcmp.eq.s32.totalorder %v13547_v53, 1  ;;  %v3825_v61 = vsel %vm3793_vm7, %v11073_v10, %v3409_v57  ;;  %v13549_v10 = vld [vmem:[#allocation281_spill] sm:$0xff]  ;;  %v5160_v18 = vld [vmem:[%s5469_s9 + $0x460] sm:$0xff]  ;;  %v11172_v3 = vld [vmem:[%s5469_s9 + $0x438] sm:$0xff] }
 0x630   : > { %v674_v49 = vsel %vm642_vm6, %v5159_v39, 0.0  ;;  %v1490_v23 = vsel %vm1458_vm11, %v1106_v43, %v1074_v22  ;;  %vm2706_vm12 = vcmp.eq.s32.totalorder %v13548_v36, 1  ;;  %vm4209_vm1 = vcmp.eq.s32.totalorder %v4139_v26, 1  ;;  %v13552_v29 = vld [vmem:[#allocation510_spill] sm:$0xff]  ;;  %v11190_v47 = vld [vmem:[%s5469_s9 + $0x440] sm:$0xff]  ;;  %v11201_v60 = vld [vmem:[%s5469_s9 + $0x448] sm:$0xff] }
 0x631   : > { %vm1058_vm5 = vcmp.eq.s32.totalorder %v13549_v10, 1  ;;  %v1906_v6 = vsel %vm1874_vm15, %v1522_v35, %v1490_v23  ;;  %vm3122_vm4 = vcmp.eq.s32.totalorder %v13550_v58, 1  ;;  %v4241_v42 = vsel %vm4209_vm1, %v11064_v4, %v3825_v61  ;;  %v13553_v4 = vld [vmem:[#allocation35_spill] sm:$0xff]  ;;  %v11207_v1 = vld [vmem:[%s5469_s9 + $0x458] sm:$0xff]  ;;  %v13558_v11 = vld [vmem:[#allocation444_spill] sm:$0xff]  ;;  %v4190_v61 = vpop.permute.xlu0 %4189 }
 0x632   : > { %v11166_v48 = vsel %vm627_vm10, %v5160_v18, 0.0  ;;  %v914_v28 = vsel %vm882_vm8, %v690_v32, %v13551_v33  ;;  %v2322_v5 = vsel %vm2290_vm9, %v11156_v52, %v1906_v6  ;;  %vm3538_vm2 = vcmp.eq.s32.totalorder %v13552_v29, 1  ;;  %4578 = vmatmul.mubr.f32.gmra.mrb[24].mxu0 %v4241_v42  ;;  %v13556_v46 = vld [vmem:[#allocation202_spill] sm:$0xff]  ;;  %v13557_v40 = vld [vmem:[#allocation355_spill] sm:$0xff]  ;;  %v11216_v17 = vld [vmem:[%s5469_s9 + $0x450] sm:$0xff]  ;;  %v3934_v27 = vpop.permute.xlu1 %3933 }
 0x633   : > { %v11182_v19 = vsel %vm899_vm14, %v11144_v24, %v13553_v4  ;;  %v930_v7 = vsel %vm898_vm13, %v706_v54, %v13554_v0  ;;  %v1330_v55 = vsel %vm1298_vm0, %v1106_v43, %v914_v28  ;;  %v2738_v2 = vsel %vm2706_vm12, %v11172_v3, %v2322_v5  ;;  %v1538_v41 = vld [vmem:[%s5469_s9 + $0x928] sm:$0xff]  ;;  %v13560_v56 = vld [vmem:[#allocation470_spill] sm:$0xff]  ;;  %v1954_v9 = vld [vmem:[%s5469_s9 + $0x930] sm:$0xff] }
 0x634   : > { %v1346_v63 = vsel %vm1314_vm3, %v1122_v16, %v930_v7  ;;  %v1090_v44 = vsel %vm1058_vm5, %v706_v54, %v674_v49  ;;  %vm1474_vm10 = vcmp.eq.s32.totalorder %v13555_v13, 1  ;;  %v3154_v31 = vsel %vm3122_vm4, %v11190_v47, %v2738_v2  ;;  %v13559_v12 = vld [vmem:[#allocation368_spill] sm:$0xff]  ;;  %v13562_v14 = vld [vmem:[#allocation481_spill] sm:$0xff]  ;;  %v2370_v38 = vld [vmem:[%s5469_s9 + $0x938] sm:$0xff] }
 0x635   : > { %vm1043_vm14 = vcmp.eq.s32.totalorder %v13556_v46, 1  ;;  %vm1714_vm7 = vcmp.eq.s32.totalorder %v13557_v40, 1  ;;  %vm1890_vm6 = vcmp.eq.s32.totalorder %v13558_v11, 1  ;;  %v3570_v20 = vsel %vm3538_vm2, %v11201_v60, %v3154_v31  ;;  %v13561_v8 = vld [vmem:[#allocation144_spill] sm:$0xff]  ;;  %v13563_v37 = vld [vmem:[#allocation422_spill] sm:$0xff]  ;;  %v13565_v57 = vld [vmem:[#allocation131_spill] sm:$0xff] }
 0x636   : > { %vm3954_vm11 = vcmp.eq.s32.totalorder %v3886_v30, 1  ;;  %vm1730_vm8 = vcmp.eq.s32.totalorder %v13559_v12, 1  ;;  %vm2306_vm13 = vcmp.eq.s32.totalorder %v13560_v56, 1  ;;  %vm4370_vm15 = vcmp.eq.s32.totalorder %v10639_v62, 1  ;;  %v13564_v51 = vld [vmem:[#allocation508_spill] sm:$0xff]  ;;  %v13566_v45 = vld [vmem:[#allocation162_spill] sm:$0xff]  ;;  %v4350_v28 = vpop.permute.xlu1 %4349 }
 0x637   : > { %v3986_v32 = vsel %vm3954_vm11, %v11216_v17, %v3570_v20  ;;  %vm2146_vm0 = vcmp.eq.s32.totalorder %v13561_v8, 1  ;;  %v1506_v21 = vsel %vm1474_vm10, %v1122_v16, %v1090_v44  ;;  %vm2722_vm3 = vcmp.eq.s32.totalorder %v13562_v14, 1  ;;  %v2786_v34 = vld [vmem:[%s5469_s9 + $0x940] sm:$0xff]  ;;  %v13567_v50 = vld [vmem:[#allocation462_spill] sm:$0xff]  ;;  %v13568_v26 = vld [vmem:[#allocation392_spill] sm:$0xff] }
 0x638   : > { %v4402_v59 = vsel %vm4370_vm15, %v11207_v1, %v3986_v32  ;;  %v1746_v22 = vsel %vm1714_vm7, %v1522_v35, %v1330_v55  ;;  %vm2562_vm9 = vcmp.eq.s32.totalorder %v13563_v37, 1  ;;  %v1922_v62 = vsel %vm1890_vm6, %v1538_v41, %v1506_v21  ;;  %v13569_v54 = vld [vmem:[#allocation117_spill] sm:$0xff]  ;;  %v3202_v49 = vld [vmem:[%s5469_s9 + $0x948] sm:$0xff]  ;;  %v13570_v23 = vld [vmem:[#allocation502_spill] sm:$0xff] }
 0x639   : > { %vm3138_vm12 = vcmp.eq.s32.totalorder %v13564_v51, 1  ;;  %4582 = vmatprep.mubr.f32.mxu0 %v4402_v59  ;;  %vm1299_vm1 = vcmp.eq.s32.totalorder %v13565_v57, 1  ;;  %vm1315_vm5 = vcmp.eq.s32.totalorder %v13566_v45, 1  ;;  %v1762_v43 = vsel %vm1730_vm8, %v1538_v41, %v1346_v63  ;;  %v13571_v36 = vld [vmem:[#allocation83_spill] sm:$0xff]  ;;  %v13572_v6 = vld [vmem:[#allocation36_spill] sm:$0xff]  ;;  %v3618_v58 = vld [vmem:[%s5469_s9 + $0x950] sm:$0xff] }
 0x63a   : > { %vm2978_vm4 = vcmp.eq.s32.totalorder %v13567_v50, 1  ;;  %v2338_v53 = vsel %vm2306_vm13, %v1954_v9, %v1922_v62  ;;  %vm3554_vm2 = vcmp.eq.s32.totalorder %v13568_v26, 1  ;;  %vm643_vm10 = vcmp.eq.s32.totalorder %v13569_v54, 1  ;;  %v13573_v42 = vld [vmem:[#allocation406_spill] sm:$0xff]  ;;  %v13574_v29 = vld [vmem:[#allocation449_spill] sm:$0xff]  ;;  %v13575_v55 = vld [vmem:[#allocation488_spill] sm:$0xff] }
 0x63b   : > { %v2178_v35 = vsel %vm2146_vm0, %v1954_v9, %v1762_v43  ;;  %v2754_v39 = vsel %vm2722_vm3, %v2370_v38, %v2338_v53  ;;  %vm3394_vm7 = vcmp.eq.s32.totalorder %v13570_v23, 1  ;;  %vm3970_vm6 = vcmp.eq.s32.totalorder %v3934_v27, 1  ;;  %v4034_v5 = vld [vmem:[%s5469_s9 + $0x958] sm:$0xff]  ;;  %v13576_v44 = vld [vmem:[#allocation307_spill] sm:$0xff]  ;;  %v13578_v40 = vld [vmem:[#allocation188_spill] sm:$0xff]  ;;  %v4142_v46 = vpop.permute.xlu1 %4141 }
 0x63c   : > { %vm2130_vm11 = vcmp.eq.s32.totalorder %v13571_v36, 1  ;;  %v2594_v16 = vsel %vm2562_vm9, %v2370_v38, %v2178_v35  ;;  %v3170_v10 = vsel %vm3138_vm12, %v2786_v34, %v2754_v39  ;;  %vm3810_vm8 = vcmp.eq.s32.totalorder %v13572_v6, 1  ;;  %v13577_v31 = vld [vmem:[#allocation310_spill] sm:$0xff]  ;;  %v5161_v11 = vld [vmem:[%s5469_s9 + $0x468] sm:$0xff]  ;;  %v13579_v20 = vld [vmem:[#allocation25_spill] sm:$0xff] }
 0x63d   : > { %vm2546_vm13 = vcmp.eq.s32.totalorder %v13573_v42, 1  ;;  %v3010_v18 = vsel %vm2978_vm4, %v2786_v34, %v2594_v16  ;;  %v3586_v33 = vsel %vm3554_vm2, %v3202_v49, %v3170_v10  ;;  %vm4226_vm15 = vcmp.eq.s32.totalorder %v4190_v61, 1  ;;  %v1107_v41 = vld [vmem:[%s5469_s9 + $0x470] sm:$0xff]  ;;  %v13580_v56 = vld [vmem:[#allocation211_spill] sm:$0xff]  ;;  %v13581_v32 = vld [vmem:[#allocation220_spill] sm:$0xff] }
 0x63e   : > { %vm2962_vm0 = vcmp.eq.s32.totalorder %v13574_v29, 1  ;;  %v3426_v4 = vsel %vm3394_vm7, %v3202_v49, %v3010_v18  ;;  %v4002_v0 = vsel %vm3970_vm6, %v3618_v58, %v3586_v33  ;;  %vm4386_vm3 = vcmp.eq.s32.totalorder %v4350_v28, 1  ;;  %v1123_v12 = vld [vmem:[%s5469_s9 + $0x970] sm:$0xff]  ;;  %v13582_v9 = vld [vmem:[#allocation179_spill] sm:$0xff]  ;;  %v1523_v8 = vld [vmem:[%s5469_s9 + $0x478] sm:$0xff] }
 0x63f   : > { %v2162_v7 = vsel %vm2130_vm11, %v11156_v52, %v1746_v22  ;;  %vm3378_vm9 = vcmp.eq.s32.totalorder %v13575_v55, 1  ;;  %v4418_v2 = vsel %vm4386_vm3, %v4034_v5, %v4002_v0  ;;  %v3842_v63 = vsel %vm3810_vm8, %v3618_v58, %v3426_v4  ;;  %v1539_v21 = vld [vmem:[%s5469_s9 + $0x978] sm:$0xff]  ;;  %v13583_v14 = vld [vmem:[#allocation56_spill] sm:$0xff]  ;;  %v1939_v22 = vld [vmem:[%s5469_s9 + $0x480] sm:$0xff] }
 0x640   : > { %vm1459_vm12 = vcmp.eq.s32.totalorder %v13576_v44, 1  ;;  %v2578_v13 = vsel %vm2546_vm13, %v11172_v3, %v2162_v7  ;;  %vm3794_vm4 = vcmp.eq.s32.totalorder %v13577_v31, 1  ;;  %4662 = vmatprep.mubr.f32.mxu1 %v4418_v2  ;;  %v4258_v30 = vsel %vm4226_vm15, %v4034_v5, %v3842_v63  ;;  %v13584_v38 = vld [vmem:[#allocation225_spill] sm:$0xff]  ;;  %v13585_v37 = vld [vmem:[#allocation266_spill] sm:$0xff]  ;;  %v2355_v43 = vld [vmem:[%s5469_s9 + $0x488] sm:$0xff]  ;;  %v3889_v23 = vpop.permute.xlu1 %3888 }
 0x641   : > { %vm1715_vm2 = vcmp.eq.s32.totalorder %v13578_v40, 1  ;;  %v1075_v52 = vsel %vm1043_vm14, %v5161_v11, %v11166_v48  ;;  %vm1875_vm7 = vcmp.eq.s32.totalorder %v13579_v20, 1  ;;  %v2994_v3 = vsel %vm2962_vm0, %v11190_v47, %v2578_v13  ;;  %4663 = vmatmul.mubr.f32.gmra.mrb[26].mxu1 %v4258_v30  ;;  %v13586_v51 = vld [vmem:[#allocation41_spill] sm:$0xff]  ;;  %v13587_v50 = vld [vmem:[#allocation311_spill] sm:$0xff]  ;;  %v11325_v39 = vld [vmem:[%s5469_s9 + $0x498] sm:$0xff] }
 0x642   : > { %vm1731_vm6 = vcmp.eq.s32.totalorder %v13580_v56, 1  ;;  %vm1059_vm11 = vcmp.eq.s32.totalorder %v13581_v32, 1  ;;  %vm2291_vm8 = vcmp.eq.s32.totalorder %v13582_v9, 1  ;;  %v3410_v48 = vsel %vm3378_vm9, %v11201_v60, %v2994_v3  ;;  %v5162_v53 = vld [vmem:[%s5469_s9 + $0x960] sm:$0xff]  ;;  %v2771_v45 = vld [vmem:[%s5469_s9 + $0x490] sm:$0xff]  ;;  %v11330_v36 = vld [vmem:[%s5469_s9 + $0x4a8] sm:$0xff] }
 0x643   : > { %v1491_v47 = vsel %vm1459_vm12, %v1107_v41, %v1075_v52  ;;  %vm2707_vm14 = vcmp.eq.s32.totalorder %v13583_v14, 1  ;;  %vm4210_vm13 = vcmp.eq.s32.totalorder %v4142_v46, 1  ;;  %v3826_v59 = vsel %vm3794_vm4, %v11216_v17, %v3410_v48  ;;  %v13588_v54 = vld [vmem:[#allocation331_spill] sm:$0xff]  ;;  %v13589_v10 = vld [vmem:[#allocation256_spill] sm:$0xff]  ;;  %v13590_v6 = vld [vmem:[#allocation145_spill] sm:$0xff]  ;;  %v4193_v52 = vpop.permute.xlu0 %4192 }
 0x644   : > { %vm2131_vm15 = vcmp.eq.s32.totalorder %v13584_v38, 1  ;;  %v1907_v60 = vsel %vm1875_vm7, %v1523_v8, %v1491_v47  ;;  %vm3123_vm0 = vcmp.eq.s32.totalorder %v13585_v37, 1  ;;  %v4242_v62 = vsel %vm4210_vm13, %v11207_v1, %v3826_v59  ;;  %v1955_v16 = vld [vmem:[%s5469_s9 + $0x980] sm:$0xff]  ;;  %v13591_v42 = vld [vmem:[#allocation284_spill] sm:$0xff]  ;;  %v13592_v18 = vld [vmem:[#allocation257_spill] sm:$0xff]  ;;  %v3937_v44 = vpop.permute.xlu1 %3936 }
 0x645   : > { %v1331_v27 = vsel %vm1299_vm1, %v1107_v41, %v13586_v51  ;;  %v1347_v17 = vsel %vm1315_vm5, %v1123_v12, %v11182_v19  ;;  %v2323_v34 = vsel %vm2291_vm8, %v1939_v22, %v1907_v60  ;;  %vm3539_vm3 = vcmp.eq.s32.totalorder %v13587_v50, 1  ;;  %4583 = vmatmul.mubr.f32.gmra.mrb[26].mxu0 %v4242_v62  ;;  %v11339_v58 = vld [vmem:[%s5469_s9 + $0x4a0] sm:$0xff]  ;;  %v2371_v28 = vld [vmem:[%s5469_s9 + $0x988] sm:$0xff]  ;;  %v13593_v5 = vld [vmem:[#allocation306_spill] sm:$0xff] }
 0x646   : > { %v675_v1 = vsel %vm643_vm10, %v5162_v53, 0.0  ;;  %v1747_v57 = vsel %vm1715_vm2, %v1523_v8, %v1331_v27  ;;  %v1763_v19 = vsel %vm1731_vm6, %v1539_v21, %v1347_v17  ;;  %v2739_v26 = vsel %vm2707_vm14, %v2355_v43, %v2323_v34  ;;  %v13594_v4 = vld [vmem:[#allocation238_spill] sm:$0xff]  ;;  %v2787_v55 = vld [vmem:[%s5469_s9 + $0x990] sm:$0xff]  ;;  %v13595_v2 = vld [vmem:[#allocation351_spill] sm:$0xff] }
 0x647   : > { %v1091_v61 = vsel %vm1059_vm11, %v11144_v24, %v675_v1  ;;  %v2163_v35 = vsel %vm2131_vm15, %v1939_v22, %v1747_v57  ;;  %vm1475_vm1 = vcmp.eq.s32.totalorder %v13588_v54, 1  ;;  %v3155_v49 = vsel %vm3123_vm0, %v2771_v45, %v2739_v26  ;;  %v13596_v63 = vld [vmem:[#allocation295_spill] sm:$0xff]  ;;  %v13597_v13 = vld [vmem:[#allocation81_spill] sm:$0xff]  ;;  %v13598_v30 = vld [vmem:[#allocation396_spill] sm:$0xff] }
 0x648   : > { %vm2147_vm5 = vcmp.eq.s32.totalorder %v13589_v10, 1  ;;  %vm1891_vm10 = vcmp.eq.s32.totalorder %v13590_v6, 1  ;;  %v3571_v24 = vsel %vm3539_vm3, %v11325_v39, %v3155_v49  ;;  %vm3955_vm9 = vcmp.eq.s32.totalorder %v3889_v23, 1  ;;  %v13599_v11 = vld [vmem:[#allocation389_spill] sm:$0xff]  ;;  %v3203_v3 = vld [vmem:[%s5469_s9 + $0x998] sm:$0xff]  ;;  %v13601_v56 = vld [vmem:[#allocation327_spill] sm:$0xff]  ;;  %v4353_v59 = vpop.permute.xlu1 %4352 }
 0x649   : > { %vm2547_vm12 = vcmp.eq.s32.totalorder %v13591_v42, 1  ;;  %vm2307_vm4 = vcmp.eq.s32.totalorder %v13592_v18, 1  ;;  %vm4371_vm2 = vcmp.eq.s32.totalorder %v10713_v25, 1  ;;  %v3987_v33 = vsel %vm3955_vm9, %v11339_v58, %v3571_v24  ;;  %v13600_v41 = vld [vmem:[#allocation373_spill] sm:$0xff]  ;;  %v13602_v9 = vld [vmem:[#allocation383_spill] sm:$0xff]  ;;  %v4035_v22 = vld [vmem:[%s5469_s9 + $0x9a8] sm:$0xff] }
 0x64a   : > { %vm2563_vm7 = vcmp.eq.s32.totalorder %v13593_v5, 1  ;;  %v1507_v29 = vsel %vm1475_vm1, %v1123_v12, %v1091_v61  ;;  %vm2723_vm6 = vcmp.eq.s32.totalorder %v13594_v4, 1  ;;  %v4403_v0 = vsel %vm4371_vm2, %v11330_v36, %v3987_v33  ;;  %v3619_v46 = vld [vmem:[%s5469_s9 + $0x9a0] sm:$0xff]  ;;  %v5163_v8 = vld [vmem:[%s5469_s9 + $0x4b0] sm:$0xff]  ;;  %v692_v62 = vld [vmem:[%s5469_s9 + $0x4b8] sm:$0xff] }
 0x64b   : > { %v2179_v7 = vsel %vm2147_vm5, %v1955_v16, %v1763_v19  ;;  %vm2979_vm11 = vcmp.eq.s32.totalorder %v13595_v2, 1  ;;  %v1923_v25 = vsel %vm1891_vm10, %v1539_v21, %v1507_v29  ;;  %vm3139_vm8 = vcmp.eq.s32.totalorder %v13596_v63, 1  ;;  %4587 = vmatprep.mubr.f32.mxu0 %v4403_v0  ;;  %v13603_v47 = vld [vmem:[#allocation195_spill] sm:$0xff]  ;;  %v13604_v38 = vld [vmem:[#allocation13_spill] sm:$0xff]  ;;  %v13605_v27 = vld [vmem:[#allocation380_spill] sm:$0xff] }
 0x64c   : > { %vm484_vm14 = vcmp.eq.s32.totalorder %v13597_v13, 1  ;;  %v2579_v31 = vsel %vm2547_vm12, %v2355_v43, %v2163_v35  ;;  %vm628_vm13 = vcmp.eq.s32.totalorder %v13598_v30, 1  ;;  %v2339_v40 = vsel %vm2307_vm4, %v1955_v16, %v1923_v25  ;;  %v13606_v34 = vld [vmem:[#allocation169_spill] sm:$0xff]  ;;  %v13607_v53 = vld [vmem:[#allocation419_spill] sm:$0xff]  ;;  %v1524_v6 = vld [vmem:[%s5469_s9 + $0x4c8] sm:$0xff] }
 0x64d   : > { %vm3555_vm15 = vcmp.eq.s32.totalorder %v13599_v11, 1  ;;  %v2595_v20 = vsel %vm2563_vm7, %v2371_v28, %v2179_v7  ;;  %vm3395_vm0 = vcmp.eq.s32.totalorder %v13600_v41, 1  ;;  %v2755_v12 = vsel %vm2723_vm6, %v2371_v28, %v2339_v40  ;;  %v13608_v57 = vld [vmem:[#allocation143_spill] sm:$0xff]  ;;  %v292_v61 = vld [vmem:[%s5469_s9 + $0x9b0] sm:$0xff]  ;;  %v4145_v16 = vpop.permute.xlu1 %4144  ;;  %v13614_v18 = vld [vmem:[#allocation474_spill] sm:$0xff] }
 0x64e   : > { %vm3971_vm3 = vcmp.eq.s32.totalorder %v3937_v44, 1  ;;  %vm2963_vm1 = vcmp.eq.s32.totalorder %v13601_v56, 1  ;;  %v3011_v32 = vsel %vm2979_vm11, %v2787_v55, %v2595_v20  ;;  %vm3811_vm5 = vcmp.eq.s32.totalorder %v13602_v9, 1  ;;  %v13609_v19 = vld [vmem:[#allocation175_spill] sm:$0xff]  ;;  %v13613_v23 = vld [vmem:[#allocation457_spill] sm:$0xff]  ;;  %v11427_v25 = vld [vmem:[%s5469_s9 + $0x4d8] sm:$0xff] }
 0x64f   : > { %v3171_v48 = vsel %vm3139_vm8, %v2787_v55, %v2755_v12  ;;  %v660_v21 = vsel %vm628_vm13, %v5163_v8, 0.0  ;;  %vm1044_vm10 = vcmp.eq.s32.totalorder %v13603_v47, 1  ;;  %vm4227_vm9 = vcmp.eq.s32.totalorder %v4193_v52, 1  ;;  %v13610_v26 = vld [vmem:[#allocation435_spill] sm:$0xff]  ;;  %v11414_v28 = vld [vmem:[%s5469_s9 + $0x4d0] sm:$0xff]  ;;  %v4519_v4 = vpop.f32.mrb[0].mxu0 }
 0x650   : > { %v3587_v14 = vsel %vm3555_vm15, %v3203_v3, %v3171_v48  ;;  %vm3379_vm12 = vcmp.eq.s32.totalorder %v13604_v38, 1  ;;  %v3427_v60 = vsel %vm3395_vm0, %v3203_v3, %v3011_v32  ;;  %vm4387_vm4 = vcmp.eq.s32.totalorder %v4353_v59, 1  ;;  %v1108_v35 = vld [vmem:[%s5469_s9 + $0x4c0] sm:$0xff]  ;;  %v13615_v5 = vld [vmem:[#allocation285_spill] sm:$0xff]  ;;  %4678 = vst [vmem:[%s10976_s10] sm:$0xff] %v4519_v4  ;;  %v11450_v3 = vld [vmem:[%s5469_s9 + $0x4e8] sm:$0xff] }
 0x651   : > { %v4003_v37 = vsel %vm3971_vm3, %v3619_v46, %v3587_v14  ;;  %v2995_v51 = vsel %vm2963_vm1, %v2771_v45, %v2579_v31  ;;  %vm3795_vm2 = vcmp.eq.s32.totalorder %v13605_v27, 1  ;;  %v3843_v43 = vsel %vm3811_vm5, %v3619_v46, %v3427_v60  ;;  %v13611_v54 = vld [vmem:[#allocation251_spill] sm:$0xff]  ;;  %v13618_v44 = vld [vmem:[#allocation513_spill] sm:$0xff]  ;;  %v4521_v31 = vpop.f32.mrb[1].mxu0  ;;  %v11456_v56 = vld [vmem:[%s5469_s9 + $0x4f8] sm:$0xff] }
 0x652   : > { %v4419_v17 = vsel %vm4387_vm4, %v4035_v22, %v4003_v37  ;;  %vm644_vm7 = vcmp.eq.s32.totalorder %v13606_v34, 1  ;;  %v1076_v50 = vsel %vm1044_vm10, %v692_v62, %v660_v21  ;;  %vm1460_vm6 = vcmp.eq.s32.totalorder %v13607_v53, 1  ;;  %v13612_v49 = vld [vmem:[#allocation283_spill] sm:$0xff]  ;;  %v13619_v20 = vld [vmem:[#allocation433_spill] sm:$0xff]  ;;  %v3892_v12 = vpop.permute.xlu1 %3891  ;;  %v13620_v32 = vld [vmem:[#allocation358_spill] sm:$0xff] }
 0x653   : > { %4667 = vmatprep.mubr.f32.mxu1 %v4419_v17  ;;  %v4259_v1 = vsel %vm4227_vm9, %v4035_v22, %v3843_v43  ;;  %vm884_vm11 = vcmp.eq.s32.totalorder %v13608_v57, 1  ;;  %vm900_vm8 = vcmp.eq.s32.totalorder %v13609_v19, 1  ;;  %v3411_v45 = vsel %vm3379_vm12, %v11325_v39, %v2995_v51  ;;  %v708_v39 = vld [vmem:[%s5469_s9 + $0x9b8] sm:$0xff]  ;;  %v1124_v33 = vld [vmem:[%s5469_s9 + $0x9c0] sm:$0xff]  ;;  %v3604_v46 = vld [vmem:[%s5469_s9 + $0x4f0] sm:$0xff]  ;;  %v4196_v19 = vpop.permute.xlu0 %4195 }
 0x654   : > { %vm1876_vm13 = vcmp.eq.s32.totalorder %v13610_v26, 1  ;;  %4668 = vmatmul.mubr.f32.gmra.mrb[28].mxu1 %v4259_v1  ;;  %vm1300_vm15 = vcmp.eq.s32.totalorder %v13611_v54, 1  ;;  %vm1316_vm0 = vcmp.eq.s32.totalorder %v13612_v49, 1  ;;  %vm2292_vm3 = vcmp.eq.s32.totalorder %v13613_v23, 1  ;;  %v13616_v29 = vld [vmem:[#allocation347_spill] sm:$0xff]  ;;  %v13621_v9 = vld [vmem:[#allocation446_spill] sm:$0xff] }
 0x655   : > { %v3827_v10 = vsel %vm3795_vm2, %v11339_v58, %v3411_v45  ;;  %v676_v24 = vsel %vm644_vm7, %v292_v61, 0.0  ;;  %v1492_v42 = vsel %vm1460_vm6, %v1108_v35, %v1076_v50  ;;  %vm2708_vm1 = vcmp.eq.s32.totalorder %v13614_v18, 1  ;;  %v13617_v55 = vld [vmem:[#allocation27_spill] sm:$0xff]  ;;  %v1540_v8 = vld [vmem:[%s5469_s9 + $0x9c8] sm:$0xff]  ;;  %v13622_v21 = vld [vmem:[#allocation369_spill] sm:$0xff] }
 0x656   : > { %vm4211_vm5 = vcmp.eq.s32.totalorder %v4145_v16, 1  ;;  %vm1060_vm10 = vcmp.eq.s32.totalorder %v13615_v5, 1  ;;  %v1908_v58 = vsel %vm1876_vm13, %v1524_v6, %v1492_v42  ;;  %vm3124_vm9 = vcmp.eq.s32.totalorder %v13616_v29, 1  ;;  %v11439_v30 = vld [vmem:[%s5469_s9 + $0x4e0] sm:$0xff]  ;;  %v13623_v47 = vld [vmem:[#allocation472_spill] sm:$0xff]  ;;  %v1956_v59 = vld [vmem:[%s5469_s9 + $0x9d0] sm:$0xff] }
 0x657   : > { %v4243_v0 = vsel %vm4211_vm5, %v11330_v36, %v3827_v10  ;;  %v516_v7 = vsel %vm484_vm14, %v292_v61, 0.0  ;;  %v916_v2 = vsel %vm884_vm11, %v692_v62, %v13617_v55  ;;  %v2324_v63 = vsel %vm2292_vm3, %v11414_v28, %v1908_v58  ;;  %v13624_v22 = vld [vmem:[#allocation148_spill] sm:$0xff]  ;;  %v13625_v60 = vld [vmem:[#allocation483_spill] sm:$0xff]  ;;  %v2372_v51 = vld [vmem:[%s5469_s9 + $0x9d8] sm:$0xff]  ;;  %v3940_v43 = vpop.permute.xlu1 %3939 }
 0x658   : > { %vm3540_vm12 = vcmp.eq.s32.totalorder %v13618_v44, 1  ;;  %4588 = vmatmul.mubr.f32.gmra.mrb[28].mxu0 %v4243_v0  ;;  %v932_v36 = vsel %vm900_vm8, %v708_v39, %v516_v7  ;;  %v1332_v13 = vsel %vm1300_vm15, %v1108_v35, %v916_v2  ;;  %v2740_v40 = vsel %vm2708_vm1, %v11427_v25, %v2324_v63  ;;  %v13626_v27 = vld [vmem:[#allocation424_spill] sm:$0xff]  ;;  %v2788_v50 = vld [vmem:[%s5469_s9 + $0x9e0] sm:$0xff]  ;;  %v13631_v54 = vld [vmem:[#allocation85_spill] sm:$0xff] }
 0x659   : > { %v1348_v11 = vsel %vm1316_vm0, %v1124_v33, %v932_v36  ;;  %v1092_v52 = vsel %vm1060_vm10, %v708_v39, %v676_v24  ;;  %vm1476_vm14 = vcmp.eq.s32.totalorder %v13619_v20, 1  ;;  %v3156_v41 = vsel %vm3124_vm9, %v11439_v30, %v2740_v40  ;;  %v13628_v53 = vld [vmem:[#allocation464_spill] sm:$0xff]  ;;  %v13629_v57 = vld [vmem:[#allocation407_spill] sm:$0xff]  ;;  %v13632_v16 = vld [vmem:[#allocation38_spill] sm:$0xff] }
 0x65a   : > { %vm1716_vm4 = vcmp.eq.s32.totalorder %v13620_v32, 1  ;;  %vm1892_vm2 = vcmp.eq.s32.totalorder %v13621_v9, 1  ;;  %v3572_v48 = vsel %vm3540_vm12, %v11450_v3, %v3156_v41  ;;  %vm3956_vm7 = vcmp.eq.s32.totalorder %v3892_v12, 1  ;;  %v3204_v61 = vld [vmem:[%s5469_s9 + $0x9e8] sm:$0xff]  ;;  %v3620_v10 = vld [vmem:[%s5469_s9 + $0x9f0] sm:$0xff]  ;;  %v4036_v18 = vld [vmem:[%s5469_s9 + $0x9f8] sm:$0xff] }
 0x65b   : > { %vm1732_vm6 = vcmp.eq.s32.totalorder %v13622_v21, 1  ;;  %vm2308_vm11 = vcmp.eq.s32.totalorder %v13623_v47, 1  ;;  %vm4372_vm8 = vcmp.eq.s32.totalorder %v10762_v15, 1  ;;  %v3988_v14 = vsel %vm3956_vm7, %v3604_v46, %v3572_v48  ;;  %v13627_v15 = vld [vmem:[#allocation509_spill] sm:$0xff]  ;;  %v13630_v35 = vld [vmem:[#allocation504_spill] sm:$0xff]  ;;  %v13635_v4 = vld [vmem:[#allocation490_spill] sm:$0xff] }
 0x65c   : > { %vm2148_vm13 = vcmp.eq.s32.totalorder %v13624_v22, 1  ;;  %v1508_v38 = vsel %vm1476_vm14, %v1124_v33, %v1092_v52  ;;  %vm2724_vm15 = vcmp.eq.s32.totalorder %v13625_v60, 1  ;;  %v4404_v37 = vsel %vm4372_vm8, %v11456_v56, %v3988_v14  ;;  %v13633_v39 = vld [vmem:[#allocation408_spill] sm:$0xff]  ;;  %v13634_v33 = vld [vmem:[#allocation450_spill] sm:$0xff]  ;;  %v13636_v2 = vld [vmem:[#allocation191_spill] sm:$0xff]  ;;  %v4524_v63 = vpop.f32.mrb[2].mxu0 }
 0x65d   : > { %v1748_v62 = vsel %vm1716_vm4, %v1524_v6, %v1332_v13  ;;  %vm2564_vm0 = vcmp.eq.s32.totalorder %v13626_v27, 1  ;;  %v1924_v17 = vsel %vm1892_vm2, %v1540_v8, %v1508_v38  ;;  %vm3140_vm3 = vcmp.eq.s32.totalorder %v13627_v15, 1  ;;  %4592 = vmatprep.mubr.f32.mxu0 %v4404_v37  ;;  %4679 = vst [vmem:[%s10976_s10 + $0x8] sm:$0xff] %v4524_v63  ;;  %v4526_v36 = vpop.f32.mrb[3].mxu0 }
 0x65e   : > { %v1764_v34 = vsel %vm1732_vm6, %v1540_v8, %v1348_v11  ;;  %vm2980_vm1 = vcmp.eq.s32.totalorder %v13628_v53, 1  ;;  %v2340_v1 = vsel %vm2308_vm11, %v1956_v59, %v1924_v17  ;;  %vm3556_vm5 = vcmp.eq.s32.totalorder %v13629_v57, 1  ;;  %v4356_v42 = vpop.permute.xlu1 %4355 }
 0x65f   : > { %v2180_v45 = vsel %vm2148_vm13, %v1956_v59, %v1764_v34  ;;  %v2756_v26 = vsel %vm2724_vm15, %v2372_v51, %v2340_v1  ;;  %vm3396_vm10 = vcmp.eq.s32.totalorder %v13630_v35, 1  ;;  %vm3972_vm9 = vcmp.eq.s32.totalorder %v3940_v43, 1 }
 0x660   : > { %vm2132_vm12 = vcmp.eq.s32.totalorder %v13631_v54, 1  ;;  %v2596_v49 = vsel %vm2564_vm0, %v2372_v51, %v2180_v45  ;;  %v3172_v23 = vsel %vm3140_vm3, %v2788_v50, %v2756_v26  ;;  %vm3812_vm14 = vcmp.eq.s32.totalorder %v13632_v16, 1 }
 0x661   : > { %vm2548_vm4 = vcmp.eq.s32.totalorder %v13633_v39, 1  ;;  %v3012_v6 = vsel %vm2980_vm1, %v2788_v50, %v2596_v49  ;;  %v3588_v24 = vsel %vm3556_vm5, %v3204_v61, %v3172_v23  ;;  %vm4228_vm2 = vcmp.eq.s32.totalorder %v4196_v19, 1 }
 0x662   : > { %vm2964_vm7 = vcmp.eq.s32.totalorder %v13634_v33, 1  ;;  %v3428_v5 = vsel %vm3396_vm10, %v3204_v61, %v3012_v6  ;;  %v4004_v58 = vsel %vm3972_vm9, %v3620_v10, %v3588_v24  ;;  %vm4388_vm6 = vcmp.eq.s32.totalorder %v4356_v42, 1 }
 0x663   : > { %v2164_v29 = vsel %vm2132_vm12, %v11414_v28, %v1748_v62  ;;  %vm3380_vm11 = vcmp.eq.s32.totalorder %v13635_v4, 1  ;;  %v4420_v0 = vsel %vm4388_vm6, %v4036_v18, %v4004_v58  ;;  %v3844_v7 = vsel %vm3812_vm14, %v3620_v10, %v3428_v5  ;;  %v4148_v13 = vpop.permute.xlu1 %4147 }
 0x664   : > { %v2580_v55 = vsel %vm2548_vm4, %v11427_v25, %v2164_v29  ;;  %vm3796_vm8 = vcmp.eq.s32.totalorder %v13636_v2, 1  ;;  %4672 = vmatprep.mubr.f32.mxu1 %v4420_v0  ;;  %v4260_v44 = vsel %vm4228_vm2, %v4036_v18, %v3844_v7  ;;  %vm4212_vm13 = vcmp.eq.s32.totalorder %v4148_v13, 1  ;;  %v4604_v25 = vpop.f32.mrb[2].mxu1 }
 0x665   : > { %v2996_v31 = vsel %vm2964_vm7, %v11439_v30, %v2580_v55  ;;  %4673 = vmatmul.mubr.f32.gmra.mrb[30].mxu1 %v4260_v44  ;;  %4695 = vst [vmem:[%s10976_s10 + $0x88] sm:$0xff] %v4604_v25  ;;  %v4606_v52 = vpop.f32.mrb[3].mxu1 }
 0x666   : > { %v3412_v28 = vsel %vm3380_vm11, %v11450_v3, %v2996_v31  ;;  %v4609_v20 = vpop.f32.mrb[4].mxu1 }
 0x667   : > { %v3828_v40 = vsel %vm3796_vm8, %v3604_v46, %v3412_v28  ;;  %4696 = vst [vmem:[%s10976_s10 + $0x90] sm:$0xff] %v4609_v20  ;;  %v4611_v30 = vpop.f32.mrb[5].mxu1 }
 0x668   : > { %v4244_v11 = vsel %vm4212_vm13, %v11456_v56, %v3828_v40 }
 0x669   : > { %4593 = vmatmul.mubr.f32.gmra.mrb[30].mxu0 %v4244_v11 }
 0x66a   : > { %v4529_v41 = vpop.f32.mrb[4].mxu0 }
 0x66b   : > { %4680 = vst [vmem:[%s10976_s10 + $0x10] sm:$0xff] %v4529_v41  ;;  %v4531_v3 = vpop.f32.mrb[5].mxu0 }
 0x679   : > { %v4534_v12 = vpop.f32.mrb[6].mxu0 }
 0x67a   : > { %4681 = vst [vmem:[%s10976_s10 + $0x18] sm:$0xff] %v4534_v12  ;;  %v4536_v32 = vpop.f32.mrb[7].mxu0 }
 0x67d   : > { %v4614_v9 = vpop.f32.mrb[6].mxu1 }
 0x67e   : > { %4697 = vst [vmem:[%s10976_s10 + $0x98] sm:$0xff] %v4614_v9  ;;  %v4616_v56 = vpop.f32.mrb[7].mxu1 }
 0x681   : > { %v4619_v48 = vpop.f32.mrb[8].mxu1 }
 0x682   : > { %4698 = vst [vmem:[%s10976_s10 + $0xa0] sm:$0xff] %v4619_v48  ;;  %v4621_v46 = vpop.f32.mrb[9].mxu1 }
 0x687   : > { %v4539_v8 = vpop.f32.mrb[8].mxu0 }
 0x688   : > { %4682 = vst [vmem:[%s10976_s10 + $0x20] sm:$0xff] %v4539_v8  ;;  %v4541_v21 = vpop.f32.mrb[9].mxu0 }
 0x695   : > { %v4544_v47 = vpop.f32.mrb[10].mxu0 }
 0x696   : > { %4683 = vst [vmem:[%s10976_s10 + $0x28] sm:$0xff] %v4544_v47  ;;  %v4546_v14 = vpop.f32.mrb[11].mxu0 }
 0x699   : > { %v4624_v59 = vpop.f32.mrb[10].mxu1 }
 0x69a   : > { %4699 = vst [vmem:[%s10976_s10 + $0xa8] sm:$0xff] %v4624_v59  ;;  %v4626_v22 = vpop.f32.mrb[11].mxu1 }
 0x69d   : > { %v4629_v38 = vpop.f32.mrb[12].mxu1 }
 0x69e   : > { %4700 = vst [vmem:[%s10976_s10 + $0xb0] sm:$0xff] %v4629_v38  ;;  %v4631_v60 = vpop.f32.mrb[13].mxu1 }
 0x6a3   : > { %v4549_v37 = vpop.f32.mrb[12].mxu0 }
 0x6a4   : > { %4684 = vst [vmem:[%s10976_s10 + $0x30] sm:$0xff] %v4549_v37  ;;  %v4551_v62 = vpop.f32.mrb[13].mxu0 }
 0x6b4   : > { %v4554_v51 = vpop.f32.mrb[14].mxu0 }
 0x6b5   : > { %4685 = vst [vmem:[%s10976_s10 + $0x38] sm:$0xff] %v4554_v51  ;;  %v4556_v27 = vpop.f32.mrb[15].mxu0 }
 0x6b7   : > { %v4634_v17 = vpop.f32.mrb[14].mxu1 }
 0x6b8   : > { %4701 = vst [vmem:[%s10976_s10 + $0xb8] sm:$0xff] %v4634_v17  ;;  %v4636_v15 = vpop.f32.mrb[15].mxu1 }
 0x6bb   : > { %v4639_v43 = vpop.f32.mrb[16].mxu1 }
 0x6bc   : > { %4702 = vst [vmem:[%s10976_s10 + $0xc0] sm:$0xff] %v4639_v43  ;;  %v4641_v34 = vpop.f32.mrb[17].mxu1 }
 0x6c1   : > { %v4559_v50 = vpop.f32.mrb[16].mxu0 }
 0x6c2   : > { %4686 = vst [vmem:[%s10976_s10 + $0x40] sm:$0xff] %v4559_v50  ;;  %v4561_v53 = vpop.f32.mrb[17].mxu0 }
 0x6d2   : > { %v4564_v1 = vpop.f32.mrb[18].mxu0 }
 0x6d3   : > { %4687 = vst [vmem:[%s10976_s10 + $0x48] sm:$0xff] %v4564_v1  ;;  %v4566_v57 = vpop.f32.mrb[19].mxu0 }
 0x6d6   : > { %v4644_v19 = vpop.f32.mrb[18].mxu1 }
 0x6d7   : > { %4703 = vst [vmem:[%s10976_s10 + $0xc8] sm:$0xff] %v4644_v19  ;;  %v4646_v45 = vpop.f32.mrb[19].mxu1 }
 0x6da   : > { %v4649_v26 = vpop.f32.mrb[20].mxu1 }
 0x6db   : > { %4704 = vst [vmem:[%s10976_s10 + $0xd0] sm:$0xff] %v4649_v26  ;;  %v4651_v61 = vpop.f32.mrb[21].mxu1 }
 0x6e0   : > { %v4569_v35 = vpop.f32.mrb[20].mxu0 }
 0x6e1   : > { %4688 = vst [vmem:[%s10976_s10 + $0x50] sm:$0xff] %v4569_v35  ;;  %v4571_v54 = vpop.f32.mrb[21].mxu0 }
 0x6ef   : > { %v4654_v49 = vpop.f32.mrb[22].mxu1 }
 0x6f0   : > { %4705 = vst [vmem:[%s10976_s10 + $0xd8] sm:$0xff] %v4654_v49  ;;  %v4656_v23 = vpop.f32.mrb[23].mxu1 }
 0x6f3   : > { %v4574_v16 = vpop.f32.mrb[22].mxu0 }
 0x6f4   : > { %4689 = vst [vmem:[%s10976_s10 + $0x58] sm:$0xff] %v4574_v16  ;;  %v4576_v10 = vpop.f32.mrb[23].mxu0 }
 0x701   : > { %v4659_v39 = vpop.f32.mrb[24].mxu1 }
 0x702   : > { %4706 = vst [vmem:[%s10976_s10 + $0xe0] sm:$0xff] %v4659_v39  ;;  %v4661_v6 = vpop.f32.mrb[25].mxu1 }
 0x705   : > { %v4579_v24 = vpop.f32.mrb[24].mxu0 }
 0x706   : > { %4690 = vst [vmem:[%s10976_s10 + $0x60] sm:$0xff] %v4579_v24  ;;  %v4581_v42 = vpop.f32.mrb[25].mxu0 }
 0x714   : > { %v4664_v18 = vpop.f32.mrb[26].mxu1 }
 0x715   : > { %4707 = vst [vmem:[%s10976_s10 + $0xe8] sm:$0xff] %v4664_v18  ;;  %v4666_v33 = vpop.f32.mrb[27].mxu1 }
 0x718   : > { %v4584_v5 = vpop.f32.mrb[26].mxu0 }
 0x719   : > { %4691 = vst [vmem:[%s10976_s10 + $0x68] sm:$0xff] %v4584_v5  ;;  %v4586_v58 = vpop.f32.mrb[27].mxu0 }
 0x727   : > { %v4669_v29 = vpop.f32.mrb[28].mxu1 }
 0x728   : > { %4708 = vst [vmem:[%s10976_s10 + $0xf0] sm:$0xff] %v4669_v29  ;;  %v4671_v4 = vpop.f32.mrb[29].mxu1 }
 0x72b   : > { %v4589_v0 = vpop.f32.mrb[28].mxu0 }
 0x72c   : > { %4692 = vst [vmem:[%s10976_s10 + $0x70] sm:$0xff] %v4589_v0  ;;  %v4591_v7 = vpop.f32.mrb[29].mxu0 }
 0x738   : > { %v4674_v55 = vpop.f32.mrb[30].mxu1 }
 0x739   : > { %4709 = vst [vmem:[%s10976_s10 + $0xf8] sm:$0xff] %v4674_v55  ;;  %v4676_v2 = vpop.f32.mrb[31].mxu1 }
 0x73c   : > { %v4594_v63 = vpop.f32.mrb[30].mxu0 }
 0x73d   : > { %4693 = vst [vmem:[%s10976_s10 + $0x78] sm:$0xff] %v4594_v63  ;;  %v4596_v44 = vpop.f32.mrb[31].mxu0 }
 0x73e   : > { %5235 = shalt.err (!%p5232_p9)
}
 0x73f   : > { %s5236_s9 = scalar_lea.hbm %s11543_s23, 4096  ;;  %s5240_s22 = scalar_lea.hbm %s11593_s3, 8192 }
 0x740   : > { %p5237_p2 = scmp.ne.s32.totalorder %s11543_s23, %s5236_s9  ;;  %p5241_p11 = scmp.lt.u32.totalorder %s11543_s23, %s11593_s3 }
 0x741   : > { %p5242_p1 = scmp.lt.u32.totalorder %s5240_s22, %s5236_s9  ;;  %p5244_p6 = scmp.lt.u32.totalorder %s5236_s9, %s11543_s23 }
 0x742   : > { %p5238_p0 = pnand %p5237_p2, %p5417_p12 }
 0x743   : > { %p5243_p4 = por %p5242_p1, %p5241_p11 }
 0x744   : > { %p5239_p5 = pneg %p5238_p0 }
 0x745   : > { %p5245_p8 = por %p5244_p6, %p5243_p4 }
 0x747   : > { %p5246_p10 = pnand %p5245_p8, %p5239_p5 }
 0x749   : > { %5249 = shalt.err (!%p5246_p10)
}
 0x74a   : > { %s5304_s5 = smov 128   ;;  %s5305_s10 = smov 8  }
 0x74b   : > { %4926 = dma.vmem_to_hbm [thread:$0]  (%p5417_p12), %s11545_s27, 4096, %s11543_s23, %s4711_s30, %s5304_s5, %s5304_s5, %s5305_s10  }
 0x74c PF: > { %s4739_s11 = sand.u32 1, %s5280_s12   ;;  %p13637_p13 = scmp.ne.s32.totalorder %s12183_s19, 0 }
 0x74d   : > { %p13638_p3 = scmp.ge.s32.totalorder %s5292_s15, 2  ;;  %s4740_s28 = scalar_lea.sflag [#allocation4], %s4739_s11 }
 0x74f   : > { %p4937_p7 = pnand %p13638_p3, %p13637_p13 }
 0x751   : > { %5275 = dma.done.wait (!%p4937_p7), %s4740_s28, 4096  }
 0x752   : > { %5277 = vsyncadd (!%p4937_p7), %s4740_s28, 4294963200  ;;  %p17_p9 = scmp.ge.s32.totalorder %s5382_s24, 4   ;;  %s13639_s12 = smov %s5284_s13 }
 0x753   : > { %s13640_s13 = smov %s5288_s14  ;;  %s13641_s14 = smov %s5413_s17 }
 0x754   : > { %s13642_s15 = smov %s5382_s24  ;;  %19 = sbr.rel (!%p17_p9) target bundleno = 6 (0x6), region = 84 }
 0x75b   :  { %4745 = vsyncpa [#allocation3], 1 }
 0x75c   :  { %4747 = vsyncpa [#allocation3 + $0x1], 1 }
 0x75d   :  { %4748 = vsyncpa [#allocation6], 1 }
 0x75e   :  { %4749 = vsyncpa [#allocation4], 1 }
 0x75f   :  { %4751 = vsyncpa [#allocation4 + $0x1], 1 }

</bundles_post_ra>
